<compile_context>
chip_gen: v6e
topology: v6e:2x2x1
jax: 0.10.0
libtpu: 0.0.40
codegen_flags: <defaults>
</compile_context>

<pallas_src>
import jax
import jax.numpy as jnp
from jax import lax
from jax.experimental import pallas as pl
from jax.experimental.pallas import tpu as pltpu

# ---------------- problem dims: MultiResBlock(in_channels=4, out_channels=16) ----------------
N, CIN, H, W = 2, 4, 16, 16
COUT, ALPHA = 16, 1.67
Wf = ALPHA * COUT
C1 = int(Wf * 0.167)        # 4   (conv3x3 branch)
C2 = int(Wf * 0.333)        # 8   (conv5x5 branch)
C3 = int(Wf * 0.5)          # 13  (conv7x7 branch)
NF = C1 + C2 + C3           # 25  (shortcut / concat width)
NHW = N * H * W             # 512 pixels -> exactly 4 full 128-lane vregs
EPS = 1e-5
PREC = lax.Precision.HIGHEST   # MXU is idle at this size -> full-accuracy passes are free

# sublane-aligned (padded-to-8) channel layout
CINP = 8
C1P, C2P, C3P = 8, 8, 16
NFP = C1P + C2P + C3P       # 32
assert C2P == C2

# row offsets inside the single packed parameter buffer (lane width = CINP = 8)
OFF_W3 = 0                      # 9 taps x (C1P, 8)  =  72 rows
OFF_W5 = OFF_W3 + 9 * C1P       #  72: 9 x (C2P, 8)  =  72 rows
OFF_W7 = OFF_W5 + 9 * C2P       # 144: 9 x (C3P, 8)  = 144 rows
OFF_WSC = OFF_W7 + 9 * C3P      # 288: (NFP, 8)      =  32 rows
OFF_BNP = OFF_WSC + NFP         # 320: 8 BN vectors x (NFP,1) in lane 0 = 256 rows
PACK_ROWS = OFF_BNP + 8 * NFP   # 576


# ---------------- the fused kernel ----------------
def _multires_kernel(x_ref, wp_ref, o_ref):
    x = x_ref[...]                                   # (CINP, NHW); rows >= CIN are zero

    # --- 3x3 "same"-padding validity masks, built in-kernel from an iota (H=W=16) ---
    fpix = lax.broadcasted_iota(jnp.int32, (1, NHW), 1)
    hh = (fpix >> 4) & (H - 1)                       # row within image
    ww = fpix & (W - 1)                              # col within image
    mh = {0: (hh >= 1).astype(jnp.float32), 1: None,
          2: (hh <= H - 2).astype(jnp.float32)}
    mw = {0: (ww >= 1).astype(jnp.float32), 1: None,
          2: (ww <= W - 2).astype(jnp.float32)}

    def bn_par(j, lo, hi):
        # BN parameter column j of the pack, padded-channel rows [lo, hi) -> (hi-lo, 1)
        base = OFF_BNP + NFP * j
        return wp_ref[base + lo:base + hi, 0:1]

    inv_n = jnp.float32(1.0 / NHW)

    def bn(v, g, b):
        # BatchNorm2d (training): batch statistics, biased variance, fused to one FMA.
        # One-pass E[x^2]-mu^2 variance: fine in f32 at these activation scales.
        # Pad channels have v == 0 and gamma == beta == 0, so they stay exactly 0.
        mu = jnp.sum(v, axis=1, keepdims=True) * inv_n
        ex2 = jnp.sum(v * v, axis=1, keepdims=True) * inv_n
        var = ex2 - mu * mu
        scale = g * lax.rsqrt(var + EPS)
        bias = b - mu * scale
        return v * scale + bias

    def relu(v):
        return jnp.maximum(v, 0.0)

    def conv3x3(src, off, o_pad):
        # 3x3 "same" conv as 9 per-tap accumulating matmuls:
        #   acc += W_tap(o_pad, CINP) @ (lane-rolled, edge-masked src)(CINP, NHW)
        # Circular wrap of the roll only ever lands on masked (zeroed) taps.
        acc = None
        for t in range(9):
            dh, dw = divmod(t, 3)
            s = (dh - 1) * W + (dw - 1)              # flat-pixel shift of this tap
            tap = src if s == 0 else pltpu.roll(src, shift=(-s) % NHW, axis=1)
            m = mh[dh]
            if mw[dw] is not None:
                m = mw[dw] if m is None else m * mw[dw]
            if m is not None:
                tap = tap * m
            w_t = wp_ref[off + t * o_pad:off + (t + 1) * o_pad, :]   # (o_pad, CINP)
            p = jnp.dot(w_t, tap, preferred_element_type=jnp.float32, precision=PREC)
            acc = p if acc is None else acc + p
        return acc

    # three conv branches: conv -> BN -> ReLU, all lane-dense, 8-row aligned
    x1 = relu(bn(conv3x3(x, OFF_W3, C1P),
                 bn_par(0, 0, C1P), bn_par(1, 0, C1P)))
    x2 = relu(bn(conv3x3(x1, OFF_W5, C2P),
                 bn_par(0, C1P, C1P + C2P), bn_par(1, C1P, C1P + C2P)))
    x3 = relu(bn(conv3x3(x2, OFF_W7, C3P),
                 bn_par(0, C1P + C2P, NFP), bn_par(1, C1P + C2P, NFP)))

    # bn_concat(cat([x1, x2, x3]))  -- concat offsets 0/8/16 are tile aligned
    xcat = jnp.concatenate([x1, x2, x3], axis=0)      # (NFP, NHW)
    x4 = bn(xcat, bn_par(4, 0, NFP), bn_par(5, 0, NFP))

    # 1x1 shortcut conv (single matmul) + BN, already in the padded-32 row layout
    wsc = wp_ref[OFF_WSC:OFF_WSC + NFP, :]            # (NFP, CINP)
    x0 = bn(jnp.dot(wsc, x, preferred_element_type=jnp.float32, precision=PREC),
            bn_par(2, 0, NFP), bn_par(3, 0, NFP))

    # bn_out(relu(x0 + x4)) -> lane-dense, fully aligned (32, 512) store
    o_ref[...] = bn(relu(x0 + x4), bn_par(6, 0, NFP), bn_par(7, 0, NFP))


# ---------------- wrapper (layout conversion + single packed parameter buffer) ----------------
def _pad_cat25(v):
    """Place 25 concat-order channels (4 + 8 + 13) into the padded-32 row layout."""
    z = lambda n: jnp.zeros((n,) + v.shape[1:], v.dtype)
    return jnp.concatenate([v[0:C1], z(C1P - C1),
                            v[C1:C1 + C2],
                            v[C1 + C2:NF], z(C3P - C3)], axis=0)


def _pack_conv(w, o_pad):
    """OIHW conv weight -> 9 stacked per-tap (o_pad, CINP) matrices, zero padded."""
    o, i = w.shape[0], w.shape[1]
    wt = jnp.transpose(w, (2, 3, 0, 1)).reshape(9, o, i)          # tap-major (9, O, I)
    wt = jnp.pad(wt, ((0, 0), (0, o_pad - o), (0, CINP - i)))
    return wt.reshape(9 * o_pad, CINP)


@jax.jit
def multires_block_pallas(x_nchw, p):
    # activations: NCHW -> channels-first pixels-on-lanes, padded to 8 channels
    x2d = jnp.transpose(x_nchw, (1, 0, 2, 3)).reshape(CIN, NHW).astype(jnp.float32)
    x2d = jnp.pad(x2d, ((0, CINP - CIN), (0, 0)))                 # (8, 512)

    # 1x1 shortcut weights placed into the padded-32 output-row layout
    wsc = jnp.pad(_pad_cat25(p['wsc'].reshape(NF, CIN)), ((0, 0), (0, CINP - CIN)))

    # 8 BN vectors (gamma/beta for conv-branches, shortcut, concat, out) in padded layout
    gcv = _pad_cat25(jnp.concatenate([p['g3'], p['g5'], p['g7']]))
    bcv = _pad_cat25(jnp.concatenate([p['b3'], p['b5'], p['b7']]))
    bn8 = jnp.stack([gcv, bcv,
                     _pad_cat25(p['gsc']), _pad_cat25(p['bsc']),
                     _pad_cat25(p['gct']), _pad_cat25(p['bct']),
                     _pad_cat25(p['go']), _pad_cat25(p['bo'])], axis=0)     # (8, 32)
    bn_block = jnp.pad(bn8.reshape(8 * NFP, 1), ((0, 0), (0, CINP - 1)))    # (256, 8)

    # one packed parameter buffer -> one input DMA instead of five
    wpack = jnp.concatenate([_pack_conv(p['w3'], C1P),
                             _pack_conv(p['w5'], C2P),
                             _pack_conv(p['w7'], C3P),
                             wsc, bn_block], axis=0)                        # (576, 8)
    assert wpack.shape == (PACK_ROWS, CINP)

    vmem = pltpu.MemorySpace.VMEM
    out32 = pl.pallas_call(
        _multires_kernel,
        out_shape=jax.ShapeDtypeStruct((NFP, NHW), jnp.float32),
        in_specs=[pl.BlockSpec(memory_space=vmem),
                  pl.BlockSpec(memory_space=vmem)],
        out_specs=pl.BlockSpec(memory_space=vmem),
    )(x2d, wpack)

    # drop pad rows (padded-32 -> 25 concat channels) and restore NCHW
    out25 = jnp.concatenate([out32[0:C1], out32[C1P:C1P + C2 + C3]], axis=0)
    return jnp.transpose(out25.reshape(NF, N, H, W), (1, 0, 2, 3))


# ---------------- deterministic parameter init & pure-JAX reference ----------------
def init_params(key):
    ks = jax.random.split(key, 10)
    w3 = 0.1 * jax.random.normal(ks[0], (C1, CIN, 3, 3), jnp.float32)
    w5 = 0.1 * jax.random.normal(ks[1], (C2, C1, 3, 3), jnp.float32)
    w7 = 0.1 * jax.random.normal(ks[2], (C3, C2, 3, 3), jnp.float32)
    wsc = 0.1 * jax.random.normal(ks[3], (NF, CIN, 1, 1), jnp.float32)

    def bn(k, c):
        kg, kb = jax.random.split(k)
        return (1.0 + 0.1 * jax.random.normal(kg, (c,), jnp.float32),
                0.1 * jax.random.normal(kb, (c,), jnp.float32))

    g3, b3 = bn(ks[4], C1)
    g5, b5 = bn(ks[5], C2)
    g7, b7 = bn(ks[6], C3)
    gsc, bsc = bn(ks[7], NF)
    gct, bct = bn(ks[8], NF)
    go, bo = bn(ks[9], NF)
    return dict(w3=w3, w5=w5, w7=w7, wsc=wsc, g3=g3, b3=b3, g5=g5, b5=b5,
                g7=g7, b7=b7, gsc=gsc, bsc=bsc, gct=gct, bct=bct, go=go, bo=bo)


def reference_forward(x, p):
    def conv(x_, w_):
        return lax.conv_general_dilated(x_, w_, (1, 1), 'SAME',
                                        dimension_numbers=('NCHW', 'OIHW', 'NCHW'),
                                        precision=lax.Precision.HIGHEST)

    def bn(x_, g, b):
        mu = jnp.mean(x_, axis=(0, 2, 3), keepdims=True)
        var = jnp.mean(jnp.square(x_ - mu), axis=(0, 2, 3), keepdims=True)
        return ((x_ - mu) * lax.rsqrt(var + EPS) * g.reshape(1, -1, 1, 1)
                + b.reshape(1, -1, 1, 1))

    x0 = bn(conv(x, p['wsc']), p['gsc'], p['bsc'])
    x1 = jax.nn.relu(bn(conv(x, p['w3']), p['g3'], p['b3']))
    x2 = jax.nn.relu(bn(conv(x1, p['w5']), p['g5'], p['b5']))
    x3 = jax.nn.relu(bn(conv(x2, p['w7']), p['g7'], p['b7']))
    x4 = bn(jnp.concatenate([x1, x2, x3], axis=1), p['gct'], p['bct'])
    return bn(jax.nn.relu(x0 + x4), p['go'], p['bo'])


if __name__ == "__main__":
    key = jax.random.PRNGKey(0)
    kx, kp = jax.random.split(key)
    x = jax.random.normal(kx, (N, CIN, H, W), jnp.float32)     # NCHW like PyTorch
    params = init_params(kp)

    out = multires_block_pallas(x, params)
    out = jax.block_until_ready(out)

    ref = reference_forward(x, params)
    assert out.shape == (N, NF, H, W), out.shape
    assert bool(jnp.allclose(out, ref, atol=2e-3, rtol=2e-3)), float(
        jnp.max(jnp.abs(out - ref)))
    print("KERNEL_OK")
</pallas_src>

<mosaic_0001>
module attributes {stable_mosaic.version = 11 : i64} {
  func.func @_multires_kernel(%arg0: memref<8x512xf32, #tpu.memory_space<vmem>>, %arg1: memref<576x8xf32, #tpu.memory_space<vmem>>, %arg2: memref<32x512xf32, #tpu.memory_space<vmem>>) attributes {dimension_semantics = [], scalar_prefetch = 0 : i64, scratch_operands = 0 : i64, tpu.core_type = #tpu.core_type<tc>} {
    %c0 = arith.constant 0 : index
    %c0_0 = arith.constant 0 : index
    %0 = vector.load %arg0[%c0, %c0_0] : memref<8x512xf32, #tpu.memory_space<vmem>>, vector<8x512xf32>
    %1 = tpu.iota {dimensions = array<i32: 1>} : vector<1x512xi32>
    %c4_i32 = arith.constant 4 : i32
    %2 = vector.broadcast %c4_i32 : i32 to vector<1x512xi32>
    %3 = arith.shrsi %1, %2 : vector<1x512xi32>
    %c15_i32 = arith.constant 15 : i32
    %4 = vector.broadcast %c15_i32 : i32 to vector<1x512xi32>
    %5 = arith.andi %3, %4 : vector<1x512xi32>
    %c15_i32_1 = arith.constant 15 : i32
    %6 = vector.broadcast %c15_i32_1 : i32 to vector<1x512xi32>
    %7 = arith.andi %1, %6 : vector<1x512xi32>
    %c1_i32 = arith.constant 1 : i32
    %8 = vector.broadcast %c1_i32 : i32 to vector<1x512xi32>
    %9 = arith.cmpi sge, %5, %8 : vector<1x512xi32>
    %10 = arith.extui %9 : vector<1x512xi1> to vector<1x512xi32>
    %11 = arith.sitofp %10 : vector<1x512xi32> to vector<1x512xf32>
    %c14_i32 = arith.constant 14 : i32
    %12 = vector.broadcast %c14_i32 : i32 to vector<1x512xi32>
    %13 = arith.cmpi sle, %5, %12 : vector<1x512xi32>
    %14 = arith.extui %13 : vector<1x512xi1> to vector<1x512xi32>
    %15 = arith.sitofp %14 : vector<1x512xi32> to vector<1x512xf32>
    %c1_i32_2 = arith.constant 1 : i32
    %16 = vector.broadcast %c1_i32_2 : i32 to vector<1x512xi32>
    %17 = arith.cmpi sge, %7, %16 : vector<1x512xi32>
    %18 = arith.extui %17 : vector<1x512xi1> to vector<1x512xi32>
    %19 = arith.sitofp %18 : vector<1x512xi32> to vector<1x512xf32>
    %c14_i32_3 = arith.constant 14 : i32
    %20 = vector.broadcast %c14_i32_3 : i32 to vector<1x512xi32>
    %21 = arith.cmpi sle, %7, %20 : vector<1x512xi32>
    %22 = arith.extui %21 : vector<1x512xi1> to vector<1x512xi32>
    %23 = arith.sitofp %22 : vector<1x512xi32> to vector<1x512xf32>
    %c17_i32 = arith.constant 17 : i32
    %24 = tpu.dynamic_rotate %0 by %c17_i32 dim 1 : vector<8x512xf32>, i32 -> vector<8x512xf32>
    %25 = arith.mulf %11, %19 : vector<1x512xf32>
    %26 = vector.broadcast %25 : vector<1x512xf32> to vector<8x512xf32>
    %27 = arith.mulf %24, %26 : vector<8x512xf32>
    %c0_4 = arith.constant 0 : index
    %c0_5 = arith.constant 0 : index
    %28 = vector.load %arg1[%c0_4, %c0_5] : memref<576x8xf32, #tpu.memory_space<vmem>>, vector<8x8xf32>
    %cst = arith.constant dense<0.000000e+00> : vector<8x512xf32>
    %29 = tpu.matmul %28, %27, %cst {dimension_numbers = #tpu.dot_dimension_numbers<[1], [0], [0], [1], [0, 0, 1, 1], [], []>, precision = #tpu.contract_precision<fp32>} : vector<8x8xf32>, vector<8x512xf32>, vector<8x512xf32> -> vector<8x512xf32>
    %c16_i32 = arith.constant 16 : i32
    %30 = tpu.dynamic_rotate %0 by %c16_i32 dim 1 : vector<8x512xf32>, i32 -> vector<8x512xf32>
    %31 = vector.broadcast %11 : vector<1x512xf32> to vector<8x512xf32>
    %32 = arith.mulf %30, %31 : vector<8x512xf32>
    %c8 = arith.constant 8 : index
    %c0_6 = arith.constant 0 : index
    %33 = vector.load %arg1[%c8, %c0_6] : memref<576x8xf32, #tpu.memory_space<vmem>>, vector<8x8xf32>
    %cst_7 = arith.constant dense<0.000000e+00> : vector<8x512xf32>
    %34 = tpu.matmul %33, %32, %cst_7 {dimension_numbers = #tpu.dot_dimension_numbers<[1], [0], [0], [1], [0, 0, 1, 1], [], []>, precision = #tpu.contract_precision<fp32>} : vector<8x8xf32>, vector<8x512xf32>, vector<8x512xf32> -> vector<8x512xf32>
    %35 = arith.addf %29, %34 : vector<8x512xf32>
    %c15_i32_8 = arith.constant 15 : i32
    %36 = tpu.dynamic_rotate %0 by %c15_i32_8 dim 1 : vector<8x512xf32>, i32 -> vector<8x512xf32>
    %37 = arith.mulf %11, %23 : vector<1x512xf32>
    %38 = vector.broadcast %37 : vector<1x512xf32> to vector<8x512xf32>
    %39 = arith.mulf %36, %38 : vector<8x512xf32>
    %c16 = arith.constant 16 : index
    %c0_9 = arith.constant 0 : index
    %40 = vector.load %arg1[%c16, %c0_9] : memref<576x8xf32, #tpu.memory_space<vmem>>, vector<8x8xf32>
    %cst_10 = arith.constant dense<0.000000e+00> : vector<8x512xf32>
    %41 = tpu.matmul %40, %39, %cst_10 {dimension_numbers = #tpu.dot_dimension_numbers<[1], [0], [0], [1], [0, 0, 1, 1], [], []>, precision = #tpu.contract_precision<fp32>} : vector<8x8xf32>, vector<8x512xf32>, vector<8x512xf32> -> vector<8x512xf32>
    %42 = arith.addf %35, %41 : vector<8x512xf32>
    %c1_i32_11 = arith.constant 1 : i32
    %43 = tpu.dynamic_rotate %0 by %c1_i32_11 dim 1 : vector<8x512xf32>, i32 -> vector<8x512xf32>
    %44 = vector.broadcast %19 : vector<1x512xf32> to vector<8x512xf32>
    %45 = arith.mulf %43, %44 : vector<8x512xf32>
    %c24 = arith.constant 24 : index
    %c0_12 = arith.constant 0 : index
    %46 = vector.load %arg1[%c24, %c0_12] : memref<576x8xf32, #tpu.memory_space<vmem>>, vector<8x8xf32>
    %cst_13 = arith.constant dense<0.000000e+00> : vector<8x512xf32>
    %47 = tpu.matmul %46, %45, %cst_13 {dimension_numbers = #tpu.dot_dimension_numbers<[1], [0], [0], [1], [0, 0, 1, 1], [], []>, precision = #tpu.contract_precision<fp32>} : vector<8x8xf32>, vector<8x512xf32>, vector<8x512xf32> -> vector<8x512xf32>
    %48 = arith.addf %42, %47 : vector<8x512xf32>
    %c32 = arith.constant 32 : index
    %c0_14 = arith.constant 0 : index
    %49 = vector.load %arg1[%c32, %c0_14] : memref<576x8xf32, #tpu.memory_space<vmem>>, vector<8x8xf32>
    %cst_15 = arith.constant dense<0.000000e+00> : vector<8x512xf32>
    %50 = tpu.matmul %49, %0, %cst_15 {dimension_numbers = #tpu.dot_dimension_numbers<[1], [0], [0], [1], [0, 0, 1, 1], [], []>, precision = #tpu.contract_precision<fp32>} : vector<8x8xf32>, vector<8x512xf32>, vector<8x512xf32> -> vector<8x512xf32>
    %51 = arith.addf %48, %50 : vector<8x512xf32>
    %c511_i32 = arith.constant 511 : i32
    %52 = tpu.dynamic_rotate %0 by %c511_i32 dim 1 : vector<8x512xf32>, i32 -> vector<8x512xf32>
    %53 = vector.broadcast %23 : vector<1x512xf32> to vector<8x512xf32>
    %54 = arith.mulf %52, %53 : vector<8x512xf32>
    %c40 = arith.constant 40 : index
    %c0_16 = arith.constant 0 : index
    %55 = vector.load %arg1[%c40, %c0_16] : memref<576x8xf32, #tpu.memory_space<vmem>>, vector<8x8xf32>
    %cst_17 = arith.constant dense<0.000000e+00> : vector<8x512xf32>
    %56 = tpu.matmul %55, %54, %cst_17 {dimension_numbers = #tpu.dot_dimension_numbers<[1], [0], [0], [1], [0, 0, 1, 1], [], []>, precision = #tpu.contract_precision<fp32>} : vector<8x8xf32>, vector<8x512xf32>, vector<8x512xf32> -> vector<8x512xf32>
    %57 = arith.addf %51, %56 : vector<8x512xf32>
    %c497_i32 = arith.constant 497 : i32
    %58 = tpu.dynamic_rotate %0 by %c497_i32 dim 1 : vector<8x512xf32>, i32 -> vector<8x512xf32>
    %59 = arith.mulf %15, %19 : vector<1x512xf32>
    %60 = vector.broadcast %59 : vector<1x512xf32> to vector<8x512xf32>
    %61 = arith.mulf %58, %60 : vector<8x512xf32>
    %c48 = arith.constant 48 : index
    %c0_18 = arith.constant 0 : index
    %62 = vector.load %arg1[%c48, %c0_18] : memref<576x8xf32, #tpu.memory_space<vmem>>, vector<8x8xf32>
    %cst_19 = arith.constant dense<0.000000e+00> : vector<8x512xf32>
    %63 = tpu.matmul %62, %61, %cst_19 {dimension_numbers = #tpu.dot_dimension_numbers<[1], [0], [0], [1], [0, 0, 1, 1], [], []>, precision = #tpu.contract_precision<fp32>} : vector<8x8xf32>, vector<8x512xf32>, vector<8x512xf32> -> vector<8x512xf32>
    %64 = arith.addf %57, %63 : vector<8x512xf32>
    %c496_i32 = arith.constant 496 : i32
    %65 = tpu.dynamic_rotate %0 by %c496_i32 dim 1 : vector<8x512xf32>, i32 -> vector<8x512xf32>
    %66 = vector.broadcast %15 : vector<1x512xf32> to vector<8x512xf32>
    %67 = arith.mulf %65, %66 : vector<8x512xf32>
    %c56 = arith.constant 56 : index
    %c0_20 = arith.constant 0 : index
    %68 = vector.load %arg1[%c56, %c0_20] : memref<576x8xf32, #tpu.memory_space<vmem>>, vector<8x8xf32>
    %cst_21 = arith.constant dense<0.000000e+00> : vector<8x512xf32>
    %69 = tpu.matmul %68, %67, %cst_21 {dimension_numbers = #tpu.dot_dimension_numbers<[1], [0], [0], [1], [0, 0, 1, 1], [], []>, precision = #tpu.contract_precision<fp32>} : vector<8x8xf32>, vector<8x512xf32>, vector<8x512xf32> -> vector<8x512xf32>
    %70 = arith.addf %64, %69 : vector<8x512xf32>
    %c495_i32 = arith.constant 495 : i32
    %71 = tpu.dynamic_rotate %0 by %c495_i32 dim 1 : vector<8x512xf32>, i32 -> vector<8x512xf32>
    %72 = arith.mulf %15, %23 : vector<1x512xf32>
    %73 = vector.broadcast %72 : vector<1x512xf32> to vector<8x512xf32>
    %74 = arith.mulf %71, %73 : vector<8x512xf32>
    %c64 = arith.constant 64 : index
    %c0_22 = arith.constant 0 : index
    %75 = vector.load %arg1[%c64, %c0_22] : memref<576x8xf32, #tpu.memory_space<vmem>>, vector<8x8xf32>
    %cst_23 = arith.constant dense<0.000000e+00> : vector<8x512xf32>
    %76 = tpu.matmul %75, %74, %cst_23 {dimension_numbers = #tpu.dot_dimension_numbers<[1], [0], [0], [1], [0, 0, 1, 1], [], []>, precision = #tpu.contract_precision<fp32>} : vector<8x8xf32>, vector<8x512xf32>, vector<8x512xf32> -> vector<8x512xf32>
    %77 = arith.addf %70, %76 : vector<8x512xf32>
    %c320 = arith.constant 320 : index
    %c0_24 = arith.constant 0 : index
    %78 = vector.load %arg1[%c320, %c0_24] : memref<576x8xf32, #tpu.memory_space<vmem>>, vector<8x1xf32>
    %c352 = arith.constant 352 : index
    %c0_25 = arith.constant 0 : index
    %79 = vector.load %arg1[%c352, %c0_25] : memref<576x8xf32, #tpu.memory_space<vmem>>, vector<8x1xf32>
    %cst_26 = arith.constant dense<0.000000e+00> : vector<8xf32>
    %80 = vector.multi_reduction <add>, %77, %cst_26 [1] : vector<8x512xf32> to vector<8xf32>
    %81 = vector.shape_cast %80 : vector<8xf32> to vector<8x1xf32>
    %cst_27 = arith.constant 0.001953125 : f32
    %82 = vector.broadcast %cst_27 : f32 to vector<8x1xf32>
    %83 = arith.mulf %81, %82 : vector<8x1xf32>
    %84 = arith.mulf %77, %77 : vector<8x512xf32>
    %cst_28 = arith.constant dense<0.000000e+00> : vector<8xf32>
    %85 = vector.multi_reduction <add>, %84, %cst_28 [1] : vector<8x512xf32> to vector<8xf32>
    %86 = vector.shape_cast %85 : vector<8xf32> to vector<8x1xf32>
    %cst_29 = arith.constant 0.001953125 : f32
    %87 = vector.broadcast %cst_29 : f32 to vector<8x1xf32>
    %88 = arith.mulf %86, %87 : vector<8x1xf32>
    %89 = arith.mulf %83, %83 : vector<8x1xf32>
    %90 = arith.subf %88, %89 : vector<8x1xf32>
    %cst_30 = arith.constant 9.99999974E-6 : f32
    %91 = vector.broadcast %cst_30 : f32 to vector<8x1xf32>
    %92 = arith.addf %90, %91 : vector<8x1xf32>
    %93 = math.rsqrt %92 : vector<8x1xf32>
    %94 = arith.mulf %78, %93 : vector<8x1xf32>
    %95 = arith.mulf %83, %94 : vector<8x1xf32>
    %96 = arith.subf %79, %95 : vector<8x1xf32>
    %97 = vector.broadcast %94 : vector<8x1xf32> to vector<8x512xf32>
    %98 = arith.mulf %77, %97 : vector<8x512xf32>
    %99 = vector.broadcast %96 : vector<8x1xf32> to vector<8x512xf32>
    %100 = arith.addf %98, %99 : vector<8x512xf32>
    %cst_31 = arith.constant 0.000000e+00 : f32
    %101 = vector.broadcast %cst_31 : f32 to vector<8x512xf32>
    %102 = arith.maximumf %100, %101 : vector<8x512xf32>
    %c17_i32_32 = arith.constant 17 : i32
    %103 = tpu.dynamic_rotate %102 by %c17_i32_32 dim 1 : vector<8x512xf32>, i32 -> vector<8x512xf32>
    %104 = arith.mulf %11, %19 : vector<1x512xf32>
    %105 = vector.broadcast %104 : vector<1x512xf32> to vector<8x512xf32>
    %106 = arith.mulf %103, %105 : vector<8x512xf32>
    %c72 = arith.constant 72 : index
    %c0_33 = arith.constant 0 : index
    %107 = vector.load %arg1[%c72, %c0_33] : memref<576x8xf32, #tpu.memory_space<vmem>>, vector<8x8xf32>
    %cst_34 = arith.constant dense<0.000000e+00> : vector<8x512xf32>
    %108 = tpu.matmul %107, %106, %cst_34 {dimension_numbers = #tpu.dot_dimension_numbers<[1], [0], [0], [1], [0, 0, 1, 1], [], []>, precision = #tpu.contract_precision<fp32>} : vector<8x8xf32>, vector<8x512xf32>, vector<8x512xf32> -> vector<8x512xf32>
    %c16_i32_35 = arith.constant 16 : i32
    %109 = tpu.dynamic_rotate %102 by %c16_i32_35 dim 1 : vector<8x512xf32>, i32 -> vector<8x512xf32>
    %110 = vector.broadcast %11 : vector<1x512xf32> to vector<8x512xf32>
    %111 = arith.mulf %109, %110 : vector<8x512xf32>
    %c80 = arith.constant 80 : index
    %c0_36 = arith.constant 0 : index
    %112 = vector.load %arg1[%c80, %c0_36] : memref<576x8xf32, #tpu.memory_space<vmem>>, vector<8x8xf32>
    %cst_37 = arith.constant dense<0.000000e+00> : vector<8x512xf32>
    %113 = tpu.matmul %112, %111, %cst_37 {dimension_numbers = #tpu.dot_dimension_numbers<[1], [0], [0], [1], [0, 0, 1, 1], [], []>, precision = #tpu.contract_precision<fp32>} : vector<8x8xf32>, vector<8x512xf32>, vector<8x512xf32> -> vector<8x512xf32>
    %114 = arith.addf %108, %113 : vector<8x512xf32>
    %c15_i32_38 = arith.constant 15 : i32
    %115 = tpu.dynamic_rotate %102 by %c15_i32_38 dim 1 : vector<8x512xf32>, i32 -> vector<8x512xf32>
    %116 = arith.mulf %11, %23 : vector<1x512xf32>
    %117 = vector.broadcast %116 : vector<1x512xf32> to vector<8x512xf32>
    %118 = arith.mulf %115, %117 : vector<8x512xf32>
    %c88 = arith.constant 88 : index
    %c0_39 = arith.constant 0 : index
    %119 = vector.load %arg1[%c88, %c0_39] : memref<576x8xf32, #tpu.memory_space<vmem>>, vector<8x8xf32>
    %cst_40 = arith.constant dense<0.000000e+00> : vector<8x512xf32>
    %120 = tpu.matmul %119, %118, %cst_40 {dimension_numbers = #tpu.dot_dimension_numbers<[1], [0], [0], [1], [0, 0, 1, 1], [], []>, precision = #tpu.contract_precision<fp32>} : vector<8x8xf32>, vector<8x512xf32>, vector<8x512xf32> -> vector<8x512xf32>
    %121 = arith.addf %114, %120 : vector<8x512xf32>
    %c1_i32_41 = arith.constant 1 : i32
    %122 = tpu.dynamic_rotate %102 by %c1_i32_41 dim 1 : vector<8x512xf32>, i32 -> vector<8x512xf32>
    %123 = vector.broadcast %19 : vector<1x512xf32> to vector<8x512xf32>
    %124 = arith.mulf %122, %123 : vector<8x512xf32>
    %c96 = arith.constant 96 : index
    %c0_42 = arith.constant 0 : index
    %125 = vector.load %arg1[%c96, %c0_42] : memref<576x8xf32, #tpu.memory_space<vmem>>, vector<8x8xf32>
    %cst_43 = arith.constant dense<0.000000e+00> : vector<8x512xf32>
    %126 = tpu.matmul %125, %124, %cst_43 {dimension_numbers = #tpu.dot_dimension_numbers<[1], [0], [0], [1], [0, 0, 1, 1], [], []>, precision = #tpu.contract_precision<fp32>} : vector<8x8xf32>, vector<8x512xf32>, vector<8x512xf32> -> vector<8x512xf32>
    %127 = arith.addf %121, %126 : vector<8x512xf32>
    %c104 = arith.constant 104 : index
    %c0_44 = arith.constant 0 : index
    %128 = vector.load %arg1[%c104, %c0_44] : memref<576x8xf32, #tpu.memory_space<vmem>>, vector<8x8xf32>
    %cst_45 = arith.constant dense<0.000000e+00> : vector<8x512xf32>
    %129 = tpu.matmul %128, %102, %cst_45 {dimension_numbers = #tpu.dot_dimension_numbers<[1], [0], [0], [1], [0, 0, 1, 1], [], []>, precision = #tpu.contract_precision<fp32>} : vector<8x8xf32>, vector<8x512xf32>, vector<8x512xf32> -> vector<8x512xf32>
    %130 = arith.addf %127, %129 : vector<8x512xf32>
    %c511_i32_46 = arith.constant 511 : i32
    %131 = tpu.dynamic_rotate %102 by %c511_i32_46 dim 1 : vector<8x512xf32>, i32 -> vector<8x512xf32>
    %132 = vector.broadcast %23 : vector<1x512xf32> to vector<8x512xf32>
    %133 = arith.mulf %131, %132 : vector<8x512xf32>
    %c112 = arith.constant 112 : index
    %c0_47 = arith.constant 0 : index
    %134 = vector.load %arg1[%c112, %c0_47] : memref<576x8xf32, #tpu.memory_space<vmem>>, vector<8x8xf32>
    %cst_48 = arith.constant dense<0.000000e+00> : vector<8x512xf32>
    %135 = tpu.matmul %134, %133, %cst_48 {dimension_numbers = #tpu.dot_dimension_numbers<[1], [0], [0], [1], [0, 0, 1, 1], [], []>, precision = #tpu.contract_precision<fp32>} : vector<8x8xf32>, vector<8x512xf32>, vector<8x512xf32> -> vector<8x512xf32>
    %136 = arith.addf %130, %135 : vector<8x512xf32>
    %c497_i32_49 = arith.constant 497 : i32
    %137 = tpu.dynamic_rotate %102 by %c497_i32_49 dim 1 : vector<8x512xf32>, i32 -> vector<8x512xf32>
    %138 = arith.mulf %15, %19 : vector<1x512xf32>
    %139 = vector.broadcast %138 : vector<1x512xf32> to vector<8x512xf32>
    %140 = arith.mulf %137, %139 : vector<8x512xf32>
    %c120 = arith.constant 120 : index
    %c0_50 = arith.constant 0 : index
    %141 = vector.load %arg1[%c120, %c0_50] : memref<576x8xf32, #tpu.memory_space<vmem>>, vector<8x8xf32>
    %cst_51 = arith.constant dense<0.000000e+00> : vector<8x512xf32>
    %142 = tpu.matmul %141, %140, %cst_51 {dimension_numbers = #tpu.dot_dimension_numbers<[1], [0], [0], [1], [0, 0, 1, 1], [], []>, precision = #tpu.contract_precision<fp32>} : vector<8x8xf32>, vector<8x512xf32>, vector<8x512xf32> -> vector<8x512xf32>
    %143 = arith.addf %136, %142 : vector<8x512xf32>
    %c496_i32_52 = arith.constant 496 : i32
    %144 = tpu.dynamic_rotate %102 by %c496_i32_52 dim 1 : vector<8x512xf32>, i32 -> vector<8x512xf32>
    %145 = vector.broadcast %15 : vector<1x512xf32> to vector<8x512xf32>
    %146 = arith.mulf %144, %145 : vector<8x512xf32>
    %c128 = arith.constant 128 : index
    %c0_53 = arith.constant 0 : index
    %147 = vector.load %arg1[%c128, %c0_53] : memref<576x8xf32, #tpu.memory_space<vmem>>, vector<8x8xf32>
    %cst_54 = arith.constant dense<0.000000e+00> : vector<8x512xf32>
    %148 = tpu.matmul %147, %146, %cst_54 {dimension_numbers = #tpu.dot_dimension_numbers<[1], [0], [0], [1], [0, 0, 1, 1], [], []>, precision = #tpu.contract_precision<fp32>} : vector<8x8xf32>, vector<8x512xf32>, vector<8x512xf32> -> vector<8x512xf32>
    %149 = arith.addf %143, %148 : vector<8x512xf32>
    %c495_i32_55 = arith.constant 495 : i32
    %150 = tpu.dynamic_rotate %102 by %c495_i32_55 dim 1 : vector<8x512xf32>, i32 -> vector<8x512xf32>
    %151 = arith.mulf %15, %23 : vector<1x512xf32>
    %152 = vector.broadcast %151 : vector<1x512xf32> to vector<8x512xf32>
    %153 = arith.mulf %150, %152 : vector<8x512xf32>
    %c136 = arith.constant 136 : index
    %c0_56 = arith.constant 0 : index
    %154 = vector.load %arg1[%c136, %c0_56] : memref<576x8xf32, #tpu.memory_space<vmem>>, vector<8x8xf32>
    %cst_57 = arith.constant dense<0.000000e+00> : vector<8x512xf32>
    %155 = tpu.matmul %154, %153, %cst_57 {dimension_numbers = #tpu.dot_dimension_numbers<[1], [0], [0], [1], [0, 0, 1, 1], [], []>, precision = #tpu.contract_precision<fp32>} : vector<8x8xf32>, vector<8x512xf32>, vector<8x512xf32> -> vector<8x512xf32>
    %156 = arith.addf %149, %155 : vector<8x512xf32>
    %c328 = arith.constant 328 : index
    %c0_58 = arith.constant 0 : index
    %157 = vector.load %arg1[%c328, %c0_58] : memref<576x8xf32, #tpu.memory_space<vmem>>, vector<8x1xf32>
    %c360 = arith.constant 360 : index
    %c0_59 = arith.constant 0 : index
    %158 = vector.load %arg1[%c360, %c0_59] : memref<576x8xf32, #tpu.memory_space<vmem>>, vector<8x1xf32>
    %cst_60 = arith.constant dense<0.000000e+00> : vector<8xf32>
    %159 = vector.multi_reduction <add>, %156, %cst_60 [1] : vector<8x512xf32> to vector<8xf32>
    %160 = vector.shape_cast %159 : vector<8xf32> to vector<8x1xf32>
    %cst_61 = arith.constant 0.001953125 : f32
    %161 = vector.broadcast %cst_61 : f32 to vector<8x1xf32>
    %162 = arith.mulf %160, %161 : vector<8x1xf32>
    %163 = arith.mulf %156, %156 : vector<8x512xf32>
    %cst_62 = arith.constant dense<0.000000e+00> : vector<8xf32>
    %164 = vector.multi_reduction <add>, %163, %cst_62 [1] : vector<8x512xf32> to vector<8xf32>
    %165 = vector.shape_cast %164 : vector<8xf32> to vector<8x1xf32>
    %cst_63 = arith.constant 0.001953125 : f32
    %166 = vector.broadcast %cst_63 : f32 to vector<8x1xf32>
    %167 = arith.mulf %165, %166 : vector<8x1xf32>
    %168 = arith.mulf %162, %162 : vector<8x1xf32>
    %169 = arith.subf %167, %168 : vector<8x1xf32>
    %cst_64 = arith.constant 9.99999974E-6 : f32
    %170 = vector.broadcast %cst_64 : f32 to vector<8x1xf32>
    %171 = arith.addf %169, %170 : vector<8x1xf32>
    %172 = math.rsqrt %171 : vector<8x1xf32>
    %173 = arith.mulf %157, %172 : vector<8x1xf32>
    %174 = arith.mulf %162, %173 : vector<8x1xf32>
    %175 = arith.subf %158, %174 : vector<8x1xf32>
    %176 = vector.broadcast %173 : vector<8x1xf32> to vector<8x512xf32>
    %177 = arith.mulf %156, %176 : vector<8x512xf32>
    %178 = vector.broadcast %175 : vector<8x1xf32> to vector<8x512xf32>
    %179 = arith.addf %177, %178 : vector<8x512xf32>
    %cst_65 = arith.constant 0.000000e+00 : f32
    %180 = vector.broadcast %cst_65 : f32 to vector<8x512xf32>
    %181 = arith.maximumf %179, %180 : vector<8x512xf32>
    %c17_i32_66 = arith.constant 17 : i32
    %182 = tpu.dynamic_rotate %181 by %c17_i32_66 dim 1 : vector<8x512xf32>, i32 -> vector<8x512xf32>
    %183 = arith.mulf %11, %19 : vector<1x512xf32>
    %184 = vector.broadcast %183 : vector<1x512xf32> to vector<8x512xf32>
    %185 = arith.mulf %182, %184 : vector<8x512xf32>
    %c144 = arith.constant 144 : index
    %c0_67 = arith.constant 0 : index
    %186 = vector.load %arg1[%c144, %c0_67] : memref<576x8xf32, #tpu.memory_space<vmem>>, vector<16x8xf32>
    %cst_68 = arith.constant dense<0.000000e+00> : vector<16x512xf32>
    %187 = tpu.matmul %186, %185, %cst_68 {dimension_numbers = #tpu.dot_dimension_numbers<[1], [0], [0], [1], [0, 0, 1, 1], [], []>, precision = #tpu.contract_precision<fp32>} : vector<16x8xf32>, vector<8x512xf32>, vector<16x512xf32> -> vector<16x512xf32>
    %c16_i32_69 = arith.constant 16 : i32
    %188 = tpu.dynamic_rotate %181 by %c16_i32_69 dim 1 : vector<8x512xf32>, i32 -> vector<8x512xf32>
    %189 = vector.broadcast %11 : vector<1x512xf32> to vector<8x512xf32>
    %190 = arith.mulf %188, %189 : vector<8x512xf32>
    %c160 = arith.constant 160 : index
    %c0_70 = arith.constant 0 : index
    %191 = vector.load %arg1[%c160, %c0_70] : memref<576x8xf32, #tpu.memory_space<vmem>>, vector<16x8xf32>
    %cst_71 = arith.constant dense<0.000000e+00> : vector<16x512xf32>
    %192 = tpu.matmul %191, %190, %cst_71 {dimension_numbers = #tpu.dot_dimension_numbers<[1], [0], [0], [1], [0, 0, 1, 1], [], []>, precision = #tpu.contract_precision<fp32>} : vector<16x8xf32>, vector<8x512xf32>, vector<16x512xf32> -> vector<16x512xf32>
    %193 = arith.addf %187, %192 : vector<16x512xf32>
    %c15_i32_72 = arith.constant 15 : i32
    %194 = tpu.dynamic_rotate %181 by %c15_i32_72 dim 1 : vector<8x512xf32>, i32 -> vector<8x512xf32>
    %195 = arith.mulf %11, %23 : vector<1x512xf32>
    %196 = vector.broadcast %195 : vector<1x512xf32> to vector<8x512xf32>
    %197 = arith.mulf %194, %196 : vector<8x512xf32>
    %c176 = arith.constant 176 : index
    %c0_73 = arith.constant 0 : index
    %198 = vector.load %arg1[%c176, %c0_73] : memref<576x8xf32, #tpu.memory_space<vmem>>, vector<16x8xf32>
    %cst_74 = arith.constant dense<0.000000e+00> : vector<16x512xf32>
    %199 = tpu.matmul %198, %197, %cst_74 {dimension_numbers = #tpu.dot_dimension_numbers<[1], [0], [0], [1], [0, 0, 1, 1], [], []>, precision = #tpu.contract_precision<fp32>} : vector<16x8xf32>, vector<8x512xf32>, vector<16x512xf32> -> vector<16x512xf32>
    %200 = arith.addf %193, %199 : vector<16x512xf32>
    %c1_i32_75 = arith.constant 1 : i32
    %201 = tpu.dynamic_rotate %181 by %c1_i32_75 dim 1 : vector<8x512xf32>, i32 -> vector<8x512xf32>
    %202 = vector.broadcast %19 : vector<1x512xf32> to vector<8x512xf32>
    %203 = arith.mulf %201, %202 : vector<8x512xf32>
    %c192 = arith.constant 192 : index
    %c0_76 = arith.constant 0 : index
    %204 = vector.load %arg1[%c192, %c0_76] : memref<576x8xf32, #tpu.memory_space<vmem>>, vector<16x8xf32>
    %cst_77 = arith.constant dense<0.000000e+00> : vector<16x512xf32>
    %205 = tpu.matmul %204, %203, %cst_77 {dimension_numbers = #tpu.dot_dimension_numbers<[1], [0], [0], [1], [0, 0, 1, 1], [], []>, precision = #tpu.contract_precision<fp32>} : vector<16x8xf32>, vector<8x512xf32>, vector<16x512xf32> -> vector<16x512xf32>
    %206 = arith.addf %200, %205 : vector<16x512xf32>
    %c208 = arith.constant 208 : index
    %c0_78 = arith.constant 0 : index
    %207 = vector.load %arg1[%c208, %c0_78] : memref<576x8xf32, #tpu.memory_space<vmem>>, vector<16x8xf32>
    %cst_79 = arith.constant dense<0.000000e+00> : vector<16x512xf32>
    %208 = tpu.matmul %207, %181, %cst_79 {dimension_numbers = #tpu.dot_dimension_numbers<[1], [0], [0], [1], [0, 0, 1, 1], [], []>, precision = #tpu.contract_precision<fp32>} : vector<16x8xf32>, vector<8x512xf32>, vector<16x512xf32> -> vector<16x512xf32>
    %209 = arith.addf %206, %208 : vector<16x512xf32>
    %c511_i32_80 = arith.constant 511 : i32
    %210 = tpu.dynamic_rotate %181 by %c511_i32_80 dim 1 : vector<8x512xf32>, i32 -> vector<8x512xf32>
    %211 = vector.broadcast %23 : vector<1x512xf32> to vector<8x512xf32>
    %212 = arith.mulf %210, %211 : vector<8x512xf32>
    %c224 = arith.constant 224 : index
    %c0_81 = arith.constant 0 : index
    %213 = vector.load %arg1[%c224, %c0_81] : memref<576x8xf32, #tpu.memory_space<vmem>>, vector<16x8xf32>
    %cst_82 = arith.constant dense<0.000000e+00> : vector<16x512xf32>
    %214 = tpu.matmul %213, %212, %cst_82 {dimension_numbers = #tpu.dot_dimension_numbers<[1], [0], [0], [1], [0, 0, 1, 1], [], []>, precision = #tpu.contract_precision<fp32>} : vector<16x8xf32>, vector<8x512xf32>, vector<16x512xf32> -> vector<16x512xf32>
    %215 = arith.addf %209, %214 : vector<16x512xf32>
    %c497_i32_83 = arith.constant 497 : i32
    %216 = tpu.dynamic_rotate %181 by %c497_i32_83 dim 1 : vector<8x512xf32>, i32 -> vector<8x512xf32>
    %217 = arith.mulf %15, %19 : vector<1x512xf32>
    %218 = vector.broadcast %217 : vector<1x512xf32> to vector<8x512xf32>
    %219 = arith.mulf %216, %218 : vector<8x512xf32>
    %c240 = arith.constant 240 : index
    %c0_84 = arith.constant 0 : index
    %220 = vector.load %arg1[%c240, %c0_84] : memref<576x8xf32, #tpu.memory_space<vmem>>, vector<16x8xf32>
    %cst_85 = arith.constant dense<0.000000e+00> : vector<16x512xf32>
    %221 = tpu.matmul %220, %219, %cst_85 {dimension_numbers = #tpu.dot_dimension_numbers<[1], [0], [0], [1], [0, 0, 1, 1], [], []>, precision = #tpu.contract_precision<fp32>} : vector<16x8xf32>, vector<8x512xf32>, vector<16x512xf32> -> vector<16x512xf32>
    %222 = arith.addf %215, %221 : vector<16x512xf32>
    %c496_i32_86 = arith.constant 496 : i32
    %223 = tpu.dynamic_rotate %181 by %c496_i32_86 dim 1 : vector<8x512xf32>, i32 -> vector<8x512xf32>
    %224 = vector.broadcast %15 : vector<1x512xf32> to vector<8x512xf32>
    %225 = arith.mulf %223, %224 : vector<8x512xf32>
    %c256 = arith.constant 256 : index
    %c0_87 = arith.constant 0 : index
    %226 = vector.load %arg1[%c256, %c0_87] : memref<576x8xf32, #tpu.memory_space<vmem>>, vector<16x8xf32>
    %cst_88 = arith.constant dense<0.000000e+00> : vector<16x512xf32>
    %227 = tpu.matmul %226, %225, %cst_88 {dimension_numbers = #tpu.dot_dimension_numbers<[1], [0], [0], [1], [0, 0, 1, 1], [], []>, precision = #tpu.contract_precision<fp32>} : vector<16x8xf32>, vector<8x512xf32>, vector<16x512xf32> -> vector<16x512xf32>
    %228 = arith.addf %222, %227 : vector<16x512xf32>
    %c495_i32_89 = arith.constant 495 : i32
    %229 = tpu.dynamic_rotate %181 by %c495_i32_89 dim 1 : vector<8x512xf32>, i32 -> vector<8x512xf32>
    %230 = arith.mulf %15, %23 : vector<1x512xf32>
    %231 = vector.broadcast %230 : vector<1x512xf32> to vector<8x512xf32>
    %232 = arith.mulf %229, %231 : vector<8x512xf32>
    %c272 = arith.constant 272 : index
    %c0_90 = arith.constant 0 : index
    %233 = vector.load %arg1[%c272, %c0_90] : memref<576x8xf32, #tpu.memory_space<vmem>>, vector<16x8xf32>
    %cst_91 = arith.constant dense<0.000000e+00> : vector<16x512xf32>
    %234 = tpu.matmul %233, %232, %cst_91 {dimension_numbers = #tpu.dot_dimension_numbers<[1], [0], [0], [1], [0, 0, 1, 1], [], []>, precision = #tpu.contract_precision<fp32>} : vector<16x8xf32>, vector<8x512xf32>, vector<16x512xf32> -> vector<16x512xf32>
    %235 = arith.addf %228, %234 : vector<16x512xf32>
    %c336 = arith.constant 336 : index
    %c0_92 = arith.constant 0 : index
    %236 = vector.load %arg1[%c336, %c0_92] : memref<576x8xf32, #tpu.memory_space<vmem>>, vector<16x1xf32>
    %c368 = arith.constant 368 : index
    %c0_93 = arith.constant 0 : index
    %237 = vector.load %arg1[%c368, %c0_93] : memref<576x8xf32, #tpu.memory_space<vmem>>, vector<16x1xf32>
    %cst_94 = arith.constant dense<0.000000e+00> : vector<16xf32>
    %238 = vector.multi_reduction <add>, %235, %cst_94 [1] : vector<16x512xf32> to vector<16xf32>
    %239 = vector.shape_cast %238 : vector<16xf32> to vector<16x1xf32>
    %cst_95 = arith.constant 0.001953125 : f32
    %240 = vector.broadcast %cst_95 : f32 to vector<16x1xf32>
    %241 = arith.mulf %239, %240 : vector<16x1xf32>
    %242 = arith.mulf %235, %235 : vector<16x512xf32>
    %cst_96 = arith.constant dense<0.000000e+00> : vector<16xf32>
    %243 = vector.multi_reduction <add>, %242, %cst_96 [1] : vector<16x512xf32> to vector<16xf32>
    %244 = vector.shape_cast %243 : vector<16xf32> to vector<16x1xf32>
    %cst_97 = arith.constant 0.001953125 : f32
    %245 = vector.broadcast %cst_97 : f32 to vector<16x1xf32>
    %246 = arith.mulf %244, %245 : vector<16x1xf32>
    %247 = arith.mulf %241, %241 : vector<16x1xf32>
    %248 = arith.subf %246, %247 : vector<16x1xf32>
    %cst_98 = arith.constant 9.99999974E-6 : f32
    %249 = vector.broadcast %cst_98 : f32 to vector<16x1xf32>
    %250 = arith.addf %248, %249 : vector<16x1xf32>
    %251 = math.rsqrt %250 : vector<16x1xf32>
    %252 = arith.mulf %236, %251 : vector<16x1xf32>
    %253 = arith.mulf %241, %252 : vector<16x1xf32>
    %254 = arith.subf %237, %253 : vector<16x1xf32>
    %255 = vector.broadcast %252 : vector<16x1xf32> to vector<16x512xf32>
    %256 = arith.mulf %235, %255 : vector<16x512xf32>
    %257 = vector.broadcast %254 : vector<16x1xf32> to vector<16x512xf32>
    %258 = arith.addf %256, %257 : vector<16x512xf32>
    %cst_99 = arith.constant 0.000000e+00 : f32
    %259 = vector.broadcast %cst_99 : f32 to vector<16x512xf32>
    %260 = arith.maximumf %258, %259 : vector<16x512xf32>
    %261 = tpu.concatenate %102, %181, %260 in 0 : vector<8x512xf32>, vector<8x512xf32>, vector<16x512xf32> -> vector<32x512xf32>
    %c448 = arith.constant 448 : index
    %c0_100 = arith.constant 0 : index
    %262 = vector.load %arg1[%c448, %c0_100] : memref<576x8xf32, #tpu.memory_space<vmem>>, vector<32x1xf32>
    %c480 = arith.constant 480 : index
    %c0_101 = arith.constant 0 : index
    %263 = vector.load %arg1[%c480, %c0_101] : memref<576x8xf32, #tpu.memory_space<vmem>>, vector<32x1xf32>
    %cst_102 = arith.constant dense<0.000000e+00> : vector<32xf32>
    %264 = vector.multi_reduction <add>, %261, %cst_102 [1] : vector<32x512xf32> to vector<32xf32>
    %265 = vector.shape_cast %264 : vector<32xf32> to vector<32x1xf32>
    %cst_103 = arith.constant 0.001953125 : f32
    %266 = vector.broadcast %cst_103 : f32 to vector<32x1xf32>
    %267 = arith.mulf %265, %266 : vector<32x1xf32>
    %268 = arith.mulf %261, %261 : vector<32x512xf32>
    %cst_104 = arith.constant dense<0.000000e+00> : vector<32xf32>
    %269 = vector.multi_reduction <add>, %268, %cst_104 [1] : vector<32x512xf32> to vector<32xf32>
    %270 = vector.shape_cast %269 : vector<32xf32> to vector<32x1xf32>
    %cst_105 = arith.constant 0.001953125 : f32
    %271 = vector.broadcast %cst_105 : f32 to vector<32x1xf32>
    %272 = arith.mulf %270, %271 : vector<32x1xf32>
    %273 = arith.mulf %267, %267 : vector<32x1xf32>
    %274 = arith.subf %272, %273 : vector<32x1xf32>
    %cst_106 = arith.constant 9.99999974E-6 : f32
    %275 = vector.broadcast %cst_106 : f32 to vector<32x1xf32>
    %276 = arith.addf %274, %275 : vector<32x1xf32>
    %277 = math.rsqrt %276 : vector<32x1xf32>
    %278 = arith.mulf %262, %277 : vector<32x1xf32>
    %279 = arith.mulf %267, %278 : vector<32x1xf32>
    %280 = arith.subf %263, %279 : vector<32x1xf32>
    %281 = vector.broadcast %278 : vector<32x1xf32> to vector<32x512xf32>
    %282 = arith.mulf %261, %281 : vector<32x512xf32>
    %283 = vector.broadcast %280 : vector<32x1xf32> to vector<32x512xf32>
    %284 = arith.addf %282, %283 : vector<32x512xf32>
    %c288 = arith.constant 288 : index
    %c0_107 = arith.constant 0 : index
    %285 = vector.load %arg1[%c288, %c0_107] : memref<576x8xf32, #tpu.memory_space<vmem>>, vector<32x8xf32>
    %cst_108 = arith.constant dense<0.000000e+00> : vector<32x512xf32>
    %286 = tpu.matmul %285, %0, %cst_108 {dimension_numbers = #tpu.dot_dimension_numbers<[1], [0], [0], [1], [0, 0, 1, 1], [], []>, precision = #tpu.contract_precision<fp32>} : vector<32x8xf32>, vector<8x512xf32>, vector<32x512xf32> -> vector<32x512xf32>
    %c384 = arith.constant 384 : index
    %c0_109 = arith.constant 0 : index
    %287 = vector.load %arg1[%c384, %c0_109] : memref<576x8xf32, #tpu.memory_space<vmem>>, vector<32x1xf32>
    %c416 = arith.constant 416 : index
    %c0_110 = arith.constant 0 : index
    %288 = vector.load %arg1[%c416, %c0_110] : memref<576x8xf32, #tpu.memory_space<vmem>>, vector<32x1xf32>
    %cst_111 = arith.constant dense<0.000000e+00> : vector<32xf32>
    %289 = vector.multi_reduction <add>, %286, %cst_111 [1] : vector<32x512xf32> to vector<32xf32>
    %290 = vector.shape_cast %289 : vector<32xf32> to vector<32x1xf32>
    %cst_112 = arith.constant 0.001953125 : f32
    %291 = vector.broadcast %cst_112 : f32 to vector<32x1xf32>
    %292 = arith.mulf %290, %291 : vector<32x1xf32>
    %293 = arith.mulf %286, %286 : vector<32x512xf32>
    %cst_113 = arith.constant dense<0.000000e+00> : vector<32xf32>
    %294 = vector.multi_reduction <add>, %293, %cst_113 [1] : vector<32x512xf32> to vector<32xf32>
    %295 = vector.shape_cast %294 : vector<32xf32> to vector<32x1xf32>
    %cst_114 = arith.constant 0.001953125 : f32
    %296 = vector.broadcast %cst_114 : f32 to vector<32x1xf32>
    %297 = arith.mulf %295, %296 : vector<32x1xf32>
    %298 = arith.mulf %292, %292 : vector<32x1xf32>
    %299 = arith.subf %297, %298 : vector<32x1xf32>
    %cst_115 = arith.constant 9.99999974E-6 : f32
    %300 = vector.broadcast %cst_115 : f32 to vector<32x1xf32>
    %301 = arith.addf %299, %300 : vector<32x1xf32>
    %302 = math.rsqrt %301 : vector<32x1xf32>
    %303 = arith.mulf %287, %302 : vector<32x1xf32>
    %304 = arith.mulf %292, %303 : vector<32x1xf32>
    %305 = arith.subf %288, %304 : vector<32x1xf32>
    %306 = vector.broadcast %303 : vector<32x1xf32> to vector<32x512xf32>
    %307 = arith.mulf %286, %306 : vector<32x512xf32>
    %308 = vector.broadcast %305 : vector<32x1xf32> to vector<32x512xf32>
    %309 = arith.addf %307, %308 : vector<32x512xf32>
    %310 = arith.addf %309, %284 : vector<32x512xf32>
    %cst_116 = arith.constant 0.000000e+00 : f32
    %311 = vector.broadcast %cst_116 : f32 to vector<32x512xf32>
    %312 = arith.maximumf %310, %311 : vector<32x512xf32>
    %c512 = arith.constant 512 : index
    %c0_117 = arith.constant 0 : index
    %313 = vector.load %arg1[%c512, %c0_117] : memref<576x8xf32, #tpu.memory_space<vmem>>, vector<32x1xf32>
    %c544 = arith.constant 544 : index
    %c0_118 = arith.constant 0 : index
    %314 = vector.load %arg1[%c544, %c0_118] : memref<576x8xf32, #tpu.memory_space<vmem>>, vector<32x1xf32>
    %cst_119 = arith.constant dense<0.000000e+00> : vector<32xf32>
    %315 = vector.multi_reduction <add>, %312, %cst_119 [1] : vector<32x512xf32> to vector<32xf32>
    %316 = vector.shape_cast %315 : vector<32xf32> to vector<32x1xf32>
    %cst_120 = arith.constant 0.001953125 : f32
    %317 = vector.broadcast %cst_120 : f32 to vector<32x1xf32>
    %318 = arith.mulf %316, %317 : vector<32x1xf32>
    %319 = arith.mulf %312, %312 : vector<32x512xf32>
    %cst_121 = arith.constant dense<0.000000e+00> : vector<32xf32>
    %320 = vector.multi_reduction <add>, %319, %cst_121 [1] : vector<32x512xf32> to vector<32xf32>
    %321 = vector.shape_cast %320 : vector<32xf32> to vector<32x1xf32>
    %cst_122 = arith.constant 0.001953125 : f32
    %322 = vector.broadcast %cst_122 : f32 to vector<32x1xf32>
    %323 = arith.mulf %321, %322 : vector<32x1xf32>
    %324 = arith.mulf %318, %318 : vector<32x1xf32>
    %325 = arith.subf %323, %324 : vector<32x1xf32>
    %cst_123 = arith.constant 9.99999974E-6 : f32
    %326 = vector.broadcast %cst_123 : f32 to vector<32x1xf32>
    %327 = arith.addf %325, %326 : vector<32x1xf32>
    %328 = math.rsqrt %327 : vector<32x1xf32>
    %329 = arith.mulf %313, %328 : vector<32x1xf32>
    %330 = arith.mulf %318, %329 : vector<32x1xf32>
    %331 = arith.subf %314, %330 : vector<32x1xf32>
    %332 = vector.broadcast %329 : vector<32x1xf32> to vector<32x512xf32>
    %333 = arith.mulf %312, %332 : vector<32x512xf32>
    %334 = vector.broadcast %331 : vector<32x1xf32> to vector<32x512xf32>
    %335 = arith.addf %333, %334 : vector<32x512xf32>
    %c0_124 = arith.constant 0 : index
    %c0_125 = arith.constant 0 : index
    %336 = vector.load %arg2[%c0_124, %c0_125] : memref<32x512xf32, #tpu.memory_space<vmem>>, vector<32x512xf32>
    tpu.vector_store %arg2[%c0_124, %c0_125], %335 {strides = array<i32>} : memref<32x512xf32, #tpu.memory_space<vmem>>, vector<32x512xf32>,
    return
  }
}

</mosaic_0001>

<bundles_post_ra>
// kernel: multires_block_pallas.1
= control target key start
LH: loop header
LB: loop body
LE: loop exit
PB: predicated region body
PF: predicated region fallthrough
CT: control target
= control target key end

     0   :  { %v33649_v2 = vmov 0.0   ;;  %s28794_s13 = smov 16   ;;  %s28795_s18 = smov 17   ;;  %v15_v5 = vlaneseq  ;;  %vm120_vm0 = vcmask 64512   ;;  %s33639_s0 = inlined_call_operand.vmem [shape: f32[8,512], index: 0, kind: input, shape index: {}]   ;;  %s33640_s1 = inlined_call_operand.vmem [shape: f32[576,8], index: 1, kind: input, shape index: {}]   ;;  %s33641_s2 = inlined_call_operand.vmem [shape: f32[32,512], index: 2, kind: output, shape index: {}]  }
   0x1   :  { %v28821_v0 = vld [vmem:[%s33639_s0 + $0x18] sm:$0xff]  ;;  %v28826_v1 = vld [vmem:[%s33639_s0] sm:$0xff]  ;;  %190 = vmatprep.mubr.f32.mxu0 %v33649_v2  ;;  %276 = vmatprep.mubr.f32.mxu1 %v33649_v2  ;;  %v28837_v3 = vld [vmem:[%s33639_s0 + $0x10] sm:$0xff]  ;;  %s28797_s19 = smov 1   ;;  %s28798_s20 = smov 127  }
   0x2   :  { %108 = vrot.lane.b32.xlu1 %v28821_v0, %s28794_s13  ;;  %102 = vrot.lane.b32.xlu0 %v28826_v1, %s28794_s13  ;;  %v28842_v4 = vld [vmem:[%s33639_s0 + $0x8] sm:$0xff]  ;;  %s28796_s0 = smov 15   ;;  %s28799_s21 = smov 113   ;;  %v28904_v6 = vand.u32 127, %v15_v5  ;;  %v101_v53 = vld [vmem:[%s33640_s1] sm:$0xff] }
   0x3   :  { %s28800_s22 = smov 112   ;;  %s28801_s23 = smov 111   ;;  %v119_v7 = vld [vmem:[%s33640_s1 + $0x8] sm:$0xff]  ;;  %v1055_v63 = vsel %vm120_vm0, %v101_v53, 0 }
   0x4   :  { %33757 = vst [vmem:[#allocation2_spill] sm:$0xff] %v28904_v6  ;;  %v20_v8 = vshra.s32 %v28904_v6, 4  ;;  %v28911_v9 = vadd.s32 384, %v28904_v6  ;;  %v28914_v10 = vadd.s32 128, %v28904_v6  ;;  %v28917_v11 = vadd.s32 256, %v28904_v6 }
   0x5   :  { %v122_v12 = vsel %vm120_vm0, %v119_v7, 0  ;;  %vm110_vm2 = vcmp.lt.s32.totalorder %v28904_v6, 16  ;;  %v28_v39 = vand.u32 15, %v28904_v6  ;;  %vm88_vm8 = vcmp.lt.s32.totalorder %v28904_v6, 17 }
   0x6   :  { %106 = vrot.lane.b32.xlu1 %v28837_v3, %s28794_s13  ;;  %104 = vrot.lane.b32.xlu0 %v28842_v4, %s28794_s13  ;;  %v28920_v13 = vand.u32 15, %v20_v8  ;;  %v23_v14 = vshra.s32 %v28911_v9, 4  ;;  %v21_v15 = vshra.s32 %v28914_v10, 4  ;;  %v28924_v16 = vand.u32 4294901760, %v122_v12 }
   0x7   :  { %v22_v17 = vshra.s32 %v28917_v11, 4  ;;  %v29_v28 = vand.u32 15, %v28914_v10  ;;  %vm56_vm7 = vcmp.ge.s32.totalorder %v28_v39, 1  ;;  %v31_v62 = vand.u32 15, %v28911_v9 }
   0x8   :  { %vm32_vm1 = vcmp.ge.s32.totalorder %v28920_v13, 1  ;;  %v28928_v18 = vand.u32 15, %v23_v14  ;;  %v28930_v19 = vand.u32 15, %v21_v15  ;;  %v28933_v20 = vsub.f32 %v122_v12, %v28924_v16 }
   0x9   :  { %v28935_v21 = vand.u32 15, %v22_v17  ;;  %v28939_v22 = vsel %vm32_vm1, 1.0, %v33649_v2  ;;  %vm57_vm6 = vcmp.ge.s32.totalorder %v29_v28, 1  ;;  %v29002_v57 = vsel %vm56_vm7, 1.0, %v33649_v2 }
   0xa   :  { %80 = vrot.lane.b32.xlu0 %v28826_v1, %s28795_s18  ;;  %82 = vrot.lane.b32.xlu1 %v28842_v4, %s28795_s18  ;;  %33758 = vst [vmem:[#allocation3_spill] sm:$0xff] %v28939_v22  ;;  %vm35_vm3 = vcmp.ge.s32.totalorder %v28928_v18, 1  ;;  %vm33_vm4 = vcmp.ge.s32.totalorder %v28930_v19, 1  ;;  %v28944_v25 = vand.u32 4294901760, %v28933_v20  ;;  %v28982_v49 = vsel %vm57_vm6, 1.0, %v33649_v2  ;;  %33764 = vst [vmem:[#allocation9_spill] sm:$0xff] %v29002_v57 }
   0xb   :  { %vm34_vm5 = vcmp.ge.s32.totalorder %v28935_v21, 1  ;;  %v28952_v29 = vsel %vm35_vm3, 1.0, %v33649_v2  ;;  %v28955_v30 = vsel %vm33_vm4, 1.0, %v33649_v2  ;;  %33762 = vst [vmem:[#allocation7_spill] sm:$0xff] %v28982_v49  ;;  %v29013_v7 = vmul.f32 %v29002_v57, %v28939_v22 }
   0xc   :  { %33759 = vst [vmem:[#allocation4_spill] sm:$0xff] %v28952_v29  ;;  %33760 = vst [vmem:[#allocation5_spill] sm:$0xff] %v28955_v30  ;;  %v28960_v33 = vsel %vm34_vm5, 1.0, %v33649_v2  ;;  %v194_v35 = vsub.f32 %v28933_v20, %v28944_v25  ;;  %v28998_v55 = vmul.f32 %v28982_v49, %v28955_v30  ;;  %vm59_vm9 = vcmp.ge.s32.totalorder %v31_v62, 1 }
   0xd   :  { %33761 = vst [vmem:[#allocation6_spill] sm:$0xff] %v28960_v33  ;;  %33765 = vst [vmem:[#allocation10_spill] sm:$0xff] %v29013_v7  ;;  %vm69_vm11 = vcmp.le.s32.totalorder %v29_v28, 14  ;;  %vm68_vm12 = vcmp.le.s32.totalorder %v28_v39, 14  ;;  %vm1995_vm13 = vcmp.lt.s32.totalorder %v28904_v6, 15  ;;  %vm71_vm14 = vcmp.le.s32.totalorder %v31_v62, 14 }
   0xe   :  { %86 = vrot.lane.b32.xlu0 %v28821_v0, %s28795_s18  ;;  %84 = vrot.lane.b32.xlu1 %v28837_v3, %s28795_s18  ;;  %v28979_v46 = vand.u32 4294901760, %v194_v35  ;;  %33763 = vst [vmem:[#allocation8_spill] sm:$0xff] %v28998_v55  ;;  %v29035_v35 = vsel %vm59_vm9, 1.0, %v33649_v2  ;;  %v29094_v28 = vsel %vm69_vm11, 1.0, %v33649_v2  ;;  %v29156_v9 = vsel %vm71_vm14, 1.0, %v33649_v2 }
   0xf   :  { %33766 = vst [vmem:[#allocation11_spill] sm:$0xff] %v29035_v35  ;;  %33770 = vst [vmem:[#allocation15_spill] sm:$0xff] %v29094_v28  ;;  %vm2954_vm1 = vcmp.lt.s32.totalorder %v28904_v6, 1  ;;  %vm4847_vm3 = vcmp.lt.s32.totalorder %v28904_v6, 127  ;;  %vm45_vm4 = vcmp.le.s32.totalorder %v28930_v19, 14  ;;  %vm44_vm5 = vcmp.le.s32.totalorder %v28920_v13, 14 }
  0x10   :  { %33774 = vst [vmem:[#allocation19_spill] sm:$0xff] %v29156_v9  ;;  %vm5802_vm6 = vcmp.lt.s32.totalorder %v28904_v6, 113  ;;  %v5815_v19 = vld [vmem:[%s33640_s1 + $0x30] sm:$0xff]  ;;  %vm47_vm7 = vcmp.le.s32.totalorder %v28928_v18, 14  ;;  %vm46_vm9 = vcmp.le.s32.totalorder %v28935_v21, 14  ;;  %vm7716_vm11 = vcmp.lt.s32.totalorder %v28904_v6, 111 }
  0x11   :  { %v29544_v18 = vsel %vm47_vm7, 1.0, %v33649_v2 }
  0x12   :  { %1987 = vrot.lane.b32.xlu0 %v28826_v1, %s28796_s0  ;;  %1989 = vrot.lane.b32.xlu1 %v28842_v4, %s28796_s0  ;;  %33798 = vst [vmem:[#allocation43_spill] sm:$0xff] %v29544_v18 }
  0x16   :  { %1993 = vrot.lane.b32.xlu0 %v28821_v0, %s28796_s0  ;;  %1991 = vrot.lane.b32.xlu1 %v28837_v3, %s28796_s0 }
  0x1a   :  { %2946 = vrot.lane.b32.xlu0 %v28826_v1, %s28797_s19  ;;  %2948 = vrot.lane.b32.xlu1 %v28842_v4, %s28797_s19 }
  0x1e   :  { %2952 = vrot.lane.b32.xlu0 %v28821_v0, %s28797_s19  ;;  %2950 = vrot.lane.b32.xlu1 %v28837_v3, %s28797_s19 }
  0x22   :  { %4841 = vrot.lane.b32.xlu0 %v28842_v4, %s28798_s20  ;;  %4843 = vrot.lane.b32.xlu1 %v28837_v3, %s28798_s20 }
  0x26   :  { %4839 = vrot.lane.b32.xlu0 %v28826_v1, %s28798_s20  ;;  %4845 = vrot.lane.b32.xlu1 %v28821_v0, %s28798_s20 }
  0x2a   :  { %5796 = vrot.lane.b32.xlu0 %v28842_v4, %s28799_s21  ;;  %5798 = vrot.lane.b32.xlu1 %v28837_v3, %s28799_s21 }
  0x2e   :  { %5794 = vrot.lane.b32.xlu0 %v28826_v1, %s28799_s21  ;;  %5800 = vrot.lane.b32.xlu1 %v28821_v0, %s28799_s21 }
  0x32   :  { %6755 = vrot.lane.b32.xlu0 %v28842_v4, %s28800_s22  ;;  %6757 = vrot.lane.b32.xlu1 %v28837_v3, %s28800_s22 }
  0x36   :  { %6753 = vrot.lane.b32.xlu0 %v28826_v1, %s28800_s22  ;;  %6759 = vrot.lane.b32.xlu1 %v28821_v0, %s28800_s22 }
  0x3a   :  { %7710 = vrot.lane.b32.xlu0 %v28842_v4, %s28801_s23  ;;  %7712 = vrot.lane.b32.xlu1 %v28837_v3, %s28801_s23 }
  0x3e   :  { %7708 = vrot.lane.b32.xlu0 %v28826_v1, %s28801_s23  ;;  %7714 = vrot.lane.b32.xlu1 %v28821_v0, %s28801_s23 }
  0x74   :  { %v109_v23 = vpop.permute.xlu1 %108  ;;  %v103_v24 = vpop.permute.xlu0 %102 }
  0x75   :  { %v114_v26 = vsel %vm110_vm2, %v109_v23, %v103_v24 }
  0x76   :  { %v115_v27 = vmul.f32 %v28939_v22, %v114_v26 }
  0x78   :  { %v28957_v31 = vand.u32 4294901760, %v115_v27  ;;  %v107_v32 = vpop.permute.xlu1 %106  ;;  %v105_v34 = vpop.permute.xlu0 %104 }
  0x79   :  { %v111_v36 = vsel %vm110_vm2, %v107_v32, %v109_v23  ;;  %v112_v37 = vsel %vm110_vm2, %v105_v34, %v107_v32  ;;  %v113_v38 = vsel %vm110_vm2, %v103_v24, %v105_v34  ;;  %v30_v23 = vand.u32 15, %v28917_v11 }
  0x7a   :  { %v239_v40 = vsub.f32 %v115_v27, %v28957_v31  ;;  %v118_v41 = vmul.f32 %v28952_v29, %v111_v36  ;;  %v116_v42 = vmul.f32 %v28955_v30, %v113_v38  ;;  %v117_v43 = vmul.f32 %v28960_v33, %v112_v37 }
  0x7b   :  { %v29021_v24 = vand.u32 4294901760, %v1055_v63  ;;  %vm58_vm10 = vcmp.ge.s32.totalorder %v30_v23, 1  ;;  %vm70_vm15 = vcmp.le.s32.totalorder %v30_v23, 14  ;;  %v29172_v23 = vmul.f32 %v29156_v9, %v28952_v29 }
  0x7c   :  { %v28977_v44 = vand.u32 4294901760, %v118_v41  ;;  %v154_v45 = vand.u32 4294901760, %v116_v42  ;;  %v81_v47 = vpop.permute.xlu0 %80  ;;  %v240_v48 = vand.u32 4294901760, %v239_v40  ;;  %v28987_v51 = vpop.permute.xlu1 %82  ;;  %v28989_v52 = vand.u32 4294901760, %v117_v43 }
  0x7d   :  { %v91_v59 = vsel %vm88_vm8, %v81_v47, %v28987_v51  ;;  %v29038_v36 = vsub.f32 %v1055_v63, %v29021_v24  ;;  %v29168_v11 = vsel %vm70_vm15, 1.0, %v33649_v2  ;;  %33776 = vst [vmem:[#allocation21_spill] sm:$0xff] %v29172_v23 }
  0x7e   :  { %155 = vmatprep.subr.mxu0 %v154_v45  ;;  %v233_v50 = vsub.f32 %v116_v42, %v154_v45  ;;  %v698_v56 = vsub.f32 %v118_v41, %v28977_v44  ;;  %v241_v58 = vsub.f32 %v239_v40, %v240_v48  ;;  %v704_v5 = vsub.f32 %v117_v43, %v28989_v52 }
  0x7f   :  { %157 = vmatpush1.msra.mxu0 %v28957_v31  ;;  %v98_v12 = vmul.f32 %v28998_v55, %v91_v59  ;;  %v29046_v41 = vsel %vm58_vm10, 1.0, %v33649_v2  ;;  %v29050_v42 = vmul.f32 %v29035_v35, %v28952_v29  ;;  %33775 = vst [vmem:[#allocation20_spill] sm:$0xff] %v29168_v11  ;;  %vm6761_vm10 = vcmp.lt.s32.totalorder %v28904_v6, 112 }
  0x80   :  { %196 = vmatmul.mubr.f32.vlgmr.msra.gmra.mxu0 %v28979_v46  ;;  %316 = vmatprep.subr.mxu0 %v233_v50  ;;  %v234_v54 = vand.u32 4294901760, %v233_v50  ;;  %v87_v60 = vpop.permute.xlu0 %86  ;;  %v699_v15 = vand.u32 4294901760, %v698_v56  ;;  %v242_v17 = vand.u32 4294901760, %v241_v58  ;;  %v705_v27 = vand.u32 4294901760, %v704_v5  ;;  %v85_v37 = vpop.permute.xlu1 %84  ;;  %33767 = vst [vmem:[#allocation12_spill] sm:$0xff] %v29046_v41 }
  0x81   :  { %319 = vmatpush1.msra.mxu0 %v239_v40  ;;  %352 = vmatprep.mubr.f32.mxu0 %v33649_v2  ;;  %v92_v14 = vsel %vm88_vm8, %v87_v60, %v81_v47  ;;  %v29027_v32 = vand.u32 4294901760, %v98_v12  ;;  %33768 = vst [vmem:[#allocation13_spill] sm:$0xff] %v29050_v42  ;;  %v89_v47 = vsel %vm88_vm8, %v85_v37, %v87_v60 }
  0x82   :  { %470 = vmatprep.subr.mxu0 %v234_v54  ;;  %v235_v61 = vsub.f32 %v233_v50, %v234_v54  ;;  %v97_v26 = vmul.f32 %v29013_v7, %v92_v14  ;;  %v700_v34 = vsub.f32 %v698_v56, %v699_v15  ;;  %v706_v40 = vsub.f32 %v704_v5, %v705_v27 }
  0x83   :  { %v29066_v53 = vmul.f32 %v29046_v41, %v28960_v33 }
  0x84   :  { %355 = vmatmul.mubr.f32.vlgmr.msra.gmra.mxu0 %v28933_v20  ;;  %v236_v8 = vand.u32 4294901760, %v235_v61  ;;  %v29041_v38 = vand.u32 4294901760, %v97_v26  ;;  %v701_v43 = vand.u32 4294901760, %v700_v34  ;;  %v707_v54 = vand.u32 4294901760, %v706_v40  ;;  %v1988_v60 = vpop.permute.xlu0 %1987  ;;  %v29101_v63 = vpop.permute.xlu1 %1989 }
  0x85   :  { %474 = vmatpush1.msra.mxu0 %v240_v48  ;;  %507 = vmatprep.mubr.f32.mxu0 %v33649_v2  ;;  %v29059_v48 = vand.u32 4294901760, %v29038_v36  ;;  %33769 = vst [vmem:[#allocation14_spill] sm:$0xff] %v29066_v53 }
  0x86   :  { %620 = vmatprep.subr.mxu0 %v28977_v44  ;;  %237 = vmatprep.subr.mxu1 %v236_v8  ;;  %v29062_v50 = vsub.f32 %v97_v26, %v29041_v38 }
  0x87   :  { %243 = vmatpush1.msra.mxu1 %v242_v17  ;;  %v1127_v58 = vsub.f32 %v29038_v36, %v29059_v48  ;;  %v1998_v17 = vsel %vm1995_vm13, %v1988_v60, %v29101_v63 }
  0x88   :  { %278 = vmatmul.mubr.f32.vlgmr.msra.gmra.mxu1 %v28924_v16  ;;  %392 = vmatprep.subr.mxu1 %v154_v45  ;;  %v1173_v59 = vand.u32 4294901760, %v29062_v50  ;;  %v1994_v26 = vpop.permute.xlu0 %1993 }
  0x89   :  { %509 = vmatmul.mubr.f32.vlgmr.msra.gmra.mxu0 %v28924_v16  ;;  %394 = vmatpush1.msra.mxu1 %v28957_v31  ;;  %v29091_v10 = vand.u32 4294901760, %v1127_v58  ;;  %v1999_v40 = vsel %vm1995_vm13, %v1994_v26, %v1988_v60 }
  0x8a   :  { %622 = vmatpush1.msra.mxu0 %v28989_v52  ;;  %546 = vmatprep.subr.mxu1 %v154_v45  ;;  %v1166_v45 = vsub.f32 %v98_v12, %v29027_v32  ;;  %v1174_v8 = vsub.f32 %v29062_v50, %v1173_v59  ;;  %v2008_v12 = vld [vmem:[%s33640_s1 + $0x10] sm:$0xff] }
  0x8b   :  { %781 = vmatprep.subr.mxu0 %v698_v56  ;;  %427 = vmatprep.mubr.f32.mxu1 %v33649_v2 }
  0x8c   :  { %655 = vmatprep.mubr.f32.mxu0 %v33649_v2  ;;  %431 = vmatmul.mubr.f32.vlgmr.msra.gmra.mxu1 %v28944_v25  ;;  %v1167_v56 = vand.u32 4294901760, %v1166_v45  ;;  %v1175_v34 = vand.u32 4294901760, %v1174_v8 }
  0x8d   :  { %548 = vmatpush1.msra.mxu1 %v28957_v31  ;;  %661 = vmatmul.mubr.f32.vlgmr.msra.gmra.mxu0 %v28979_v46  ;;  %v90_v31 = vsel %vm88_vm8, %v28987_v51, %v85_v37  ;;  %v100_v46 = vmul.f32 %v29050_v42, %v89_v47 }
  0x8e   :  { %784 = vmatpush1.msra.mxu0 %v704_v5  ;;  %702 = vmatprep.subr.mxu1 %v701_v43  ;;  %v99_v51 = vmul.f32 %v29066_v53, %v90_v31  ;;  %v1992_v31 = vpop.permute.xlu1 %1991 }
  0x8f   :  { %935 = vmatprep.subr.mxu0 %v699_v15  ;;  %581 = vmatprep.mubr.f32.mxu1 %v33649_v2  ;;  %v29085_v61 = vand.u32 4294901760, %v100_v46  ;;  %v29118_v15 = vsel %vm68_vm12, 1.0, %v33649_v2 }
  0x90   :  { %817 = vmatprep.mubr.f32.mxu0 %v33649_v2  ;;  %583 = vmatmul.mubr.f32.vlgmr.msra.gmra.mxu1 %v28924_v16  ;;  %v29103_v5 = vand.u32 4294901760, %v99_v51  ;;  %33772 = vst [vmem:[#allocation17_spill] sm:$0xff] %v29118_v15 }
  0x91   :  { %708 = vmatpush1.msra.mxu1 %v707_v54  ;;  %820 = vmatmul.mubr.f32.vlgmr.msra.gmra.mxu0 %v28933_v20  ;;  %v1168_v20 = vsub.f32 %v1166_v45, %v1167_v56  ;;  %v1631_v14 = vsub.f32 %v100_v46, %v29085_v61 }
  0x92   :  { %939 = vmatpush1.msra.mxu0 %v705_v27  ;;  %857 = vmatprep.subr.mxu1 %v28977_v44  ;;  %v1637_v27 = vsub.f32 %v99_v51, %v29103_v5  ;;  %v1996_v51 = vsel %vm1995_vm13, %v1992_v31, %v1994_v26 }
  0x93   :  { %741 = vmatprep.mubr.f32.mxu1 %v33649_v2  ;;  %972 = vmatprep.mubr.f32.mxu0 %v33649_v2  ;;  %v1169_v39 = vand.u32 4294901760, %v1168_v20  ;;  %v1632_v43 = vand.u32 4294901760, %v1631_v14  ;;  %v29186_v20 = vmul.f32 %v29168_v11, %v28960_v33 }
  0x94   :  { %1088 = vmatprep.subr.mxu0 %v29027_v32  ;;  %743 = vmatmul.mubr.f32.vlgmr.msra.gmra.mxu1 %v28924_v16  ;;  %v1638_v47 = vand.u32 4294901760, %v1637_v27 }
  0x95   :  { %859 = vmatpush1.msra.mxu1 %v28989_v52  ;;  %974 = vmatmul.mubr.f32.vlgmr.msra.gmra.mxu0 %v28924_v16  ;;  %v1633_v54 = vsub.f32 %v1631_v14, %v1632_v43  ;;  %33777 = vst [vmem:[#allocation22_spill] sm:$0xff] %v29186_v20 }
  0x96   :  { %1090 = vmatpush1.msra.mxu0 %v29041_v38  ;;  %1011 = vmatprep.subr.mxu1 %v28977_v44  ;;  %v29114_v44 = vmul.f32 %v29094_v28, %v28955_v30 }
  0x97   :  { %1249 = vmatprep.subr.mxu0 %v1166_v45  ;;  %892 = vmatprep.mubr.f32.mxu1 %v33649_v2  ;;  %v1634_v58 = vand.u32 4294901760, %v1633_v54 }
  0x98   :  { %1123 = vmatprep.mubr.f32.mxu0 %v33649_v2  ;;  %896 = vmatmul.mubr.f32.vlgmr.msra.gmra.mxu1 %v28944_v25  ;;  %33771 = vst [vmem:[#allocation16_spill] sm:$0xff] %v29114_v44  ;;  %v2010_v25 = vsel %vm120_vm0, %v2008_v12, 0  ;;  %v2005_v37 = vmul.f32 %v29114_v44, %v1998_v17  ;;  %v2947_v17 = vpop.permute.xlu0 %2946 }
  0x99   :  { %1013 = vmatpush1.msra.mxu1 %v28989_v52  ;;  %1129 = vmatmul.mubr.f32.vlgmr.msra.gmra.mxu0 %v29091_v10  ;;  %v29131_v52 = vmul.f32 %v29118_v15, %v28939_v22  ;;  %v29139_v45 = vand.u32 4294901760, %v2010_v25 }
  0x9a   :  { %1252 = vmatpush1.msra.mxu0 %v29062_v50  ;;  %1170 = vmatprep.subr.mxu1 %v1169_v39  ;;  %v29148_v50 = vand.u32 4294901760, %v2005_v37 }
  0x9b   :  { %1403 = vmatprep.subr.mxu0 %v1167_v56  ;;  %1046 = vmatprep.mubr.f32.mxu1 %v33649_v2  ;;  %33773 = vst [vmem:[#allocation18_spill] sm:$0xff] %v29131_v52  ;;  %v29159_v62 = vsub.f32 %v2010_v25, %v29139_v45  ;;  %v1639_v56 = vsub.f32 %v1637_v27, %v1638_v47 }
  0x9c   :  { %1285 = vmatprep.mubr.f32.mxu0 %v33649_v2  ;;  %1048 = vmatmul.mubr.f32.vlgmr.msra.gmra.mxu1 %v28924_v16  ;;  %v2004_v16 = vmul.f32 %v29131_v52, %v1999_v40  ;;  %v2963_v40 = vld [vmem:[%s33640_s1 + $0x18] sm:$0xff] }
  0x9d   :  { %1176 = vmatpush1.msra.mxu1 %v1175_v34  ;;  %1288 = vmatmul.mubr.f32.vlgmr.msra.gmra.mxu0 %v29038_v36  ;;  %v1640_v8 = vand.u32 4294901760, %v1639_v56  ;;  %v2965_v54 = vsel %vm120_vm0, %v2963_v40, 0 }
  0x9e   :  { %1407 = vmatpush1.msra.mxu0 %v1173_v59  ;;  %1325 = vmatprep.subr.mxu1 %v29027_v32  ;;  %v29163_v46 = vand.u32 4294901760, %v2004_v16  ;;  %v29181_v59 = vand.u32 4294901760, %v29159_v62 }
  0x9f   :  { %1553 = vmatprep.subr.mxu0 %v29085_v61  ;;  %1209 = vmatprep.mubr.f32.mxu1 %v33649_v2 }
  0xa0   :  { %1440 = vmatprep.mubr.f32.mxu0 %v33649_v2  ;;  %1211 = vmatmul.mubr.f32.vlgmr.msra.gmra.mxu1 %v29021_v24  ;;  %v2127_v60 = vsub.f32 %v2004_v16, %v29163_v46  ;;  %v2082_v39 = vsub.f32 %v29159_v62, %v29181_v59 }
  0xa1   :  { %1327 = vmatpush1.msra.mxu1 %v29041_v38  ;;  %1442 = vmatmul.mubr.f32.vlgmr.msra.gmra.mxu0 %v29021_v24 }
  0xa2   :  { %1555 = vmatpush1.msra.mxu0 %v29103_v5  ;;  %1479 = vmatprep.subr.mxu1 %v29027_v32  ;;  %v2121_v32 = vsub.f32 %v2005_v37, %v29148_v50  ;;  %v2083_v25 = vand.u32 4294901760, %v2082_v39 }
  0xa3   :  { %1714 = vmatprep.subr.mxu0 %v1631_v14  ;;  %1360 = vmatprep.mubr.f32.mxu1 %v33649_v2 }
  0xa4   :  { %1588 = vmatprep.mubr.f32.mxu0 %v33649_v2  ;;  %1364 = vmatmul.mubr.f32.vlgmr.msra.gmra.mxu1 %v29059_v48  ;;  %v2122_v12 = vand.u32 4294901760, %v2121_v32 }
  0xa5   :  { %1481 = vmatpush1.msra.mxu1 %v29041_v38  ;;  %1594 = vmatmul.mubr.f32.vlgmr.msra.gmra.mxu0 %v29091_v10  ;;  %v1997_v38 = vsel %vm1995_vm13, %v29101_v63, %v1992_v31  ;;  %v2007_v10 = vmul.f32 %v29172_v23, %v1996_v51  ;;  %v2128_v63 = vand.u32 4294901760, %v2127_v60 }
  0xa6   :  { %1717 = vmatpush1.msra.mxu0 %v1637_v27  ;;  %1635 = vmatprep.subr.mxu1 %v1634_v58  ;;  %v2006_v14 = vmul.f32 %v29186_v20, %v1997_v38  ;;  %v29211_v27 = vpop.permute.xlu1 %2948 }
  0xa7   :  { %1868 = vmatprep.subr.mxu0 %v1632_v43  ;;  %1514 = vmatprep.mubr.f32.mxu1 %v33649_v2  ;;  %v29202_v26 = vand.u32 4294901760, %v2007_v10  ;;  %v2129_v37 = vsub.f32 %v2127_v60, %v2128_v63  ;;  %v2957_v16 = vsel %vm2954_vm1, %v2947_v17, %v29211_v27 }
  0xa8   :  { %1750 = vmatprep.mubr.f32.mxu0 %v33649_v2  ;;  %1516 = vmatmul.mubr.f32.vlgmr.msra.gmra.mxu1 %v29021_v24  ;;  %v29213_v34 = vand.u32 4294901760, %v2006_v14 }
  0xa9   :  { %1641 = vmatpush1.msra.mxu1 %v1640_v8  ;;  %1753 = vmatmul.mubr.f32.vlgmr.msra.gmra.mxu0 %v29038_v36  ;;  %v2123_v36 = vsub.f32 %v2121_v32, %v2122_v12 }
  0xaa   :  { %1872 = vmatpush1.msra.mxu0 %v1638_v47  ;;  %1790 = vmatprep.subr.mxu1 %v29085_v61  ;;  %v2953_v47 = vpop.permute.xlu0 %2952  ;;  %v2592_v31 = vsub.f32 %v2006_v14, %v29213_v34 }
  0xab   :  { %1674 = vmatprep.mubr.f32.mxu1 %v33649_v2  ;;  %1905 = vmatprep.mubr.f32.mxu0 %v33649_v2  ;;  %v2124_v43 = vand.u32 4294901760, %v2123_v36  ;;  %v2958_v56 = vsel %vm2954_vm1, %v2953_v47, %v2947_v17 }
  0xac   :  { %2043 = vmatprep.subr.mxu0 %v29148_v50  ;;  %1676 = vmatmul.mubr.f32.vlgmr.msra.gmra.mxu1 %v29021_v24  ;;  %v2593_v51 = vand.u32 4294901760, %v2592_v31 }
  0xad   :  { %1792 = vmatpush1.msra.mxu1 %v29103_v5  ;;  %1907 = vmatmul.mubr.f32.vlgmr.msra.gmra.mxu0 %v29021_v24 }
  0xae   :  { %2045 = vmatpush1.msra.mxu0 %v29163_v46  ;;  %1944 = vmatprep.subr.mxu1 %v29085_v61  ;;  %v2586_v61 = vsub.f32 %v2007_v10, %v29202_v26  ;;  %v2951_v10 = vpop.permute.xlu1 %2950  ;;  %v2594_v39 = vsub.f32 %v2592_v31, %v2593_v51 }
  0xaf   :  { %2204 = vmatprep.subr.mxu0 %v2121_v32  ;;  %1825 = vmatprep.mubr.f32.mxu1 %v33649_v2  ;;  %v29235_v32 = vand.u32 4294901760, %v2965_v54  ;;  %v2955_v17 = vsel %vm2954_vm1, %v2951_v10, %v2953_v47  ;;  %v2956_v40 = vsel %vm2954_vm1, %v29211_v27, %v2951_v10  ;;  %v29316_v10 = vand.u32 4294901760, %v28826_v1 }
  0xb0   :  { %2078 = vmatprep.mubr.f32.mxu0 %v33649_v2  ;;  %1829 = vmatmul.mubr.f32.vlgmr.msra.gmra.mxu1 %v29059_v48  ;;  %v2130_v48 = vand.u32 4294901760, %v2129_v37  ;;  %v2587_v58 = vand.u32 4294901760, %v2586_v61  ;;  %v2595_v37 = vand.u32 4294901760, %v2594_v39 }
  0xb1   :  { %1946 = vmatpush1.msra.mxu1 %v29103_v5  ;;  %2084 = vmatmul.mubr.f32.vlgmr.msra.gmra.mxu0 %v2083_v25  ;;  %v2960_v5 = vmul.f32 %v28982_v49, %v2957_v16  ;;  %v29248_v38 = vsub.f32 %v2965_v54, %v29235_v32  ;;  %33779 = vst [vmem:[#allocation24_spill] sm:$0xff] %v29316_v10 }
  0xb2   :  { %2207 = vmatpush1.msra.mxu0 %v2127_v60  ;;  %2125 = vmatprep.subr.mxu1 %v2124_v43  ;;  %v2588_v8 = vsub.f32 %v2586_v61, %v2587_v58  ;;  %v2962_v43 = vmul.f32 %v29035_v35, %v2955_v17 }
  0xb3   :  { %2358 = vmatprep.subr.mxu0 %v2122_v12  ;;  %1979 = vmatprep.mubr.f32.mxu1 %v33649_v2  ;;  %v29242_v60 = vand.u32 4294901760, %v2960_v5 }
  0xb4   :  { %2240 = vmatprep.mubr.f32.mxu0 %v33649_v2  ;;  %1981 = vmatmul.mubr.f32.vlgmr.msra.gmra.mxu1 %v29021_v24  ;;  %v2959_v24 = vmul.f32 %v29002_v57, %v2958_v56  ;;  %v2589_v14 = vand.u32 4294901760, %v2588_v8  ;;  %v29279_v16 = vand.u32 4294901760, %v2962_v43  ;;  %v29309_v8 = vand.u32 4294901760, %v28842_v4 }
  0xb5   :  { %2131 = vmatpush1.msra.mxu1 %v2130_v48  ;;  %2243 = vmatmul.mubr.f32.vlgmr.msra.gmra.mxu0 %v29159_v62  ;;  %v3901_v48 = vld [vmem:[%s33640_s1 + $0x20] sm:$0xff] }
  0xb6   :  { %2362 = vmatpush1.msra.mxu0 %v2128_v63  ;;  %2280 = vmatprep.subr.mxu1 %v29148_v50  ;;  %v29252_v12 = vand.u32 4294901760, %v2959_v24  ;;  %v3076_v63 = vsub.f32 %v2960_v5, %v29242_v60  ;;  %v3541_v56 = vsub.f32 %v2962_v43, %v29279_v16  ;;  %33778 = vst [vmem:[#allocation23_spill] sm:$0xff] %v29309_v8 }
  0xb7   :  { %2508 = vmatprep.subr.mxu0 %v29202_v26  ;;  %2164 = vmatprep.mubr.f32.mxu1 %v33649_v2 }
  0xb8   :  { %2395 = vmatprep.mubr.f32.mxu0 %v33649_v2  ;;  %2166 = vmatmul.mubr.f32.vlgmr.msra.gmra.mxu1 %v29139_v45  ;;  %v3082_v36 = vsub.f32 %v2959_v24, %v29252_v12 }
  0xb9   :  { %2282 = vmatpush1.msra.mxu1 %v29163_v46  ;;  %2397 = vmatmul.mubr.f32.vlgmr.msra.gmra.mxu0 %v29139_v45 }
  0xba   :  { %2510 = vmatpush1.msra.mxu0 %v29213_v34  ;;  %2434 = vmatprep.subr.mxu1 %v29148_v50  ;;  %v29262_v50 = vand.u32 4294901760, %v29248_v38  ;;  %v3083_v27 = vand.u32 4294901760, %v3082_v36 }
  0xbb   :  { %2669 = vmatprep.subr.mxu0 %v2586_v61  ;;  %2315 = vmatprep.mubr.f32.mxu1 %v33649_v2  ;;  %v2961_v61 = vmul.f32 %v29046_v41, %v2956_v40  ;;  %v4842_v40 = vpop.permute.xlu0 %4841 }
  0xbc   :  { %2543 = vmatprep.mubr.f32.mxu0 %v33649_v2  ;;  %2319 = vmatmul.mubr.f32.vlgmr.msra.gmra.mxu1 %v29181_v59 }
  0xbd   :  { %2436 = vmatpush1.msra.mxu1 %v29163_v46  ;;  %2549 = vmatmul.mubr.f32.vlgmr.msra.gmra.mxu0 %v2083_v25  ;;  %v3077_v46 = vand.u32 4294901760, %v3076_v63  ;;  %v3037_v25 = vsub.f32 %v29248_v38, %v29262_v50  ;;  %v29287_v54 = vand.u32 4294901760, %v2961_v61 }
  0xbe   :  { %2672 = vmatpush1.msra.mxu0 %v2592_v31  ;;  %2590 = vmatprep.subr.mxu1 %v2589_v14  ;;  %v3084_v31 = vsub.f32 %v3082_v36, %v3083_v27 }
  0xbf   :  { %2823 = vmatprep.subr.mxu0 %v2587_v58  ;;  %2469 = vmatprep.mubr.f32.mxu1 %v33649_v2  ;;  %v3038_v47 = vand.u32 4294901760, %v3037_v25  ;;  %v3547_v58 = vsub.f32 %v2961_v61, %v29287_v54  ;;  %v29365_v61 = vand.u32 4294901760, %v28837_v3 }
  0xc0   :  { %2705 = vmatprep.mubr.f32.mxu0 %v33649_v2  ;;  %2471 = vmatmul.mubr.f32.vlgmr.msra.gmra.mxu1 %v29139_v45  ;;  %v3085_v24 = vand.u32 4294901760, %v3084_v31 }
  0xc1   :  { %2596 = vmatpush1.msra.mxu1 %v2595_v37  ;;  %2708 = vmatmul.mubr.f32.vlgmr.msra.gmra.mxu0 %v29159_v62  ;;  %v3078_v62 = vsub.f32 %v3076_v63, %v3077_v46  ;;  %33785 = vst [vmem:[#allocation30_spill] sm:$0xff] %v29365_v61 }
  0xc2   :  { %2827 = vmatpush1.msra.mxu0 %v2593_v51  ;;  %2745 = vmatprep.subr.mxu1 %v29202_v26  ;;  %v3548_v51 = vand.u32 4294901760, %v3547_v58 }
  0xc3   :  { %2629 = vmatprep.mubr.f32.mxu1 %v33649_v2  ;;  %2860 = vmatprep.mubr.f32.mxu0 %v33649_v2  ;;  %v3079_v5 = vand.u32 4294901760, %v3078_v62 }
  0xc4   :  { %2998 = vmatprep.subr.mxu0 %v29242_v60  ;;  %2631 = vmatmul.mubr.f32.vlgmr.msra.gmra.mxu1 %v29139_v45  ;;  %v3549_v14 = vsub.f32 %v3547_v58, %v3548_v51 }
  0xc5   :  { %2747 = vmatpush1.msra.mxu1 %v29213_v34  ;;  %2862 = vmatmul.mubr.f32.vlgmr.msra.gmra.mxu0 %v29139_v45 }
  0xc6   :  { %3000 = vmatpush1.msra.mxu0 %v29252_v12  ;;  %2899 = vmatprep.subr.mxu1 %v29202_v26  ;;  %v3903_v26 = vsel %vm120_vm0, %v3901_v48, 0 }
  0xc7   :  { %3159 = vmatprep.subr.mxu0 %v3076_v63  ;;  %2780 = vmatprep.mubr.f32.mxu1 %v33649_v2  ;;  %v29326_v63 = vsub.f32 %v28842_v4, %v29309_v8  ;;  %v3550_v4 = vand.u32 4294901760, %v3549_v14 }
  0xc8   :  { %3033 = vmatprep.mubr.f32.mxu0 %v33649_v2  ;;  %2784 = vmatmul.mubr.f32.vlgmr.msra.gmra.mxu1 %v29181_v59  ;;  %v3542_v59 = vand.u32 4294901760, %v3541_v56 }
  0xc9   :  { %2901 = vmatpush1.msra.mxu1 %v29213_v34  ;;  %3039 = vmatmul.mubr.f32.vlgmr.msra.gmra.mxu0 %v3038_v47  ;;  %v29303_v34 = vand.u32 4294901760, %v3903_v26  ;;  %33780 = vst [vmem:[#allocation25_spill] sm:$0xff] %v29326_v63  ;;  %v29340_v37 = vand.u32 4294901760, %v29326_v63 }
  0xca   :  { %3162 = vmatpush1.msra.mxu0 %v3082_v36  ;;  %3080 = vmatprep.subr.mxu1 %v3079_v5  ;;  %v4840_v5 = vpop.permute.xlu0 %4839 }
  0xcb   :  { %3313 = vmatprep.subr.mxu0 %v3077_v46  ;;  %2934 = vmatprep.mubr.f32.mxu1 %v33649_v2  ;;  %v29319_v39 = vsub.f32 %v3903_v26, %v29303_v34  ;;  %33782 = vst [vmem:[#allocation27_spill] sm:$0xff] %v29340_v37  ;;  %v4016_v43 = vsub.f32 %v29326_v63, %v29340_v37 }
  0xcc   :  { %3195 = vmatprep.mubr.f32.mxu0 %v33649_v2  ;;  %2936 = vmatmul.mubr.f32.vlgmr.msra.gmra.mxu1 %v29139_v45  ;;  %v3543_v45 = vsub.f32 %v3541_v56, %v3542_v59 }
  0xcd   :  { %3086 = vmatpush1.msra.mxu1 %v3085_v24  ;;  %3198 = vmatmul.mubr.f32.vlgmr.msra.gmra.mxu0 %v29248_v38  ;;  %v29332_v36 = vand.u32 4294901760, %v29319_v39  ;;  %v29372_v62 = vand.u32 4294901760, %v4016_v43 }
  0xce   :  { %3317 = vmatpush1.msra.mxu0 %v3083_v27  ;;  %3235 = vmatprep.subr.mxu1 %v29242_v60  ;;  %v3544_v17 = vand.u32 4294901760, %v3543_v45  ;;  %v4844_v27 = vpop.permute.xlu1 %4843 }
  0xcf   :  { %3463 = vmatprep.subr.mxu0 %v29279_v16  ;;  %3119 = vmatprep.mubr.f32.mxu1 %v33649_v2  ;;  %33786 = vst [vmem:[#allocation31_spill] sm:$0xff] %v29372_v62  ;;  %v4849_v48 = vsel %vm4847_vm3, %v4842_v40, %v4844_v27 }
  0xd0   :  { %3350 = vmatprep.mubr.f32.mxu0 %v33649_v2  ;;  %3121 = vmatmul.mubr.f32.vlgmr.msra.gmra.mxu1 %v29235_v32 }
  0xd1   :  { %3237 = vmatpush1.msra.mxu1 %v29252_v12  ;;  %3352 = vmatmul.mubr.f32.vlgmr.msra.gmra.mxu0 %v29235_v32 }
  0xd2   :  { %3465 = vmatpush1.msra.mxu0 %v29287_v54  ;;  %3389 = vmatprep.subr.mxu1 %v29242_v60  ;;  %v29336_v60 = vsub.f32 %v28826_v1, %v29316_v10  ;;  %v3975_v1 = vsub.f32 %v29319_v39, %v29332_v36  ;;  %v4846_v14 = vpop.permute.xlu1 %4845 }
  0xd3   :  { %3624 = vmatprep.subr.mxu0 %v3541_v56  ;;  %3270 = vmatprep.mubr.f32.mxu1 %v33649_v2  ;;  %v29390_v56 = vsub.f32 %v28837_v3, %v29365_v61  ;;  %v4850_v3 = vsel %vm4847_vm3, %v4840_v5, %v4842_v40  ;;  %v4851_v40 = vsel %vm4847_vm3, %v4846_v14, %v4840_v5 }
  0xd4   :  { %3498 = vmatprep.mubr.f32.mxu0 %v33649_v2  ;;  %3274 = vmatmul.mubr.f32.vlgmr.msra.gmra.mxu1 %v29262_v50  ;;  %33781 = vst [vmem:[#allocation26_spill] sm:$0xff] %v29336_v60  ;;  %v3976_v46 = vand.u32 4294901760, %v3975_v1 }
  0xd5   :  { %3391 = vmatpush1.msra.mxu1 %v29252_v12  ;;  %3504 = vmatmul.mubr.f32.vlgmr.msra.gmra.mxu0 %v3038_v47  ;;  %v29348_v12 = vand.u32 4294901760, %v29336_v60  ;;  %v4856_v47 = vld [vmem:[%s33640_s1 + $0x28] sm:$0xff]  ;;  %33789 = vst [vmem:[#allocation34_spill] sm:$0xff] %v29390_v56  ;;  %v29408_v26 = vand.u32 4294901760, %v29390_v56 }
  0xd6   :  { %3627 = vmatpush1.msra.mxu0 %v3547_v58  ;;  %3545 = vmatprep.subr.mxu1 %v3544_v17 }
  0xd7   :  { %3778 = vmatprep.subr.mxu0 %v3542_v59  ;;  %3424 = vmatprep.mubr.f32.mxu1 %v33649_v2  ;;  %33783 = vst [vmem:[#allocation28_spill] sm:$0xff] %v29348_v12  ;;  %v4022_v25 = vsub.f32 %v29336_v60, %v29348_v12  ;;  %33791 = vst [vmem:[#allocation36_spill] sm:$0xff] %v29408_v26 }
  0xd8   :  { %3660 = vmatprep.mubr.f32.mxu0 %v33649_v2  ;;  %3426 = vmatmul.mubr.f32.vlgmr.msra.gmra.mxu1 %v29235_v32 }
  0xd9   :  { %3551 = vmatpush1.msra.mxu1 %v3550_v4  ;;  %3663 = vmatmul.mubr.f32.vlgmr.msra.gmra.mxu0 %v29248_v38  ;;  %v29358_v38 = vand.u32 4294901760, %v28821_v0  ;;  %v29384_v31 = vand.u32 4294901760, %v4022_v25 }
  0xda   :  { %3782 = vmatpush1.msra.mxu0 %v3548_v51  ;;  %3700 = vmatprep.subr.mxu1 %v29279_v16  ;;  %v4487_v51 = vsub.f32 %v29390_v56, %v29408_v26 }
  0xdb   :  { %3584 = vmatprep.mubr.f32.mxu1 %v33649_v2  ;;  %3815 = vmatprep.mubr.f32.mxu0 %v33649_v2  ;;  %33784 = vst [vmem:[#allocation29_spill] sm:$0xff] %v29358_v38  ;;  %33788 = vst [vmem:[#allocation33_spill] sm:$0xff] %v29384_v31 }
  0xdc   :  { %3586 = vmatmul.mubr.f32.vlgmr.msra.gmra.mxu1 %v29235_v32  ;;  %3936 = vmatprep.subr.mxu0 %v29309_v8  ;;  %v29444_v43 = vand.u32 4294901760, %v4487_v51  ;;  %v29484_v51 = vsel %vm45_vm4, 1.0, %v33649_v2 }
  0xdd   :  { %3702 = vmatpush1.msra.mxu1 %v29287_v54  ;;  %3817 = vmatmul.mubr.f32.vlgmr.msra.gmra.mxu0 %v29235_v32  ;;  %33794 = vst [vmem:[#allocation39_spill] sm:$0xff] %v29484_v51 }
  0xde   :  { %3854 = vmatprep.subr.mxu1 %v29279_v16  ;;  %3735 = vmatprep.mubr.f32.mxu1 %v33649_v2  ;;  %v29381_v16 = vsub.f32 %v28821_v0, %v29358_v38  ;;  %v4858_v0 = vsel %vm120_vm0, %v4856_v47, 0  ;;  %33793 = vst [vmem:[#allocation38_spill] sm:$0xff] %v29444_v43 }
  0xdf   :  { %3938 = vmatpush1.msra.mxu0 %v29316_v10  ;;  %3971 = vmatprep.mubr.f32.mxu0 %v33649_v2  ;;  %v29410_v58 = vand.u32 4294901760, %v4858_v0 }
  0xe0   :  { %3739 = vmatmul.mubr.f32.vlgmr.msra.gmra.mxu1 %v29262_v50  ;;  %4097 = vmatprep.subr.mxu0 %v29326_v63  ;;  %33787 = vst [vmem:[#allocation32_spill] sm:$0xff] %v29381_v16  ;;  %v4853_v50 = vmul.f32 %v29094_v28, %v4849_v48  ;;  %v4855_v48 = vmul.f32 %v29156_v9, %v4851_v40 }
  0xe1   :  { %3856 = vmatpush1.msra.mxu1 %v29287_v54  ;;  %3977 = vmatmul.mubr.f32.vlgmr.msra.gmra.mxu0 %v3976_v46  ;;  %v29403_v54 = vand.u32 4294901760, %v29381_v16  ;;  %v29428_v45 = vsub.f32 %v4858_v0, %v29410_v58 }
  0xe2   :  { %3889 = vmatprep.mubr.f32.mxu1 %v33649_v2  ;;  %4100 = vmatpush1.msra.mxu0 %v29336_v60  ;;  %v29417_v24 = vand.u32 4294901760, %v4853_v50 }
  0xe3   :  { %4133 = vmatprep.mubr.f32.mxu0 %v33649_v2  ;;  %4018 = vmatprep.subr.mxu1 %v29372_v62  ;;  %33790 = vst [vmem:[#allocation35_spill] sm:$0xff] %v29403_v54  ;;  %v4481_v59 = vsub.f32 %v29381_v16, %v29403_v54  ;;  %v29447_v25 = vand.u32 4294901760, %v29428_v45 }
  0xe4   :  { %3891 = vmatmul.mubr.f32.vlgmr.msra.gmra.mxu1 %v29235_v32  ;;  %4251 = vmatprep.subr.mxu0 %v29340_v37  ;;  %v4852_v32 = vmul.f32 %v29118_v15, %v4850_v3  ;;  %v4969_v1 = vsub.f32 %v4853_v50, %v29417_v24  ;;  %v29472_v3 = vand.u32 4294901760, %v4855_v48 }
  0xe5   :  { %4136 = vmatmul.mubr.f32.vlgmr.msra.gmra.mxu0 %v29319_v39  ;;  %4024 = vmatpush1.msra.mxu1 %v29384_v31  ;;  %v29438_v4 = vand.u32 4294901760, %v4481_v59  ;;  %v4930_v0 = vsub.f32 %v29428_v45, %v29447_v25 }
  0xe6   :  { %4057 = vmatprep.mubr.f32.mxu1 %v33649_v2  ;;  %4255 = vmatpush1.msra.mxu0 %v29348_v12  ;;  %v29432_v17 = vand.u32 4294901760, %v4852_v32  ;;  %v4970_v5 = vand.u32 4294901760, %v4969_v1 }
  0xe7   :  { %4288 = vmatprep.mubr.f32.mxu0 %v33649_v2  ;;  %4173 = vmatprep.subr.mxu1 %v29309_v8  ;;  %33792 = vst [vmem:[#allocation37_spill] sm:$0xff] %v29438_v4  ;;  %v29479_v59 = vand.u32 4294901760, %v4930_v0 }
  0xe8   :  { %4059 = vmatmul.mubr.f32.vlgmr.msra.gmra.mxu1 %v29303_v34  ;;  %4401 = vmatprep.subr.mxu0 %v29358_v38  ;;  %v29452_v47 = vsub.f32 %v4852_v32, %v29432_v17  ;;  %v4971_v32 = vsub.f32 %v4969_v1, %v4970_v5 }
  0xe9   :  { %4290 = vmatmul.mubr.f32.vlgmr.msra.gmra.mxu0 %v29303_v34  ;;  %4175 = vmatpush1.msra.mxu1 %v29316_v10 }
  0xea   :  { %4208 = vmatprep.mubr.f32.mxu1 %v33649_v2  ;;  %4403 = vmatpush1.msra.mxu0 %v29365_v61  ;;  %v4976_v50 = vand.u32 4294901760, %v29452_v47  ;;  %v4972_v0 = vand.u32 4294901760, %v4971_v32 }
  0xeb   :  { %4436 = vmatprep.mubr.f32.mxu0 %v33649_v2  ;;  %4327 = vmatprep.subr.mxu1 %v29309_v8 }
  0xec   :  { %4212 = vmatmul.mubr.f32.vlgmr.msra.gmra.mxu1 %v29332_v36  ;;  %4562 = vmatprep.subr.mxu0 %v29381_v16 }
  0xed   :  { %4442 = vmatmul.mubr.f32.vlgmr.msra.gmra.mxu0 %v3976_v46  ;;  %4329 = vmatpush1.msra.mxu1 %v29316_v10  ;;  %v4848_v46 = vsel %vm4847_vm3, %v4844_v27, %v4846_v14  ;;  %v29489_v14 = vpop.permute.xlu1 %5798 }
  0xee   :  { %4362 = vmatprep.mubr.f32.mxu1 %v33649_v2  ;;  %4565 = vmatpush1.msra.mxu0 %v29390_v56  ;;  %v4854_v27 = vmul.f32 %v29168_v11, %v4848_v46  ;;  %v4977_v46 = vsub.f32 %v29452_v47, %v4976_v50  ;;  %v5817_v56 = vsel %vm120_vm0, %v5815_v19, 0 }
  0xef   :  { %4598 = vmatprep.mubr.f32.mxu0 %v33649_v2  ;;  %4716 = vmatprep.subr.mxu0 %v29403_v54  ;;  %v5434_v54 = vsub.f32 %v4855_v48, %v29472_v3 }
  0xf0   :  { %4364 = vmatmul.mubr.f32.vlgmr.msra.gmra.mxu1 %v29303_v34  ;;  %4483 = vmatprep.subr.mxu1 %v29438_v4  ;;  %v29491_v40 = vand.u32 4294901760, %v4854_v27  ;;  %v4978_v48 = vand.u32 4294901760, %v4977_v46 }
  0xf1   :  { %4601 = vmatmul.mubr.f32.vlgmr.msra.gmra.mxu0 %v29319_v39  ;;  %4489 = vmatpush1.msra.mxu1 %v29444_v43  ;;  %v5797_v39 = vpop.permute.xlu0 %5796  ;;  %v5435_v19 = vand.u32 4294901760, %v5434_v54 }
  0xf2   :  { %4720 = vmatpush1.msra.mxu0 %v29408_v26  ;;  %4522 = vmatprep.mubr.f32.mxu1 %v33649_v2  ;;  %v29502_v26 = vmul.f32 %v28982_v49, %v29484_v51  ;;  %v5440_v13 = vsub.f32 %v4854_v27, %v29491_v40 }
  0xf3   :  { %4753 = vmatprep.mubr.f32.mxu0 %v33649_v2  ;;  %4891 = vmatprep.subr.mxu0 %v29417_v24  ;;  %v5436_v46 = vsub.f32 %v5434_v54, %v5435_v19 }
  0xf4   :  { %4524 = vmatmul.mubr.f32.vlgmr.msra.gmra.mxu1 %v29303_v34  ;;  %4638 = vmatprep.subr.mxu1 %v29358_v38  ;;  %33795 = vst [vmem:[#allocation40_spill] sm:$0xff] %v29502_v26  ;;  %v5441_v27 = vand.u32 4294901760, %v5440_v13 }
  0xf5   :  { %4755 = vmatmul.mubr.f32.vlgmr.msra.gmra.mxu0 %v29303_v34  ;;  %4640 = vmatpush1.msra.mxu1 %v29365_v61  ;;  %v5795_v32 = vpop.permute.xlu0 %5794 }
  0xf6   :  { %4893 = vmatpush1.msra.mxu0 %v29432_v17  ;;  %4673 = vmatprep.mubr.f32.mxu1 %v33649_v2  ;;  %v5442_v21 = vsub.f32 %v5440_v13, %v5441_v27 }
  0xf7   :  { %5052 = vmatprep.subr.mxu0 %v4969_v1  ;;  %4792 = vmatprep.subr.mxu1 %v29358_v38  ;;  %v29507_v1 = vsel %vm44_vm5, 1.0, %v33649_v2 }
  0xf8   :  { %4926 = vmatprep.mubr.f32.mxu0 %v33649_v2  ;;  %4677 = vmatmul.mubr.f32.vlgmr.msra.gmra.mxu1 %v29332_v36  ;;  %33796 = vst [vmem:[#allocation41_spill] sm:$0xff] %v29507_v1  ;;  %v5804_v36 = vsel %vm5802_vm6, %v5797_v39, %v29489_v14  ;;  %v29521_v43 = vmul.f32 %v29002_v57, %v29507_v1 }
  0xf9   :  { %4794 = vmatpush1.msra.mxu1 %v29365_v61  ;;  %4932 = vmatmul.mubr.f32.vlgmr.msra.gmra.mxu0 %v29479_v59  ;;  %v5812_v16 = vmul.f32 %v29502_v26, %v5804_v36 }
  0xfa   :  { %5055 = vmatpush1.msra.mxu0 %v29452_v47  ;;  %4973 = vmatprep.subr.mxu1 %v4972_v0  ;;  %33797 = vst [vmem:[#allocation42_spill] sm:$0xff] %v29521_v43  ;;  %v5805_v47 = vsel %vm5802_vm6, %v5795_v32, %v5797_v39  ;;  %v5801_v0 = vpop.permute.xlu1 %5800 }
  0xfb   :  { %5206 = vmatprep.subr.mxu0 %v4970_v5  ;;  %4827 = vmatprep.mubr.f32.mxu1 %v33649_v2  ;;  %v29529_v5 = vand.u32 4294901760, %v5817_v56  ;;  %v29537_v39 = vand.u32 4294901760, %v5812_v16 }
  0xfc   :  { %5088 = vmatprep.mubr.f32.mxu0 %v33649_v2  ;;  %4829 = vmatmul.mubr.f32.vlgmr.msra.gmra.mxu1 %v29303_v34  ;;  %v5811_v34 = vmul.f32 %v29521_v43, %v5805_v47  ;;  %v5437_v47 = vand.u32 4294901760, %v5436_v46  ;;  %v5443_v46 = vand.u32 4294901760, %v5442_v21 }
  0xfd   :  { %4979 = vmatpush1.msra.mxu1 %v4978_v48  ;;  %5091 = vmatmul.mubr.f32.vlgmr.msra.gmra.mxu0 %v29428_v45  ;;  %v29556_v48 = vsel %vm46_vm9, 1.0, %v33649_v2 }
  0xfe   :  { %5210 = vmatpush1.msra.mxu0 %v4976_v50  ;;  %5128 = vmatprep.subr.mxu1 %v29417_v24  ;;  %v29547_v50 = vsub.f32 %v5817_v56, %v29529_v5  ;;  %v29551_v36 = vand.u32 4294901760, %v5811_v34  ;;  %33799 = vst [vmem:[#allocation44_spill] sm:$0xff] %v29556_v48  ;;  %v29560_v56 = vmul.f32 %v29035_v35, %v29544_v18  ;;  %v29599_v21 = vpop.permute.xlu1 %6757 }
  0xff   :  { %5356 = vmatprep.subr.mxu0 %v29472_v3  ;;  %5012 = vmatprep.mubr.f32.mxu1 %v33649_v2  ;;  %v29574_v4 = vmul.f32 %v29046_v41, %v29556_v48  ;;  %v29744_v31 = vmul.f32 %v29168_v11, %v29556_v48 }
 0x100   :  { %5243 = vmatprep.mubr.f32.mxu0 %v33649_v2  ;;  %5014 = vmatmul.mubr.f32.vlgmr.msra.gmra.mxu1 %v29410_v58  ;;  %33800 = vst [vmem:[#allocation45_spill] sm:$0xff] %v29560_v56  ;;  %v29569_v61 = vand.u32 4294901760, %v29547_v50 }
 0x101   :  { %5130 = vmatpush1.msra.mxu1 %v29432_v17  ;;  %5245 = vmatmul.mubr.f32.vlgmr.msra.gmra.mxu0 %v29410_v58  ;;  %33801 = vst [vmem:[#allocation46_spill] sm:$0xff] %v29574_v4  ;;  %33806 = vst [vmem:[#allocation50_spill] sm:$0xff] %v29744_v31 }
 0x102   :  { %5358 = vmatpush1.msra.mxu0 %v29491_v40  ;;  %5282 = vmatprep.subr.mxu1 %v29417_v24  ;;  %v5928_v24 = vsub.f32 %v5812_v16, %v29537_v39  ;;  %v33802_v16 = vmov 0.0  }
 0x103   :  { %5517 = vmatprep.subr.mxu0 %v5434_v54  ;;  %5163 = vmatprep.mubr.f32.mxu1 %v33649_v2  ;;  %v5806_v54 = vsel %vm5802_vm6, %v5801_v0, %v5795_v32 }
 0x104   :  { %5391 = vmatprep.mubr.f32.mxu0 %v33649_v2  ;;  %5167 = vmatmul.mubr.f32.vlgmr.msra.gmra.mxu1 %v29447_v25  ;;  %v5934_v2 = vsub.f32 %v5811_v34, %v29551_v36  ;;  %v5929_v32 = vand.u32 4294901760, %v5928_v24  ;;  %v6756_v34 = vpop.permute.xlu0 %6755 }
 0x105   :  { %5284 = vmatpush1.msra.mxu1 %v29432_v17  ;;  %5397 = vmatmul.mubr.f32.vlgmr.msra.gmra.mxu0 %v29479_v59  ;;  %v5803_v17 = vsel %vm5802_vm6, %v29489_v14, %v5801_v0  ;;  %v5814_v59 = vmul.f32 %v29560_v56, %v5806_v54 }
 0x106   :  { %5520 = vmatpush1.msra.mxu0 %v5440_v13  ;;  %5438 = vmatprep.subr.mxu1 %v5437_v47  ;;  %v5889_v13 = vsub.f32 %v29547_v50, %v29569_v61  ;;  %v5935_v14 = vand.u32 4294901760, %v5934_v2 }
 0x107   :  { %5671 = vmatprep.subr.mxu0 %v5435_v19  ;;  %5317 = vmatprep.mubr.f32.mxu1 %v33802_v16  ;;  %v5813_v19 = vmul.f32 %v29574_v4, %v5803_v17  ;;  %v29590_v0 = vand.u32 4294901760, %v5814_v59 }
 0x108   :  { %5553 = vmatprep.mubr.f32.mxu0 %v33802_v16  ;;  %5319 = vmatmul.mubr.f32.vlgmr.msra.gmra.mxu1 %v29410_v58  ;;  %v5936_v54 = vsub.f32 %v5934_v2, %v5935_v14 }
 0x109   :  { %5444 = vmatpush1.msra.mxu1 %v5443_v46  ;;  %5556 = vmatmul.mubr.f32.vlgmr.msra.gmra.mxu0 %v29428_v45  ;;  %v5930_v45 = vsub.f32 %v5928_v24, %v5929_v32  ;;  %v29601_v47 = vand.u32 4294901760, %v5813_v19  ;;  %v6770_v46 = vld [vmem:[%s33640_s1 + $0x38] sm:$0xff] }
 0x10a   :  { %5675 = vmatpush1.msra.mxu0 %v5441_v27  ;;  %5593 = vmatprep.subr.mxu1 %v29472_v3  ;;  %v5890_v27 = vand.u32 4294901760, %v5889_v13  ;;  %v6754_v13 = vpop.permute.xlu0 %6753  ;;  %v6772_v38 = vsel %vm120_vm0, %v6770_v46, 0 }
 0x10b   :  { %5477 = vmatprep.mubr.f32.mxu1 %v33802_v16  ;;  %5708 = vmatprep.mubr.f32.mxu0 %v33802_v16  ;;  %v5931_v17 = vand.u32 4294901760, %v5930_v45  ;;  %v6399_v12 = vsub.f32 %v5813_v19, %v29601_v47 }
 0x10c   :  { %5850 = vmatprep.subr.mxu0 %v29537_v39  ;;  %5479 = vmatmul.mubr.f32.vlgmr.msra.gmra.mxu1 %v29410_v58 }
 0x10d   :  { %5595 = vmatpush1.msra.mxu1 %v29491_v40  ;;  %5710 = vmatmul.mubr.f32.vlgmr.msra.gmra.mxu0 %v29410_v58 }
 0x10e   :  { %5852 = vmatpush1.msra.mxu0 %v29551_v36  ;;  %5747 = vmatprep.subr.mxu1 %v29472_v3  ;;  %v6393_v3 = vsub.f32 %v5814_v59, %v29590_v0  ;;  %v6764_v59 = vsel %vm6761_vm10, %v6754_v13, %v6756_v34 }
 0x10f   :  { %6011 = vmatprep.subr.mxu0 %v5928_v24  ;;  %5628 = vmatprep.mubr.f32.mxu1 %v33802_v16  ;;  %v6763_v24 = vsel %vm6761_vm10, %v6756_v34, %v29599_v21 }
 0x110   :  { %5885 = vmatprep.mubr.f32.mxu0 %v33802_v16  ;;  %5632 = vmatmul.mubr.f32.vlgmr.msra.gmra.mxu1 %v29447_v25  ;;  %v5937_v25 = vand.u32 4294901760, %v5936_v54  ;;  %v6394_v45 = vand.u32 4294901760, %v6393_v3  ;;  %v6760_v54 = vpop.permute.xlu1 %6759 }
 0x111   :  { %5749 = vmatpush1.msra.mxu1 %v29491_v40  ;;  %5891 = vmatmul.mubr.f32.vlgmr.msra.gmra.mxu0 %v5890_v27  ;;  %v6767_v40 = vmul.f32 %v29484_v51, %v6763_v24 }
 0x112   :  { %6014 = vmatpush1.msra.mxu0 %v5934_v2  ;;  %5932 = vmatprep.subr.mxu1 %v5931_v17  ;;  %v29623_v2 = vand.u32 4294901760, %v6772_v38  ;;  %v6395_v34 = vsub.f32 %v6393_v3, %v6394_v45 }
 0x113   :  { %6165 = vmatprep.subr.mxu0 %v5929_v32  ;;  %5782 = vmatprep.mubr.f32.mxu1 %v33802_v16  ;;  %v6400_v32 = vand.u32 4294901760, %v6399_v12  ;;  %v29630_v19 = vand.u32 4294901760, %v6767_v40 }
 0x114   :  { %6047 = vmatprep.mubr.f32.mxu0 %v33802_v16  ;;  %5784 = vmatmul.mubr.f32.vlgmr.msra.gmra.mxu1 %v29410_v58  ;;  %v6766_v58 = vmul.f32 %v29507_v1, %v6764_v59  ;;  %v6396_v24 = vand.u32 4294901760, %v6395_v34  ;;  %v29676_v34 = vpop.permute.xlu1 %7712 }
 0x115   :  { %5938 = vmatpush1.msra.mxu1 %v5937_v25  ;;  %6050 = vmatmul.mubr.f32.vlgmr.msra.gmra.mxu0 %v29547_v50  ;;  %v6401_v17 = vsub.f32 %v6399_v12, %v6400_v32  ;;  %v6883_v25 = vsub.f32 %v6767_v40, %v29630_v19  ;;  %v6762_v40 = vsel %vm6761_vm10, %v29599_v21, %v6760_v54 }
 0x116   :  { %6169 = vmatpush1.msra.mxu0 %v5935_v14  ;;  %6087 = vmatprep.subr.mxu1 %v29537_v39  ;;  %v29636_v14 = vsub.f32 %v6772_v38, %v29623_v2  ;;  %v29640_v46 = vand.u32 4294901760, %v6766_v58  ;;  %v6765_v38 = vsel %vm6761_vm10, %v6760_v54, %v6754_v13 }
 0x117   :  { %6315 = vmatprep.subr.mxu0 %v29590_v0  ;;  %5971 = vmatprep.mubr.f32.mxu1 %v33802_v16  ;;  %v6402_v59 = vand.u32 4294901760, %v6401_v17  ;;  %v6769_v13 = vmul.f32 %v29544_v18, %v6765_v38 }
 0x118   :  { %6202 = vmatprep.mubr.f32.mxu0 %v33802_v16  ;;  %5973 = vmatmul.mubr.f32.vlgmr.msra.gmra.mxu1 %v29529_v5 }
 0x119   :  { %6089 = vmatpush1.msra.mxu1 %v29551_v36  ;;  %6204 = vmatmul.mubr.f32.vlgmr.msra.gmra.mxu0 %v29529_v5 }
 0x11a   :  { %6317 = vmatpush1.msra.mxu0 %v29601_v47  ;;  %6241 = vmatprep.subr.mxu1 %v29537_v39  ;;  %v29650_v39 = vand.u32 4294901760, %v29636_v14 }
 0x11b   :  { %6476 = vmatprep.subr.mxu0 %v6393_v3  ;;  %6122 = vmatprep.mubr.f32.mxu1 %v33802_v16  ;;  %v6889_v3 = vsub.f32 %v6766_v58, %v29640_v46  ;;  %v29667_v58 = vand.u32 4294901760, %v6769_v13 }
 0x11c   :  { %6350 = vmatprep.mubr.f32.mxu0 %v33802_v16  ;;  %6126 = vmatmul.mubr.f32.vlgmr.msra.gmra.mxu1 %v29569_v61 }
 0x11d   :  { %6243 = vmatpush1.msra.mxu1 %v29551_v36  ;;  %6356 = vmatmul.mubr.f32.vlgmr.msra.gmra.mxu0 %v5890_v27  ;;  %v6884_v36 = vand.u32 4294901760, %v6883_v25  ;;  %v6768_v27 = vmul.f32 %v29556_v48, %v6762_v40  ;;  %v6890_v21 = vand.u32 4294901760, %v6889_v3 }
 0x11e   :  { %6479 = vmatpush1.msra.mxu0 %v6399_v12  ;;  %6397 = vmatprep.subr.mxu1 %v6396_v24  ;;  %v6844_v12 = vsub.f32 %v29636_v14, %v29650_v39  ;;  %v7729_v24 = vld [vmem:[%s33640_s1 + $0x40] sm:$0xff] }
 0x11f   :  { %6630 = vmatprep.subr.mxu0 %v6394_v45  ;;  %6276 = vmatprep.mubr.f32.mxu1 %v33802_v16  ;;  %v7711_v45 = vpop.permute.xlu0 %7710  ;;  %v29678_v54 = vand.u32 4294901760, %v6768_v27  ;;  %v6891_v17 = vsub.f32 %v6889_v3, %v6890_v21 }
 0x120   :  { %6512 = vmatprep.mubr.f32.mxu0 %v33802_v16  ;;  %6278 = vmatmul.mubr.f32.vlgmr.msra.gmra.mxu1 %v29529_v5 }
 0x121   :  { %6403 = vmatpush1.msra.mxu1 %v6402_v59  ;;  %6515 = vmatmul.mubr.f32.vlgmr.msra.gmra.mxu0 %v29547_v50  ;;  %v6885_v50 = vsub.f32 %v6883_v25, %v6884_v36  ;;  %v7348_v59 = vsub.f32 %v6769_v13, %v29667_v58  ;;  %v29700_v13 = vmul.f32 %v29118_v15, %v29507_v1 }
 0x122   :  { %6634 = vmatpush1.msra.mxu0 %v6400_v32  ;;  %6552 = vmatprep.subr.mxu1 %v29590_v0  ;;  %v6845_v32 = vand.u32 4294901760, %v6844_v12  ;;  %v7731_v12 = vsel %vm120_vm0, %v7729_v24, 0 }
 0x123   :  { %6436 = vmatprep.mubr.f32.mxu1 %v33802_v16  ;;  %6667 = vmatprep.mubr.f32.mxu0 %v33802_v16  ;;  %v6886_v38 = vand.u32 4294901760, %v6885_v50  ;;  %v7709_v40 = vpop.permute.xlu0 %7708  ;;  %v6892_v50 = vand.u32 4294901760, %v6891_v17  ;;  %33804 = vst [vmem:[#allocation48_spill] sm:$0xff] %v29700_v13  ;;  %v7349_v24 = vand.u32 4294901760, %v7348_v59 }
 0x124   :  { %6805 = vmatprep.subr.mxu0 %v29630_v19  ;;  %6438 = vmatmul.mubr.f32.vlgmr.msra.gmra.mxu1 %v29529_v5 }
 0x125   :  { %6554 = vmatpush1.msra.mxu1 %v29601_v47  ;;  %6669 = vmatmul.mubr.f32.vlgmr.msra.gmra.mxu0 %v29529_v5 }
 0x126   :  { %6807 = vmatpush1.msra.mxu0 %v29640_v46  ;;  %6706 = vmatprep.subr.mxu1 %v29590_v0  ;;  %v29688_v0 = vmul.f32 %v29094_v28, %v29484_v51 }
 0x127   :  { %6966 = vmatprep.subr.mxu0 %v6883_v25  ;;  %6587 = vmatprep.mubr.f32.mxu1 %v33802_v16  ;;  %v7718_v25 = vsel %vm7716_vm11, %v7711_v45, %v29676_v34 }
 0x128   :  { %6840 = vmatprep.mubr.f32.mxu0 %v33802_v16  ;;  %6591 = vmatmul.mubr.f32.vlgmr.msra.gmra.mxu1 %v29569_v61  ;;  %33803 = vst [vmem:[#allocation47_spill] sm:$0xff] %v29688_v0  ;;  %v7354_v61 = vsub.f32 %v6768_v27, %v29678_v54 }
 0x129   :  { %6708 = vmatpush1.msra.mxu1 %v29601_v47  ;;  %6846 = vmatmul.mubr.f32.vlgmr.msra.gmra.mxu0 %v6845_v32  ;;  %v7726_v47 = vmul.f32 %v29688_v0, %v7718_v25 }
 0x12a   :  { %6969 = vmatpush1.msra.mxu0 %v6889_v3  ;;  %6887 = vmatprep.subr.mxu1 %v6886_v38  ;;  %v7719_v3 = vsel %vm7716_vm11, %v7709_v40, %v7711_v45  ;;  %v7355_v27 = vand.u32 4294901760, %v7354_v61  ;;  %v7350_v45 = vsub.f32 %v7348_v59, %v7349_v24  ;;  %v7715_v38 = vpop.permute.xlu1 %7714 }
 0x12b   :  { %7120 = vmatprep.subr.mxu0 %v6884_v36  ;;  %6741 = vmatprep.mubr.f32.mxu1 %v33802_v16  ;;  %v29708_v36 = vand.u32 4294901760, %v7731_v12  ;;  %v29715_v17 = vand.u32 4294901760, %v7726_v47 }
 0x12c   :  { %7002 = vmatprep.mubr.f32.mxu0 %v33802_v16  ;;  %6743 = vmatmul.mubr.f32.vlgmr.msra.gmra.mxu1 %v29529_v5  ;;  %v7725_v5 = vmul.f32 %v29700_v13, %v7719_v3  ;;  %v29731_v3 = vmul.f32 %v29156_v9, %v29544_v18 }
 0x12d   :  { %6893 = vmatpush1.msra.mxu1 %v6892_v50  ;;  %7005 = vmatmul.mubr.f32.vlgmr.msra.gmra.mxu0 %v29636_v14  ;;  %v7356_v50 = vsub.f32 %v7354_v61, %v7355_v27  ;;  %v7842_v37 = vsub.f32 %v7726_v47, %v29715_v17 }
 0x12e   :  { %7124 = vmatpush1.msra.mxu0 %v6890_v21  ;;  %7042 = vmatprep.subr.mxu1 %v29630_v19  ;;  %v29721_v21 = vsub.f32 %v7731_v12, %v29708_v36  ;;  %v29725_v25 = vand.u32 4294901760, %v7725_v5  ;;  %33805 = vst [vmem:[#allocation49_spill] sm:$0xff] %v29731_v3  ;;  %v7351_v12 = vand.u32 4294901760, %v7350_v45 }
 0x12f   :  { %7270 = vmatprep.subr.mxu0 %v29667_v58  ;;  %6926 = vmatprep.mubr.f32.mxu1 %v33802_v16  ;;  %v7357_v47 = vand.u32 4294901760, %v7356_v50 }
 0x130   :  { %7157 = vmatprep.mubr.f32.mxu0 %v33802_v16  ;;  %6928 = vmatmul.mubr.f32.vlgmr.msra.gmra.mxu1 %v29623_v2  ;;  %v7848_v60 = vsub.f32 %v7725_v5, %v29725_v25 }
 0x131   :  { %7044 = vmatpush1.msra.mxu1 %v29640_v46  ;;  %7159 = vmatmul.mubr.f32.vlgmr.msra.gmra.mxu0 %v29623_v2 }
 0x132   :  { %7272 = vmatpush1.msra.mxu0 %v29678_v54  ;;  %7196 = vmatprep.subr.mxu1 %v29630_v19  ;;  %v7720_v19 = vsel %vm7716_vm11, %v7715_v38, %v7709_v40  ;;  %v7843_v40 = vand.u32 4294901760, %v7842_v37 }
 0x133   :  { %7431 = vmatprep.subr.mxu0 %v7348_v59  ;;  %7077 = vmatprep.mubr.f32.mxu1 %v33802_v16  ;;  %v29739_v59 = vand.u32 4294901760, %v29721_v21 }
 0x134   :  { %7305 = vmatprep.mubr.f32.mxu0 %v33802_v16  ;;  %7081 = vmatmul.mubr.f32.vlgmr.msra.gmra.mxu1 %v29650_v39 }
 0x135   :  { %7198 = vmatpush1.msra.mxu1 %v29640_v46  ;;  %7311 = vmatmul.mubr.f32.vlgmr.msra.gmra.mxu0 %v6845_v32  ;;  %v7717_v46 = vsel %vm7716_vm11, %v29676_v34, %v7715_v38  ;;  %v7728_v32 = vmul.f32 %v29731_v3, %v7720_v19  ;;  %v7849_v34 = vand.u32 4294901760, %v7848_v60 }
 0x136   :  { %7434 = vmatpush1.msra.mxu0 %v7354_v61  ;;  %7352 = vmatprep.subr.mxu1 %v7351_v12  ;;  %v7803_v61 = vsub.f32 %v29721_v21, %v29739_v59 }
 0x137   :  { %7585 = vmatprep.subr.mxu0 %v7349_v24  ;;  %7231 = vmatprep.mubr.f32.mxu1 %v33802_v16  ;;  %v7727_v24 = vmul.f32 %v29744_v31, %v7717_v46  ;;  %v29760_v5 = vand.u32 4294901760, %v7728_v32  ;;  %v7850_v38 = vsub.f32 %v7848_v60, %v7849_v34 }
 0x138   :  { %7467 = vmatprep.mubr.f32.mxu0 %v33802_v16  ;;  %7233 = vmatmul.mubr.f32.vlgmr.msra.gmra.mxu1 %v29623_v2 }
 0x139   :  { %7358 = vmatpush1.msra.mxu1 %v7357_v47  ;;  %7470 = vmatmul.mubr.f32.vlgmr.msra.gmra.mxu0 %v29636_v14  ;;  %v7844_v14 = vsub.f32 %v7842_v37, %v7843_v40  ;;  %v29768_v45 = vand.u32 4294901760, %v7727_v24  ;;  %v8307_v19 = vsub.f32 %v7728_v32, %v29760_v5  ;;  %v7851_v47 = vand.u32 4294901760, %v7850_v38 }
 0x13a   :  { %7589 = vmatpush1.msra.mxu0 %v7355_v27  ;;  %7507 = vmatprep.subr.mxu1 %v29667_v58  ;;  %v7804_v27 = vand.u32 4294901760, %v7803_v61 }
 0x13b   :  { %7391 = vmatprep.mubr.f32.mxu1 %v33802_v16  ;;  %7622 = vmatprep.mubr.f32.mxu0 %v33802_v16  ;;  %v7845_v12 = vand.u32 4294901760, %v7844_v14 }
 0x13c   :  { %7764 = vmatprep.subr.mxu0 %v29715_v17  ;;  %7393 = vmatmul.mubr.f32.vlgmr.msra.gmra.mxu1 %v29623_v2 }
 0x13d   :  { %7509 = vmatpush1.msra.mxu1 %v29678_v54  ;;  %7624 = vmatmul.mubr.f32.vlgmr.msra.gmra.mxu0 %v29623_v2 }
 0x13e   :  { %7766 = vmatpush1.msra.mxu0 %v29725_v25  ;;  %7661 = vmatprep.subr.mxu1 %v29667_v58 }
 0x13f   :  { %7925 = vmatprep.subr.mxu0 %v7842_v37  ;;  %7542 = vmatprep.mubr.f32.mxu1 %v33802_v16  ;;  %v8313_v37 = vsub.f32 %v7727_v24, %v29768_v45 }
 0x140   :  { %7799 = vmatprep.mubr.f32.mxu0 %v33802_v16  ;;  %v197_v50 = vpop.f32.mrf.mxu0  ;;  %7546 = vmatmul.mubr.f32.vlgmr.msra.gmra.mxu1 %v29650_v39  ;;  %v8308_v39 = vand.u32 4294901760, %v8307_v19 }
 0x141   :  { %7663 = vmatpush1.msra.mxu1 %v29678_v54  ;;  %7805 = vmatmul.mubr.f32.vlgmr.msra.gmra.mxu0 %v7804_v27  ;;  %v8314_v54 = vand.u32 4294901760, %v8313_v37 }
 0x142   :  { %7928 = vmatpush1.msra.mxu0 %v7848_v60  ;;  %7846 = vmatprep.subr.mxu1 %v7845_v12  ;;  %v29775_v58 = vpop.f32.mrf.mxu0 }
 0x143   :  { %8079 = vmatprep.subr.mxu0 %v7843_v40  ;;  %7696 = vmatprep.mubr.f32.mxu1 %v33802_v16  ;;  %v8315_v38 = vsub.f32 %v8313_v37, %v8314_v54 }
 0x144   :  { %7961 = vmatprep.mubr.f32.mxu0 %v33802_v16  ;;  %v356_v46 = vpop.f32.mrf.mxu0  ;;  %7698 = vmatmul.mubr.f32.vlgmr.msra.gmra.mxu1 %v29623_v2  ;;  %v8309_v2 = vsub.f32 %v8307_v19, %v8308_v39 }
 0x145   :  { %7852 = vmatpush1.msra.mxu1 %v7851_v47  ;;  %7964 = vmatmul.mubr.f32.vlgmr.msra.gmra.mxu0 %v29721_v21 }
 0x146   :  { %8083 = vmatpush1.msra.mxu0 %v7849_v34  ;;  %8001 = vmatprep.subr.mxu1 %v29715_v17  ;;  %v29783_v60 = vpop.f32.mrf.mxu0  ;;  %v8310_v12 = vand.u32 4294901760, %v8309_v2 }
 0x147   :  { %8229 = vmatprep.subr.mxu0 %v29760_v5  ;;  %7885 = vmatprep.mubr.f32.mxu1 %v33802_v16 }
 0x148   :  { %8116 = vmatprep.mubr.f32.mxu0 %v33802_v16  ;;  %v279_v32 = vpop.f32.mrf.mxu1  ;;  %7887 = vmatmul.mubr.f32.vlgmr.msra.gmra.mxu1 %v29708_v36 }
 0x149   :  { %v280_v40 = vadd.f32 %v279_v32, %v197_v50  ;;  %v510_v61 = vpop.f32.mrf.mxu0  ;;  %8003 = vmatpush1.msra.mxu1 %v29725_v25  ;;  %8118 = vmatmul.mubr.f32.vlgmr.msra.gmra.mxu0 %v29708_v36 }
 0x14a   :  { %8231 = vmatpush1.msra.mxu0 %v29768_v45  ;;  %8155 = vmatprep.subr.mxu1 %v29715_v17  ;;  %v29793_v24 = vpop.f32.mrf.mxu1 }
 0x14b   :  { %8390 = vmatprep.subr.mxu0 %v8307_v19  ;;  %v29795_v34 = vpop.f32.mrf.mxu0  ;;  %8036 = vmatprep.mubr.f32.mxu1 %v33802_v16  ;;  %v357_v14 = vadd.f32 %v356_v46, %v280_v40  ;;  %v8316_v40 = vand.u32 4294901760, %v8315_v38 }
 0x14c   :  { %8264 = vmatprep.mubr.f32.mxu0 %v33802_v16  ;;  %v432_v50 = vpop.f32.mrf.mxu1  ;;  %8040 = vmatmul.mubr.f32.vlgmr.msra.gmra.mxu1 %v29739_v59 }
 0x14d   :  { %v433_v47 = vadd.f32 %v432_v50, %v357_v14  ;;  %v662_v32 = vpop.f32.mrf.mxu0  ;;  %8157 = vmatpush1.msra.mxu1 %v29725_v25  ;;  %8270 = vmatmul.mubr.f32.vlgmr.msra.gmra.mxu0 %v7804_v27 }
 0x14e   :  { %8393 = vmatpush1.msra.mxu0 %v8313_v37  ;;  %8311 = vmatprep.subr.mxu1 %v8310_v12  ;;  %v29801_v17 = vpop.f32.mrf.mxu1 }
 0x14f   :  { %8544 = vmatprep.subr.mxu0 %v8308_v39  ;;  %v29803_v19 = vpop.f32.mrf.mxu0  ;;  %8190 = vmatprep.mubr.f32.mxu1 %v33802_v16  ;;  %v511_v46 = vadd.f32 %v510_v61, %v433_v47 }
 0x150   :  { %8426 = vmatprep.mubr.f32.mxu0 %v33802_v16  ;;  %v584_v63 = vpop.f32.mrf.mxu1  ;;  %8192 = vmatmul.mubr.f32.vlgmr.msra.gmra.mxu1 %v29708_v36 }
 0x151   :  { %v585_v2 = vadd.f32 %v584_v63, %v511_v46  ;;  %v821_v14 = vpop.f32.mrf.mxu0  ;;  %8317 = vmatpush1.msra.mxu1 %v8316_v40  ;;  %8429 = vmatmul.mubr.f32.vlgmr.msra.gmra.mxu0 %v29721_v21 }
 0x152   :  { %8548 = vmatpush1.msra.mxu0 %v8314_v54  ;;  %8466 = vmatprep.subr.mxu1 %v29760_v5  ;;  %v29810_v25 = vpop.f32.mrf.mxu1 }
 0x153   :  { %v29812_v27 = vpop.f32.mrf.mxu0  ;;  %8350 = vmatprep.mubr.f32.mxu1 %v33802_v16  ;;  %8581 = vmatprep.mubr.f32.mxu0 %v33802_v16 }
 0x154   :  { %v744_v37 = vpop.f32.mrf.mxu1  ;;  %8352 = vmatmul.mubr.f32.vlgmr.msra.gmra.mxu1 %v29708_v36 }
 0x155   :  { %v745_v39 = vadd.f32 %v744_v37, %v662_v32  ;;  %v975_v63 = vpop.f32.mrf.mxu0  ;;  %8468 = vmatpush1.msra.mxu1 %v29768_v45  ;;  %8501 = vmatprep.mubr.f32.mxu1 %v33802_v16 }
 0x156   :  { %8620 = vmatprep.subr.mxu1 %v29760_v5  ;;  %v29820_v21 = vpop.f32.mrf.mxu1  ;;  %8583 = vmatmul.mubr.f32.vlgmr.msra.gmra.mxu0 %v29708_v36 }
 0x157   :  { %v29823_v54 = vpop.f32.mrf.mxu0  ;;  %v822_v61 = vadd.f32 %v821_v14, %v745_v39  ;;  %8817 = vmatprep.mubr.f32.mxu0 %v33802_v16 }
 0x158   :  { %v897_v38 = vpop.f32.mrf.mxu1  ;;  %8505 = vmatmul.mubr.f32.vlgmr.msra.gmra.mxu1 %v29739_v59 }
 0x159   :  { %v898_v50 = vadd.f32 %v897_v38, %v822_v61  ;;  %v1130_v12 = vpop.f32.mrf.mxu0  ;;  %8622 = vmatpush1.msra.mxu1 %v29768_v45  ;;  %8655 = vmatprep.mubr.f32.mxu1 %v33802_v16 }
 0x15a   :  { %v1131_v47 = vadd.f32 %v1130_v12, %v585_v2  ;;  %v29829_v5 = vpop.f32.mrf.mxu1 }
 0x15b   :  { %v29831_v32 = vpop.f32.mrf.mxu0  ;;  %v976_v46 = vadd.f32 %v975_v63, %v898_v50 }
 0x15c   :  { %v1049_v40 = vpop.f32.mrf.mxu1  ;;  %8657 = vmatmul.mubr.f32.vlgmr.msra.gmra.mxu1 %v29708_v36 }
 0x15d   :  { %v1050_v14 = vadd.f32 %v1049_v40, %v976_v46  ;;  %v1289_v37 = vpop.f32.mrf.mxu0  ;;  %8903 = vmatprep.mubr.f32.mxu1 %v33802_v16 }
 0x15e   :  { %v29835_v59 = vpop.f32.mrf.mxu1 }
 0x15f   :  { %v29837_v39 = vpop.f32.mrf.mxu0 }
 0x160   :  { %v1212_v45 = vpop.f32.mrf.mxu1 }
 0x161   :  { %v1213_v61 = vadd.f32 %v1212_v45, %v1131_v47  ;;  %v1443_v38 = vpop.f32.mrf.mxu0 }
 0x162   :  { %v29839_v2 = vpop.f32.mrf.mxu1 }
 0x163   :  { %v29841_v12 = vpop.f32.mrf.mxu0  ;;  %v1290_v62 = vadd.f32 %v1289_v37, %v1213_v61 }
 0x164   :  { %v1365_v63 = vpop.f32.mrf.mxu1 }
 0x165   :  { %v1366_v50 = vadd.f32 %v1365_v63, %v1290_v62  ;;  %v1595_v10 = vpop.f32.mrf.mxu0 }
 0x166   :  { %v1596_v36 = vadd.f32 %v1595_v10, %v1050_v14  ;;  %v29843_v46 = vpop.f32.mrf.mxu1 }
 0x167   :  { %v29845_v40 = vpop.f32.mrf.mxu0  ;;  %v1444_v8 = vadd.f32 %v1443_v38, %v1366_v50 }
 0x168   :  { %v1517_v31 = vpop.f32.mrf.mxu1 }
 0x169   :  { %v1518_v3 = vadd.f32 %v1517_v31, %v1444_v8  ;;  %v1754_v13 = vpop.f32.mrf.mxu0 }
 0x16a   :  { %v29847_v0 = vpop.f32.mrf.mxu1 }
 0x16b   :  { %33807 = vst [vmem:[#allocation51_spill] sm:$0xff] %v29847_v0  ;;  %v29849_v47 = vpop.f32.mrf.mxu0 }
 0x16c   :  { %v1677_v45 = vpop.f32.mrf.mxu1 }
 0x16d   :  { %v1678_v48 = vadd.f32 %v1677_v45, %v1596_v36  ;;  %v1908_v18 = vpop.f32.mrf.mxu0 }
 0x16e   :  { %v29851_v37 = vpop.f32.mrf.mxu1 }
 0x16f   :  { %v1755_v62 = vadd.f32 %v1754_v13, %v1678_v48  ;;  %v29853_v61 = vpop.f32.mrf.mxu0 }
 0x170   :  { %v1830_v10 = vpop.f32.mrf.mxu1 }
 0x171   :  { %v1831_v14 = vadd.f32 %v1830_v10, %v1755_v62  ;;  %v2085_v63 = vpop.f32.mrf.mxu0 }
 0x172   :  { %v29855_v1 = vpop.f32.mrf.mxu1 }
 0x173   :  { %v1909_v38 = vadd.f32 %v1908_v18, %v1831_v14  ;;  %v29857_v8 = vpop.f32.mrf.mxu0 }
 0x174   :  { %v1982_v31 = vpop.f32.mrf.mxu1 }
 0x175   :  { %v1983_v50 = vadd.f32 %v1982_v31, %v1909_v38  ;;  %v2244_v51 = vpop.f32.mrf.mxu0 }
 0x176   :  { %v29859_v4 = vpop.f32.mrf.mxu1 }
 0x177   :  { %33808 = vst [vmem:[#allocation52_spill] sm:$0xff] %v29859_v4  ;;  %v29861_v36 = vpop.f32.mrf.mxu0 }
 0x178   :  { %v2167_v45 = vpop.f32.mrf.mxu1 }
 0x179   :  { %v2168_v56 = vadd.f32 %v2167_v45, %v2085_v63  ;;  %v2398_v48 = vpop.f32.mrf.mxu0 }
 0x17a   :  { %v29863_v13 = vpop.f32.mrf.mxu1 }
 0x17b   :  { %v2245_v43 = vadd.f32 %v2244_v51, %v2168_v56  ;;  %v29865_v62 = vpop.f32.mrf.mxu0 }
 0x17c   :  { %v2320_v10 = vpop.f32.mrf.mxu1 }
 0x17d   :  { %v2321_v26 = vadd.f32 %v2320_v10, %v2245_v43  ;;  %v2550_v18 = vpop.f32.mrf.mxu0 }
 0x17e   :  { %v29867_v14 = vpop.f32.mrf.mxu1 }
 0x17f   :  { %v2399_v11 = vadd.f32 %v2398_v48, %v2321_v26  ;;  %v29869_v38 = vpop.f32.mrf.mxu0 }
 0x180   :  { %v2472_v31 = vpop.f32.mrf.mxu1 }
 0x181   :  { %v2473_v9 = vadd.f32 %v2472_v31, %v2399_v11  ;;  %v2709_v15 = vpop.f32.mrf.mxu0 }
 0x182   :  { %v29871_v28 = vpop.f32.mrf.mxu1 }
 0x183   :  { %v2942_v63 = vadd.f32 %v2473_v9, %v1518_v3  ;;  %v29873_v45 = vpop.f32.mrf.mxu0 }
 0x184   :  { %v2632_v41 = vpop.f32.mrf.mxu1 }
 0x185   :  { %v2633_v51 = vadd.f32 %v2632_v41, %v2550_v18  ;;  %v2863_v56 = vpop.f32.mrf.mxu0 }
 0x186   :  { %v29875_v35 = vpop.f32.mrf.mxu1 }
 0x187   :  { %v2710_v43 = vadd.f32 %v2709_v15, %v2633_v51  ;;  %v29877_v10 = vpop.f32.mrf.mxu0 }
 0x188   :  { %v2785_v57 = vpop.f32.mrf.mxu1 }
 0x189   :  { %v2786_v26 = vadd.f32 %v2785_v57, %v2710_v43  ;;  %v3040_v48 = vpop.f32.mrf.mxu0 }
 0x18a   :  { %v29879_v49 = vpop.f32.mrf.mxu1 }
 0x18b   :  { %v2864_v11 = vadd.f32 %v2863_v56, %v2786_v26  ;;  %v29881_v31 = vpop.f32.mrf.mxu0 }
 0x18c   :  { %v2937_v20 = vpop.f32.mrf.mxu1 }
 0x18d   :  { %v2938_v9 = vadd.f32 %v2937_v20, %v2864_v11  ;;  %v3199_v3 = vpop.f32.mrf.mxu0 }
 0x18e   :  { %v29883_v23 = vpop.f32.mrf.mxu1 }
 0x18f   :  { %33809 = vst [vmem:[#allocation53_spill] sm:$0xff] %v29883_v23  ;;  %v2944_v41 = vadd.f32 %v2938_v9, %v1983_v50  ;;  %v29885_v18 = vpop.f32.mrf.mxu0 }
 0x190   :  { %v3122_v52 = vpop.f32.mrf.mxu1 }
 0x191   :  { %v3123_v15 = vadd.f32 %v3122_v52, %v3040_v48  ;;  %v3353_v51 = vpop.f32.mrf.mxu0 }
 0x192   :  { %v29887_v44 = vpop.f32.mrf.mxu1 }
 0x193   :  { %v3200_v57 = vadd.f32 %v3199_v3, %v3123_v15  ;;  %v29889_v43 = vpop.f32.mrf.mxu0 }
 0x194   :  { %v3275_v53 = vpop.f32.mrf.mxu1 }
 0x195   :  { %v3276_v56 = vadd.f32 %v3275_v53, %v3200_v57  ;;  %v3505_v26 = vpop.f32.mrf.mxu0 }
 0x196   :  { %v29891_v42 = vpop.f32.mrf.mxu1 }
 0x197   :  { %v3354_v20 = vadd.f32 %v3353_v51, %v3276_v56  ;;  %v29893_v11 = vpop.f32.mrf.mxu0 }
 0x198   :  { %v3427_v55 = vpop.f32.mrf.mxu1 }
 0x199   :  { %v3428_v50 = vadd.f32 %v3427_v55, %v3354_v20  ;;  %v3664_v9 = vpop.f32.mrf.mxu0 }
 0x19a   :  { %v29895_v7 = vpop.f32.mrf.mxu1 }
 0x19b   :  { %33810 = vst [vmem:[#allocation54_spill] sm:$0xff] %v29895_v7  ;;  %v3897_v52 = vadd.f32 %v3428_v50, %v2942_v63  ;;  %v29897_v48 = vpop.f32.mrf.mxu0 }
 0x19c   :  { %33811 = vst [vmem:[#allocation55_spill] sm:$0xff] %v29897_v48  ;;  %v3587_v16 = vpop.f32.mrf.mxu1 }
 0x19d   :  { %v3588_v3 = vadd.f32 %v3587_v16, %v3505_v26  ;;  %v3818_v15 = vpop.f32.mrf.mxu0 }
 0x19e   :  { %v29899_v29 = vpop.f32.mrf.mxu1 }
 0x19f   :  { %v3665_v53 = vadd.f32 %v3664_v9, %v3588_v3  ;;  %v29901_v57 = vpop.f32.mrf.mxu0 }
 0x1a0   :  { %33812 = vst [vmem:[#allocation56_spill] sm:$0xff] %v29901_v57  ;;  %v3740_v33 = vpop.f32.mrf.mxu1 }
 0x1a1   :  { %v3741_v51 = vadd.f32 %v3740_v33, %v3665_v53  ;;  %v3978_v56 = vpop.f32.mrf.mxu0 }
 0x1a2   :  { %v29903_v22 = vpop.f32.mrf.mxu1 }
 0x1a3   :  { %33813 = vst [vmem:[#allocation57_spill] sm:$0xff] %v29903_v22  ;;  %v3819_v55 = vadd.f32 %v3818_v15, %v3741_v51  ;;  %v29905_v20 = vpop.f32.mrf.mxu0 }
 0x1a4   :  { %v3892_v30 = vpop.f32.mrf.mxu1 }
 0x1a5   :  { %v3893_v63 = vadd.f32 %v3892_v30, %v3819_v55  ;;  %v4137_v50 = vpop.f32.mrf.mxu0 }
 0x1a6   :  { %v29907_v6 = vpop.f32.mrf.mxu1 }
 0x1a7   :  { %33814 = vst [vmem:[#allocation58_spill] sm:$0xff] %v29907_v6  ;;  %v3899_v16 = vadd.f32 %v3893_v63, %v2944_v41  ;;  %v29909_v26 = vpop.f32.mrf.mxu0 }
 0x1a8   :  { %33815 = vst [vmem:[#allocation59_spill] sm:$0xff] %v29909_v26  ;;  %v4060_v4 = vpop.f32.mrf.mxu1 }
 0x1a9   :  { %v4061_v9 = vadd.f32 %v4060_v4, %v3978_v56  ;;  %v4291_v3 = vpop.f32.mrf.mxu0 }
 0x1aa   :  { %v29911_v57 = vpop.f32.mrf.mxu1 }
 0x1ab   :  { %v4138_v33 = vadd.f32 %v4137_v50, %v4061_v9  ;;  %v29913_v53 = vpop.f32.mrf.mxu0 }
 0x1ac   :  { %33816 = vst [vmem:[#allocation60_spill] sm:$0xff] %v29913_v53  ;;  %v4213_v22 = vpop.f32.mrf.mxu1 }
 0x1ad   :  { %v4214_v15 = vadd.f32 %v4213_v22, %v4138_v33  ;;  %v4443_v51 = vpop.f32.mrf.mxu0 }
 0x1ae   :  { %v29915_v48 = vpop.f32.mrf.mxu1 }
 0x1af   :  { %33817 = vst [vmem:[#allocation61_spill] sm:$0xff] %v29915_v48  ;;  %v4292_v30 = vadd.f32 %v4291_v3, %v4214_v15  ;;  %v29917_v55 = vpop.f32.mrf.mxu0 }
 0x1b0   :  { %33818 = vst [vmem:[#allocation62_spill] sm:$0xff] %v29917_v55  ;;  %v4365_v6 = vpop.f32.mrf.mxu1 }
 0x1b1   :  { %v4366_v41 = vadd.f32 %v4365_v6, %v4292_v30  ;;  %v4602_v63 = vpop.f32.mrf.mxu0 }
 0x1b2   :  { %v29919_v7 = vpop.f32.mrf.mxu1 }
 0x1b3   :  { %33819 = vst [vmem:[#allocation63_spill] sm:$0xff] %v29919_v7  ;;  %v4835_v4 = vadd.f32 %v4366_v41, %v3897_v52  ;;  %v29921_v56 = vpop.f32.mrf.mxu0 }
 0x1b4   :  { %33820 = vst [vmem:[#allocation64_spill] sm:$0xff] %v29921_v56  ;;  %v4525_v23 = vpop.f32.mrf.mxu1 }
 0x1b5   :  { %v4526_v50 = vadd.f32 %v4525_v23, %v4443_v51  ;;  %v4756_v9 = vpop.f32.mrf.mxu0 }
 0x1b6   :  { %v29923_v53 = vpop.f32.mrf.mxu1 }
 0x1b7   :  { %33821 = vst [vmem:[#allocation65_spill] sm:$0xff] %v29923_v53  ;;  %v4603_v22 = vadd.f32 %v4602_v63, %v4526_v50  ;;  %v29925_v33 = vpop.f32.mrf.mxu0 }
 0x1b8   :  { %33822 = vst [vmem:[#allocation66_spill] sm:$0xff] %v29925_v33  ;;  %v4678_v48 = vpop.f32.mrf.mxu1 }
 0x1b9   :  { %v4679_v3 = vadd.f32 %v4678_v48, %v4603_v22  ;;  %v4933_v15 = vpop.f32.mrf.mxu0 }
 0x1ba   :  { %v29927_v55 = vpop.f32.mrf.mxu1 }
 0x1bb   :  { %33823 = vst [vmem:[#allocation67_spill] sm:$0xff] %v29927_v55  ;;  %v4757_v6 = vadd.f32 %v4756_v9, %v4679_v3  ;;  %v29929_v30 = vpop.f32.mrf.mxu0 }
 0x1bc   :  { %v4830_v7 = vpop.f32.mrf.mxu1 }
 0x1bd   :  { %v4831_v52 = vadd.f32 %v4830_v7, %v4757_v6  ;;  %v5092_v41 = vpop.f32.mrf.mxu0 }
 0x1be   :  { %v29931_v56 = vpop.f32.mrf.mxu1 }
 0x1bf   :  { %33824 = vst [vmem:[#allocation68_spill] sm:$0xff] %v29931_v56  ;;  %v4837_v23 = vadd.f32 %v4831_v52, %v3899_v16  ;;  %v29933_v51 = vpop.f32.mrf.mxu0 }
 0x1c0   :  { %33825 = vst [vmem:[#allocation69_spill] sm:$0xff] %v29933_v51  ;;  %v5015_v53 = vpop.f32.mrf.mxu1 }
 0x1c1   :  { %v5016_v63 = vadd.f32 %v5015_v53, %v4933_v15  ;;  %v5246_v50 = vpop.f32.mrf.mxu0 }
 0x1c2   :  { %v29935_v33 = vpop.f32.mrf.mxu1 }
 0x1c3   :  { %v5093_v48 = vadd.f32 %v5092_v41, %v5016_v63  ;;  %v29937_v22 = vpop.f32.mrf.mxu0 }
 0x1c4   :  { %33826 = vst [vmem:[#allocation70_spill] sm:$0xff] %v29937_v22  ;;  %v5168_v55 = vpop.f32.mrf.mxu1 }
 0x1c5   :  { %v5169_v9 = vadd.f32 %v5168_v55, %v5093_v48  ;;  %v5398_v3 = vpop.f32.mrf.mxu0 }
 0x1c6   :  { %v29939_v0 = vpop.f32.mrf.mxu1 }
 0x1c7   :  { %33827 = vst [vmem:[#allocation71_spill] sm:$0xff] %v29939_v0  ;;  %v5247_v7 = vadd.f32 %v5246_v50, %v5169_v9  ;;  %v29941_v6 = vpop.f32.mrf.mxu0 }
 0x1c8   :  { %v5320_v56 = vpop.f32.mrf.mxu1 }
 0x1c9   :  { %v5321_v16 = vadd.f32 %v5320_v56, %v5247_v7  ;;  %v5557_v52 = vpop.f32.mrf.mxu0 }
 0x1ca   :  { %v29943_v51 = vpop.f32.mrf.mxu1 }
 0x1cb   :  { %33828 = vst [vmem:[#allocation72_spill] sm:$0xff] %v29943_v51  ;;  %v29945_v53 = vadd.f32 %v5321_v16, %v4835_v4  ;;  %v29947_v15 = vpop.f32.mrf.mxu0 }
 0x1cc   :  { %33830 = vst [vmem:[#allocation74_spill] sm:$0xff] %v29947_v15  ;;  %v5480_v41 = vpop.f32.mrf.mxu1 }
 0x1cd   :  { %33829 = vst [vmem:[#allocation73_spill] sm:$0xff] %v29945_v53  ;;  %v5481_v63 = vadd.f32 %v5480_v41, %v5398_v3  ;;  %v5711_v22 = vpop.f32.mrf.mxu0 }
 0x1ce   :  { %v29949_v26 = vpop.f32.mrf.mxu1 }
 0x1cf   :  { %v5558_v55 = vadd.f32 %v5557_v52, %v5481_v63  ;;  %v29951_v48 = vpop.f32.mrf.mxu0 }
 0x1d0   :  { %33831 = vst [vmem:[#allocation75_spill] sm:$0xff] %v29951_v48  ;;  %v5633_v50 = vpop.f32.mrf.mxu1 }
 0x1d1   :  { %v5634_v9 = vadd.f32 %v5633_v50, %v5558_v55  ;;  %v29953_v0 = vpop.f32.mrf.mxu0 }
 0x1d2   :  { %v29955_v56 = vpop.f32.mrf.mxu1 }
 0x1d3   :  { %33832 = vst [vmem:[#allocation76_spill] sm:$0xff] %v29955_v56  ;;  %v5712_v7 = vadd.f32 %v5711_v22, %v5634_v9  ;;  %v29957_v51 = vpop.f32.mrf.mxu0 }
 0x1d4   :  { %v5785_v4 = vpop.f32.mrf.mxu1 }
 0x1d5   :  { %v5786_v16 = vadd.f32 %v5785_v4, %v5712_v7  ;;  %v29959_v53 = vpop.f32.mrf.mxu0  ;;  %v282_v7 = vadd.f32 %v29793_v24, %v29775_v58 }
 0x1d6   :  { %v29961_v3 = vpop.f32.mrf.mxu1 }
 0x1d7   :  { %33833 = vst [vmem:[#allocation77_spill] sm:$0xff] %v29961_v3  ;;  %v29963_v41 = vadd.f32 %v5786_v16, %v4837_v23  ;;  %v29965_v52 = vpop.f32.mrf.mxu0 }
 0x1d8   :  { %v29967_v63 = vpop.f32.mrf.mxu1 }
 0x1d9   :  { %33834 = vst [vmem:[#allocation78_spill] sm:$0xff] %v29963_v41  ;;  %v29969_v55 = vpop.f32.mrf.mxu0  ;;  %v747_v41 = vadd.f32 %v29820_v21, %v29803_v19 }
 0x1da   :  { %33835 = vst [vmem:[#allocation79_spill] sm:$0xff] %v29969_v55  ;;  %v29971_v50 = vpop.f32.mrf.mxu1  ;;  %v359_v55 = vadd.f32 %v29783_v60, %v282_v7 }
 0x1db   :  { %v29973_v48 = vpop.f32.mrf.mxu0  ;;  %v824_v58 = vadd.f32 %v29812_v27, %v747_v41 }
 0x1dc   :  { %33836 = vst [vmem:[#allocation80_spill] sm:$0xff] %v29973_v48  ;;  %v29975_v22 = vpop.f32.mrf.mxu1  ;;  %v435_v15 = vadd.f32 %v29801_v17, %v359_v55 }
 0x1dd   :  { %33837 = vst [vmem:[#allocation81_spill] sm:$0xff] %v29975_v22  ;;  %v29977_v9 = vpop.f32.mrf.mxu0  ;;  %v900_v60 = vadd.f32 %v29829_v5, %v824_v58 }
 0x1de   :  { %v29981_v4 = vpop.f32.mrf.mxu1  ;;  %v513_v7 = vadd.f32 %v29795_v34, %v435_v15  ;;  %v2170_v15 = vadd.f32 %v29863_v13, %v29857_v8 }
 0x1df   :  { %33838 = vst [vmem:[#allocation82_spill] sm:$0xff] %v29981_v4  ;;  %v29983_v23 = vpop.f32.mrf.mxu0  ;;  %v978_v41 = vadd.f32 %v29823_v54, %v900_v60 }
 0x1e0   :  { %v29985_v16 = vpop.f32.mrf.mxu1  ;;  %v587_v55 = vadd.f32 %v29810_v25, %v513_v7  ;;  %v2635_v25 = vadd.f32 %v29875_v35, %v29869_v38  ;;  %v3125_v7 = vadd.f32 %v29887_v44, %v29881_v31  ;;  %v2247_v8 = vadd.f32 %v29861_v36, %v2170_v15 }
 0x1e1   :  { %33839 = vst [vmem:[#allocation83_spill] sm:$0xff] %v29985_v16  ;;  %v29989_v3 = vpop.f32.mrf.mxu0  ;;  %v1052_v34 = vadd.f32 %v29835_v59, %v978_v41 }
 0x1e2   :  { %v29992_v56 = vpop.f32.mrf.mxu1  ;;  %v1133_v5 = vadd.f32 %v29831_v32, %v587_v55  ;;  %v3202_v35 = vadd.f32 %v29885_v18, %v3125_v7 }
 0x1e3   :  { %33840 = vst [vmem:[#allocation84_spill] sm:$0xff] %v29992_v56  ;;  %v29994_v48 = vpop.f32.mrf.mxu0 }
 0x1e4   :  { %33841 = vst [vmem:[#allocation85_spill] sm:$0xff] %v29994_v48  ;;  %v29996_v22 = vpop.f32.mrf.mxu1  ;;  %v1215_v54 = vadd.f32 %v29839_v2, %v1133_v5 }
 0x1e5   :  { %v29999_v24 = vpop.f32.mrf.mxu0 }
 0x1e6   :  { %33842 = vst [vmem:[#allocation86_spill] sm:$0xff] %v29999_v24  ;;  %v30002_v16 = vpop.f32.mrf.mxu1  ;;  %v1292_v2 = vadd.f32 %v29837_v39, %v1215_v54 }
 0x1e7   :  { %v30004_v4 = vpop.f32.mrf.mxu0 }
 0x1e8   :  { %33843 = vst [vmem:[#allocation87_spill] sm:$0xff] %v30004_v4  ;;  %v30006_v19 = vpop.f32.mrf.mxu1  ;;  %v1368_v36 = vadd.f32 %v29843_v46, %v1292_v2  ;;  %v33847_v2 = vld [vmem:[#allocation51_spill] sm:$0xff] }
 0x1e9   :  { %v30009_v21 = vpop.f32.mrf.mxu0 }
 0x1ea   :  { %v30012_v56 = vpop.f32.mrf.mxu1  ;;  %v1446_v46 = vadd.f32 %v29841_v12, %v1368_v36  ;;  %v33846_v12 = vld [vmem:[#allocation59_spill] sm:$0xff] }
 0x1eb   :  { %33844 = vst [vmem:[#allocation88_spill] sm:$0xff] %v30012_v56  ;;  %v6849_v48 = vpop.f32.mrf.mxu0 }
 0x1ec   :  { %v30014_v27 = vpop.f32.mrf.mxu1 }
 0x1ed   :  { %33845 = vst [vmem:[#allocation89_spill] sm:$0xff] %v30014_v27  ;;  %v30017_v17 = vpop.f32.mrf.mxu0  ;;  %v1598_v27 = vadd.f32 %v29845_v40, %v1052_v34  ;;  %v2712_v40 = vadd.f32 %v29873_v45, %v2635_v25  ;;  %v3278_v45 = vadd.f32 %v29891_v42, %v3202_v35  ;;  %v5018_v42 = vadd.f32 %v29935_v33, %v29929_v30  ;;  %v33849_v35 = vld [vmem:[#allocation54_spill] sm:$0xff] }
 0x1ee   :  { %v30020_v4 = vpop.f32.mrf.mxu1  ;;  %v5975_v33 = vadd.f32 %v29967_v63, %v29953_v0  ;;  %v33854_v0 = vld [vmem:[#allocation52_spill] sm:$0xff] }
 0x1ef   :  { %v30022_v24 = vpop.f32.mrf.mxu0  ;;  %v1680_v59 = vadd.f32 %v29851_v37, %v1598_v27  ;;  %v2323_v37 = vadd.f32 %v29867_v14, %v2247_v8  ;;  %v2788_v39 = vadd.f32 %v29879_v49, %v2712_v40  ;;  %v3356_v49 = vadd.f32 %v29889_v43, %v3278_v45 }
 0x1f0   :  { %v6929_v58 = vpop.f32.mrf.mxu1  ;;  %v1520_v40 = vadd.f32 %v33847_v2, %v1446_v46 }
 0x1f1   :  { %v30028_v56 = vpop.f32.mrf.mxu0  ;;  %v1757_v31 = vadd.f32 %v29849_v47, %v1680_v59  ;;  %v2401_v54 = vadd.f32 %v29865_v62, %v2323_v37  ;;  %v4063_v47 = vadd.f32 %v29911_v57, %v29905_v20  ;;  %v2866_v7 = vadd.f32 %v29877_v10, %v2788_v39  ;;  %v33851_v39 = vld [vmem:[#allocation55_spill] sm:$0xff] }
 0x1f2   :  { %v6931_v60 = vpop.f32.mrf.mxu1  ;;  %v5977_v10 = vadd.f32 %v29971_v50, %v29957_v51  ;;  %v33853_v51 = vld [vmem:[#allocation65_spill] sm:$0xff] }
 0x1f3   :  { %v30036_v32 = vpop.f32.mrf.mxu0  ;;  %v1833_v15 = vadd.f32 %v29855_v1, %v1757_v31  ;;  %v3590_v1 = vadd.f32 %v29899_v29, %v29893_v11  ;;  %v2475_v20 = vadd.f32 %v29871_v28, %v2401_v54  ;;  %v4140_v8 = vadd.f32 %v33846_v12, %v4063_v47  ;;  %v33848_v29 = vld [vmem:[#allocation53_spill] sm:$0xff] }
 0x1f4   :  { %v30038_v55 = vpop.f32.mrf.mxu1  ;;  %v2940_v11 = vadd.f32 %v33848_v29, %v2866_v7  ;;  %v3430_v31 = vadd.f32 %v33849_v35, %v3356_v49  ;;  %v6932_v28 = vadd.f32 %v6931_v60, %v6849_v48  ;;  %v6930_v54 = vadd.f32 %v6929_v58, %v30009_v21  ;;  %v33855_v12 = vld [vmem:[#allocation61_spill] sm:$0xff]  ;;  %v33858_v29 = vld [vmem:[#allocation64_spill] sm:$0xff] }
 0x1f5   :  { %v30042_v13 = vpop.f32.mrf.mxu0  ;;  %v1911_v57 = vadd.f32 %v29853_v61, %v1833_v15  ;;  %v33850_v61 = vld [vmem:[#allocation69_spill] sm:$0xff]  ;;  %v3667_v45 = vadd.f32 %v33851_v39, %v3590_v1  ;;  %v33852_v15 = vld [vmem:[#allocation62_spill] sm:$0xff]  ;;  %v2943_v46 = vadd.f32 %v2475_v20, %v1520_v40  ;;  %v4216_v7 = vadd.f32 %v33855_v12, %v4140_v8 }
 0x1f6   :  { %v30045_v41 = vpop.f32.mrf.mxu1  ;;  %v5095_v37 = vadd.f32 %v33850_v61, %v5018_v42  ;;  %v4528_v50 = vadd.f32 %v33853_v51, %v33852_v15  ;;  %v6054_v49 = vadd.f32 %v29965_v52, %v5977_v10  ;;  %v5483_v48 = vadd.f32 %v29949_v26, %v29941_v6  ;;  %v33857_v52 = vld [vmem:[#allocation57_spill] sm:$0xff] }
 0x1f7   :  { %v30049_v38 = vpop.f32.mrf.mxu0  ;;  %v1985_v63 = vadd.f32 %v33854_v0, %v1911_v57  ;;  %v6052_v60 = vadd.f32 %v29959_v53, %v5975_v33  ;;  %v6440_v42 = vadd.f32 %v29996_v22, %v29977_v9  ;;  %v3898_v58 = vadd.f32 %v3430_v31, %v2943_v46  ;;  %v33856_v57 = vld [vmem:[#allocation71_spill] sm:$0xff]  ;;  %v33859_v22 = vld [vmem:[#allocation60_spill] sm:$0xff]  ;;  %v33860_v33 = vld [vmem:[#allocation82_spill] sm:$0xff] }
 0x1f8   :  { %v30051_v44 = vpop.f32.mrf.mxu1  ;;  %v5171_v20 = vadd.f32 %v33856_v57, %v5095_v37  ;;  %v7009_v8 = vadd.f32 %v30022_v24, %v6932_v28  ;;  %v3743_v10 = vadd.f32 %v33857_v52, %v3667_v45  ;;  %v4605_v35 = vadd.f32 %v33858_v29, %v4528_v50  ;;  %v33861_v24 = vld [vmem:[#allocation74_spill] sm:$0xff]  ;;  %v33862_v39 = vld [vmem:[#allocation81_spill] sm:$0xff]  ;;  %v33864_v46 = vld [vmem:[#allocation56_spill] sm:$0xff] }
 0x1f9   :  { %v30055_v27 = vpop.f32.mrf.mxu0  ;;  %v30110_v21 = vadd.f32 %v2940_v11, %v1985_v63  ;;  %v6442_v26 = vadd.f32 %v30002_v16, %v29983_v23  ;;  %v7007_v6 = vadd.f32 %v30017_v17, %v6930_v54  ;;  %v4294_v9 = vadd.f32 %v33859_v22, %v4216_v7  ;;  %v33863_v16 = vld [vmem:[#allocation70_spill] sm:$0xff]  ;;  %v33866_v12 = vld [vmem:[#allocation85_spill] sm:$0xff] }
 0x1fa   :  { %v30058_v5 = vpop.f32.mrf.mxu1  ;;  %v6130_v11 = vadd.f32 %v33860_v33, %v6054_v49  ;;  %v5560_v28 = vadd.f32 %v33861_v24, %v5483_v48  ;;  %v6128_v45 = vadd.f32 %v33862_v39, %v6052_v60  ;;  %v6517_v15 = vadd.f32 %v29989_v3, %v6440_v42  ;;  %v33867_v3 = vld [vmem:[#allocation63_spill] sm:$0xff] }
 0x1fb   :  { %v30062_v34 = vpop.f32.mrf.mxu0  ;;  %v5249_v17 = vadd.f32 %v33863_v16, %v5171_v20  ;;  %v7085_v50 = vadd.f32 %v30045_v41, %v7009_v8  ;;  %v6519_v7 = vadd.f32 %v33866_v12, %v6442_v26  ;;  %v7083_v49 = vadd.f32 %v30038_v55, %v7007_v6  ;;  %v33870_v20 = vld [vmem:[#allocation79_spill] sm:$0xff] }
 0x1fc   :  { %v7394_v18 = vpop.f32.mrf.mxu1  ;;  %v4368_v60 = vadd.f32 %v33867_v3, %v4294_v9  ;;  %v6206_v8 = vadd.f32 %v33870_v20, %v6128_v45  ;;  %v6593_v52 = vadd.f32 %v30006_v19, %v6517_v15  ;;  %v33872_v9 = vld [vmem:[#allocation58_spill] sm:$0xff] }
 0x1fd   :  { %v30068_v14 = vpop.f32.mrf.mxu0  ;;  %v7395_v31 = vadd.f32 %v7394_v18, %v30042_v13  ;;  %v3821_v13 = vadd.f32 %v33864_v46, %v3743_v10  ;;  %v33865_v18 = vld [vmem:[#allocation67_spill] sm:$0xff]  ;;  %v7163_v26 = vadd.f32 %v30036_v32, %v7085_v50 }
 0x1fe   :  { %v7396_v25 = vpop.f32.mrf.mxu1  ;;  %v4836_v19 = vadd.f32 %v4368_v60, %v3898_v58  ;;  %v33876_v32 = vld [vmem:[#allocation75_spill] sm:$0xff] }
 0x1ff   :  { %v30075_v59 = vpop.f32.mrf.mxu0  ;;  %v7397_v51 = vadd.f32 %v7396_v25, %v30049_v38  ;;  %v33868_v38 = vld [vmem:[#allocation80_spill] sm:$0xff]  ;;  %v7472_v42 = vadd.f32 %v30055_v27, %v7395_v31  ;;  %v3895_v27 = vadd.f32 %v33872_v9, %v3821_v13 }
 0x200   :  { %v30079_v62 = vpop.f32.mrf.mxu1  ;;  %v6208_v25 = vadd.f32 %v33868_v38, %v6130_v11  ;;  %v33874_v11 = vld [vmem:[#allocation88_spill] sm:$0xff]  ;;  %v33881_v38 = vld [vmem:[#allocation77_spill] sm:$0xff] }
 0x201   :  { %v7806_v43 = vpop.f32.mrf.mxu0  ;;  %v7474_v10 = vadd.f32 %v30062_v34, %v7397_v51  ;;  %v6595_v31 = vadd.f32 %v33874_v11, %v6519_v7  ;;  %v7548_v39 = vadd.f32 %v30079_v62, %v7472_v42  ;;  %v3900_v58 = vadd.f32 %v3895_v27, %v30110_v21  ;;  %v33880_v62 = vld [vmem:[#allocation87_spill] sm:$0xff]  ;;  %v33882_v42 = vld [vmem:[#allocation73_spill] sm:$0xff]  ;;  %v33884_v27 = vld [vmem:[#allocation78_spill] sm:$0xff] }
 0x202   :  { %v30089_v30 = vpop.f32.mrf.mxu1 }
 0x203   :  { %v7808_v36 = vpop.f32.mrf.mxu0  ;;  %v7626_v3 = vadd.f32 %v30068_v14, %v7548_v39 }
 0x204   :  { %v30098_v47 = vpop.f32.mrf.mxu1 }
 0x205   :  { %v7965_v2 = vpop.f32.mrf.mxu0 }
 0x206   :  { %v30108_v1 = vpop.f32.mrf.mxu1 }
 0x207   :  { %v7967_v40 = vpop.f32.mrf.mxu0 }
 0x208   :  { %v7888_v53 = vpop.f32.mrf.mxu1 }
 0x209   :  { %v7889_v61 = vadd.f32 %v7888_v53, %v7806_v43  ;;  %v8119_v37 = vpop.f32.mrf.mxu0  ;;  %v4681_v43 = vadd.f32 %v33865_v18, %v4605_v35  ;;  %v33871_v35 = vld [vmem:[#allocation72_spill] sm:$0xff] }
 0x20a   :  { %v7890_v23 = vpop.f32.mrf.mxu1  ;;  %v5323_v55 = vadd.f32 %v33871_v35, %v5249_v17  ;;  %v33878_v17 = vld [vmem:[#allocation86_spill] sm:$0xff]  ;;  %v33879_v18 = vld [vmem:[#allocation68_spill] sm:$0xff] }
 0x20b   :  { %v7966_v54 = vadd.f32 %v7965_v2, %v7889_v61  ;;  %v7891_v0 = vadd.f32 %v7890_v23, %v7808_v36  ;;  %v8121_v63 = vpop.f32.mrf.mxu0  ;;  %v33869_v2 = vld [vmem:[#allocation76_spill] sm:$0xff]  ;;  %v7161_v61 = vadd.f32 %v30028_v56, %v7083_v49  ;;  %v33877_v23 = vld [vmem:[#allocation83_spill] sm:$0xff]  ;;  %v6671_v50 = vadd.f32 %v33878_v17, %v6593_v52 }
 0x20c   :  { %v8041_v48 = vpop.f32.mrf.mxu1  ;;  %v5636_v36 = vadd.f32 %v33869_v2, %v5560_v28  ;;  %v33875_v28 = vld [vmem:[#allocation84_spill] sm:$0xff]  ;;  %v6280_v16 = vadd.f32 %v33877_v23, %v6206_v8  ;;  %v5791_v46 = vadd.f32 %v5323_v55, %v4836_v19  ;;  %v7237_v56 = vadd.f32 %v30058_v5, %v7163_v26 }
 0x20d   :  { %v7968_v57 = vadd.f32 %v7967_v40, %v7891_v0  ;;  %v8271_v41 = vpop.f32.mrf.mxu0  ;;  %v8042_v6 = vadd.f32 %v8041_v48, %v7966_v54  ;;  %v33873_v40 = vld [vmem:[#allocation66_spill] sm:$0xff]  ;;  %v6282_v34 = vadd.f32 %v33875_v28, %v6208_v25  ;;  %v7550_v54 = vadd.f32 %v30089_v30, %v7474_v10 }
 0x20e   :  { %v8043_v29 = vpop.f32.mrf.mxu1  ;;  %v4759_v33 = vadd.f32 %v33873_v40, %v4681_v43  ;;  %v5714_v51 = vadd.f32 %v33876_v32, %v5636_v36  ;;  %v7235_v12 = vadd.f32 %v30051_v44, %v7161_v61  ;;  %v6749_v5 = vadd.f32 %v6280_v16, %v33882_v42 }
 0x20f   :  { %v8044_v53 = vadd.f32 %v8043_v29, %v7968_v57  ;;  %v8273_v22 = vpop.f32.mrf.mxu0  ;;  %v8120_v13 = vadd.f32 %v8119_v37, %v8042_v6  ;;  %v6750_v48 = vadd.f32 %v6282_v34, %v5791_v46  ;;  %v33883_v37 = vld [vmem:[#allocation89_spill] sm:$0xff]  ;;  %v7628_v21 = vadd.f32 %v30075_v59, %v7550_v54 }
 0x210   :  { %v8193_v24 = vpop.f32.mrf.mxu1  ;;  %v4833_v43 = vadd.f32 %v33879_v18, %v4759_v33  ;;  %v5788_v25 = vadd.f32 %v33881_v38, %v5714_v51  ;;  %v6745_v57 = vadd.f32 %v33883_v37, %v6671_v50  ;;  %v7704_v29 = vadd.f32 %v7235_v12, %v6749_v5 }
 0x211   :  { %v8122_v45 = vadd.f32 %v8121_v63, %v8044_v53  ;;  %v8430_v15 = vpop.f32.mrf.mxu0  ;;  %v6673_v63 = vadd.f32 %v33880_v62, %v6595_v31  ;;  %v7705_v36 = vadd.f32 %v7237_v56, %v6750_v48  ;;  %v8194_v20 = vadd.f32 %v8193_v24, %v8120_v13 }
 0x212   :  { %v8195_v0 = vpop.f32.mrf.mxu1  ;;  %v4838_v52 = vadd.f32 %v4833_v43, %v3900_v58  ;;  %v7702_v9 = vadd.f32 %v30108_v1, %v7628_v21  ;;  %v6751_v40 = vadd.f32 %v6745_v57, %v33884_v27  ;;  %v28802_v56 = vmov 0  }
 0x213   :  { %v8432_v49 = vpop.f32.mrf.mxu0  ;;  %v8196_v60 = vadd.f32 %v8195_v0, %v8122_v45  ;;  %v6747_v10 = vadd.f32 %v30020_v4, %v6673_v63  ;;  %v8663_v33 = vadd.f32 %v8194_v20, %v7704_v29  ;;  %28759 = vset.pattern.permute.xlu0 %v28802_v56  ;;  %28760 = vset.pattern.permute.xlu1 %v28802_v56  ;;  %v8747_v29 = vld [vmem:[%s33640_s1 + $0x50] sm:$0xff] }
 0x214   :  { %v8353_v7 = vpop.f32.mrf.mxu1  ;;  %v5793_v53 = vadd.f32 %v5788_v25, %v4838_v52 }
 0x215   :  { %v8354_v30 = vadd.f32 %v8353_v7, %v8271_v41  ;;  %v7700_v41 = vadd.f32 %v30098_v47, %v7626_v3  ;;  %v8664_v55 = vadd.f32 %v8196_v60, %v7705_v36  ;;  %v8675_v45 = vmul.f32 %v8663_v33, %v8663_v33  ;;  %v8667_v7 = vld [vmem:[%s33640_s1 + $0x140] sm:$0xff] }
 0x216   :  { %v8355_v2 = vpop.f32.mrf.mxu1  ;;  %v8584_v35 = vpop.f32.mrf.mxu0  ;;  %v6752_v31 = vadd.f32 %v6747_v10, %v5793_v53  ;;  %v8668_v3 = vld [vmem:[%s33640_s1 + $0x160] sm:$0xff] }
 0x217   :  { %v8431_v8 = vadd.f32 %v8430_v15, %v8354_v30  ;;  %v8356_v44 = vadd.f32 %v8355_v2, %v8273_v22  ;;  %v7706_v24 = vadd.f32 %v7700_v41, %v6751_v40  ;;  %v8676_v34 = vmul.f32 %v8664_v55, %v8664_v55 }
 0x218   :  { %v8506_v14 = vpop.f32.mrf.mxu1  ;;  %v8586_v61 = vpop.f32.mrf.mxu0  ;;  %v7707_v47 = vadd.f32 %v7702_v9, %v6752_v31  ;;  %v8669_v51 = vadd.f32 %v8664_v55, %v8663_v33  ;;  %v33891_v31 = vld [vmem:[#allocation3_spill] sm:$0xff] }
 0x219   :  { %v8433_v26 = vadd.f32 %v8432_v49, %v8356_v44  ;;  %v8507_v6 = vadd.f32 %v8506_v14, %v8431_v8  ;;  %v8679_v17 = vadd.f32 %v8676_v34, %v8675_v45  ;;  %v8749_v14 = vsel %vm120_vm0, %v8747_v29, 0 }
 0x21a   :  { %v8508_v59 = vpop.f32.mrf.mxu1 }
 0x21b   :  { %v8585_v11 = vadd.f32 %v8584_v35, %v8507_v6  ;;  %v8509_v22 = vadd.f32 %v8508_v59, %v8433_v26  ;;  %v30247_v35 = vand.u32 4294901760, %v8749_v14  ;;  %v33890_v59 = vld [vmem:[#allocation5_spill] sm:$0xff] }
 0x21c   :  { %v8658_v4 = vpop.f32.mrf.mxu1 }
 0x21d   :  { %v8587_v19 = vadd.f32 %v8586_v61, %v8509_v22  ;;  %v8659_v28 = vadd.f32 %v8658_v4, %v8585_v11  ;;  %v30250_v41 = vsub.f32 %v8749_v14, %v30247_v35 }
 0x21e   :  { %v8660_v39 = vpop.f32.mrf.mxu1 }
 0x21f   :  { %v8665_v15 = vadd.f32 %v8659_v28, %v7706_v24  ;;  %v8661_v32 = vadd.f32 %v8660_v39, %v8587_v19  ;;  %v30253_v26 = vand.u32 4294901760, %v30250_v41 }
 0x221   :  { %v8666_v1 = vadd.f32 %v8661_v32, %v7707_v47  ;;  %v8670_v23 = vadd.f32 %v8669_v51, %v8665_v15  ;;  %v8677_v16 = vmul.f32 %v8665_v15, %v8665_v15  ;;  %v8821_v40 = vsub.f32 %v30250_v41, %v30253_v26  ;;  %v33893_v51 = vld [vmem:[#allocation4_spill] sm:$0xff] }
 0x223   :  { %v8671_v50 = vadd.f32 %v8670_v23, %v8666_v1  ;;  %v8678_v54 = vmul.f32 %v8666_v1, %v8666_v1  ;;  %v8680_v0 = vadd.f32 %v8679_v17, %v8677_v16  ;;  %v8822_v24 = vand.u32 4294901760, %v8821_v40  ;;  %v8730_v23 = vld [vmem:[%s33640_s1 + $0x48] sm:$0xff]  ;;  %v33897_v40 = vld [vmem:[#allocation13_spill] sm:$0xff] }
 0x225   :  { %8672 = vadd.xlane.f32.xlu0 %v8671_v50  ;;  %v8681_v46 = vadd.f32 %v8680_v0, %v8678_v54  ;;  %v33894_v0 = vmov 0.0  }
 0x227   :  { %8682 = vadd.xlane.f32.xlu1 %v8681_v46 }
 0x2ae   :  { %v8673_v13 = vpop.xlane.xlu0 %8672 }
 0x2af   :  { %v8674_v58 = vmul.f32 0.001953125, %v8673_v13  ;;  %v9682_v13 = vsel %vm120_vm0, %v8730_v23, 0 }
 0x2b0   :  { %v8683_v18 = vpop.xlane.xlu1 %8682 }
 0x2b1   :  { %v8685_v43 = vmul.f32 %v8674_v58, %v8674_v58  ;;  %v8684_v62 = vmul.f32 0.001953125, %v8683_v18 }
 0x2b3   :  { %v8686_v63 = vsub.f32 %v8684_v62, %v8685_v43 }
 0x2b5   :  { %v8687_v12 = vadd.f32 1e-05, %v8686_v63 }
 0x2b7   :  { %28761 = vrsqrt.f32 %v8687_v12 }
 0x2c4   :  { %v28762_v49 = vpop.eup %28761 }
 0x2c5   :  { %v8689_v48 = vmul.f32 %v28762_v49, %v8667_v7  ;;  %v30284_v49 = vand.u32 4294901760, %v9682_v13 }
 0x2c7   :  { %8694 = vperm.xlu0 %28759, %v8689_v48   ;;  %v8690_v60 = vmul.f32 %v8689_v48, %v8674_v58 }
 0x2c9   :  { %v8691_v30 = vsub.f32 %v8668_v3, %v8690_v60  ;;  %v33895_v60 = vld [vmem:[#allocation10_spill] sm:$0xff] }
 0x2cb   :  { %8703 = vperm.xlu1 %28760, %v8691_v30  }
 0x342   :  { %v8695_v38 = vpop.permute.xlu0 %8694 }
 0x343   :  { %v8697_v25 = vmul.f32 %v8695_v38, %v8663_v33  ;;  %v8700_v42 = vmul.f32 %v8695_v38, %v8666_v1  ;;  %v8698_v37 = vmul.f32 %v8695_v38, %v8664_v55  ;;  %v8699_v44 = vmul.f32 %v8695_v38, %v8665_v15  ;;  %v33892_v15 = vld [vmem:[#allocation6_spill] sm:$0xff]  ;;  %v33896_v38 = vld [vmem:[#allocation8_spill] sm:$0xff] }
 0x346   :  { %v8704_v5 = vpop.permute.xlu1 %8703 }
 0x347   :  { %v8706_v57 = vadd.f32 %v8704_v5, %v8697_v25  ;;  %v8709_v21 = vadd.f32 %v8704_v5, %v8700_v42  ;;  %v8707_v2 = vadd.f32 %v8704_v5, %v8698_v37  ;;  %v8708_v52 = vadd.f32 %v8704_v5, %v8699_v44 }
 0x349   :  { %v30171_v36 = vmax.f32 %v8706_v57, 0.0  ;;  %v30173_v20 = vmax.f32 %v8709_v21, 0.0  ;;  %v30179_v8 = vmax.f32 %v8707_v2, 0.0  ;;  %v30189_v10 = vmax.f32 %v8708_v52, 0.0 }
 0x34a   :  { %v30296_v57 = vsub.f32 %v9682_v13, %v30284_v49  ;;  %v33899_v13 = vld [vmem:[#allocation16_spill] sm:$0xff] }
 0x34b   :  { %33885 = vst [vmem:[#allocation59_spill] sm:$0xff] %v30171_v36  ;;  %33886 = vst [vmem:[#allocation51_spill] sm:$0xff] %v30173_v20  ;;  %8720 = vrot.lane.b32.xlu0 %v30173_v20, %s28795_s18  ;;  %8731 = vrot.lane.b32.xlu1 %v30171_v36, %s28794_s13 }
 0x34c   :  { %33887 = vst [vmem:[#allocation53_spill] sm:$0xff] %v30179_v8  ;;  %33888 = vst [vmem:[#allocation54_spill] sm:$0xff] %v30189_v10 }
 0x34f   :  { %10614 = vrot.lane.b32.xlu0 %v30171_v36, %s28796_s0  ;;  %8733 = vrot.lane.b32.xlu1 %v30179_v8, %s28794_s13 }
 0x353   :  { %10620 = vrot.lane.b32.xlu0 %v30173_v20, %s28796_s0  ;;  %8737 = vrot.lane.b32.xlu1 %v30173_v20, %s28794_s13 }
 0x357   :  { %11568 = vrot.lane.b32.xlu0 %v30171_v36, %s28797_s19  ;;  %8735 = vrot.lane.b32.xlu1 %v30189_v10, %s28794_s13 }
 0x35b   :  { %11574 = vrot.lane.b32.xlu0 %v30173_v20, %s28797_s19  ;;  %8714 = vrot.lane.b32.xlu1 %v30171_v36, %s28795_s18 }
 0x35f   :  { %13462 = vrot.lane.b32.xlu0 %v30179_v8, %s28798_s20  ;;  %8716 = vrot.lane.b32.xlu1 %v30179_v8, %s28795_s18 }
 0x363   :  { %13460 = vrot.lane.b32.xlu0 %v30171_v36, %s28798_s20  ;;  %8718 = vrot.lane.b32.xlu1 %v30189_v10, %s28795_s18 }
 0x367   :  { %14416 = vrot.lane.b32.xlu0 %v30179_v8, %s28799_s21  ;;  %10616 = vrot.lane.b32.xlu1 %v30179_v8, %s28796_s0 }
 0x36b   :  { %14414 = vrot.lane.b32.xlu0 %v30171_v36, %s28799_s21  ;;  %10618 = vrot.lane.b32.xlu1 %v30189_v10, %s28796_s0 }
 0x36f   :  { %15370 = vrot.lane.b32.xlu0 %v30179_v8, %s28800_s22  ;;  %11570 = vrot.lane.b32.xlu1 %v30179_v8, %s28797_s19 }
 0x373   :  { %15368 = vrot.lane.b32.xlu0 %v30171_v36, %s28800_s22  ;;  %11572 = vrot.lane.b32.xlu1 %v30189_v10, %s28797_s19 }
 0x377   :  { %16324 = vrot.lane.b32.xlu0 %v30179_v8, %s28801_s23  ;;  %13464 = vrot.lane.b32.xlu1 %v30189_v10, %s28798_s20 }
 0x37b   :  { %16322 = vrot.lane.b32.xlu0 %v30171_v36, %s28801_s23  ;;  %13466 = vrot.lane.b32.xlu1 %v30173_v20, %s28798_s20 }
 0x37f   :  { %14418 = vrot.lane.b32.xlu1 %v30189_v10, %s28799_s21 }
 0x383   :  { %14420 = vrot.lane.b32.xlu1 %v30173_v20, %s28799_s21 }
 0x387   :  { %15372 = vrot.lane.b32.xlu1 %v30189_v10, %s28800_s22 }
 0x38b   :  { %15374 = vrot.lane.b32.xlu1 %v30173_v20, %s28800_s22 }
 0x38f   :  { %16326 = vrot.lane.b32.xlu1 %v30189_v10, %s28801_s23 }
 0x393   :  { %16328 = vrot.lane.b32.xlu1 %v30173_v20, %s28801_s23 }
 0x3bd   :  { %v8732_v55 = vpop.permute.xlu1 %8731  ;;  %v8721_v58 = vpop.permute.xlu0 %8720 }
 0x3c1   :  { %v8734_v6 = vpop.permute.xlu1 %8733 }
 0x3c2   :  { %v8741_v9 = vsel %vm110_vm2, %v8732_v55, %v8734_v6 }
 0x3c3   :  { %v8744_v27 = vmul.f32 %v33890_v59, %v8741_v9 }
 0x3c5   :  { %v8781_v33 = vand.u32 4294901760, %v8744_v27  ;;  %v8738_v11 = vpop.permute.xlu1 %8737 }
 0x3c6   :  { %v8742_v22 = vsel %vm110_vm2, %v8738_v11, %v8732_v55  ;;  %v30308_v55 = vand.u32 4294901760, %v30296_v57 }
 0x3c7   :  { %v8743_v61 = vmul.f32 %v33891_v31, %v8742_v22  ;;  %8782 = vmatprep.subr.mxu0 %v8781_v33  ;;  %v8860_v4 = vsub.f32 %v8744_v27, %v8781_v33 }
 0x3c8   :  { %v9754_v22 = vsub.f32 %v30296_v57, %v30308_v55 }
 0x3c9   :  { %v8783_v19 = vand.u32 4294901760, %v8743_v61  ;;  %v8736_v28 = vpop.permute.xlu1 %8735  ;;  %v8861_v34 = vand.u32 4294901760, %v8860_v4 }
 0x3ca   :  { %v8739_v47 = vsel %vm110_vm2, %v8736_v28, %v8738_v11  ;;  %v8740_v39 = vsel %vm110_vm2, %v8734_v6, %v8736_v28 }
 0x3cb   :  { %v8866_v45 = vsub.f32 %v8743_v61, %v8783_v19  ;;  %v8745_v32 = vmul.f32 %v33892_v15, %v8740_v39  ;;  %v8746_v1 = vmul.f32 %v33893_v51, %v8739_v47  ;;  %8784 = vmatpush1.msra.mxu0 %v8783_v19  ;;  %v8862_v16 = vsub.f32 %v8860_v4, %v8861_v34  ;;  %v10615_v61 = vpop.permute.xlu0 %10614 }
 0x3cc   :  { %8823 = vmatmul.mubr.f32.vlgmr.msra.gmra.mxu0 %v8822_v24  ;;  %8943 = vmatprep.subr.mxu0 %v8860_v4  ;;  %v33898_v4 = vld [vmem:[#allocation14_spill] sm:$0xff] }
 0x3cd   :  { %v30272_v17 = vand.u32 4294901760, %v8746_v1  ;;  %v30274_v50 = vand.u32 4294901760, %v8745_v32  ;;  %8946 = vmatpush1.msra.mxu0 %v8866_v45  ;;  %v8715_v54 = vpop.permute.xlu1 %8714  ;;  %8979 = vmatprep.mubr.f32.mxu0 %v33894_v0  ;;  %v8867_v46 = vand.u32 4294901760, %v8866_v45  ;;  %v8863_v56 = vand.u32 4294901760, %v8862_v16 }
 0x3ce   :  { %9097 = vmatprep.subr.mxu0 %v8861_v34  ;;  %v8725_v62 = vsel %vm88_vm8, %v8721_v58, %v8715_v54  ;;  %v9755_v34 = vand.u32 4294901760, %v9754_v22 }
 0x3cf   :  { %v9331_v18 = vsub.f32 %v8745_v32, %v30274_v50  ;;  %v8868_v43 = vsub.f32 %v8866_v45, %v8867_v46  ;;  %8864 = vmatprep.subr.mxu1 %v8863_v56  ;;  %v9325_v63 = vsub.f32 %v8746_v1, %v30272_v17  ;;  %v8726_v30 = vmul.f32 %v8725_v62, %v33895_v60  ;;  %v10630_v32 = vld [vmem:[%s33640_s1 + $0x58] sm:$0xff]  ;;  %v10621_v16 = vpop.permute.xlu0 %10620 }
 0x3d0   :  { %8982 = vmatmul.mubr.f32.vlgmr.msra.gmra.mxu0 %v30250_v41  ;;  %v10625_v56 = vsel %vm1995_vm13, %v10621_v16, %v10615_v61 }
 0x3d1   :  { %9101 = vmatpush1.msra.mxu0 %v8867_v46  ;;  %v8717_v12 = vpop.permute.xlu1 %8716  ;;  %v8869_v7 = vand.u32 4294901760, %v8868_v43  ;;  %9134 = vmatprep.mubr.f32.mxu0 %v33894_v0  ;;  %v9326_v3 = vand.u32 4294901760, %v9325_v63  ;;  %v9332_v42 = vand.u32 4294901760, %v9331_v18  ;;  %v30299_v2 = vand.u32 4294901760, %v8726_v30  ;;  %v33900_v43 = vld [vmem:[#allocation18_spill] sm:$0xff] }
 0x3d2   :  { %9247 = vmatprep.subr.mxu0 %v30272_v17  ;;  %v8724_v48 = vsel %vm88_vm8, %v8715_v54, %v8717_v12  ;;  %v10632_v54 = vsel %vm120_vm0, %v10630_v32, 0  ;;  %v10626_v62 = vmul.f32 %v10625_v56, %v33900_v43 }
 0x3d3   :  { %v8727_v25 = vmul.f32 %v8724_v48, %v33896_v38  ;;  %8870 = vmatpush1.msra.mxu1 %v8869_v7  ;;  %v9327_v5 = vsub.f32 %v9325_v63, %v9326_v3  ;;  %v9333_v44 = vsub.f32 %v9331_v18, %v9332_v42  ;;  %v9799_v6 = vsub.f32 %v8726_v30, %v30299_v2 }
 0x3d4   :  { %8905 = vmatmul.mubr.f32.vlgmr.msra.gmra.mxu1 %v30247_v35  ;;  %9019 = vmatprep.subr.mxu1 %v8781_v33 }
 0x3d5   :  { %v30292_v37 = vand.u32 4294901760, %v8727_v25  ;;  %9136 = vmatmul.mubr.f32.vlgmr.msra.gmra.mxu0 %v30247_v35  ;;  %9021 = vmatpush1.msra.mxu1 %v8783_v19  ;;  %v8719_v21 = vpop.permute.xlu1 %8718  ;;  %v9328_v52 = vand.u32 4294901760, %v9327_v5  ;;  %v9334_v9 = vand.u32 4294901760, %v9333_v44 }
 0x3d6   :  { %9249 = vmatpush1.msra.mxu0 %v30274_v50  ;;  %9173 = vmatprep.subr.mxu1 %v8781_v33  ;;  %v8722_v14 = vsel %vm88_vm8, %v8719_v21, %v8721_v58  ;;  %v8723_v27 = vsel %vm88_vm8, %v8717_v12, %v8719_v21 }
 0x3d7   :  { %9408 = vmatprep.subr.mxu0 %v9325_v63  ;;  %9054 = vmatprep.mubr.f32.mxu1 %v33894_v0  ;;  %v9793_v29 = vsub.f32 %v8727_v25, %v30292_v37  ;;  %v8729_v33 = vmul.f32 %v8722_v14, %v33897_v40 }
 0x3d8   :  { %9282 = vmatprep.mubr.f32.mxu0 %v33894_v0  ;;  %9058 = vmatmul.mubr.f32.vlgmr.msra.gmra.mxu1 %v30253_v26 }
 0x3d9   :  { %9175 = vmatpush1.msra.mxu1 %v8783_v19  ;;  %9288 = vmatmul.mubr.f32.vlgmr.msra.gmra.mxu0 %v8822_v24  ;;  %v9794_v11 = vand.u32 4294901760, %v9793_v29  ;;  %v8728_v24 = vmul.f32 %v8723_v27, %v33898_v4  ;;  %v9800_v19 = vand.u32 4294901760, %v9799_v6  ;;  %v30324_v28 = vand.u32 4294901760, %v8729_v33  ;;  %v30330_v47 = vpop.permute.xlu1 %10616  ;;  %v33902_v27 = vld [vmem:[#allocation22_spill] sm:$0xff] }
 0x3da   :  { %9411 = vmatpush1.msra.mxu0 %v9331_v18  ;;  %9329 = vmatprep.subr.mxu1 %v9328_v52  ;;  %v30356_v18 = vand.u32 4294901760, %v10632_v54 }
 0x3db   :  { %9562 = vmatprep.subr.mxu0 %v9326_v3  ;;  %9208 = vmatprep.mubr.f32.mxu1 %v33894_v0  ;;  %v30334_v39 = vand.u32 4294901760, %v8728_v24  ;;  %v9801_v45 = vsub.f32 %v9799_v6, %v9800_v19  ;;  %v10258_v23 = vsub.f32 %v8729_v33, %v30324_v28  ;;  %v30373_v3 = vand.u32 4294901760, %v10626_v62 }
 0x3dc   :  { %9444 = vmatprep.mubr.f32.mxu0 %v33894_v0  ;;  %9210 = vmatmul.mubr.f32.vlgmr.msra.gmra.mxu1 %v30247_v35  ;;  %v30369_v7 = vsub.f32 %v10632_v54, %v30356_v18 }
 0x3dd   :  { %9335 = vmatpush1.msra.mxu1 %v9334_v9  ;;  %9447 = vmatmul.mubr.f32.vlgmr.msra.gmra.mxu0 %v30250_v41  ;;  %v9795_v41 = vsub.f32 %v9793_v29, %v9794_v11  ;;  %v10264_v46 = vsub.f32 %v8728_v24, %v30334_v39  ;;  %v10619_v48 = vpop.permute.xlu1 %10618  ;;  %v10749_v21 = vsub.f32 %v10626_v62, %v30373_v3  ;;  %v11569_v9 = vpop.permute.xlu0 %11568 }
 0x3de   :  { %9566 = vmatpush1.msra.mxu0 %v9332_v42  ;;  %9484 = vmatprep.subr.mxu1 %v30272_v17  ;;  %v10622_v5 = vsel %vm1995_vm13, %v10619_v48, %v10621_v16  ;;  %v10623_v52 = vsel %vm1995_vm13, %v30330_v47, %v10619_v48 }
 0x3df   :  { %9715 = vmatprep.subr.mxu0 %v30292_v37  ;;  %9368 = vmatprep.mubr.f32.mxu1 %v33894_v0  ;;  %v9796_v1 = vand.u32 4294901760, %v9795_v41  ;;  %v10265_v63 = vand.u32 4294901760, %v10264_v46  ;;  %v10628_v33 = vmul.f32 %v10623_v52, %v33902_v27  ;;  %v33905_v52 = vld [vmem:[#allocation11_spill] sm:$0xff] }
 0x3e0   :  { %9599 = vmatprep.mubr.f32.mxu0 %v33894_v0  ;;  %9370 = vmatmul.mubr.f32.vlgmr.msra.gmra.mxu1 %v30247_v35 }
 0x3e1   :  { %9486 = vmatpush1.msra.mxu1 %v30274_v50  ;;  %9601 = vmatmul.mubr.f32.vlgmr.msra.gmra.mxu0 %v30247_v35  ;;  %v10266_v30 = vsub.f32 %v10264_v46, %v10265_v63  ;;  %v30406_v24 = vpop.permute.xlu1 %11570  ;;  %v11575_v32 = vpop.permute.xlu0 %11574 }
 0x3e2   :  { %9717 = vmatpush1.msra.mxu0 %v30299_v2  ;;  %9638 = vmatprep.subr.mxu1 %v30272_v17  ;;  %v10624_v17 = vsel %vm1995_vm13, %v10615_v61, %v30330_v47  ;;  %v11579_v16 = vsel %vm2954_vm1, %v11575_v32, %v11569_v9 }
 0x3e3   :  { %9876 = vmatprep.subr.mxu0 %v9793_v29  ;;  %9519 = vmatprep.mubr.f32.mxu1 %v33894_v0  ;;  %v10627_v58 = vmul.f32 %v10624_v17, %v33899_v13  ;;  %v10267_v44 = vand.u32 4294901760, %v10266_v30  ;;  %v33901_v29 = vld [vmem:[#allocation21_spill] sm:$0xff]  ;;  %v33903_v17 = vld [vmem:[#allocation7_spill] sm:$0xff] }
 0x3e4   :  { %9750 = vmatprep.mubr.f32.mxu0 %v33894_v0  ;;  %9523 = vmatmul.mubr.f32.vlgmr.msra.gmra.mxu1 %v30253_v26  ;;  %v9802_v26 = vand.u32 4294901760, %v9801_v45  ;;  %v10629_v14 = vmul.f32 %v10622_v5, %v33901_v29 }
 0x3e5   :  { %9640 = vmatpush1.msra.mxu1 %v30274_v50  ;;  %9756 = vmatmul.mubr.f32.vlgmr.msra.gmra.mxu0 %v9755_v34  ;;  %v10259_v50 = vand.u32 4294901760, %v10258_v23  ;;  %v30362_v12 = vand.u32 4294901760, %v10627_v58 }
 0x3e6   :  { %9879 = vmatpush1.msra.mxu0 %v9799_v6  ;;  %9797 = vmatprep.subr.mxu1 %v9796_v1  ;;  %v30400_v22 = vand.u32 4294901760, %v10629_v14 }
 0x3e7   :  { %10030 = vmatprep.subr.mxu0 %v9794_v11  ;;  %9673 = vmatprep.mubr.f32.mxu1 %v33894_v0  ;;  %v10743_v42 = vsub.f32 %v10627_v58, %v30362_v12  ;;  %v10750_v11 = vand.u32 4294901760, %v10749_v21 }
 0x3e8   :  { %9912 = vmatprep.mubr.f32.mxu0 %v33894_v0  ;;  %9675 = vmatmul.mubr.f32.vlgmr.msra.gmra.mxu1 %v30247_v35  ;;  %v10260_v35 = vsub.f32 %v10258_v23, %v10259_v50  ;;  %v11208_v45 = vsub.f32 %v10629_v14, %v30400_v22 }
 0x3e9   :  { %9803 = vmatpush1.msra.mxu1 %v9802_v26  ;;  %9915 = vmatmul.mubr.f32.vlgmr.msra.gmra.mxu0 %v30296_v57  ;;  %v10751_v41 = vsub.f32 %v10749_v21, %v10750_v11  ;;  %v33904_v26 = vld [vmem:[#allocation9_spill] sm:$0xff] }
 0x3ea   :  { %10034 = vmatpush1.msra.mxu0 %v9800_v19  ;;  %9952 = vmatprep.subr.mxu1 %v30292_v37  ;;  %v10261_v25 = vand.u32 4294901760, %v10260_v35  ;;  %v30410_v19 = vand.u32 4294901760, %v10628_v33  ;;  %v11580_v56 = vmul.f32 %v33904_v26, %v11579_v16  ;;  %v30519_v16 = vand.u32 4294901760, %v30171_v36 }
 0x3eb   :  { %10180 = vmatprep.subr.mxu0 %v30324_v28  ;;  %9836 = vmatprep.mubr.f32.mxu1 %v33894_v0 }
 0x3ec   :  { %10067 = vmatprep.mubr.f32.mxu0 %v33894_v0  ;;  %9838 = vmatmul.mubr.f32.vlgmr.msra.gmra.mxu1 %v30284_v49  ;;  %v30449_v35 = vand.u32 4294901760, %v11580_v56 }
 0x3ed   :  { %9954 = vmatpush1.msra.mxu1 %v30299_v2  ;;  %10069 = vmatmul.mubr.f32.vlgmr.msra.gmra.mxu0 %v30284_v49 }
 0x3ee   :  { %10182 = vmatpush1.msra.mxu0 %v30334_v39  ;;  %10106 = vmatprep.subr.mxu1 %v30292_v37  ;;  %v30383_v37 = vand.u32 4294901760, %v30369_v7  ;;  %v11703_v5 = vsub.f32 %v11580_v56, %v30449_v35 }
 0x3ef   :  { %10341 = vmatprep.subr.mxu0 %v10258_v23  ;;  %9987 = vmatprep.mubr.f32.mxu1 %v33894_v0  ;;  %v11214_v23 = vsub.f32 %v10628_v33, %v30410_v19 }
 0x3f0   :  { %10215 = vmatprep.mubr.f32.mxu0 %v33894_v0  ;;  %9991 = vmatmul.mubr.f32.vlgmr.msra.gmra.mxu1 %v30308_v55  ;;  %v10704_v6 = vsub.f32 %v30369_v7, %v30383_v37  ;;  %v11704_v33 = vand.u32 4294901760, %v11703_v5 }
 0x3f1   :  { %10108 = vmatpush1.msra.mxu1 %v30299_v2  ;;  %10221 = vmatmul.mubr.f32.vlgmr.msra.gmra.mxu0 %v9755_v34  ;;  %v10744_v2 = vand.u32 4294901760, %v10743_v42  ;;  %v11584_v34 = vld [vmem:[%s33640_s1 + $0x60] sm:$0xff]  ;;  %v11215_v58 = vand.u32 4294901760, %v11214_v23 }
 0x3f2   :  { %10344 = vmatpush1.msra.mxu0 %v10264_v46  ;;  %10262 = vmatprep.subr.mxu1 %v10261_v25  ;;  %v10705_v61 = vand.u32 4294901760, %v10704_v6  ;;  %v11586_v1 = vsel %vm120_vm0, %v11584_v34, 0  ;;  %v33906_v6 = vld [vmem:[#allocation12_spill] sm:$0xff] }
 0x3f3   :  { %10495 = vmatprep.subr.mxu0 %v10259_v50  ;;  %10141 = vmatprep.mubr.f32.mxu1 %v33894_v0  ;;  %v30432_v46 = vand.u32 4294901760, %v11586_v1  ;;  %v11216_v48 = vsub.f32 %v11214_v23, %v11215_v58 }
 0x3f4   :  { %10377 = vmatprep.mubr.f32.mxu0 %v33894_v0  ;;  %10143 = vmatmul.mubr.f32.vlgmr.msra.gmra.mxu1 %v30284_v49 }
 0x3f5   :  { %10268 = vmatpush1.msra.mxu1 %v10267_v44  ;;  %10380 = vmatmul.mubr.f32.vlgmr.msra.gmra.mxu0 %v30296_v57  ;;  %v10745_v57 = vsub.f32 %v10743_v42, %v10744_v2  ;;  %v30445_v62 = vsub.f32 %v11586_v1, %v30432_v46 }
 0x3f6   :  { %10499 = vmatpush1.msra.mxu0 %v10265_v63  ;;  %10417 = vmatprep.subr.mxu1 %v30324_v28  ;;  %v11573_v63 = vpop.permute.xlu1 %11572 }
 0x3f7   :  { %10665 = vmatprep.subr.mxu0 %v30362_v12  ;;  %10301 = vmatprep.mubr.f32.mxu1 %v33894_v0  ;;  %v10746_v47 = vand.u32 4294901760, %v10745_v57  ;;  %v11577_v44 = vsel %vm2954_vm1, %v30406_v24, %v11573_v63 }
 0x3f8   :  { %10532 = vmatprep.mubr.f32.mxu0 %v33894_v0  ;;  %10303 = vmatmul.mubr.f32.vlgmr.msra.gmra.mxu1 %v30284_v49 }
 0x3f9   :  { %10419 = vmatpush1.msra.mxu1 %v30334_v39  ;;  %10534 = vmatmul.mubr.f32.vlgmr.msra.gmra.mxu0 %v30284_v49 }
 0x3fa   :  { %10667 = vmatpush1.msra.mxu0 %v30373_v3  ;;  %10571 = vmatprep.subr.mxu1 %v30324_v28  ;;  %v11578_v28 = vsel %vm2954_vm1, %v11569_v9, %v30406_v24  ;;  %v11582_v9 = vmul.f32 %v33906_v6, %v11577_v44  ;;  %v11705_v24 = vsub.f32 %v11703_v5, %v11704_v33  ;;  %v13476_v44 = vld [vmem:[%s33640_s1 + $0x70] sm:$0xff] }
 0x3fb   :  { %10826 = vmatprep.subr.mxu0 %v10743_v42  ;;  %10452 = vmatprep.mubr.f32.mxu1 %v33894_v0  ;;  %v11581_v54 = vmul.f32 %v33903_v17, %v11578_v28  ;;  %v11576_v42 = vsel %vm2954_vm1, %v11573_v63, %v11575_v32 }
 0x3fc   :  { %10700 = vmatprep.mubr.f32.mxu0 %v33894_v0  ;;  %10456 = vmatmul.mubr.f32.vlgmr.msra.gmra.mxu1 %v30308_v55  ;;  %v10752_v55 = vand.u32 4294901760, %v10751_v41  ;;  %v11583_v14 = vmul.f32 %v33905_v52, %v11576_v42  ;;  %v12522_v41 = vld [vmem:[%s33640_s1 + $0x68] sm:$0xff]  ;;  %v11706_v32 = vand.u32 4294901760, %v11705_v24  ;;  %v30547_v42 = vpop.permute.xlu1 %13464 }
 0x3fd   :  { %10573 = vmatpush1.msra.mxu1 %v30334_v39  ;;  %10706 = vmatmul.mubr.f32.vlgmr.msra.gmra.mxu0 %v10705_v61  ;;  %v11209_v39 = vand.u32 4294901760, %v11208_v45  ;;  %v30438_v50 = vand.u32 4294901760, %v11581_v54 }
 0x3fe   :  { %10829 = vmatpush1.msra.mxu0 %v10749_v21  ;;  %10747 = vmatprep.subr.mxu1 %v10746_v47  ;;  %v11217_v21 = vand.u32 4294901760, %v11216_v48 }
 0x3ff   :  { %10980 = vmatprep.subr.mxu0 %v10744_v2  ;;  %10606 = vmatprep.mubr.f32.mxu1 %v33894_v0  ;;  %v11697_v25 = vsub.f32 %v11581_v54, %v30438_v50 }
 0x400   :  { %10862 = vmatprep.mubr.f32.mxu0 %v33894_v0  ;;  %10608 = vmatmul.mubr.f32.vlgmr.msra.gmra.mxu1 %v30284_v49  ;;  %v11210_v49 = vsub.f32 %v11208_v45, %v11209_v39 }
 0x401   :  { %10753 = vmatpush1.msra.mxu1 %v10752_v55  ;;  %10865 = vmatmul.mubr.f32.vlgmr.msra.gmra.mxu0 %v30369_v7 }
 0x402   :  { %10984 = vmatpush1.msra.mxu0 %v10750_v11  ;;  %10902 = vmatprep.subr.mxu1 %v30362_v12  ;;  %v11211_v30 = vand.u32 4294901760, %v11210_v49  ;;  %v30476_v11 = vand.u32 4294901760, %v11583_v14 }
 0x403   :  { %11130 = vmatprep.subr.mxu0 %v30400_v22  ;;  %10786 = vmatprep.mubr.f32.mxu1 %v33894_v0 }
 0x404   :  { %11017 = vmatprep.mubr.f32.mxu0 %v33894_v0  ;;  %10788 = vmatmul.mubr.f32.vlgmr.msra.gmra.mxu1 %v30356_v18  ;;  %v12162_v47 = vsub.f32 %v11583_v14, %v30476_v11 }
 0x405   :  { %10904 = vmatpush1.msra.mxu1 %v30373_v3  ;;  %11019 = vmatmul.mubr.f32.vlgmr.msra.gmra.mxu0 %v30356_v18 }
 0x406   :  { %11132 = vmatpush1.msra.mxu0 %v30410_v19  ;;  %11056 = vmatprep.subr.mxu1 %v30362_v12  ;;  %v30459_v12 = vand.u32 4294901760, %v30445_v62 }
 0x407   :  { %11291 = vmatprep.subr.mxu0 %v11208_v45  ;;  %10937 = vmatprep.mubr.f32.mxu1 %v33894_v0 }
 0x408   :  { %11165 = vmatprep.mubr.f32.mxu0 %v33894_v0  ;;  %10941 = vmatmul.mubr.f32.vlgmr.msra.gmra.mxu1 %v30383_v37  ;;  %v11658_v2 = vsub.f32 %v30445_v62, %v30459_v12 }
 0x409   :  { %11058 = vmatpush1.msra.mxu1 %v30373_v3  ;;  %11171 = vmatmul.mubr.f32.vlgmr.msra.gmra.mxu0 %v10705_v61  ;;  %v11698_v3 = vand.u32 4294901760, %v11697_v25  ;;  %v30484_v61 = vand.u32 4294901760, %v11582_v9 }
 0x40a   :  { %11294 = vmatpush1.msra.mxu0 %v11214_v23  ;;  %11212 = vmatprep.subr.mxu1 %v11211_v30  ;;  %v11659_v57 = vand.u32 4294901760, %v11658_v2 }
 0x40b   :  { %11445 = vmatprep.subr.mxu0 %v11209_v39  ;;  %11091 = vmatprep.mubr.f32.mxu1 %v33894_v0  ;;  %v12168_v45 = vsub.f32 %v11582_v9, %v30484_v61 }
 0x40c   :  { %11327 = vmatprep.mubr.f32.mxu0 %v33894_v0  ;;  %11093 = vmatmul.mubr.f32.vlgmr.msra.gmra.mxu1 %v30356_v18 }
 0x40d   :  { %11218 = vmatpush1.msra.mxu1 %v11217_v21  ;;  %11330 = vmatmul.mubr.f32.vlgmr.msra.gmra.mxu0 %v30369_v7  ;;  %v11699_v7 = vsub.f32 %v11697_v25, %v11698_v3  ;;  %v12169_v28 = vand.u32 4294901760, %v12168_v45  ;;  %v30553_v21 = vand.u32 4294901760, %v30189_v10 }
 0x40e   :  { %11449 = vmatpush1.msra.mxu0 %v11215_v58  ;;  %11367 = vmatprep.subr.mxu1 %v30400_v22 }
 0x40f   :  { %11619 = vmatprep.subr.mxu0 %v30438_v50  ;;  %11251 = vmatprep.mubr.f32.mxu1 %v33894_v0  ;;  %v11700_v34 = vand.u32 4294901760, %v11699_v7  ;;  %v12170_v55 = vsub.f32 %v12168_v45, %v12169_v28 }
 0x410   :  { %11482 = vmatprep.mubr.f32.mxu0 %v33894_v0  ;;  %11253 = vmatmul.mubr.f32.vlgmr.msra.gmra.mxu1 %v30356_v18 }
 0x411   :  { %11369 = vmatpush1.msra.mxu1 %v30410_v19  ;;  %11484 = vmatmul.mubr.f32.vlgmr.msra.gmra.mxu0 %v30356_v18  ;;  %v12171_v58 = vand.u32 4294901760, %v12170_v55 }
 0x412   :  { %11621 = vmatpush1.msra.mxu0 %v30449_v35  ;;  %11521 = vmatprep.subr.mxu1 %v30400_v22  ;;  %v12524_v22 = vsel %vm120_vm0, %v12522_v41, 0 }
 0x413   :  { %11780 = vmatprep.subr.mxu0 %v11697_v25  ;;  %11402 = vmatprep.mubr.f32.mxu1 %v33894_v0  ;;  %v30543_v25 = vand.u32 4294901760, %v30173_v20 }
 0x414   :  { %11654 = vmatprep.mubr.f32.mxu0 %v33894_v0  ;;  %11406 = vmatmul.mubr.f32.vlgmr.msra.gmra.mxu1 %v30383_v37  ;;  %v12163_v37 = vand.u32 4294901760, %v12162_v47 }
 0x415   :  { %11523 = vmatpush1.msra.mxu1 %v30410_v19  ;;  %11660 = vmatmul.mubr.f32.vlgmr.msra.gmra.mxu0 %v11659_v57  ;;  %v30500_v19 = vand.u32 4294901760, %v12524_v22 }
 0x416   :  { %11783 = vmatpush1.msra.mxu0 %v11703_v5  ;;  %11701 = vmatprep.subr.mxu1 %v11700_v34  ;;  %v12164_v1 = vsub.f32 %v12162_v47, %v12163_v37  ;;  %v33908_v34 = vld [vmem:[#allocation17_spill] sm:$0xff] }
 0x417   :  { %11934 = vmatprep.subr.mxu0 %v11698_v3  ;;  %11556 = vmatprep.mubr.f32.mxu1 %v33894_v0  ;;  %v30513_v23 = vsub.f32 %v12524_v22, %v30500_v19  ;;  %v13100_v3 = vsub.f32 %v30173_v20, %v30543_v25 }
 0x418   :  { %11816 = vmatprep.mubr.f32.mxu0 %v33894_v0  ;;  %11558 = vmatmul.mubr.f32.vlgmr.msra.gmra.mxu1 %v30356_v18  ;;  %v30508_v18 = vand.u32 4294901760, %v30179_v8  ;;  %v12165_v54 = vand.u32 4294901760, %v12164_v1 }
 0x419   :  { %11707 = vmatpush1.msra.mxu1 %v11706_v32  ;;  %11819 = vmatmul.mubr.f32.vlgmr.msra.gmra.mxu0 %v30445_v62  ;;  %v30527_v56 = vand.u32 4294901760, %v30513_v23 }
 0x41a   :  { %11938 = vmatpush1.msra.mxu0 %v11704_v33  ;;  %11856 = vmatprep.subr.mxu1 %v30438_v50  ;;  %v12635_v39 = vsub.f32 %v30179_v8, %v30508_v18  ;;  %v13478_v33 = vsel %vm120_vm0, %v13476_v44, 0 }
 0x41b   :  { %12084 = vmatprep.subr.mxu0 %v30476_v11  ;;  %11740 = vmatprep.mubr.f32.mxu1 %v33894_v0  ;;  %v12596_v63 = vsub.f32 %v30513_v23, %v30527_v56  ;;  %v30576_v41 = vand.u32 4294901760, %v13478_v33 }
 0x41c   :  { %11971 = vmatprep.mubr.f32.mxu0 %v33894_v0  ;;  %11742 = vmatmul.mubr.f32.vlgmr.msra.gmra.mxu1 %v30432_v46  ;;  %v12636_v49 = vand.u32 4294901760, %v12635_v39 }
 0x41d   :  { %11858 = vmatpush1.msra.mxu1 %v30449_v35  ;;  %11973 = vmatmul.mubr.f32.vlgmr.msra.gmra.mxu0 %v30432_v46  ;;  %v30589_v32 = vsub.f32 %v13478_v33, %v30576_v41  ;;  %v14430_v33 = vld [vmem:[%s33640_s1 + $0x78] sm:$0xff] }
 0x41e   :  { %12086 = vmatpush1.msra.mxu0 %v30484_v61  ;;  %12010 = vmatprep.subr.mxu1 %v30438_v50  ;;  %v12641_v50 = vsub.f32 %v30171_v36, %v30519_v16  ;;  %v12637_v30 = vsub.f32 %v12635_v39, %v12636_v49 }
 0x41f   :  { %12245 = vmatprep.subr.mxu0 %v12162_v47  ;;  %11891 = vmatprep.mubr.f32.mxu1 %v33894_v0 }
 0x420   :  { %12119 = vmatprep.mubr.f32.mxu0 %v33894_v0  ;;  %11895 = vmatmul.mubr.f32.vlgmr.msra.gmra.mxu1 %v30459_v12  ;;  %v12642_v48 = vand.u32 4294901760, %v12641_v50  ;;  %v12638_v14 = vand.u32 4294901760, %v12637_v30 }
 0x421   :  { %12012 = vmatpush1.msra.mxu1 %v30449_v35  ;;  %12125 = vmatmul.mubr.f32.vlgmr.msra.gmra.mxu0 %v11659_v57  ;;  %v13463_v35 = vpop.permute.xlu0 %13462  ;;  %v33907_v57 = vld [vmem:[#allocation15_spill] sm:$0xff] }
 0x422   :  { %12248 = vmatpush1.msra.mxu0 %v12168_v45  ;;  %12166 = vmatprep.subr.mxu1 %v12165_v54  ;;  %v12643_v5 = vsub.f32 %v12641_v50, %v12642_v48  ;;  %v13469_v9 = vsel %vm4847_vm3, %v13463_v35, %v30547_v42 }
 0x423   :  { %12399 = vmatprep.subr.mxu0 %v12163_v37  ;;  %12045 = vmatprep.mubr.f32.mxu1 %v33894_v0  ;;  %v13473_v24 = vmul.f32 %v33907_v57, %v13469_v9  ;;  %v13467_v37 = vpop.permute.xlu1 %13466 }
 0x424   :  { %12281 = vmatprep.mubr.f32.mxu0 %v33894_v0  ;;  %12047 = vmatmul.mubr.f32.vlgmr.msra.gmra.mxu1 %v30432_v46 }
 0x425   :  { %12172 = vmatpush1.msra.mxu1 %v12171_v58  ;;  %12284 = vmatmul.mubr.f32.vlgmr.msra.gmra.mxu0 %v30445_v62  ;;  %v12597_v62 = vand.u32 4294901760, %v12596_v63  ;;  %v13461_v2 = vpop.permute.xlu0 %13460  ;;  %v30582_v45 = vand.u32 4294901760, %v13473_v24  ;;  %v33909_v63 = vld [vmem:[#allocation19_spill] sm:$0xff] }
 0x426   :  { %12403 = vmatpush1.msra.mxu0 %v12169_v28  ;;  %12321 = vmatprep.subr.mxu1 %v30476_v11  ;;  %v13470_v7 = vsel %vm4847_vm3, %v13461_v2, %v13463_v35 }
 0x427   :  { %12557 = vmatprep.subr.mxu0 %v30508_v18  ;;  %12205 = vmatprep.mubr.f32.mxu1 %v33894_v0  ;;  %v13472_v47 = vmul.f32 %v33908_v34, %v13470_v7  ;;  %v13589_v54 = vsub.f32 %v13473_v24, %v30582_v45  ;;  %v14432_v24 = vsel %vm120_vm0, %v14430_v33, 0 }
 0x428   :  { %12436 = vmatprep.mubr.f32.mxu0 %v33894_v0  ;;  %12207 = vmatmul.mubr.f32.vlgmr.msra.gmra.mxu1 %v30432_v46 }
 0x429   :  { %12323 = vmatpush1.msra.mxu1 %v30484_v61  ;;  %12438 = vmatmul.mubr.f32.vlgmr.msra.gmra.mxu0 %v30432_v46  ;;  %v30593_v28 = vand.u32 4294901760, %v13472_v47  ;;  %v14417_v30 = vpop.permute.xlu0 %14416 }
 0x42a   :  { %12559 = vmatpush1.msra.mxu0 %v30519_v16  ;;  %12475 = vmatprep.subr.mxu1 %v30476_v11  ;;  %v13106_v11 = vsub.f32 %v30189_v10, %v30553_v21 }
 0x42b   :  { %12718 = vmatprep.subr.mxu0 %v12635_v39  ;;  %12356 = vmatprep.mubr.f32.mxu1 %v33894_v0  ;;  %v13471_v39 = vsel %vm4847_vm3, %v13467_v37, %v13461_v2  ;;  %v13595_v58 = vsub.f32 %v13472_v47, %v30593_v28 }
 0x42c   :  { %12592 = vmatprep.mubr.f32.mxu0 %v33894_v0  ;;  %12360 = vmatmul.mubr.f32.vlgmr.msra.gmra.mxu1 %v30459_v12  ;;  %v12644_v12 = vand.u32 4294901760, %v12643_v5  ;;  %v13107_v22 = vand.u32 4294901760, %v13106_v11  ;;  %v13475_v35 = vmul.f32 %v33909_v63, %v13471_v39 }
 0x42d   :  { %12477 = vmatpush1.msra.mxu1 %v30484_v61  ;;  %12598 = vmatmul.mubr.f32.vlgmr.msra.gmra.mxu0 %v12597_v62  ;;  %v13101_v61 = vand.u32 4294901760, %v13100_v3  ;;  %v14415_v7 = vpop.permute.xlu0 %14414 }
 0x42e   :  { %12721 = vmatpush1.msra.mxu0 %v12641_v50  ;;  %12639 = vmatprep.subr.mxu1 %v12638_v14  ;;  %v13108_v1 = vsub.f32 %v13106_v11, %v13107_v22  ;;  %v30620_v44 = vand.u32 4294901760, %v13475_v35  ;;  %v14424_v47 = vsel %vm5802_vm6, %v14415_v7, %v14417_v30 }
 0x42f   :  { %12872 = vmatprep.subr.mxu0 %v12636_v49  ;;  %12510 = vmatprep.mubr.f32.mxu1 %v33894_v0  ;;  %v13468_v49 = vsel %vm4847_vm3, %v30547_v42, %v13467_v37  ;;  %v13596_v42 = vand.u32 4294901760, %v13595_v58  ;;  %v30652_v37 = vand.u32 4294901760, %v14432_v24 }
 0x430   :  { %12754 = vmatprep.mubr.f32.mxu0 %v33894_v0  ;;  %12512 = vmatmul.mubr.f32.vlgmr.msra.gmra.mxu1 %v30432_v46  ;;  %v13102_v46 = vsub.f32 %v13100_v3, %v13101_v61  ;;  %v13109_v50 = vand.u32 4294901760, %v13108_v1  ;;  %v33912_v1 = vld [vmem:[#allocation42_spill] sm:$0xff] }
 0x431   :  { %12645 = vmatpush1.msra.mxu1 %v12644_v12  ;;  %12757 = vmatmul.mubr.f32.vlgmr.msra.gmra.mxu0 %v30513_v23  ;;  %v13597_v9 = vsub.f32 %v13595_v58, %v13596_v42 }
 0x432   :  { %12876 = vmatpush1.msra.mxu0 %v12642_v48  ;;  %12794 = vmatprep.subr.mxu1 %v30508_v18  ;;  %v13103_v55 = vand.u32 4294901760, %v13102_v46 }
 0x433   :  { %13022 = vmatprep.subr.mxu0 %v30543_v25  ;;  %12678 = vmatprep.mubr.f32.mxu1 %v33894_v0 }
 0x434   :  { %12909 = vmatprep.mubr.f32.mxu0 %v33894_v0  ;;  %12680 = vmatmul.mubr.f32.vlgmr.msra.gmra.mxu1 %v30500_v19 }
 0x435   :  { %12796 = vmatpush1.msra.mxu1 %v30519_v16  ;;  %12911 = vmatmul.mubr.f32.vlgmr.msra.gmra.mxu0 %v30500_v19 }
 0x436   :  { %13024 = vmatpush1.msra.mxu0 %v30553_v21  ;;  %12948 = vmatprep.subr.mxu1 %v30508_v18  ;;  %v30603_v18 = vand.u32 4294901760, %v30589_v32 }
 0x437   :  { %13183 = vmatprep.subr.mxu0 %v13100_v3  ;;  %12829 = vmatprep.mubr.f32.mxu1 %v33894_v0  ;;  %v30626_v3 = vpop.permute.xlu1 %14418 }
 0x438   :  { %13057 = vmatprep.mubr.f32.mxu0 %v33894_v0  ;;  %12833 = vmatmul.mubr.f32.vlgmr.msra.gmra.mxu1 %v30527_v56  ;;  %v13550_v48 = vsub.f32 %v30589_v32, %v30603_v18 }
 0x439   :  { %12950 = vmatpush1.msra.mxu1 %v30519_v16  ;;  %13063 = vmatmul.mubr.f32.vlgmr.msra.gmra.mxu0 %v12597_v62  ;;  %v13590_v16 = vand.u32 4294901760, %v13589_v54  ;;  %v33910_v62 = vld [vmem:[#allocation20_spill] sm:$0xff] }
 0x43a   :  { %13186 = vmatpush1.msra.mxu0 %v13106_v11  ;;  %13104 = vmatprep.subr.mxu1 %v13103_v55  ;;  %v13474_v5 = vmul.f32 %v33910_v62, %v13468_v49  ;;  %v13551_v14 = vand.u32 4294901760, %v13550_v48  ;;  %v14054_v11 = vsub.f32 %v13475_v35, %v30620_v44  ;;  %v14426_v55 = vmul.f32 %v14424_v47, %v33912_v1 }
 0x43b   :  { %13337 = vmatprep.subr.mxu0 %v13101_v61  ;;  %12983 = vmatprep.mubr.f32.mxu1 %v33894_v0 }
 0x43c   :  { %13219 = vmatprep.mubr.f32.mxu0 %v33894_v0  ;;  %12985 = vmatmul.mubr.f32.vlgmr.msra.gmra.mxu1 %v30500_v19  ;;  %v30630_v2 = vand.u32 4294901760, %v13474_v5  ;;  %v30669_v49 = vand.u32 4294901760, %v14426_v55 }
 0x43d   :  { %13110 = vmatpush1.msra.mxu1 %v13109_v50  ;;  %13222 = vmatmul.mubr.f32.vlgmr.msra.gmra.mxu0 %v30513_v23  ;;  %v13591_v23 = vsub.f32 %v13589_v54, %v13590_v16  ;;  %v14421_v50 = vpop.permute.xlu1 %14420 }
 0x43e   :  { %13341 = vmatpush1.msra.mxu0 %v13107_v22  ;;  %13259 = vmatprep.subr.mxu1 %v30543_v25  ;;  %v14060_v61 = vsub.f32 %v13474_v5, %v30630_v2  ;;  %v33911_v22 = vld [vmem:[#allocation40_spill] sm:$0xff]  ;;  %v14549_v5 = vsub.f32 %v14426_v55, %v30669_v49 }
 0x43f   :  { %13511 = vmatprep.subr.mxu0 %v30582_v45  ;;  %13143 = vmatprep.mubr.f32.mxu1 %v33894_v0  ;;  %v13592_v12 = vand.u32 4294901760, %v13591_v23  ;;  %v14422_v23 = vsel %vm5802_vm6, %v30626_v3, %v14421_v50 }
 0x440   :  { %13374 = vmatprep.mubr.f32.mxu0 %v33894_v0  ;;  %13145 = vmatmul.mubr.f32.vlgmr.msra.gmra.mxu1 %v30500_v19 }
 0x441   :  { %13261 = vmatpush1.msra.mxu1 %v30553_v21  ;;  %13376 = vmatmul.mubr.f32.vlgmr.msra.gmra.mxu0 %v30500_v19 }
 0x442   :  { %13513 = vmatpush1.msra.mxu0 %v30593_v28  ;;  %13413 = vmatprep.subr.mxu1 %v30543_v25  ;;  %v14423_v25 = vsel %vm5802_vm6, %v14417_v30, %v30626_v3  ;;  %v14425_v30 = vsel %vm5802_vm6, %v14421_v50, %v14415_v7  ;;  %v14550_v3 = vand.u32 4294901760, %v14549_v5 }
 0x443   :  { %13672 = vmatprep.subr.mxu0 %v13589_v54  ;;  %13294 = vmatprep.mubr.f32.mxu1 %v33894_v0  ;;  %v14427_v46 = vmul.f32 %v14423_v25, %v33911_v22  ;;  %v14061_v54 = vand.u32 4294901760, %v14060_v61 }
 0x444   :  { %13546 = vmatprep.mubr.f32.mxu0 %v33894_v0  ;;  %13298 = vmatmul.mubr.f32.vlgmr.msra.gmra.mxu1 %v30527_v56  ;;  %v13598_v56 = vand.u32 4294901760, %v13597_v9  ;;  %v33913_v9 = vld [vmem:[#allocation45_spill] sm:$0xff]  ;;  %v14551_v47 = vsub.f32 %v14549_v5, %v14550_v3 }
 0x445   :  { %13415 = vmatpush1.msra.mxu1 %v30553_v21  ;;  %13552 = vmatmul.mubr.f32.vlgmr.msra.gmra.mxu0 %v13551_v14  ;;  %v14055_v21 = vand.u32 4294901760, %v14054_v11  ;;  %v30658_v39 = vand.u32 4294901760, %v14427_v46  ;;  %v14062_v35 = vsub.f32 %v14060_v61, %v14061_v54  ;;  %v14429_v33 = vmul.f32 %v14425_v30, %v33913_v9 }
 0x446   :  { %13675 = vmatpush1.msra.mxu0 %v13595_v58  ;;  %13593 = vmatprep.subr.mxu1 %v13592_v12  ;;  %v30665_v58 = vsub.f32 %v14432_v24, %v30652_v37  ;;  %v15371_v12 = vpop.permute.xlu0 %15370 }
 0x447   :  { %13826 = vmatprep.subr.mxu0 %v13590_v16  ;;  %13448 = vmatprep.mubr.f32.mxu1 %v33894_v0  ;;  %v14543_v48 = vsub.f32 %v14427_v46, %v30658_v39  ;;  %v30696_v25 = vand.u32 4294901760, %v14429_v33  ;;  %v15384_v46 = vld [vmem:[%s33640_s1 + $0x80] sm:$0xff] }
 0x448   :  { %13708 = vmatprep.mubr.f32.mxu0 %v33894_v0  ;;  %13450 = vmatmul.mubr.f32.vlgmr.msra.gmra.mxu1 %v30500_v19  ;;  %v14056_v19 = vsub.f32 %v14054_v11, %v14055_v21 }
 0x449   :  { %13599 = vmatpush1.msra.mxu1 %v13598_v56  ;;  %13711 = vmatmul.mubr.f32.vlgmr.msra.gmra.mxu0 %v30589_v32  ;;  %v15008_v55 = vsub.f32 %v14429_v33, %v30696_v25 }
 0x44a   :  { %13830 = vmatpush1.msra.mxu0 %v13596_v42  ;;  %13748 = vmatprep.subr.mxu1 %v30582_v45  ;;  %v14057_v16 = vand.u32 4294901760, %v14056_v19  ;;  %v14063_v42 = vand.u32 4294901760, %v14062_v35  ;;  %v15386_v19 = vsel %vm120_vm0, %v15384_v46, 0 }
 0x44b   :  { %13976 = vmatprep.subr.mxu0 %v30620_v44  ;;  %13632 = vmatprep.mubr.f32.mxu1 %v33894_v0  ;;  %v30728_v30 = vand.u32 4294901760, %v15386_v19 }
 0x44c   :  { %13863 = vmatprep.mubr.f32.mxu0 %v33894_v0  ;;  %13634 = vmatmul.mubr.f32.vlgmr.msra.gmra.mxu1 %v30576_v41 }
 0x44d   :  { %13750 = vmatpush1.msra.mxu1 %v30593_v28  ;;  %13865 = vmatmul.mubr.f32.vlgmr.msra.gmra.mxu0 %v30576_v41 }
 0x44e   :  { %13978 = vmatpush1.msra.mxu0 %v30630_v2  ;;  %13902 = vmatprep.subr.mxu1 %v30582_v45  ;;  %v30679_v45 = vand.u32 4294901760, %v30665_v58 }
 0x44f   :  { %14137 = vmatprep.subr.mxu0 %v14054_v11  ;;  %13783 = vmatprep.mubr.f32.mxu1 %v33894_v0  ;;  %v33914_v11 = vld [vmem:[#allocation46_spill] sm:$0xff] }
 0x450   :  { %14011 = vmatprep.mubr.f32.mxu0 %v33894_v0  ;;  %13787 = vmatmul.mubr.f32.vlgmr.msra.gmra.mxu1 %v30603_v18  ;;  %v14428_v7 = vmul.f32 %v14422_v23, %v33914_v11 }
 0x451   :  { %13904 = vmatpush1.msra.mxu1 %v30593_v28  ;;  %14017 = vmatmul.mubr.f32.vlgmr.msra.gmra.mxu0 %v13551_v14  ;;  %v14544_v28 = vand.u32 4294901760, %v14543_v48  ;;  %v14504_v14 = vsub.f32 %v30665_v58, %v30679_v45 }
 0x452   :  { %14140 = vmatpush1.msra.mxu0 %v14060_v61  ;;  %14058 = vmatprep.subr.mxu1 %v14057_v16  ;;  %v30702_v61 = vpop.permute.xlu1 %15372  ;;  %v30706_v56 = vand.u32 4294901760, %v14428_v7  ;;  %v33915_v16 = vld [vmem:[#allocation39_spill] sm:$0xff] }
 0x453   :  { %14291 = vmatprep.subr.mxu0 %v14055_v21  ;;  %13937 = vmatprep.mubr.f32.mxu1 %v33894_v0  ;;  %v14505_v24 = vand.u32 4294901760, %v14504_v14 }
 0x454   :  { %14173 = vmatprep.mubr.f32.mxu0 %v33894_v0  ;;  %13939 = vmatmul.mubr.f32.vlgmr.msra.gmra.mxu1 %v30576_v41  ;;  %v15014_v50 = vsub.f32 %v14428_v7, %v30706_v56 }
 0x455   :  { %14064 = vmatpush1.msra.mxu1 %v14063_v42  ;;  %14176 = vmatmul.mubr.f32.vlgmr.msra.gmra.mxu0 %v30589_v32  ;;  %v14545_v32 = vsub.f32 %v14543_v48, %v14544_v28 }
 0x456   :  { %14295 = vmatpush1.msra.mxu0 %v14061_v54  ;;  %14213 = vmatprep.subr.mxu1 %v30620_v44  ;;  %v15369_v54 = vpop.permute.xlu0 %15368  ;;  %v15015_v23 = vand.u32 4294901760, %v15014_v50  ;;  %v15375_v14 = vpop.permute.xlu1 %15374 }
 0x457   :  { %14465 = vmatprep.subr.mxu0 %v30658_v39  ;;  %14097 = vmatprep.mubr.f32.mxu1 %v33894_v0  ;;  %v14546_v21 = vand.u32 4294901760, %v14545_v32  ;;  %v15378_v35 = vsel %vm6761_vm10, %v15369_v54, %v15371_v12 }
 0x458   :  { %14328 = vmatprep.mubr.f32.mxu0 %v33894_v0  ;;  %14099 = vmatmul.mubr.f32.vlgmr.msra.gmra.mxu1 %v30576_v41  ;;  %v15016_v7 = vsub.f32 %v15014_v50, %v15015_v23 }
 0x459   :  { %14215 = vmatpush1.msra.mxu1 %v30630_v2  ;;  %14330 = vmatmul.mubr.f32.vlgmr.msra.gmra.mxu0 %v30576_v41 }
 0x45a   :  { %14467 = vmatpush1.msra.mxu0 %v30669_v49  ;;  %14367 = vmatprep.subr.mxu1 %v30620_v44  ;;  %v15377_v44 = vsel %vm6761_vm10, %v15371_v12, %v30702_v61 }
 0x45b   :  { %14626 = vmatprep.subr.mxu0 %v14543_v48  ;;  %14248 = vmatprep.mubr.f32.mxu1 %v33894_v0  ;;  %v15381_v48 = vmul.f32 %v33915_v16, %v15377_v44  ;;  %v33917_v44 = vld [vmem:[#allocation43_spill] sm:$0xff] }
 0x45c   :  { %14500 = vmatprep.mubr.f32.mxu0 %v33894_v0  ;;  %14252 = vmatmul.mubr.f32.vlgmr.msra.gmra.mxu1 %v30603_v18  ;;  %v14552_v18 = vand.u32 4294901760, %v14551_v47  ;;  %v15379_v47 = vsel %vm6761_vm10, %v15375_v14, %v15369_v54 }
 0x45d   :  { %14369 = vmatpush1.msra.mxu1 %v30630_v2  ;;  %14506 = vmatmul.mubr.f32.vlgmr.msra.gmra.mxu0 %v14505_v24  ;;  %v15009_v2 = vand.u32 4294901760, %v15008_v55  ;;  %v30734_v33 = vand.u32 4294901760, %v15381_v48  ;;  %v15383_v54 = vmul.f32 %v33917_v44, %v15379_v47 }
 0x45e   :  { %14629 = vmatpush1.msra.mxu0 %v14549_v5  ;;  %14547 = vmatprep.subr.mxu1 %v14546_v21  ;;  %v33916_v5 = vld [vmem:[#allocation41_spill] sm:$0xff]  ;;  %v15017_v21 = vand.u32 4294901760, %v15016_v7 }
 0x45f   :  { %14780 = vmatprep.subr.mxu0 %v14544_v28  ;;  %14402 = vmatprep.mubr.f32.mxu1 %v33894_v0  ;;  %v15380_v42 = vmul.f32 %v33916_v5, %v15378_v35  ;;  %v30741_v28 = vsub.f32 %v15386_v19, %v30728_v30  ;;  %v15497_v32 = vsub.f32 %v15381_v48, %v30734_v33  ;;  %v30772_v35 = vand.u32 4294901760, %v15383_v54 }
 0x460   :  { %14662 = vmatprep.mubr.f32.mxu0 %v33894_v0  ;;  %14404 = vmatmul.mubr.f32.vlgmr.msra.gmra.mxu1 %v30576_v41  ;;  %v15010_v41 = vsub.f32 %v15008_v55, %v15009_v2 }
 0x461   :  { %14553 = vmatpush1.msra.mxu1 %v14552_v18  ;;  %14665 = vmatmul.mubr.f32.vlgmr.msra.gmra.mxu0 %v30665_v58  ;;  %v30745_v12 = vand.u32 4294901760, %v15380_v42  ;;  %v33918_v18 = vld [vmem:[#allocation44_spill] sm:$0xff]  ;;  %v15962_v7 = vsub.f32 %v15383_v54, %v30772_v35 }
 0x462   :  { %14784 = vmatpush1.msra.mxu0 %v14550_v3  ;;  %14702 = vmatprep.subr.mxu1 %v30658_v39  ;;  %v15011_v3 = vand.u32 4294901760, %v15010_v41  ;;  %v16338_v41 = vld [vmem:[%s33640_s1 + $0x88] sm:$0xff] }
 0x463   :  { %14930 = vmatprep.subr.mxu0 %v30696_v25  ;;  %14586 = vmatprep.mubr.f32.mxu1 %v33894_v0  ;;  %v15503_v46 = vsub.f32 %v15380_v42, %v30745_v12 }
 0x464   :  { %14817 = vmatprep.mubr.f32.mxu0 %v33894_v0  ;;  %14588 = vmatmul.mubr.f32.vlgmr.msra.gmra.mxu1 %v30652_v37 }
 0x465   :  { %14704 = vmatpush1.msra.mxu1 %v30669_v49  ;;  %14819 = vmatmul.mubr.f32.vlgmr.msra.gmra.mxu0 %v30652_v37  ;;  %v15504_v19 = vand.u32 4294901760, %v15503_v46 }
 0x466   :  { %14932 = vmatpush1.msra.mxu0 %v30706_v56  ;;  %14856 = vmatprep.subr.mxu1 %v30658_v39  ;;  %v30755_v39 = vand.u32 4294901760, %v30741_v28 }
 0x467   :  { %15091 = vmatprep.subr.mxu0 %v15008_v55  ;;  %14737 = vmatprep.mubr.f32.mxu1 %v33894_v0  ;;  %v15376_v55 = vsel %vm6761_vm10, %v30702_v61, %v15375_v14 }
 0x468   :  { %14965 = vmatprep.mubr.f32.mxu0 %v33894_v0  ;;  %14741 = vmatmul.mubr.f32.vlgmr.msra.gmra.mxu1 %v30679_v45  ;;  %v15382_v61 = vmul.f32 %v33918_v18, %v15376_v55  ;;  %v33919_v55 = vld [vmem:[#allocation47_spill] sm:$0xff] }
 0x469   :  { %14858 = vmatpush1.msra.mxu1 %v30669_v49  ;;  %14971 = vmatmul.mubr.f32.vlgmr.msra.gmra.mxu0 %v14505_v24  ;;  %v15498_v49 = vand.u32 4294901760, %v15497_v32  ;;  %v15458_v24 = vsub.f32 %v30741_v28, %v30755_v39 }
 0x46a   :  { %15094 = vmatpush1.msra.mxu0 %v15014_v50  ;;  %15012 = vmatprep.subr.mxu1 %v15011_v3  ;;  %v16325_v50 = vpop.permute.xlu0 %16324  ;;  %v30782_v42 = vand.u32 4294901760, %v15382_v61 }
 0x46b   :  { %15245 = vmatprep.subr.mxu0 %v15009_v2  ;;  %14891 = vmatprep.mubr.f32.mxu1 %v33894_v0  ;;  %v15459_v48 = vand.u32 4294901760, %v15458_v24  ;;  %v30778_v2 = vpop.permute.xlu1 %16326 }
 0x46c   :  { %15127 = vmatprep.mubr.f32.mxu0 %v33894_v0  ;;  %14893 = vmatmul.mubr.f32.vlgmr.msra.gmra.mxu1 %v30652_v37  ;;  %v15968_v47 = vsub.f32 %v15382_v61, %v30782_v42 }
 0x46d   :  { %15018 = vmatpush1.msra.mxu1 %v15017_v21  ;;  %15130 = vmatmul.mubr.f32.vlgmr.msra.gmra.mxu0 %v30665_v58  ;;  %v15499_v58 = vsub.f32 %v15497_v32, %v15498_v49 }
 0x46e   :  { %15249 = vmatpush1.msra.mxu0 %v15015_v23  ;;  %15167 = vmatprep.subr.mxu1 %v30696_v25  ;;  %v15505_v23 = vsub.f32 %v15503_v46, %v15504_v19  ;;  %v16323_v3 = vpop.permute.xlu0 %16322  ;;  %v15969_v61 = vand.u32 4294901760, %v15968_v47 }
 0x46f   :  { %15419 = vmatprep.subr.mxu0 %v30734_v33  ;;  %15051 = vmatprep.mubr.f32.mxu1 %v33894_v0  ;;  %v15500_v14 = vand.u32 4294901760, %v15499_v58  ;;  %v16332_v21 = vsel %vm7716_vm11, %v16323_v3, %v16325_v50  ;;  %v16329_v58 = vpop.permute.xlu1 %16328 }
 0x470   :  { %15282 = vmatprep.mubr.f32.mxu0 %v33894_v0  ;;  %15053 = vmatmul.mubr.f32.vlgmr.msra.gmra.mxu1 %v30652_v37 }
 0x471   :  { %15169 = vmatpush1.msra.mxu1 %v30706_v56  ;;  %15284 = vmatmul.mubr.f32.vlgmr.msra.gmra.mxu0 %v30652_v37 }
 0x472   :  { %15421 = vmatpush1.msra.mxu0 %v30745_v12  ;;  %15321 = vmatprep.subr.mxu1 %v30696_v25  ;;  %v16331_v25 = vsel %vm7716_vm11, %v16325_v50, %v30778_v2 }
 0x473   :  { %15580 = vmatprep.subr.mxu0 %v15497_v32  ;;  %15202 = vmatprep.mubr.f32.mxu1 %v33894_v0  ;;  %v16340_v32 = vsel %vm120_vm0, %v16338_v41, 0  ;;  %v16335_v54 = vmul.f32 %v16331_v25, %v33919_v55  ;;  %v15970_v41 = vsub.f32 %v15968_v47, %v15969_v61 }
 0x474   :  { %15454 = vmatprep.mubr.f32.mxu0 %v33894_v0  ;;  %15206 = vmatmul.mubr.f32.vlgmr.msra.gmra.mxu1 %v30679_v45  ;;  %v15506_v45 = vand.u32 4294901760, %v15505_v23 }
 0x475   :  { %15323 = vmatpush1.msra.mxu1 %v30706_v56  ;;  %15460 = vmatmul.mubr.f32.vlgmr.msra.gmra.mxu0 %v15459_v48  ;;  %v15963_v56 = vand.u32 4294901760, %v15962_v7  ;;  %v30810_v50 = vand.u32 4294901760, %v16335_v54 }
 0x476   :  { %15583 = vmatpush1.msra.mxu0 %v15503_v46  ;;  %15501 = vmatprep.subr.mxu1 %v15500_v14  ;;  %v30804_v46 = vand.u32 4294901760, %v16340_v32 }
 0x477   :  { %15734 = vmatprep.subr.mxu0 %v15498_v49  ;;  %15356 = vmatprep.mubr.f32.mxu1 %v33894_v0  ;;  %v33920_v49 = vld [vmem:[#allocation48_spill] sm:$0xff]  ;;  %v16451_v25 = vsub.f32 %v16335_v54, %v30810_v50  ;;  %v33921_v54 = vld [vmem:[#allocation49_spill] sm:$0xff] }
 0x478   :  { %15616 = vmatprep.mubr.f32.mxu0 %v33894_v0  ;;  %15358 = vmatmul.mubr.f32.vlgmr.msra.gmra.mxu1 %v30652_v37  ;;  %v16334_v24 = vmul.f32 %v16332_v21, %v33920_v49  ;;  %v15964_v37 = vsub.f32 %v15962_v7, %v15963_v56  ;;  %v16330_v21 = vsel %vm7716_vm11, %v30778_v2, %v16329_v58 }
 0x479   :  { %15507 = vmatpush1.msra.mxu1 %v15506_v45  ;;  %15619 = vmatmul.mubr.f32.vlgmr.msra.gmra.mxu0 %v30741_v28  ;;  %v15971_v45 = vand.u32 4294901760, %v15970_v41 }
 0x47a   :  { %15738 = vmatpush1.msra.mxu0 %v15504_v19  ;;  %15656 = vmatprep.subr.mxu1 %v30734_v33  ;;  %v30817_v19 = vsub.f32 %v16340_v32, %v30804_v46  ;;  %v30821_v23 = vand.u32 4294901760, %v16334_v24  ;;  %v15965_v14 = vand.u32 4294901760, %v15964_v37  ;;  %v16333_v32 = vsel %vm7716_vm11, %v16329_v58, %v16323_v3 }
 0x47b   :  { %15884 = vmatprep.subr.mxu0 %v30772_v35  ;;  %15540 = vmatprep.mubr.f32.mxu1 %v33894_v0  ;;  %v16337_v3 = vmul.f32 %v16333_v32, %v33921_v54 }
 0x47c   :  { %15771 = vmatprep.mubr.f32.mxu0 %v33894_v0  ;;  %15542 = vmatmul.mubr.f32.vlgmr.msra.gmra.mxu1 %v30728_v30 }
 0x47d   :  { %15658 = vmatpush1.msra.mxu1 %v30745_v12  ;;  %15773 = vmatmul.mubr.f32.vlgmr.msra.gmra.mxu0 %v30728_v30  ;;  %v30848_v2 = vand.u32 4294901760, %v16337_v3 }
 0x47e   :  { %15886 = vmatpush1.msra.mxu0 %v30782_v42  ;;  %15810 = vmatprep.subr.mxu1 %v30734_v33  ;;  %v30831_v33 = vand.u32 4294901760, %v30817_v19 }
 0x47f   :  { %16045 = vmatprep.subr.mxu0 %v15962_v7  ;;  %15691 = vmatprep.mubr.f32.mxu1 %v33894_v0  ;;  %v16457_v7 = vsub.f32 %v16334_v24, %v30821_v23  ;;  %v16916_v32 = vsub.f32 %v16337_v3, %v30848_v2 }
 0x480   :  { %15919 = vmatprep.mubr.f32.mxu0 %v33894_v0  ;;  %15695 = vmatmul.mubr.f32.vlgmr.msra.gmra.mxu1 %v30755_v39 }
 0x481   :  { %15812 = vmatpush1.msra.mxu1 %v30745_v12  ;;  %15925 = vmatmul.mubr.f32.vlgmr.msra.gmra.mxu0 %v15459_v48  ;;  %v16452_v12 = vand.u32 4294901760, %v16451_v25  ;;  %v16412_v48 = vsub.f32 %v30817_v19, %v30831_v33 }
 0x482   :  { %16048 = vmatpush1.msra.mxu0 %v15968_v47  ;;  %15966 = vmatprep.subr.mxu1 %v15965_v14  ;;  %v16458_v47 = vand.u32 4294901760, %v16457_v7 }
 0x483   :  { %16199 = vmatprep.subr.mxu0 %v15963_v56  ;;  %15845 = vmatprep.mubr.f32.mxu1 %v33894_v0  ;;  %v33922_v56 = vld [vmem:[#allocation50_spill] sm:$0xff] }
 0x484   :  { %16081 = vmatprep.mubr.f32.mxu0 %v33894_v0  ;;  %15847 = vmatmul.mubr.f32.vlgmr.msra.gmra.mxu1 %v30728_v30  ;;  %v16336_v24 = vmul.f32 %v16330_v21, %v33922_v56  ;;  %v16459_v58 = vsub.f32 %v16457_v7, %v16458_v47 }
 0x485   :  { %15972 = vmatpush1.msra.mxu1 %v15971_v45  ;;  %16084 = vmatmul.mubr.f32.vlgmr.msra.gmra.mxu0 %v30741_v28  ;;  %v16453_v28 = vsub.f32 %v16451_v25, %v16452_v12 }
 0x486   :  { %16203 = vmatpush1.msra.mxu0 %v15969_v61  ;;  %16121 = vmatprep.subr.mxu1 %v30772_v35  ;;  %v16413_v61 = vand.u32 4294901760, %v16412_v48  ;;  %v30856_v37 = vand.u32 4294901760, %v16336_v24  ;;  %v16460_v45 = vand.u32 4294901760, %v16459_v58 }
 0x487   :  { %16373 = vmatprep.subr.mxu0 %v30810_v50  ;;  %16005 = vmatprep.mubr.f32.mxu1 %v33894_v0  ;;  %v16454_v14 = vand.u32 4294901760, %v16453_v28 }
 0x488   :  { %16236 = vmatprep.mubr.f32.mxu0 %v33894_v0  ;;  %16007 = vmatmul.mubr.f32.vlgmr.msra.gmra.mxu1 %v30728_v30 }
 0x489   :  { %16123 = vmatpush1.msra.mxu1 %v30782_v42  ;;  %16238 = vmatmul.mubr.f32.vlgmr.msra.gmra.mxu0 %v30728_v30 }
 0x48a   :  { %16375 = vmatpush1.msra.mxu0 %v30821_v23  ;;  %16275 = vmatprep.subr.mxu1 %v30772_v35 }
 0x48b   :  { %16534 = vmatprep.subr.mxu0 %v16451_v25  ;;  %16156 = vmatprep.mubr.f32.mxu1 %v33894_v0  ;;  %v16922_v25 = vsub.f32 %v16336_v24, %v30856_v37 }
 0x48c   :  { %16408 = vmatprep.mubr.f32.mxu0 %v33894_v0  ;;  %v8824_v41 = vpop.f32.mrf.mxu0  ;;  %16160 = vmatmul.mubr.f32.vlgmr.msra.gmra.mxu1 %v30755_v39  ;;  %v16917_v39 = vand.u32 4294901760, %v16916_v32 }
 0x48d   :  { %16277 = vmatpush1.msra.mxu1 %v30782_v42  ;;  %16414 = vmatmul.mubr.f32.vlgmr.msra.gmra.mxu0 %v16413_v61 }
 0x48e   :  { %16537 = vmatpush1.msra.mxu0 %v16457_v7  ;;  %16455 = vmatprep.subr.mxu1 %v16454_v14  ;;  %v30863_v35 = vpop.f32.mrf.mxu0  ;;  %v16923_v7 = vand.u32 4294901760, %v16922_v25 }
 0x48f   :  { %16688 = vmatprep.subr.mxu0 %v16452_v12  ;;  %16310 = vmatprep.mubr.f32.mxu1 %v33894_v0 }
 0x490   :  { %16570 = vmatprep.mubr.f32.mxu0 %v33894_v0  ;;  %v8983_v21 = vpop.f32.mrf.mxu0  ;;  %16312 = vmatmul.mubr.f32.vlgmr.msra.gmra.mxu1 %v30728_v30  ;;  %v16918_v30 = vsub.f32 %v16916_v32, %v16917_v39  ;;  %v16924_v58 = vsub.f32 %v16922_v25, %v16923_v7 }
 0x491   :  { %16461 = vmatpush1.msra.mxu1 %v16460_v45  ;;  %16573 = vmatmul.mubr.f32.vlgmr.msra.gmra.mxu0 %v30817_v19 }
 0x492   :  { %16692 = vmatpush1.msra.mxu0 %v16458_v47  ;;  %16610 = vmatprep.subr.mxu1 %v30810_v50  ;;  %v30871_v42 = vpop.f32.mrf.mxu0  ;;  %v16919_v14 = vand.u32 4294901760, %v16918_v30 }
 0x493   :  { %16838 = vmatprep.subr.mxu0 %v30848_v2  ;;  %16494 = vmatprep.mubr.f32.mxu1 %v33894_v0 }
 0x494   :  { %16725 = vmatprep.mubr.f32.mxu0 %v33894_v0  ;;  %v8906_v3 = vpop.f32.mrf.mxu1  ;;  %16496 = vmatmul.mubr.f32.vlgmr.msra.gmra.mxu1 %v30804_v46 }
 0x495   :  { %v8907_v12 = vadd.f32 %v8906_v3, %v8824_v41  ;;  %v9137_v48 = vpop.f32.mrf.mxu0  ;;  %16612 = vmatpush1.msra.mxu1 %v30821_v23  ;;  %16727 = vmatmul.mubr.f32.vlgmr.msra.gmra.mxu0 %v30804_v46 }
 0x496   :  { %16840 = vmatpush1.msra.mxu0 %v30856_v37  ;;  %16764 = vmatprep.subr.mxu1 %v30810_v50  ;;  %v30881_v47 = vpop.f32.mrf.mxu1 }
 0x497   :  { %16999 = vmatprep.subr.mxu0 %v16916_v32  ;;  %v30883_v24 = vpop.f32.mrf.mxu0  ;;  %16645 = vmatprep.mubr.f32.mxu1 %v33894_v0  ;;  %v8984_v28 = vadd.f32 %v8983_v21, %v8907_v12  ;;  %v16925_v12 = vand.u32 4294901760, %v16924_v58 }
 0x498   :  { %16873 = vmatprep.mubr.f32.mxu0 %v33894_v0  ;;  %v9059_v41 = vpop.f32.mrf.mxu1  ;;  %16649 = vmatmul.mubr.f32.vlgmr.msra.gmra.mxu1 %v30831_v33 }
 0x499   :  { %v9060_v45 = vadd.f32 %v9059_v41, %v8984_v28  ;;  %v9289_v3 = vpop.f32.mrf.mxu0  ;;  %16766 = vmatpush1.msra.mxu1 %v30821_v23  ;;  %16879 = vmatmul.mubr.f32.vlgmr.msra.gmra.mxu0 %v16413_v61 }
 0x49a   :  { %17002 = vmatpush1.msra.mxu0 %v16922_v25  ;;  %16920 = vmatprep.subr.mxu1 %v16919_v14  ;;  %v30889_v50 = vpop.f32.mrf.mxu1 }
 0x49b   :  { %17153 = vmatprep.subr.mxu0 %v16917_v39  ;;  %v30891_v32 = vpop.f32.mrf.mxu0  ;;  %16799 = vmatprep.mubr.f32.mxu1 %v33894_v0  ;;  %v9138_v21 = vadd.f32 %v9137_v48, %v9060_v45 }
 0x49c   :  { %17035 = vmatprep.mubr.f32.mxu0 %v33894_v0  ;;  %v9211_v20 = vpop.f32.mrf.mxu1  ;;  %16801 = vmatmul.mubr.f32.vlgmr.msra.gmra.mxu1 %v30804_v46 }
 0x49d   :  { %v9212_v30 = vadd.f32 %v9211_v20, %v9138_v21  ;;  %v9448_v28 = vpop.f32.mrf.mxu0  ;;  %16926 = vmatpush1.msra.mxu1 %v16925_v12  ;;  %17038 = vmatmul.mubr.f32.vlgmr.msra.gmra.mxu0 %v30817_v19 }
 0x49e   :  { %17157 = vmatpush1.msra.mxu0 %v16923_v7  ;;  %17075 = vmatprep.subr.mxu1 %v30848_v2  ;;  %v30898_v23 = vpop.f32.mrf.mxu1 }
 0x49f   :  { %v30900_v61 = vpop.f32.mrf.mxu0  ;;  %16959 = vmatprep.mubr.f32.mxu1 %v33894_v0  ;;  %17190 = vmatprep.mubr.f32.mxu0 %v33894_v0 }
 0x4a0   :  { %v9371_v25 = vpop.f32.mrf.mxu1  ;;  %16961 = vmatmul.mubr.f32.vlgmr.msra.gmra.mxu1 %v30804_v46 }
 0x4a1   :  { %v9372_v39 = vadd.f32 %v9371_v25, %v9289_v3  ;;  %v9602_v20 = vpop.f32.mrf.mxu0  ;;  %17077 = vmatpush1.msra.mxu1 %v30856_v37  ;;  %17110 = vmatprep.mubr.f32.mxu1 %v33894_v0 }
 0x4a2   :  { %17229 = vmatprep.subr.mxu1 %v30848_v2  ;;  %v30908_v19 = vpop.f32.mrf.mxu1  ;;  %17192 = vmatmul.mubr.f32.vlgmr.msra.gmra.mxu0 %v30804_v46 }
 0x4a3   :  { %v30911_v7 = vpop.f32.mrf.mxu0  ;;  %v9449_v48 = vadd.f32 %v9448_v28, %v9372_v39  ;;  %17431 = vmatprep.mubr.f32.mxu0 %v33894_v0 }
 0x4a4   :  { %v9524_v58 = vpop.f32.mrf.mxu1  ;;  %17114 = vmatmul.mubr.f32.vlgmr.msra.gmra.mxu1 %v30831_v33 }
 0x4a5   :  { %v9525_v41 = vadd.f32 %v9524_v58, %v9449_v48  ;;  %v9757_v14 = vpop.f32.mrf.mxu0  ;;  %17231 = vmatpush1.msra.mxu1 %v30856_v37  ;;  %17264 = vmatprep.mubr.f32.mxu1 %v33894_v0 }
 0x4a6   :  { %v9758_v45 = vadd.f32 %v9757_v14, %v9212_v30  ;;  %v30917_v2 = vpop.f32.mrf.mxu1 }
 0x4a7   :  { %v30919_v3 = vpop.f32.mrf.mxu0  ;;  %v9603_v21 = vadd.f32 %v9602_v20, %v9525_v41 }
 0x4a8   :  { %v9676_v12 = vpop.f32.mrf.mxu1  ;;  %17266 = vmatmul.mubr.f32.vlgmr.msra.gmra.mxu1 %v30804_v46 }
 0x4a9   :  { %v9677_v28 = vadd.f32 %v9676_v12, %v9603_v21  ;;  %v9916_v25 = vpop.f32.mrf.mxu0  ;;  %17528 = vmatprep.mubr.f32.mxu1 %v33894_v0 }
 0x4aa   :  { %v30923_v33 = vpop.f32.mrf.mxu1 }
 0x4ab   :  { %v30925_v39 = vpop.f32.mrf.mxu0 }
 0x4ac   :  { %v9839_v37 = vpop.f32.mrf.mxu1 }
 0x4ad   :  { %v9840_v48 = vadd.f32 %v9839_v37, %v9758_v45  ;;  %v10070_v58 = vpop.f32.mrf.mxu0 }
 0x4ae   :  { %v30927_v30 = vpop.f32.mrf.mxu1 }
 0x4af   :  { %v30929_v14 = vpop.f32.mrf.mxu0  ;;  %v9917_v10 = vadd.f32 %v9916_v25, %v9840_v48 }
 0x4b0   :  { %v9992_v20 = vpop.f32.mrf.mxu1 }
 0x4b1   :  { %v9993_v41 = vadd.f32 %v9992_v20, %v9917_v10  ;;  %v10222_v8 = vpop.f32.mrf.mxu0 }
 0x4b2   :  { %v10223_v46 = vadd.f32 %v10222_v8, %v9677_v28  ;;  %v30931_v21 = vpop.f32.mrf.mxu1 }
 0x4b3   :  { %v30933_v12 = vpop.f32.mrf.mxu0  ;;  %v10071_v36 = vadd.f32 %v10070_v58, %v9993_v41 }
 0x4b4   :  { %v10144_v56 = vpop.f32.mrf.mxu1 }
 0x4b5   :  { %v10145_v54 = vadd.f32 %v10144_v56, %v10071_v36  ;;  %v10381_v49 = vpop.f32.mrf.mxu0 }
 0x4b6   :  { %v30935_v55 = vpop.f32.mrf.mxu1 }
 0x4b7   :  { %33923 = vst [vmem:[#allocation69_spill] sm:$0xff] %v30935_v55  ;;  %v30937_v45 = vpop.f32.mrf.mxu0 }
 0x4b8   :  { %v10304_v37 = vpop.f32.mrf.mxu1 }
 0x4b9   :  { %v10305_v18 = vadd.f32 %v10304_v37, %v10223_v46  ;;  %v10535_v44 = vpop.f32.mrf.mxu0 }
 0x4ba   :  { %v30939_v25 = vpop.f32.mrf.mxu1 }
 0x4bb   :  { %v10382_v10 = vadd.f32 %v10381_v49, %v10305_v18  ;;  %v30941_v48 = vpop.f32.mrf.mxu0 }
 0x4bc   :  { %v10457_v8 = vpop.f32.mrf.mxu1 }
 0x4bd   :  { %v10458_v28 = vadd.f32 %v10457_v8, %v10382_v10  ;;  %v10707_v20 = vpop.f32.mrf.mxu0 }
 0x4be   :  { %v30943_v5 = vpop.f32.mrf.mxu1 }
 0x4bf   :  { %v10536_v58 = vadd.f32 %v10535_v44, %v10458_v28  ;;  %v30945_v36 = vpop.f32.mrf.mxu0 }
 0x4c0   :  { %v10609_v56 = vpop.f32.mrf.mxu1 }
 0x4c1   :  { %v10610_v41 = vadd.f32 %v10609_v56, %v10536_v58  ;;  %v10866_v16 = vpop.f32.mrf.mxu0 }
 0x4c2   :  { %v30947_v11 = vpop.f32.mrf.mxu1 }
 0x4c3   :  { %33924 = vst [vmem:[#allocation55_spill] sm:$0xff] %v30947_v11  ;;  %v30949_v46 = vpop.f32.mrf.mxu0 }
 0x4c4   :  { %v10789_v37 = vpop.f32.mrf.mxu1 }
 0x4c5   :  { %v10790_v9 = vadd.f32 %v10789_v37, %v10707_v20  ;;  %v11020_v18 = vpop.f32.mrf.mxu0 }
 0x4c6   :  { %v30951_v49 = vpop.f32.mrf.mxu1 }
 0x4c7   :  { %v10867_v1 = vadd.f32 %v10866_v16, %v10790_v9  ;;  %v30953_v10 = vpop.f32.mrf.mxu0 }
 0x4c8   :  { %v10942_v8 = vpop.f32.mrf.mxu1 }
 0x4c9   :  { %v10943_v22 = vadd.f32 %v10942_v8, %v10867_v1  ;;  %v11172_v44 = vpop.f32.mrf.mxu0 }
 0x4ca   :  { %v30955_v28 = vpop.f32.mrf.mxu1 }
 0x4cb   :  { %v11021_v62 = vadd.f32 %v11020_v18, %v10943_v22  ;;  %v30957_v58 = vpop.f32.mrf.mxu0 }
 0x4cc   :  { %v11094_v56 = vpop.f32.mrf.mxu1 }
 0x4cd   :  { %v11095_v63 = vadd.f32 %v11094_v56, %v11021_v62  ;;  %v11331_v34 = vpop.f32.mrf.mxu0 }
 0x4ce   :  { %v30959_v57 = vpop.f32.mrf.mxu1 }
 0x4cf   :  { %v11564_v20 = vadd.f32 %v11095_v63, %v10145_v54  ;;  %v30961_v37 = vpop.f32.mrf.mxu0 }
 0x4d0   :  { %v11254_v6 = vpop.f32.mrf.mxu1 }
 0x4d1   :  { %v11255_v9 = vadd.f32 %v11254_v6, %v11172_v44  ;;  %v11485_v16 = vpop.f32.mrf.mxu0 }
 0x4d2   :  { %v30963_v52 = vpop.f32.mrf.mxu1 }
 0x4d3   :  { %v11332_v1 = vadd.f32 %v11331_v34, %v11255_v9  ;;  %v30965_v8 = vpop.f32.mrf.mxu0 }
 0x4d4   :  { %v11407_v26 = vpop.f32.mrf.mxu1 }
 0x4d5   :  { %v11408_v22 = vadd.f32 %v11407_v26, %v11332_v1  ;;  %v11661_v18 = vpop.f32.mrf.mxu0 }
 0x4d6   :  { %v30967_v17 = vpop.f32.mrf.mxu1 }
 0x4d7   :  { %v11486_v62 = vadd.f32 %v11485_v16, %v11408_v22  ;;  %v30969_v56 = vpop.f32.mrf.mxu0 }
 0x4d8   :  { %v11559_v27 = vpop.f32.mrf.mxu1 }
 0x4d9   :  { %v11560_v63 = vadd.f32 %v11559_v27, %v11486_v62  ;;  %v11820_v54 = vpop.f32.mrf.mxu0 }
 0x4da   :  { %v30971_v29 = vpop.f32.mrf.mxu1 }
 0x4db   :  { %33925 = vst [vmem:[#allocation62_spill] sm:$0xff] %v30971_v29  ;;  %v11566_v6 = vadd.f32 %v11560_v63, %v10610_v41  ;;  %v30973_v44 = vpop.f32.mrf.mxu0 }
 0x4dc   :  { %v11743_v43 = vpop.f32.mrf.mxu1 }
 0x4dd   :  { %v11744_v34 = vadd.f32 %v11743_v43, %v11661_v18  ;;  %v11974_v9 = vpop.f32.mrf.mxu0 }
 0x4de   :  { %v30975_v13 = vpop.f32.mrf.mxu1 }
 0x4df   :  { %v11821_v26 = vadd.f32 %v11820_v54, %v11744_v34  ;;  %v30977_v1 = vpop.f32.mrf.mxu0 }
 0x4e0   :  { %v11896_v4 = vpop.f32.mrf.mxu1 }
 0x4e1   :  { %v11897_v16 = vadd.f32 %v11896_v4, %v11821_v26  ;;  %v12126_v22 = vpop.f32.mrf.mxu0 }
 0x4e2   :  { %v30979_v40 = vpop.f32.mrf.mxu1 }
 0x4e3   :  { %v11975_v27 = vadd.f32 %v11974_v9, %v11897_v16  ;;  %v30981_v62 = vpop.f32.mrf.mxu0 }
 0x4e4   :  { %v12048_v60 = vpop.f32.mrf.mxu1 }
 0x4e5   :  { %v12049_v41 = vadd.f32 %v12048_v60, %v11975_v27  ;;  %v12285_v63 = vpop.f32.mrf.mxu0 }
 0x4e6   :  { %v30983_v38 = vpop.f32.mrf.mxu1 }
 0x4e7   :  { %33926 = vst [vmem:[#allocation65_spill] sm:$0xff] %v30983_v38  ;;  %v12518_v43 = vadd.f32 %v12049_v41, %v11564_v20  ;;  %v30985_v18 = vpop.f32.mrf.mxu0 }
 0x4e8   :  { %33927 = vst [vmem:[#allocation52_spill] sm:$0xff] %v30985_v18  ;;  %v12208_v15 = vpop.f32.mrf.mxu1 }
 0x4e9   :  { %v12209_v54 = vadd.f32 %v12208_v15, %v12126_v22  ;;  %v12439_v34 = vpop.f32.mrf.mxu0 }
 0x4ea   :  { %v30987_v0 = vpop.f32.mrf.mxu1 }
 0x4eb   :  { %v12286_v4 = vadd.f32 %v12285_v63, %v12209_v54  ;;  %v30989_v26 = vpop.f32.mrf.mxu0 }
 0x4ec   :  { %33928 = vst [vmem:[#allocation61_spill] sm:$0xff] %v30989_v26  ;;  %v12361_v51 = vpop.f32.mrf.mxu1 }
 0x4ed   :  { %v12362_v9 = vadd.f32 %v12361_v51, %v12286_v4  ;;  %v12599_v16 = vpop.f32.mrf.mxu0 }
 0x4ee   :  { %v30991_v31 = vpop.f32.mrf.mxu1 }
 0x4ef   :  { %33929 = vst [vmem:[#allocation71_spill] sm:$0xff] %v30991_v31  ;;  %v12440_v60 = vadd.f32 %v12439_v34, %v12362_v9  ;;  %v30993_v27 = vpop.f32.mrf.mxu0 }
 0x4f0   :  { %v12513_v59 = vpop.f32.mrf.mxu1 }
 0x4f1   :  { %v12514_v20 = vadd.f32 %v12513_v59, %v12440_v60  ;;  %v12758_v41 = vpop.f32.mrf.mxu0 }
 0x4f2   :  { %v30995_v53 = vpop.f32.mrf.mxu1 }
 0x4f3   :  { %33930 = vst [vmem:[#allocation57_spill] sm:$0xff] %v30995_v53  ;;  %v12520_v15 = vadd.f32 %v12514_v20, %v11566_v6  ;;  %v30997_v22 = vpop.f32.mrf.mxu0 }
 0x4f4   :  { %33931 = vst [vmem:[#allocation64_spill] sm:$0xff] %v30997_v22  ;;  %v12681_v11 = vpop.f32.mrf.mxu1 }
 0x4f5   :  { %v12682_v63 = vadd.f32 %v12681_v11, %v12599_v16  ;;  %v12912_v54 = vpop.f32.mrf.mxu0 }
 0x4f6   :  { %v30999_v26 = vpop.f32.mrf.mxu1 }
 0x4f7   :  { %v12759_v51 = vadd.f32 %v12758_v41, %v12682_v63  ;;  %v31001_v4 = vpop.f32.mrf.mxu0 }
 0x4f8   :  { %33932 = vst [vmem:[#allocation60_spill] sm:$0xff] %v31001_v4  ;;  %v12834_v31 = vpop.f32.mrf.mxu1 }
 0x4f9   :  { %v12835_v34 = vadd.f32 %v12834_v31, %v12759_v51  ;;  %v13064_v9 = vpop.f32.mrf.mxu0 }
 0x4fa   :  { %v31003_v18 = vpop.f32.mrf.mxu1 }
 0x4fb   :  { %33933 = vst [vmem:[#allocation82_spill] sm:$0xff] %v31003_v18  ;;  %v12913_v59 = vadd.f32 %v12912_v54, %v12835_v34  ;;  %v31005_v60 = vpop.f32.mrf.mxu0 }
 0x4fc   :  { %33934 = vst [vmem:[#allocation74_spill] sm:$0xff] %v31005_v60  ;;  %v12986_v53 = vpop.f32.mrf.mxu1 }
 0x4fd   :  { %v12987_v6 = vadd.f32 %v12986_v53, %v12913_v59  ;;  %v13223_v20 = vpop.f32.mrf.mxu0 }
 0x4fe   :  { %v31007_v38 = vpop.f32.mrf.mxu1 }
 0x4ff   :  { %33935 = vst [vmem:[#allocation81_spill] sm:$0xff] %v31007_v38  ;;  %v13456_v11 = vadd.f32 %v12987_v6, %v12518_v43  ;;  %v31009_v16 = vpop.f32.mrf.mxu0 }
 0x500   :  { %33936 = vst [vmem:[#allocation70_spill] sm:$0xff] %v31009_v16  ;;  %v13146_v29 = vpop.f32.mrf.mxu1 }
 0x501   :  { %v13147_v41 = vadd.f32 %v13146_v29, %v13064_v9  ;;  %v13377_v63 = vpop.f32.mrf.mxu0 }
 0x502   :  { %v31011_v4 = vpop.f32.mrf.mxu1 }
 0x503   :  { %33937 = vst [vmem:[#allocation56_spill] sm:$0xff] %v31011_v4  ;;  %v13224_v31 = vadd.f32 %v13223_v20, %v13147_v41  ;;  %v31013_v51 = vpop.f32.mrf.mxu0 }
 0x504   :  { %33938 = vst [vmem:[#allocation67_spill] sm:$0xff] %v31013_v51  ;;  %v13299_v18 = vpop.f32.mrf.mxu1 }
 0x505   :  { %v13300_v54 = vadd.f32 %v13299_v18, %v13224_v31  ;;  %v13553_v34 = vpop.f32.mrf.mxu0 }
 0x506   :  { %v31015_v60 = vpop.f32.mrf.mxu1 }
 0x507   :  { %33939 = vst [vmem:[#allocation85_spill] sm:$0xff] %v31015_v60  ;;  %v13378_v53 = vadd.f32 %v13377_v63, %v13300_v54  ;;  %v31017_v59 = vpop.f32.mrf.mxu0 }
 0x508   :  { %v13451_v38 = vpop.f32.mrf.mxu1 }
 0x509   :  { %v13452_v43 = vadd.f32 %v13451_v38, %v13378_v53  ;;  %v13712_v6 = vpop.f32.mrf.mxu0 }
 0x50a   :  { %v31019_v16 = vpop.f32.mrf.mxu1 }
 0x50b   :  { %33940 = vst [vmem:[#allocation63_spill] sm:$0xff] %v31019_v16  ;;  %v13458_v29 = vadd.f32 %v13452_v43, %v12520_v15  ;;  %v31021_v9 = vpop.f32.mrf.mxu0 }
 0x50c   :  { %33941 = vst [vmem:[#allocation80_spill] sm:$0xff] %v31021_v9  ;;  %v13635_v4 = vpop.f32.mrf.mxu1 }
 0x50d   :  { %v13636_v20 = vadd.f32 %v13635_v4, %v13553_v34  ;;  %v13866_v41 = vpop.f32.mrf.mxu0 }
 0x50e   :  { %v31023_v51 = vpop.f32.mrf.mxu1 }
 0x50f   :  { %v13713_v18 = vadd.f32 %v13712_v6, %v13636_v20  ;;  %v31025_v31 = vpop.f32.mrf.mxu0 }
 0x510   :  { %33942 = vst [vmem:[#allocation76_spill] sm:$0xff] %v31025_v31  ;;  %v13788_v60 = vpop.f32.mrf.mxu1 }
 0x511   :  { %v13789_v63 = vadd.f32 %v13788_v60, %v13713_v18  ;;  %v14018_v54 = vpop.f32.mrf.mxu0 }
 0x512   :  { %v31027_v55 = vpop.f32.mrf.mxu1 }
 0x513   :  { %33943 = vst [vmem:[#allocation79_spill] sm:$0xff] %v31027_v55  ;;  %v13867_v38 = vadd.f32 %v13866_v41, %v13789_v63  ;;  %v31029_v53 = vpop.f32.mrf.mxu0 }
 0x514   :  { %v13940_v16 = vpop.f32.mrf.mxu1 }
 0x515   :  { %v13941_v15 = vadd.f32 %v13940_v16, %v13867_v38  ;;  %v14177_v43 = vpop.f32.mrf.mxu0 }
 0x516   :  { %v31031_v9 = vpop.f32.mrf.mxu1 }
 0x517   :  { %33944 = vst [vmem:[#allocation72_spill] sm:$0xff] %v31031_v9  ;;  %v31033_v4 = vadd.f32 %v13941_v15, %v13456_v11  ;;  %v31035_v34 = vpop.f32.mrf.mxu0 }
 0x518   :  { %33946 = vst [vmem:[#allocation66_spill] sm:$0xff] %v31035_v34  ;;  %v14100_v6 = vpop.f32.mrf.mxu1 }
 0x519   :  { %33945 = vst [vmem:[#allocation58_spill] sm:$0xff] %v31033_v4  ;;  %v14101_v20 = vadd.f32 %v14100_v6, %v14018_v54  ;;  %v14331_v31 = vpop.f32.mrf.mxu0 }
 0x51a   :  { %v31037_v22 = vpop.f32.mrf.mxu1 }
 0x51b   :  { %v14178_v60 = vadd.f32 %v14177_v43, %v14101_v20  ;;  %v31039_v18 = vpop.f32.mrf.mxu0 }
 0x51c   :  { %33947 = vst [vmem:[#allocation88_spill] sm:$0xff] %v31039_v18  ;;  %v14253_v41 = vpop.f32.mrf.mxu1 }
 0x51d   :  { %v14254_v63 = vadd.f32 %v14253_v41, %v14178_v60  ;;  %v31041_v55 = vpop.f32.mrf.mxu0 }
 0x51e   :  { %v31043_v16 = vpop.f32.mrf.mxu1 }
 0x51f   :  { %33948 = vst [vmem:[#allocation84_spill] sm:$0xff] %v31043_v16  ;;  %v14332_v38 = vadd.f32 %v14331_v31, %v14254_v63  ;;  %v31045_v9 = vpop.f32.mrf.mxu0 }
 0x520   :  { %v14405_v11 = vpop.f32.mrf.mxu1 }
 0x521   :  { %v14406_v15 = vadd.f32 %v14405_v11, %v14332_v38  ;;  %v31047_v4 = vpop.f32.mrf.mxu0  ;;  %v8909_v38 = vadd.f32 %v30881_v47, %v30863_v35 }
 0x522   :  { %v31049_v54 = vpop.f32.mrf.mxu1 }
 0x523   :  { %33949 = vst [vmem:[#allocation75_spill] sm:$0xff] %v31049_v54  ;;  %v31051_v6 = vadd.f32 %v14406_v15, %v13458_v29  ;;  %v31053_v43 = vpop.f32.mrf.mxu0 }
 0x524   :  { %v31055_v20 = vpop.f32.mrf.mxu1 }
 0x525   :  { %33950 = vst [vmem:[#allocation83_spill] sm:$0xff] %v31051_v6  ;;  %v31057_v60 = vpop.f32.mrf.mxu0  ;;  %v9374_v6 = vadd.f32 %v30908_v19, %v30891_v32 }
 0x526   :  { %33951 = vst [vmem:[#allocation86_spill] sm:$0xff] %v31057_v60  ;;  %v31059_v41 = vpop.f32.mrf.mxu1  ;;  %v8986_v60 = vadd.f32 %v30871_v42, %v8909_v38 }
 0x527   :  { %v31061_v18 = vpop.f32.mrf.mxu0  ;;  %v9451_v35 = vadd.f32 %v30900_v61, %v9374_v6 }
 0x528   :  { %33952 = vst [vmem:[#allocation68_spill] sm:$0xff] %v31061_v18  ;;  %v31063_v31 = vpop.f32.mrf.mxu1  ;;  %v9062_v34 = vadd.f32 %v30889_v50, %v8986_v60 }
 0x529   :  { %33953 = vst [vmem:[#allocation87_spill] sm:$0xff] %v31063_v31  ;;  %v31065_v63 = vpop.f32.mrf.mxu0  ;;  %v9527_v42 = vadd.f32 %v30917_v2, %v9451_v35 }
 0x52a   :  { %v31069_v11 = vpop.f32.mrf.mxu1  ;;  %v9140_v38 = vadd.f32 %v30883_v24, %v9062_v34  ;;  %v10792_v34 = vadd.f32 %v30951_v49, %v30945_v36 }
 0x52b   :  { %33954 = vst [vmem:[#allocation77_spill] sm:$0xff] %v31069_v11  ;;  %v31071_v29 = vpop.f32.mrf.mxu0  ;;  %v9605_v6 = vadd.f32 %v30911_v7, %v9527_v42 }
 0x52c   :  { %v31073_v15 = vpop.f32.mrf.mxu1  ;;  %v9214_v60 = vadd.f32 %v30898_v23, %v9140_v38  ;;  %v11257_v23 = vadd.f32 %v30963_v52, %v30957_v58  ;;  %v11746_v38 = vadd.f32 %v30975_v13, %v30969_v56  ;;  %v10869_v36 = vadd.f32 %v30949_v46, %v10792_v34 }
 0x52d   :  { %33955 = vst [vmem:[#allocation73_spill] sm:$0xff] %v31073_v15  ;;  %v31077_v54 = vpop.f32.mrf.mxu0  ;;  %v9679_v24 = vadd.f32 %v30923_v33, %v9605_v6 }
 0x52e   :  { %v31080_v16 = vpop.f32.mrf.mxu1  ;;  %v9760_v2 = vadd.f32 %v30919_v3, %v9214_v60  ;;  %v11823_v52 = vadd.f32 %v30973_v44, %v11746_v38 }
 0x52f   :  { %33956 = vst [vmem:[#allocation89_spill] sm:$0xff] %v31080_v16  ;;  %v31082_v18 = vpop.f32.mrf.mxu0 }
 0x530   :  { %33957 = vst [vmem:[#allocation78_spill] sm:$0xff] %v31082_v18  ;;  %v31084_v31 = vpop.f32.mrf.mxu1  ;;  %v9842_v7 = vadd.f32 %v30927_v30, %v9760_v2 }
 0x531   :  { %v31087_v47 = vpop.f32.mrf.mxu0 }
 0x532   :  { %33958 = vst [vmem:[#allocation90_spill] sm:$0xff] %v31087_v47  ;;  %v31090_v15 = vpop.f32.mrf.mxu1  ;;  %v9919_v30 = vadd.f32 %v30925_v39, %v9842_v7 }
 0x533   :  { %v31092_v11 = vpop.f32.mrf.mxu0 }
 0x534   :  { %33959 = vst [vmem:[#allocation91_spill] sm:$0xff] %v31092_v11  ;;  %v31094_v32 = vpop.f32.mrf.mxu1  ;;  %v9995_v46 = vadd.f32 %v30931_v21, %v9919_v30  ;;  %v33963_v30 = vld [vmem:[#allocation69_spill] sm:$0xff] }
 0x535   :  { %v31097_v19 = vpop.f32.mrf.mxu0 }
 0x536   :  { %v31100_v16 = vpop.f32.mrf.mxu1  ;;  %v10073_v21 = vadd.f32 %v30929_v14, %v9995_v46  ;;  %v33962_v14 = vld [vmem:[#allocation64_spill] sm:$0xff] }
 0x537   :  { %33960 = vst [vmem:[#allocation92_spill] sm:$0xff] %v31100_v16  ;;  %v15463_v18 = vpop.f32.mrf.mxu0 }
 0x538   :  { %v31102_v61 = vpop.f32.mrf.mxu1 }
 0x539   :  { %33961 = vst [vmem:[#allocation93_spill] sm:$0xff] %v31102_v61  ;;  %v31105_v50 = vpop.f32.mrf.mxu0  ;;  %v10225_v61 = vadd.f32 %v30933_v12, %v9679_v24  ;;  %v11334_v12 = vadd.f32 %v30961_v37, %v11257_v23  ;;  %v11899_v37 = vadd.f32 %v30979_v40, %v11823_v52  ;;  %v13638_v40 = vadd.f32 %v31023_v51, %v31017_v59  ;;  %v33965_v52 = vld [vmem:[#allocation65_spill] sm:$0xff] }
 0x53a   :  { %v31108_v11 = vpop.f32.mrf.mxu1  ;;  %v14590_v51 = vadd.f32 %v31055_v20, %v31041_v55  ;;  %v33970_v55 = vld [vmem:[#allocation55_spill] sm:$0xff] }
 0x53b   :  { %v31110_v47 = vpop.f32.mrf.mxu0  ;;  %v10307_v33 = vadd.f32 %v30939_v25, %v10225_v61  ;;  %v10945_v25 = vadd.f32 %v30955_v28, %v10869_v36  ;;  %v11410_v39 = vadd.f32 %v30967_v17, %v11334_v12  ;;  %v11977_v17 = vadd.f32 %v30977_v1, %v11899_v37 }
 0x53c   :  { %v15543_v35 = vpop.f32.mrf.mxu1  ;;  %v10147_v12 = vadd.f32 %v33963_v30, %v10073_v21 }
 0x53d   :  { %v31116_v16 = vpop.f32.mrf.mxu0  ;;  %v10384_v56 = vadd.f32 %v30937_v45, %v10307_v33  ;;  %v11023_v7 = vadd.f32 %v30953_v10, %v10945_v25  ;;  %v12684_v45 = vadd.f32 %v30999_v26, %v30993_v27  ;;  %v11488_v38 = vadd.f32 %v30965_v8, %v11410_v39  ;;  %v33967_v39 = vld [vmem:[#allocation52_spill] sm:$0xff] }
 0x53e   :  { %v15545_v42 = vpop.f32.mrf.mxu1  ;;  %v14592_v8 = vadd.f32 %v31059_v41, %v31045_v9  ;;  %v33969_v9 = vld [vmem:[#allocation56_spill] sm:$0xff] }
 0x53f   :  { %v31124_v3 = vpop.f32.mrf.mxu0  ;;  %v10460_v34 = vadd.f32 %v30943_v5, %v10384_v56  ;;  %v12211_v5 = vadd.f32 %v30987_v0, %v30981_v62  ;;  %v11097_v27 = vadd.f32 %v30959_v57, %v11023_v7  ;;  %v12761_v36 = vadd.f32 %v33962_v14, %v12684_v45  ;;  %v33964_v0 = vld [vmem:[#allocation62_spill] sm:$0xff] }
 0x540   :  { %v31126_v60 = vpop.f32.mrf.mxu1  ;;  %v11562_v62 = vadd.f32 %v33964_v0, %v11488_v38  ;;  %v12051_v56 = vadd.f32 %v33965_v52, %v11977_v17  ;;  %v15546_v57 = vadd.f32 %v15545_v42, %v15463_v18  ;;  %v15544_v7 = vadd.f32 %v15543_v35, %v31097_v19  ;;  %v33971_v14 = vld [vmem:[#allocation82_spill] sm:$0xff] }
 0x541   :  { %v31130_v49 = vpop.f32.mrf.mxu0  ;;  %v10538_v26 = vadd.f32 %v30941_v48, %v10460_v34  ;;  %v33966_v48 = vld [vmem:[#allocation80_spill] sm:$0xff]  ;;  %v12288_v37 = vadd.f32 %v33967_v39, %v12211_v5  ;;  %v33968_v34 = vld [vmem:[#allocation74_spill] sm:$0xff]  ;;  %v11565_v21 = vadd.f32 %v11097_v27, %v10147_v12  ;;  %v12837_v38 = vadd.f32 %v33971_v14, %v12761_v36  ;;  %v33978_v39 = vld [vmem:[#allocation87_spill] sm:$0xff] }
 0x542   :  { %v31133_v6 = vpop.f32.mrf.mxu1  ;;  %v13715_v25 = vadd.f32 %v33966_v48, %v13638_v40  ;;  %v13149_v41 = vadd.f32 %v33969_v9, %v33968_v34  ;;  %v14669_v17 = vadd.f32 %v31053_v43, %v14592_v8  ;;  %v14103_v18 = vadd.f32 %v31037_v22, %v31029_v53  ;;  %v33973_v43 = vld [vmem:[#allocation71_spill] sm:$0xff]  ;;  %v33974_v0 = vld [vmem:[#allocation70_spill] sm:$0xff] }
 0x543   :  { %v31137_v58 = vpop.f32.mrf.mxu0  ;;  %v10612_v20 = vadd.f32 %v33970_v55, %v10538_v26  ;;  %v14667_v42 = vadd.f32 %v31047_v4, %v14590_v51  ;;  %v15055_v40 = vadd.f32 %v31084_v31, %v31065_v63  ;;  %v12519_v35 = vadd.f32 %v12051_v56, %v11565_v21  ;;  %v33972_v26 = vld [vmem:[#allocation79_spill] sm:$0xff]  ;;  %v33975_v31 = vld [vmem:[#allocation60_spill] sm:$0xff]  ;;  %v33976_v51 = vld [vmem:[#allocation77_spill] sm:$0xff] }
 0x544   :  { %v31139_v13 = vpop.f32.mrf.mxu1  ;;  %v13791_v27 = vadd.f32 %v33972_v26, %v13715_v25  ;;  %v15623_v36 = vadd.f32 %v31110_v47, %v15546_v57  ;;  %v12364_v8 = vadd.f32 %v33973_v43, %v12288_v37  ;;  %v13226_v52 = vadd.f32 %v33974_v0, %v13149_v41  ;;  %v33977_v47 = vld [vmem:[#allocation66_spill] sm:$0xff]  ;;  %v33980_v21 = vld [vmem:[#allocation61_spill] sm:$0xff] }
 0x545   :  { %v31143_v61 = vpop.f32.mrf.mxu0  ;;  %v31198_v19 = vadd.f32 %v11562_v62, %v10612_v20  ;;  %v15057_v22 = vadd.f32 %v31090_v15, %v31071_v29  ;;  %v15621_v53 = vadd.f32 %v31105_v50, %v15544_v7  ;;  %v12915_v63 = vadd.f32 %v33975_v31, %v12837_v38  ;;  %v33979_v15 = vld [vmem:[#allocation76_spill] sm:$0xff]  ;;  %v33982_v14 = vld [vmem:[#allocation78_spill] sm:$0xff] }
 0x546   :  { %v31146_v2 = vpop.f32.mrf.mxu1  ;;  %v14745_v62 = vadd.f32 %v33976_v51, %v14669_v17  ;;  %v14180_v57 = vadd.f32 %v33977_v47, %v14103_v18  ;;  %v14743_v37 = vadd.f32 %v33978_v39, %v14667_v42  ;;  %v15132_v34 = vadd.f32 %v31077_v54, %v15055_v40  ;;  %v33983_v54 = vld [vmem:[#allocation81_spill] sm:$0xff] }
 0x547   :  { %v31150_v24 = vpop.f32.mrf.mxu0  ;;  %v13869_v50 = vadd.f32 %v33979_v15, %v13791_v27  ;;  %v15699_v41 = vadd.f32 %v31133_v6, %v15623_v36  ;;  %v15134_v38 = vadd.f32 %v33982_v14, %v15057_v22  ;;  %v15697_v17 = vadd.f32 %v31126_v60, %v15621_v53  ;;  %v33986_v27 = vld [vmem:[#allocation86_spill] sm:$0xff] }
 0x548   :  { %v16008_v44 = vpop.f32.mrf.mxu1  ;;  %v12989_v42 = vadd.f32 %v33983_v54, %v12915_v63  ;;  %v14821_v36 = vadd.f32 %v33986_v27, %v14743_v37  ;;  %v15208_v43 = vadd.f32 %v31094_v32, %v15132_v34  ;;  %v33988_v63 = vld [vmem:[#allocation57_spill] sm:$0xff] }
 0x549   :  { %v31156_v28 = vpop.f32.mrf.mxu0  ;;  %v16009_v56 = vadd.f32 %v16008_v44, %v31130_v49  ;;  %v12442_v49 = vadd.f32 %v33980_v21, %v12364_v8  ;;  %v33981_v44 = vld [vmem:[#allocation85_spill] sm:$0xff]  ;;  %v15777_v22 = vadd.f32 %v31124_v3, %v15699_v41  ;;  %v33992_v3 = vld [vmem:[#allocation88_spill] sm:$0xff] }
 0x54a   :  { %v16010_v23 = vpop.f32.mrf.mxu1  ;;  %v13457_v32 = vadd.f32 %v12989_v42, %v12519_v35 }
 0x54b   :  { %v31163_v33 = vpop.f32.mrf.mxu0  ;;  %v16011_v9 = vadd.f32 %v16010_v23, %v31137_v58  ;;  %v33984_v58 = vld [vmem:[#allocation68_spill] sm:$0xff]  ;;  %v16086_v40 = vadd.f32 %v31143_v61, %v16009_v56  ;;  %v12516_v61 = vadd.f32 %v33988_v63, %v12442_v49 }
 0x54c   :  { %v31167_v10 = vpop.f32.mrf.mxu1  ;;  %v14823_v23 = vadd.f32 %v33984_v58, %v14745_v62  ;;  %v33990_v62 = vld [vmem:[#allocation92_spill] sm:$0xff]  ;;  %v33997_v58 = vld [vmem:[#allocation75_spill] sm:$0xff] }
 0x54d   :  { %v16415_v1 = vpop.f32.mrf.mxu0  ;;  %v16088_v8 = vadd.f32 %v31150_v24, %v16011_v9  ;;  %v15210_v56 = vadd.f32 %v33990_v62, %v15134_v38  ;;  %v16162_v39 = vadd.f32 %v31167_v10, %v16086_v40  ;;  %v12521_v35 = vadd.f32 %v12516_v61, %v31198_v19  ;;  %v33996_v10 = vld [vmem:[#allocation91_spill] sm:$0xff]  ;;  %v33998_v40 = vld [vmem:[#allocation58_spill] sm:$0xff] }
 0x54e   :  { %v31177_v59 = vpop.f32.mrf.mxu1  ;;  %v34000_v61 = vld [vmem:[#allocation83_spill] sm:$0xff] }
 0x54f   :  { %v16417_v46 = vpop.f32.mrf.mxu0  ;;  %v16240_v54 = vadd.f32 %v31156_v28, %v16162_v39 }
 0x550   :  { %v31186_v45 = vpop.f32.mrf.mxu1 }
 0x551   :  { %v16574_v30 = vpop.f32.mrf.mxu0 }
 0x552   :  { %v31196_v5 = vpop.f32.mrf.mxu1 }
 0x553   :  { %v16576_v12 = vpop.f32.mrf.mxu0 }
 0x554   :  { %v16497_v4 = vpop.f32.mrf.mxu1 }
 0x555   :  { %v16498_v48 = vadd.f32 %v16497_v4, %v16415_v1  ;;  %v16728_v25 = vpop.f32.mrf.mxu0  ;;  %v13302_v1 = vadd.f32 %v33981_v44, %v13226_v52  ;;  %v33987_v52 = vld [vmem:[#allocation72_spill] sm:$0xff]  ;;  %v33995_v44 = vld [vmem:[#allocation63_spill] sm:$0xff] }
 0x556   :  { %v16499_v29 = vpop.f32.mrf.mxu1  ;;  %v13943_v60 = vadd.f32 %v33987_v52, %v13869_v50  ;;  %v33994_v50 = vld [vmem:[#allocation90_spill] sm:$0xff] }
 0x557   :  { %v16575_v7 = vadd.f32 %v16574_v30, %v16498_v48  ;;  %v16500_v55 = vadd.f32 %v16499_v29, %v16417_v46  ;;  %v16730_v20 = vpop.f32.mrf.mxu0  ;;  %v33985_v30 = vld [vmem:[#allocation84_spill] sm:$0xff]  ;;  %v15775_v48 = vadd.f32 %v31116_v16, %v15697_v17  ;;  %v33993_v29 = vld [vmem:[#allocation73_spill] sm:$0xff]  ;;  %v15286_v41 = vadd.f32 %v33994_v50, %v15208_v43 }
 0x558   :  { %v16650_v18 = vpop.f32.mrf.mxu1  ;;  %v14256_v46 = vadd.f32 %v33985_v30, %v14180_v57  ;;  %v33991_v57 = vld [vmem:[#allocation89_spill] sm:$0xff]  ;;  %v14895_v15 = vadd.f32 %v33993_v29, %v14821_v36  ;;  %v14411_v21 = vadd.f32 %v13943_v60, %v13457_v32  ;;  %v15851_v16 = vadd.f32 %v31146_v2, %v15777_v22 }
 0x559   :  { %v16577_v26 = vadd.f32 %v16576_v12, %v16500_v55  ;;  %v16880_v6 = vpop.f32.mrf.mxu0  ;;  %v16651_v53 = vadd.f32 %v16650_v18, %v16575_v7  ;;  %v33989_v12 = vld [vmem:[#allocation67_spill] sm:$0xff]  ;;  %v14897_v24 = vadd.f32 %v33991_v57, %v14823_v23  ;;  %v16164_v7 = vadd.f32 %v31177_v59, %v16088_v8 }
 0x55a   :  { %v16652_v0 = vpop.f32.mrf.mxu1  ;;  %v13380_v51 = vadd.f32 %v33989_v12, %v13302_v1  ;;  %v14334_v9 = vadd.f32 %v33992_v3, %v14256_v46  ;;  %v15849_v14 = vadd.f32 %v31139_v13, %v15775_v48  ;;  %v15364_v2 = vadd.f32 %v14895_v15, %v33998_v40 }
 0x55b   :  { %v16653_v4 = vadd.f32 %v16652_v0, %v16577_v26  ;;  %v16882_v31 = vpop.f32.mrf.mxu0  ;;  %v16729_v49 = vadd.f32 %v16728_v25, %v16651_v53  ;;  %v15365_v18 = vadd.f32 %v14897_v24, %v14411_v21  ;;  %v33999_v25 = vld [vmem:[#allocation93_spill] sm:$0xff]  ;;  %v16242_v19 = vadd.f32 %v31163_v33, %v16164_v7 }
 0x55c   :  { %v16802_v47 = vpop.f32.mrf.mxu1  ;;  %v13454_v1 = vadd.f32 %v33995_v44, %v13380_v51  ;;  %v14408_v23 = vadd.f32 %v33997_v58, %v14334_v9  ;;  %v15360_v26 = vadd.f32 %v33999_v25, %v15286_v41  ;;  %v16318_v0 = vadd.f32 %v15849_v14, %v15364_v2  ;;  %v17276_v14 = vld [vmem:[%s33640_s1 + $0x148] sm:$0xff] }
 0x55d   :  { %v16731_v37 = vadd.f32 %v16730_v20, %v16653_v4  ;;  %v17039_v34 = vpop.f32.mrf.mxu0  ;;  %v15288_v20 = vadd.f32 %v33996_v10, %v15210_v56  ;;  %v16319_v46 = vadd.f32 %v15851_v16, %v15365_v18  ;;  %v16803_v27 = vadd.f32 %v16802_v47, %v16729_v49  ;;  %v17277_v18 = vld [vmem:[%s33640_s1 + $0x168] sm:$0xff] }
 0x55e   :  { %v16804_v55 = vpop.f32.mrf.mxu1  ;;  %v13459_v43 = vadd.f32 %v13454_v1, %v12521_v35  ;;  %v16316_v63 = vadd.f32 %v31196_v5, %v16242_v19  ;;  %v15366_v12 = vadd.f32 %v15360_v26, %v34000_v61  ;;  %v34038_v61 = vld [vmem:[#allocation50_spill] sm:$0xff] }
 0x55f   :  { %v17041_v17 = vpop.f32.mrf.mxu0  ;;  %v16805_v42 = vadd.f32 %v16804_v55, %v16731_v37  ;;  %v15362_v8 = vadd.f32 %v31108_v11, %v15288_v20  ;;  %v17272_v51 = vadd.f32 %v16803_v27, %v16318_v0 }
 0x560   :  { %v16962_v38 = vpop.f32.mrf.mxu1  ;;  %v14413_v4 = vadd.f32 %v14408_v23, %v13459_v43 }
 0x561   :  { %v16963_v59 = vadd.f32 %v16962_v38, %v16880_v6  ;;  %v16314_v6 = vadd.f32 %v31186_v45, %v16240_v54  ;;  %v17273_v60 = vadd.f32 %v16805_v42, %v16319_v46  ;;  %v17284_v37 = vmul.f32 %v17272_v51, %v17272_v51 }
 0x562   :  { %v16964_v30 = vpop.f32.mrf.mxu1  ;;  %v17193_v52 = vpop.f32.mrf.mxu0  ;;  %v15367_v56 = vadd.f32 %v15362_v8, %v14413_v4  ;;  %v17357_v8 = vld [vmem:[%s33640_s1 + $0xa0] sm:$0xff] }
 0x563   :  { %v17040_v36 = vadd.f32 %v17039_v34, %v16963_v59  ;;  %v16965_v13 = vadd.f32 %v16964_v30, %v16882_v31  ;;  %v16320_v47 = vadd.f32 %v16314_v6, %v15366_v12  ;;  %v17285_v24 = vmul.f32 %v17273_v60, %v17273_v60 }
 0x564   :  { %v17115_v28 = vpop.f32.mrf.mxu1  ;;  %v17195_v48 = vpop.f32.mrf.mxu0  ;;  %v16321_v45 = vadd.f32 %v16316_v63, %v15367_v56  ;;  %v17278_v9 = vadd.f32 %v17273_v60, %v17272_v51  ;;  %v17360_v0 = vsel %vm120_vm0, %v17357_v8, 0 }
 0x565   :  { %v17042_v22 = vadd.f32 %v17041_v17, %v16965_v13  ;;  %v17116_v53 = vadd.f32 %v17115_v28, %v17040_v36  ;;  %v17288_v50 = vadd.f32 %v17285_v24, %v17284_v37  ;;  %v17358_v28 = vld [vmem:[%s33640_s1 + $0xa8] sm:$0xff] }
 0x566   :  { %v17117_v33 = vpop.f32.mrf.mxu1  ;;  %v17363_v6 = vsel %vm120_vm0, %v17358_v28, 0  ;;  %v34007_v24 = vld [vmem:[#allocation3_spill] sm:$0xff]  ;;  %v34012_v28 = vld [vmem:[#allocation10_spill] sm:$0xff] }
 0x567   :  { %v17194_v62 = vadd.f32 %v17193_v52, %v17116_v53  ;;  %v17118_v31 = vadd.f32 %v17117_v33, %v17042_v22  ;;  %v31338_v52 = vand.u32 4294901760, %v17360_v0  ;;  %v31344_v22 = vand.u32 4294901760, %v17363_v6 }
 0x568   :  { %v17267_v11 = vpop.f32.mrf.mxu1 }
 0x569   :  { %v17196_v32 = vadd.f32 %v17195_v48, %v17118_v31  ;;  %v17268_v57 = vadd.f32 %v17267_v11, %v17194_v62  ;;  %v31350_v4 = vsub.f32 %v17363_v6, %v31344_v22 }
 0x56a   :  { %v17269_v39 = vpop.f32.mrf.mxu1 }
 0x56b   :  { %v17274_v34 = vadd.f32 %v17268_v57, %v16320_v47  ;;  %v17270_v3 = vadd.f32 %v17269_v39, %v17196_v32  ;;  %v31358_v56 = vand.u32 4294901760, %v31350_v4 }
 0x56d   :  { %v17275_v5 = vadd.f32 %v17270_v3, %v16321_v45  ;;  %v17279_v29 = vadd.f32 %v17278_v9, %v17274_v34  ;;  %v17286_v15 = vmul.f32 %v17274_v34, %v17274_v34  ;;  %v34008_v3 = vld [vmem:[#allocation4_spill] sm:$0xff] }
 0x56f   :  { %v17280_v41 = vadd.f32 %v17279_v29, %v17275_v5  ;;  %v17287_v7 = vmul.f32 %v17275_v5, %v17275_v5  ;;  %v17289_v55 = vadd.f32 %v17288_v50, %v17286_v15 }
 0x571   :  { %17281 = vadd.xlane.f32.xlu0 %v17280_v41  ;;  %v17290_v21 = vadd.f32 %v17289_v55, %v17287_v7 }
 0x573   :  { %17291 = vadd.xlane.f32.xlu1 %v17290_v21 }
 0x5fa   :  { %v17282_v16 = vpop.xlane.xlu0 %17281 }
 0x5fb   :  { %v17283_v49 = vmul.f32 0.001953125, %v17282_v16  ;;  %v34009_v16 = vmov 0.0  }
 0x5fc   :  { %v17292_v35 = vpop.xlane.xlu1 %17291 }
 0x5fd   :  { %v17294_v44 = vmul.f32 %v17283_v49, %v17283_v49  ;;  %v17293_v1 = vmul.f32 0.001953125, %v17292_v35  ;;  %v34010_v35 = vld [vmem:[#allocation6_spill] sm:$0xff] }
 0x5ff   :  { %v17295_v10 = vsub.f32 %v17293_v1, %v17294_v44 }
 0x601   :  { %v17296_v20 = vadd.f32 1e-05, %v17295_v10 }
 0x603   :  { %28763 = vrsqrt.f32 %v17296_v20 }
 0x610   :  { %v28764_v38 = vpop.eup %28763 }
 0x611   :  { %v17298_v17 = vmul.f32 %v28764_v38, %v17276_v14 }
 0x613   :  { %17303 = vperm.xlu0 %28759, %v17298_v17   ;;  %v17299_v54 = vmul.f32 %v17298_v17, %v17283_v49 }
 0x615   :  { %v17300_v42 = vsub.f32 %v17277_v18, %v17299_v54 }
 0x617   :  { %17312 = vperm.xlu1 %28760, %v17300_v42  }
 0x68e   :  { %v17304_v59 = vpop.permute.xlu0 %17303 }
 0x68f   :  { %v17306_v58 = vmul.f32 %v17304_v59, %v17272_v51  ;;  %v17307_v23 = vmul.f32 %v17304_v59, %v17273_v60  ;;  %v17308_v2 = vmul.f32 %v17304_v59, %v17274_v34  ;;  %v17309_v25 = vmul.f32 %v17304_v59, %v17275_v5  ;;  %v34006_v51 = vld [vmem:[#allocation5_spill] sm:$0xff] }
 0x690   :  { %v31342_v60 = vsub.f32 %v17360_v0, %v31338_v52  ;;  %v17446_v34 = vsub.f32 %v31350_v4, %v31358_v56 }
 0x692   :  { %v17313_v40 = vpop.permute.xlu1 %17312  ;;  %v31347_v53 = vand.u32 4294901760, %v31342_v60  ;;  %v31371_v41 = vand.u32 4294901760, %v17446_v34 }
 0x693   :  { %v17315_v26 = vadd.f32 %v17313_v40, %v17306_v58  ;;  %v17316_v19 = vadd.f32 %v17313_v40, %v17307_v23  ;;  %v17317_v30 = vadd.f32 %v17313_v40, %v17308_v2  ;;  %v17318_v46 = vadd.f32 %v17313_v40, %v17309_v25  ;;  %v34011_v2 = vld [vmem:[#allocation8_spill] sm:$0xff] }
 0x694   :  { %v17435_v31 = vsub.f32 %v31342_v60, %v31347_v53 }
 0x695   :  { %v31259_v27 = vmax.f32 %v17315_v26, 0.0  ;;  %v31261_v36 = vmax.f32 %v17316_v19, 0.0  ;;  %v31267_v13 = vmax.f32 %v17317_v30, 0.0  ;;  %v31269_v43 = vmax.f32 %v17318_v46, 0.0  ;;  %v17339_v30 = vld [vmem:[%s33640_s1 + $0x90] sm:$0xff] }
 0x696   :  { %v31365_v37 = vand.u32 4294901760, %v17435_v31  ;;  %v18394_v0 = vsel %vm120_vm0, %v17339_v30, 0 }
 0x697   :  { %34001 = vst [vmem:[#allocation64_spill] sm:$0xff] %v31259_v27  ;;  %34002 = vst [vmem:[#allocation69_spill] sm:$0xff] %v31261_v36  ;;  %17343 = vrot.lane.b32.xlu1 %v31261_v36, %s28794_s13  ;;  %17341 = vrot.lane.b32.xlu0 %v31259_v27, %s28794_s13 }
 0x698   :  { %34003 = vst [vmem:[#allocation62_spill] sm:$0xff] %v31267_v13  ;;  %34004 = vst [vmem:[#allocation65_spill] sm:$0xff] %v31269_v43 }
 0x69b   :  { %17345 = vrot.lane.b32.xlu1 %v31267_v13, %s28794_s13  ;;  %17347 = vrot.lane.b32.xlu0 %v31269_v43, %s28794_s13 }
 0x69f   :  { %17325 = vrot.lane.b32.xlu1 %v31261_v36, %s28795_s18  ;;  %17323 = vrot.lane.b32.xlu0 %v31259_v27, %s28795_s18 }
 0x6a3   :  { %17327 = vrot.lane.b32.xlu1 %v31267_v13, %s28795_s18  ;;  %17329 = vrot.lane.b32.xlu0 %v31269_v43, %s28795_s18 }
 0x6a7   :  { %19429 = vrot.lane.b32.xlu1 %v31261_v36, %s28796_s0  ;;  %19427 = vrot.lane.b32.xlu0 %v31259_v27, %s28796_s0 }
 0x6ab   :  { %19431 = vrot.lane.b32.xlu1 %v31267_v13, %s28796_s0  ;;  %19433 = vrot.lane.b32.xlu0 %v31269_v43, %s28796_s0 }
 0x6af   :  { %20489 = vrot.lane.b32.xlu1 %v31261_v36, %s28797_s19  ;;  %20487 = vrot.lane.b32.xlu0 %v31259_v27, %s28797_s19 }
 0x6b3   :  { %20491 = vrot.lane.b32.xlu1 %v31267_v13, %s28797_s19  ;;  %20493 = vrot.lane.b32.xlu0 %v31269_v43, %s28797_s19 }
 0x6b7   :  { %22595 = vrot.lane.b32.xlu1 %v31267_v13, %s28798_s20  ;;  %22593 = vrot.lane.b32.xlu0 %v31261_v36, %s28798_s20 }
 0x6bb   :  { %22597 = vrot.lane.b32.xlu1 %v31269_v43, %s28798_s20  ;;  %22591 = vrot.lane.b32.xlu0 %v31259_v27, %s28798_s20 }
 0x6bf   :  { %23655 = vrot.lane.b32.xlu1 %v31267_v13, %s28799_s21  ;;  %23653 = vrot.lane.b32.xlu0 %v31261_v36, %s28799_s21 }
 0x6c3   :  { %23657 = vrot.lane.b32.xlu1 %v31269_v43, %s28799_s21  ;;  %23651 = vrot.lane.b32.xlu0 %v31259_v27, %s28799_s21 }
 0x6c7   :  { %24715 = vrot.lane.b32.xlu1 %v31267_v13, %s28800_s22  ;;  %24713 = vrot.lane.b32.xlu0 %v31261_v36, %s28800_s22 }
 0x6cb   :  { %24717 = vrot.lane.b32.xlu1 %v31269_v43, %s28800_s22  ;;  %24711 = vrot.lane.b32.xlu0 %v31259_v27, %s28800_s22 }
 0x6cf   :  { %25775 = vrot.lane.b32.xlu1 %v31267_v13, %s28801_s23  ;;  %25773 = vrot.lane.b32.xlu0 %v31261_v36, %s28801_s23 }
 0x6d3   :  { %25777 = vrot.lane.b32.xlu1 %v31269_v43, %s28801_s23  ;;  %25771 = vrot.lane.b32.xlu0 %v31259_v27, %s28801_s23 }
 0x709   :  { %v17344_v63 = vpop.permute.xlu1 %17343  ;;  %v17342_v33 = vpop.permute.xlu0 %17341 }
 0x70a   :  { %v17351_v12 = vsel %vm110_vm2, %v17342_v33, %v17344_v63 }
 0x70b   :  { %v17354_v62 = vmul.f32 %v34006_v51, %v17351_v12  ;;  %v31430_v12 = vand.u32 4294901760, %v18394_v0 }
 0x70d   :  { %v17395_v48 = vand.u32 4294901760, %v17354_v62  ;;  %v17346_v11 = vpop.permute.xlu1 %17345  ;;  %v17348_v47 = vpop.permute.xlu0 %17347 }
 0x70e   :  { %v17349_v32 = vsel %vm110_vm2, %v17346_v11, %v17348_v47  ;;  %v17352_v57 = vsel %vm110_vm2, %v17348_v47, %v17342_v33  ;;  %v17350_v7 = vsel %vm110_vm2, %v17344_v63, %v17346_v11  ;;  %v17340_v63 = vld [vmem:[%s33640_s1 + $0x98] sm:$0xff] }
 0x70f   :  { %v17353_v45 = vmul.f32 %v34007_v24, %v17352_v57  ;;  %17396 = vmatprep.subr.mxu0 %v17395_v48  ;;  %v17485_v39 = vsub.f32 %v17354_v62, %v17395_v48  ;;  %v17356_v9 = vmul.f32 %v34008_v3, %v17349_v32  ;;  %v17355_v44 = vmul.f32 %v34010_v35, %v17350_v7  ;;  %v34013_v3 = vld [vmem:[#allocation13_spill] sm:$0xff]  ;;  %v34014_v7 = vld [vmem:[#allocation14_spill] sm:$0xff] }
 0x710   :  { %v18397_v51 = vsel %vm120_vm0, %v17340_v63, 0 }
 0x711   :  { %v17397_v5 = vand.u32 4294901760, %v17353_v45  ;;  %v17486_v29 = vand.u32 4294901760, %v17485_v39  ;;  %v31375_v21 = vand.u32 4294901760, %v17356_v9  ;;  %v31382_v14 = vand.u32 4294901760, %v17355_v44  ;;  %v31393_v54 = vpop.permute.xlu1 %17325  ;;  %v17324_v42 = vpop.permute.xlu0 %17323 }
 0x712   :  { %v17333_v23 = vsel %vm88_vm8, %v17324_v42, %v31393_v54  ;;  %v31442_v11 = vand.u32 4294901760, %v18397_v51 }
 0x713   :  { %v17491_v15 = vsub.f32 %v17353_v45, %v17397_v5  ;;  %17398 = vmatpush1.msra.mxu0 %v17397_v5  ;;  %v17487_v50 = vsub.f32 %v17485_v39, %v17486_v29  ;;  %v17999_v10 = vsub.f32 %v17356_v9, %v31375_v21  ;;  %v18005_v17 = vsub.f32 %v17355_v44, %v31382_v14 }
 0x714   :  { %17437 = vmatmul.mubr.f32.vlgmr.msra.gmra.mxu0 %v31365_v37  ;;  %17575 = vmatprep.subr.mxu0 %v17485_v39  ;;  %v17336_v25 = vmul.f32 %v17333_v23, %v34011_v2  ;;  %v31456_v57 = vsub.f32 %v18397_v51, %v31442_v11  ;;  %v34016_v2 = vld [vmem:[#allocation18_spill] sm:$0xff] }
 0x715   :  { %v17492_v55 = vand.u32 4294901760, %v17491_v15  ;;  %17578 = vmatpush1.msra.mxu0 %v17491_v15  ;;  %17442 = vmatprep.mubr.f32.mxu0 %v34009_v16  ;;  %v17488_v49 = vand.u32 4294901760, %v17487_v50  ;;  %v18000_v38 = vand.u32 4294901760, %v17999_v10  ;;  %v18006_v59 = vand.u32 4294901760, %v18005_v17  ;;  %v17330_v26 = vpop.permute.xlu0 %17329  ;;  %v17328_v24 = vpop.permute.xlu1 %17327 }
 0x716   :  { %17746 = vmatprep.subr.mxu0 %v17486_v29  ;;  %v31412_v46 = vand.u32 4294901760, %v17336_v25  ;;  %v17334_v8 = vsel %vm88_vm8, %v17330_v26, %v17324_v42  ;;  %v31467_v34 = vand.u32 4294901760, %v31456_v57  ;;  %v17332_v50 = vsel %vm88_vm8, %v31393_v54, %v17328_v24 }
 0x717   :  { %17489 = vmatprep.subr.mxu1 %v17488_v49  ;;  %v17493_v1 = vsub.f32 %v17491_v15, %v17492_v55  ;;  %v18001_v18 = vsub.f32 %v17999_v10, %v18000_v38  ;;  %v18007_v40 = vsub.f32 %v18005_v17, %v18006_v59  ;;  %v17335_v6 = vmul.f32 %v17334_v8, %v34012_v28 }
 0x718   :  { %17448 = vmatmul.mubr.f32.gmra.mxu0 %v31371_v41  ;;  %v18519_v33 = vsub.f32 %v17336_v25, %v31412_v46  ;;  %v18480_v29 = vsub.f32 %v31456_v57, %v31467_v34 }
 0x719   :  { %17611 = vmatprep.mubr.f32.mxu0 %v34009_v16  ;;  %v17494_v20 = vand.u32 4294901760, %v17493_v1  ;;  %v18002_v58 = vand.u32 4294901760, %v18001_v18  ;;  %v18008_v19 = vand.u32 4294901760, %v18007_v40  ;;  %v31434_v62 = vand.u32 4294901760, %v17335_v6  ;;  %v31509_v44 = vpop.permute.xlu1 %19429  ;;  %v19428_v1 = vpop.permute.xlu0 %19427 }
 0x71a   :  { %v18520_v31 = vand.u32 4294901760, %v18519_v33 }
 0x71b   :  { %17495 = vmatpush1.msra.mxu1 %v17494_v20  ;;  %v18525_v47 = vsub.f32 %v17335_v6, %v31434_v62 }
 0x71c   :  { %17614 = vmatmul.mubr.f32.vlgmr.msra.gmra.mxu0 %v31342_v60  ;;  %17530 = vmatmul.mubr.f32.vlgmr.msra.gmra.mxu1 %v31338_v52 }
 0x71d   :  { %17659 = vmatprep.subr.mxu1 %v17395_v48  ;;  %17750 = vmatpush1.msra.mxu0 %v17492_v55  ;;  %v18526_v45 = vand.u32 4294901760, %v18525_v47  ;;  %v17337_v55 = vmul.f32 %v17332_v50, %v34014_v7  ;;  %v19434_v54 = vpop.permute.xlu0 %19433 }
 0x71e   :  { %17661 = vmatpush1.msra.mxu1 %v17397_v5  ;;  %17910 = vmatprep.subr.mxu0 %v31375_v21  ;;  %v19438_v23 = vsel %vm1995_vm13, %v19434_v54, %v19428_v1 }
 0x71f   :  { %17829 = vmatprep.subr.mxu1 %v17395_v48  ;;  %17535 = vmatprep.mubr.f32.mxu1 %v34009_v16  ;;  %v31440_v48 = vsub.f32 %v18394_v0, %v31430_v12  ;;  %v19439_v25 = vmul.f32 %v19438_v23, %v34016_v2 }
 0x720   :  { %17619 = vmatprep.mubr.f32.mxu0 %v34009_v16  ;;  %17537 = vmatmul.mubr.f32.gmra.mxu1 %v31344_v22 }
 0x721   :  { %17622 = vmatmul.mubr.f32.gmra.mxu0 %v31350_v4  ;;  %17694 = vmatprep.mubr.f32.mxu1 %v34009_v16  ;;  %v31453_v32 = vand.u32 4294901760, %v31440_v48  ;;  %v31550_v8 = vand.u32 4294901760, %v19439_v25  ;;  %v20488_v7 = vpop.permute.xlu0 %20487 }
 0x722   :  { %17783 = vmatprep.mubr.f32.mxu0 %v34009_v16 }
 0x723   :  { %v19577_v63 = vsub.f32 %v19439_v25, %v31550_v8 }
 0x724   :  { %17698 = vmatmul.mubr.f32.vlgmr.msra.gmra.mxu1 %v31347_v53 }
 0x725   :  { %17785 = vmatmul.mubr.f32.vlgmr.msra.gmra.mxu0 %v31338_v52  ;;  %17831 = vmatpush1.msra.mxu1 %v17397_v5 }
 0x726   :  { %17912 = vmatpush1.msra.mxu0 %v31382_v14  ;;  %18003 = vmatprep.subr.mxu1 %v18002_v58 }
 0x727   :  { %18089 = vmatprep.subr.mxu0 %v17999_v10  ;;  %17703 = vmatprep.mubr.f32.mxu1 %v34009_v16 }
 0x728   :  { %17790 = vmatprep.mubr.f32.mxu0 %v34009_v16  ;;  %17707 = vmatmul.mubr.f32.gmra.mxu1 %v31358_v56 }
 0x729   :  { %17792 = vmatmul.mubr.f32.gmra.mxu0 %v31344_v22  ;;  %17864 = vmatprep.mubr.f32.mxu1 %v34009_v16 }
 0x72a   :  { %17945 = vmatprep.mubr.f32.mxu0 %v34009_v16 }
 0x72c   :  { %17866 = vmatmul.mubr.f32.vlgmr.msra.gmra.mxu1 %v31338_v52 }
 0x72d   :  { %17951 = vmatmul.mubr.f32.vlgmr.msra.gmra.mxu0 %v31365_v37  ;;  %18009 = vmatpush1.msra.mxu1 %v18008_v19  ;;  %v17331_v37 = vsel %vm88_vm8, %v17328_v24, %v17330_v26  ;;  %v19444_v26 = vld [vmem:[%s33640_s1 + $0xb8] sm:$0xff] }
 0x72e   :  { %18092 = vmatpush1.msra.mxu0 %v18005_v17  ;;  %18173 = vmatprep.subr.mxu1 %v31375_v21  ;;  %v17338_v9 = vmul.f32 %v17331_v37, %v34013_v3  ;;  %v34015_v17 = vld [vmem:[#allocation16_spill] sm:$0xff] }
 0x72f   :  { %18260 = vmatprep.subr.mxu0 %v18000_v38  ;;  %17871 = vmatprep.mubr.f32.mxu1 %v34009_v16 }
 0x730   :  { %17956 = vmatprep.mubr.f32.mxu0 %v34009_v16  ;;  %17873 = vmatmul.mubr.f32.gmra.mxu1 %v31344_v22 }
 0x731   :  { %17962 = vmatmul.mubr.f32.gmra.mxu0 %v31371_v41  ;;  %18042 = vmatprep.mubr.f32.mxu1 %v34009_v16  ;;  %v31482_v41 = vand.u32 4294901760, %v17338_v9 }
 0x732   :  { %18125 = vmatprep.mubr.f32.mxu0 %v34009_v16 }
 0x734   :  { %18044 = vmatmul.mubr.f32.vlgmr.msra.gmra.mxu1 %v31338_v52 }
 0x735   :  { %18128 = vmatmul.mubr.f32.vlgmr.msra.gmra.mxu0 %v31342_v60  ;;  %18175 = vmatpush1.msra.mxu1 %v31382_v14  ;;  %v18521_v60 = vsub.f32 %v18519_v33, %v18520_v31 }
 0x736   :  { %18264 = vmatpush1.msra.mxu0 %v18006_v59  ;;  %18343 = vmatprep.subr.mxu1 %v31375_v21  ;;  %v19033_v21 = vsub.f32 %v17338_v9, %v31482_v41  ;;  %v19443_v59 = vld [vmem:[%s33640_s1 + $0xb0] sm:$0xff] }
 0x737   :  { %18430 = vmatprep.subr.mxu0 %v31412_v46  ;;  %18049 = vmatprep.mubr.f32.mxu1 %v34009_v16  ;;  %v18522_v39 = vand.u32 4294901760, %v18521_v60  ;;  %v19446_v40 = vsel %vm120_vm0, %v19443_v59, 0 }
 0x738   :  { %18133 = vmatprep.mubr.f32.mxu0 %v34009_v16  ;;  %18051 = vmatmul.mubr.f32.gmra.mxu1 %v31344_v22  ;;  %v19034_v49 = vand.u32 4294901760, %v19033_v21  ;;  %v31546_v30 = vand.u32 4294901760, %v19446_v40 }
 0x739   :  { %18136 = vmatmul.mubr.f32.gmra.mxu0 %v31350_v4  ;;  %18208 = vmatprep.mubr.f32.mxu1 %v34009_v16  ;;  %v18469_v4 = vsub.f32 %v31440_v48, %v31453_v32 }
 0x73a   :  { %18297 = vmatprep.mubr.f32.mxu0 %v34009_v16  ;;  %v19035_v35 = vsub.f32 %v19033_v21, %v19034_v49  ;;  %v31556_v28 = vsub.f32 %v19446_v40, %v31546_v30 }
 0x73b   :  { %v18470_v5 = vand.u32 4294901760, %v18469_v4 }
 0x73c   :  { %18212 = vmatmul.mubr.f32.vlgmr.msra.gmra.mxu1 %v31347_v53  ;;  %v18527_v53 = vsub.f32 %v18525_v47, %v18526_v45  ;;  %v19036_v20 = vand.u32 4294901760, %v19035_v35  ;;  %v31569_v51 = vand.u32 4294901760, %v31556_v28 }
 0x73d   :  { %18299 = vmatmul.mubr.f32.vlgmr.msra.gmra.mxu0 %v31338_v52  ;;  %18345 = vmatpush1.msra.mxu1 %v31382_v14  ;;  %v19437_v14 = vsel %vm1995_vm13, %v19428_v1, %v31509_v44 }
 0x73e   :  { %18432 = vmatpush1.msra.mxu0 %v31434_v62  ;;  %18523 = vmatprep.subr.mxu1 %v18522_v39  ;;  %v18528_v15 = vand.u32 4294901760, %v18527_v53  ;;  %v19440_v18 = vmul.f32 %v19437_v14, %v34015_v17  ;;  %v34020_v17 = vld [vmem:[#allocation9_spill] sm:$0xff] }
 0x73f   :  { %18609 = vmatprep.subr.mxu0 %v18519_v33  ;;  %18217 = vmatprep.mubr.f32.mxu1 %v34009_v16 }
 0x740   :  { %18304 = vmatprep.mubr.f32.mxu0 %v34009_v16  ;;  %18221 = vmatmul.mubr.f32.gmra.mxu1 %v31358_v56  ;;  %v31485_v56 = vand.u32 4294901760, %v18480_v29  ;;  %v31529_v58 = vand.u32 4294901760, %v19440_v18 }
 0x741   :  { %18306 = vmatmul.mubr.f32.gmra.mxu0 %v31344_v22  ;;  %18378 = vmatprep.mubr.f32.mxu1 %v34009_v16 }
 0x742   :  { %18465 = vmatprep.mubr.f32.mxu0 %v34009_v16  ;;  %v19571_v19 = vsub.f32 %v19440_v18, %v31529_v58 }
 0x744   :  { %18380 = vmatmul.mubr.f32.vlgmr.msra.gmra.mxu1 %v31338_v52  ;;  %v31496_v52 = vand.u32 4294901760, %v17337_v55  ;;  %v19572_v0 = vand.u32 4294901760, %v19571_v19 }
 0x745   :  { %18471 = vmatmul.mubr.f32.vlgmr.msra.gmra.mxu0 %v18470_v5  ;;  %18529 = vmatpush1.msra.mxu1 %v18528_v15 }
 0x746   :  { %18612 = vmatpush1.msra.mxu0 %v18525_v47  ;;  %18693 = vmatprep.subr.mxu1 %v31412_v46  ;;  %v19573_v33 = vsub.f32 %v19571_v19, %v19572_v0 }
 0x747   :  { %18780 = vmatprep.subr.mxu0 %v18520_v31  ;;  %18385 = vmatprep.mubr.f32.mxu1 %v34009_v16  ;;  %v19432_v31 = vpop.permute.xlu1 %19431 }
 0x748   :  { %18476 = vmatprep.mubr.f32.mxu0 %v34009_v16  ;;  %18387 = vmatmul.mubr.f32.gmra.mxu1 %v31344_v22  ;;  %v19039_v22 = vsub.f32 %v17337_v55, %v31496_v52  ;;  %v19574_v47 = vand.u32 4294901760, %v19573_v33  ;;  %v19435_v60 = vsel %vm1995_vm13, %v19432_v31, %v19434_v54  ;;  %v19436_v3 = vsel %vm1995_vm13, %v31509_v44, %v19432_v31  ;;  %v20494_v44 = vpop.permute.xlu0 %20493  ;;  %v20504_v54 = vld [vmem:[%s33640_s1 + $0xc8] sm:$0xff] }
 0x749   :  { %18482 = vmatmul.mubr.f32.gmra.mxu0 %v31485_v56  ;;  %18562 = vmatprep.mubr.f32.mxu1 %v34009_v16  ;;  %v20498_v14 = vsel %vm2954_vm1, %v20494_v44, %v20488_v7 }
 0x74a   :  { %18645 = vmatprep.mubr.f32.mxu0 %v34009_v16  ;;  %v19040_v10 = vand.u32 4294901760, %v19039_v22  ;;  %v20499_v18 = vmul.f32 %v34020_v17, %v20498_v14 }
 0x74c   :  { %18564 = vmatmul.mubr.f32.vlgmr.msra.gmra.mxu1 %v31430_v12  ;;  %v19041_v38 = vsub.f32 %v19039_v22, %v19040_v10  ;;  %v31666_v23 = vand.u32 4294901760, %v20499_v18 }
 0x74d   :  { %18648 = vmatmul.mubr.f32.vlgmr.msra.gmra.mxu0 %v31440_v48  ;;  %18695 = vmatpush1.msra.mxu1 %v31434_v62 }
 0x74e   :  { %18784 = vmatpush1.msra.mxu0 %v18526_v45  ;;  %18863 = vmatprep.subr.mxu1 %v31412_v46  ;;  %v19042_v42 = vand.u32 4294901760, %v19041_v38  ;;  %v19449_v46 = vsel %vm120_vm0, %v19444_v26, 0  ;;  %v34017_v45 = vld [vmem:[#allocation21_spill] sm:$0xff]  ;;  %v20637_v26 = vsub.f32 %v20499_v18, %v31666_v23 }
 0x74f   :  { %18944 = vmatprep.subr.mxu0 %v31482_v41  ;;  %18569 = vmatprep.mubr.f32.mxu1 %v34009_v16  ;;  %v31558_v6 = vand.u32 4294901760, %v19449_v46  ;;  %v19442_v39 = vmul.f32 %v19435_v60, %v34017_v45 }
 0x750   :  { %18653 = vmatprep.mubr.f32.mxu0 %v34009_v16  ;;  %18571 = vmatmul.mubr.f32.gmra.mxu1 %v31442_v11 }
 0x751   :  { %18656 = vmatmul.mubr.f32.gmra.mxu0 %v31456_v57  ;;  %18728 = vmatprep.mubr.f32.mxu1 %v34009_v16  ;;  %v31598_v9 = vand.u32 4294901760, %v19442_v39 }
 0x752   :  { %18817 = vmatprep.mubr.f32.mxu0 %v34009_v16 }
 0x753   :  { %v20085_v15 = vsub.f32 %v19442_v39, %v31598_v9 }
 0x754   :  { %18732 = vmatmul.mubr.f32.vlgmr.msra.gmra.mxu1 %v31453_v32 }
 0x755   :  { %18819 = vmatmul.mubr.f32.vlgmr.msra.gmra.mxu0 %v31430_v12  ;;  %18865 = vmatpush1.msra.mxu1 %v31434_v62  ;;  %v31572_v62 = vsub.f32 %v19449_v46, %v31558_v6  ;;  %v20086_v50 = vand.u32 4294901760, %v20085_v15 }
 0x756   :  { %18946 = vmatpush1.msra.mxu0 %v31496_v52  ;;  %19037 = vmatprep.subr.mxu1 %v19036_v20 }
 0x757   :  { %19123 = vmatprep.subr.mxu0 %v19033_v21  ;;  %18737 = vmatprep.mubr.f32.mxu1 %v34009_v16  ;;  %v31583_v24 = vand.u32 4294901760, %v31572_v62 }
 0x758   :  { %18824 = vmatprep.mubr.f32.mxu0 %v34009_v16  ;;  %18741 = vmatmul.mubr.f32.gmra.mxu1 %v31467_v34 }
 0x759   :  { %18826 = vmatmul.mubr.f32.gmra.mxu0 %v31442_v11  ;;  %18898 = vmatprep.mubr.f32.mxu1 %v34009_v16  ;;  %v19532_v4 = vsub.f32 %v31572_v62, %v31583_v24 }
 0x75a   :  { %18979 = vmatprep.mubr.f32.mxu0 %v34009_v16 }
 0x75c   :  { %18900 = vmatmul.mubr.f32.vlgmr.msra.gmra.mxu1 %v31430_v12 }
 0x75d   :  { %18985 = vmatmul.mubr.f32.vlgmr.msra.gmra.mxu0 %v18470_v5  ;;  %19043 = vmatpush1.msra.mxu1 %v19042_v42  ;;  %v34018_v5 = vld [vmem:[#allocation22_spill] sm:$0xff] }
 0x75e   :  { %19126 = vmatpush1.msra.mxu0 %v19039_v22  ;;  %19207 = vmatprep.subr.mxu1 %v31482_v41  ;;  %v19441_v29 = vmul.f32 %v19436_v3, %v34018_v5  ;;  %v34019_v22 = vld [vmem:[#allocation7_spill] sm:$0xff] }
 0x75f   :  { %19294 = vmatprep.subr.mxu0 %v19034_v49  ;;  %18905 = vmatprep.mubr.f32.mxu1 %v34009_v16 }
 0x760   :  { %18990 = vmatprep.mubr.f32.mxu0 %v34009_v16  ;;  %18907 = vmatmul.mubr.f32.gmra.mxu1 %v31442_v11 }
 0x761   :  { %18996 = vmatmul.mubr.f32.gmra.mxu0 %v31485_v56  ;;  %19076 = vmatprep.mubr.f32.mxu1 %v34009_v16  ;;  %v31625_v56 = vpop.permute.xlu1 %20489 }
 0x762   :  { %19159 = vmatprep.mubr.f32.mxu0 %v34009_v16 }
 0x764   :  { %19078 = vmatmul.mubr.f32.vlgmr.msra.gmra.mxu1 %v31430_v12 }
 0x765   :  { %19162 = vmatmul.mubr.f32.vlgmr.msra.gmra.mxu0 %v31440_v48  ;;  %19209 = vmatpush1.msra.mxu1 %v31496_v52  ;;  %v19578_v48 = vand.u32 4294901760, %v19577_v63 }
 0x766   :  { %19298 = vmatpush1.msra.mxu0 %v19040_v10  ;;  %19377 = vmatprep.subr.mxu1 %v31482_v41  ;;  %v20087_v41 = vsub.f32 %v20085_v15, %v20086_v50  ;;  %v20503_v10 = vld [vmem:[%s33640_s1 + $0xc0] sm:$0xff] }
 0x767   :  { %19482 = vmatprep.subr.mxu0 %v31529_v58  ;;  %19083 = vmatprep.mubr.f32.mxu1 %v34009_v16  ;;  %v20506_v38 = vsel %vm120_vm0, %v20503_v10, 0 }
 0x768   :  { %19167 = vmatprep.mubr.f32.mxu0 %v34009_v16  ;;  %19085 = vmatmul.mubr.f32.gmra.mxu1 %v31442_v11  ;;  %v20088_v21 = vand.u32 4294901760, %v20087_v41  ;;  %v31662_v59 = vand.u32 4294901760, %v20506_v38  ;;  %v21548_v41 = vld [vmem:[%s33640_s1 + $0xd8] sm:$0xff] }
 0x769   :  { %19170 = vmatmul.mubr.f32.gmra.mxu0 %v31456_v57  ;;  %19242 = vmatprep.mubr.f32.mxu1 %v34009_v16  ;;  %v19521_v57 = vsub.f32 %v31556_v28, %v31569_v51 }
 0x76a   :  { %19331 = vmatprep.mubr.f32.mxu0 %v34009_v16  ;;  %v31672_v2 = vsub.f32 %v20506_v38, %v31662_v59 }
 0x76b   :  { %v19522_v37 = vand.u32 4294901760, %v19521_v57 }
 0x76c   :  { %19246 = vmatmul.mubr.f32.vlgmr.msra.gmra.mxu1 %v31453_v32  ;;  %v19579_v32 = vsub.f32 %v19577_v63, %v19578_v48  ;;  %v31685_v46 = vand.u32 4294901760, %v31672_v2 }
 0x76d   :  { %19333 = vmatmul.mubr.f32.vlgmr.msra.gmra.mxu0 %v31430_v12  ;;  %19379 = vmatpush1.msra.mxu1 %v31496_v52  ;;  %v20497_v52 = vsel %vm2954_vm1, %v20488_v7, %v31625_v56 }
 0x76e   :  { %19484 = vmatpush1.msra.mxu0 %v31550_v8  ;;  %19575 = vmatprep.subr.mxu1 %v19574_v47  ;;  %v19580_v53 = vand.u32 4294901760, %v19579_v32  ;;  %v20500_v35 = vmul.f32 %v34019_v22, %v20497_v52 }
 0x76f   :  { %19661 = vmatprep.subr.mxu0 %v19571_v19  ;;  %19251 = vmatprep.mubr.f32.mxu1 %v34009_v16 }
 0x770   :  { %19338 = vmatprep.mubr.f32.mxu0 %v34009_v16  ;;  %19255 = vmatmul.mubr.f32.gmra.mxu1 %v31467_v34  ;;  %v31601_v34 = vand.u32 4294901760, %v19532_v4  ;;  %v31645_v20 = vand.u32 4294901760, %v20500_v35 }
 0x771   :  { %19340 = vmatmul.mubr.f32.gmra.mxu0 %v31442_v11  ;;  %19412 = vmatprep.mubr.f32.mxu1 %v34009_v16 }
 0x772   :  { %19517 = vmatprep.mubr.f32.mxu0 %v34009_v16  ;;  %v20631_v42 = vsub.f32 %v20500_v35, %v31645_v20 }
 0x774   :  { %19414 = vmatmul.mubr.f32.vlgmr.msra.gmra.mxu1 %v31430_v12  ;;  %v31612_v12 = vand.u32 4294901760, %v19441_v29  ;;  %v20632_v40 = vand.u32 4294901760, %v20631_v42 }
 0x775   :  { %19523 = vmatmul.mubr.f32.vlgmr.msra.gmra.mxu0 %v19522_v37  ;;  %19581 = vmatpush1.msra.mxu1 %v19580_v53 }
 0x776   :  { %19664 = vmatpush1.msra.mxu0 %v19577_v63  ;;  %19745 = vmatprep.subr.mxu1 %v31529_v58  ;;  %v20633_v19 = vsub.f32 %v20631_v42, %v20632_v40 }
 0x777   :  { %19832 = vmatprep.subr.mxu0 %v19572_v0  ;;  %19419 = vmatprep.mubr.f32.mxu1 %v34009_v16  ;;  %v20492_v0 = vpop.permute.xlu1 %20491 }
 0x778   :  { %19528 = vmatprep.mubr.f32.mxu0 %v34009_v16  ;;  %19421 = vmatmul.mubr.f32.gmra.mxu1 %v31442_v11  ;;  %v20091_v11 = vsub.f32 %v19441_v29, %v31612_v12  ;;  %v20634_v63 = vand.u32 4294901760, %v20633_v19  ;;  %v20495_v33 = vsel %vm2954_vm1, %v20492_v0, %v20494_v44  ;;  %v20496_v45 = vsel %vm2954_vm1, %v31625_v56, %v20492_v0 }
 0x779   :  { %19534 = vmatmul.mubr.f32.gmra.mxu0 %v31601_v34  ;;  %19614 = vmatprep.mubr.f32.mxu1 %v34009_v16  ;;  %v31836_v0 = vand.u32 4294901760, %v31267_v13 }
 0x77a   :  { %19697 = vmatprep.mubr.f32.mxu0 %v34009_v16  ;;  %v20092_v55 = vand.u32 4294901760, %v20091_v11 }
 0x77c   :  { %19616 = vmatmul.mubr.f32.vlgmr.msra.gmra.mxu1 %v31546_v30  ;;  %v20093_v49 = vsub.f32 %v20091_v11, %v20092_v55 }
 0x77d   :  { %19700 = vmatmul.mubr.f32.vlgmr.msra.gmra.mxu0 %v31556_v28  ;;  %19747 = vmatpush1.msra.mxu1 %v31550_v8 }
 0x77e   :  { %19836 = vmatpush1.msra.mxu0 %v19578_v48  ;;  %19915 = vmatprep.subr.mxu1 %v31529_v58  ;;  %v20094_v1 = vand.u32 4294901760, %v20093_v49  ;;  %v20509_v58 = vsel %vm120_vm0, %v20504_v54, 0  ;;  %v34021_v48 = vld [vmem:[#allocation11_spill] sm:$0xff] }
 0x77f   :  { %19996 = vmatprep.subr.mxu0 %v31598_v9  ;;  %19621 = vmatprep.mubr.f32.mxu1 %v34009_v16  ;;  %v31674_v25 = vand.u32 4294901760, %v20509_v58  ;;  %v20502_v47 = vmul.f32 %v34021_v48, %v20495_v33  ;;  %v31847_v48 = vsub.f32 %v31267_v13, %v31836_v0 }
 0x780   :  { %19705 = vmatprep.mubr.f32.mxu0 %v34009_v16  ;;  %19623 = vmatmul.mubr.f32.gmra.mxu1 %v31558_v6 }
 0x781   :  { %19708 = vmatmul.mubr.f32.gmra.mxu0 %v31572_v62  ;;  %19780 = vmatprep.mubr.f32.mxu1 %v34009_v16  ;;  %v31714_v39 = vand.u32 4294901760, %v20502_v47 }
 0x782   :  { %19869 = vmatprep.mubr.f32.mxu0 %v34009_v16 }
 0x783   :  { %v21145_v53 = vsub.f32 %v20502_v47, %v31714_v39 }
 0x784   :  { %19784 = vmatmul.mubr.f32.vlgmr.msra.gmra.mxu1 %v31569_v51 }
 0x785   :  { %19871 = vmatmul.mubr.f32.vlgmr.msra.gmra.mxu0 %v31546_v30  ;;  %19917 = vmatpush1.msra.mxu1 %v31550_v8  ;;  %v31688_v8 = vsub.f32 %v20509_v58, %v31674_v25  ;;  %v21146_v3 = vand.u32 4294901760, %v21145_v53 }
 0x786   :  { %19998 = vmatpush1.msra.mxu0 %v31612_v12  ;;  %20089 = vmatprep.subr.mxu1 %v20088_v21  ;;  %v31772_v21 = vand.u32 4294901760, %v31259_v27 }
 0x787   :  { %20175 = vmatprep.subr.mxu0 %v20085_v15  ;;  %19789 = vmatprep.mubr.f32.mxu1 %v34009_v16  ;;  %v31699_v31 = vand.u32 4294901760, %v31688_v8 }
 0x788   :  { %19876 = vmatprep.mubr.f32.mxu0 %v34009_v16  ;;  %19793 = vmatmul.mubr.f32.gmra.mxu1 %v31583_v24  ;;  %v21681_v35 = vsub.f32 %v31259_v27, %v31772_v21 }
 0x789   :  { %19878 = vmatmul.mubr.f32.gmra.mxu0 %v31558_v6  ;;  %19950 = vmatprep.mubr.f32.mxu1 %v34009_v16  ;;  %v20592_v57 = vsub.f32 %v31688_v8, %v31699_v31 }
 0x78a   :  { %20031 = vmatprep.mubr.f32.mxu0 %v34009_v16 }
 0x78c   :  { %19952 = vmatmul.mubr.f32.vlgmr.msra.gmra.mxu1 %v31546_v30 }
 0x78d   :  { %20037 = vmatmul.mubr.f32.vlgmr.msra.gmra.mxu0 %v19522_v37  ;;  %20095 = vmatpush1.msra.mxu1 %v20094_v1  ;;  %v34022_v37 = vld [vmem:[#allocation12_spill] sm:$0xff] }
 0x78e   :  { %20178 = vmatpush1.msra.mxu0 %v20091_v11  ;;  %20259 = vmatprep.subr.mxu1 %v31598_v9  ;;  %v20501_v4 = vmul.f32 %v34022_v37, %v20496_v45 }
 0x78f   :  { %20346 = vmatprep.subr.mxu0 %v20086_v50  ;;  %19957 = vmatprep.mubr.f32.mxu1 %v34009_v16  ;;  %v31754_v50 = vand.u32 4294901760, %v31261_v36 }
 0x790   :  { %20042 = vmatprep.mubr.f32.mxu0 %v34009_v16  ;;  %19959 = vmatmul.mubr.f32.gmra.mxu1 %v31558_v6 }
 0x791   :  { %20048 = vmatmul.mubr.f32.gmra.mxu0 %v31601_v34  ;;  %20128 = vmatprep.mubr.f32.mxu1 %v34009_v16  ;;  %v21675_v56 = vsub.f32 %v31261_v36, %v31754_v50 }
 0x792   :  { %20211 = vmatprep.mubr.f32.mxu0 %v34009_v16 }
 0x793   :  { %v21676_v52 = vand.u32 4294901760, %v21675_v56 }
 0x794   :  { %20130 = vmatmul.mubr.f32.vlgmr.msra.gmra.mxu1 %v31546_v30 }
 0x795   :  { %20214 = vmatmul.mubr.f32.vlgmr.msra.gmra.mxu0 %v31556_v28  ;;  %20261 = vmatpush1.msra.mxu1 %v31612_v12  ;;  %v20638_v28 = vand.u32 4294901760, %v20637_v26  ;;  %v21677_v44 = vsub.f32 %v21675_v56, %v21676_v52 }
 0x796   :  { %20350 = vmatpush1.msra.mxu0 %v20092_v55  ;;  %20429 = vmatprep.subr.mxu1 %v31598_v9  ;;  %v21553_v55 = vsel %vm120_vm0, %v21548_v41, 0 }
 0x797   :  { %20542 = vmatprep.subr.mxu0 %v31645_v20  ;;  %20135 = vmatprep.mubr.f32.mxu1 %v34009_v16  ;;  %v31780_v22 = vand.u32 4294901760, %v21553_v55  ;;  %v21678_v14 = vand.u32 4294901760, %v21677_v44 }
 0x798   :  { %20219 = vmatprep.mubr.f32.mxu0 %v34009_v16  ;;  %20137 = vmatmul.mubr.f32.gmra.mxu1 %v31558_v6 }
 0x799   :  { %20222 = vmatmul.mubr.f32.gmra.mxu0 %v31572_v62  ;;  %20294 = vmatprep.mubr.f32.mxu1 %v34009_v16  ;;  %v20581_v62 = vsub.f32 %v31672_v2, %v31685_v46  ;;  %v31795_v10 = vsub.f32 %v21553_v55, %v31780_v22  ;;  %v34023_v55 = vld [vmem:[#allocation15_spill] sm:$0xff] }
 0x79a   :  { %20383 = vmatprep.mubr.f32.mxu0 %v34009_v16 }
 0x79b   :  { %v20582_v60 = vand.u32 4294901760, %v20581_v62  ;;  %v31804_v17 = vand.u32 4294901760, %v31795_v10 }
 0x79c   :  { %20298 = vmatmul.mubr.f32.vlgmr.msra.gmra.mxu1 %v31569_v51  ;;  %v20639_v51 = vsub.f32 %v20637_v26, %v20638_v28 }
 0x79d   :  { %20385 = vmatmul.mubr.f32.vlgmr.msra.gmra.mxu0 %v31546_v30  ;;  %20431 = vmatpush1.msra.mxu1 %v31612_v12  ;;  %v21547_v12 = vld [vmem:[%s33640_s1 + $0xd0] sm:$0xff] }
 0x79e   :  { %20544 = vmatpush1.msra.mxu0 %v31666_v23  ;;  %20635 = vmatprep.subr.mxu1 %v20634_v63  ;;  %v20640_v32 = vand.u32 4294901760, %v20639_v51  ;;  %v21550_v11 = vsel %vm120_vm0, %v21547_v12, 0 }
 0x79f   :  { %20721 = vmatprep.subr.mxu0 %v20631_v42  ;;  %20303 = vmatprep.mubr.f32.mxu1 %v34009_v16  ;;  %v31767_v7 = vand.u32 4294901760, %v21550_v11  ;;  %v21636_v42 = vsub.f32 %v31795_v10, %v31804_v17 }
 0x7a0   :  { %20390 = vmatprep.mubr.f32.mxu0 %v34009_v16  ;;  %20307 = vmatmul.mubr.f32.gmra.mxu1 %v31583_v24  ;;  %v20593_v24 = vand.u32 4294901760, %v20592_v57  ;;  %v31854_v57 = vpop.permute.xlu1 %22595 }
 0x7a1   :  { %20392 = vmatmul.mubr.f32.gmra.mxu0 %v31558_v6  ;;  %20464 = vmatprep.mubr.f32.mxu1 %v34009_v16  ;;  %v31778_v49 = vsub.f32 %v21550_v11, %v31767_v7 }
 0x7a2   :  { %20577 = vmatprep.mubr.f32.mxu0 %v34009_v16 }
 0x7a3   :  { %v31792_v1 = vand.u32 4294901760, %v31778_v49 }
 0x7a4   :  { %20466 = vmatmul.mubr.f32.vlgmr.msra.gmra.mxu1 %v31546_v30  ;;  %v31725_v30 = vand.u32 4294901760, %v20501_v4 }
 0x7a5   :  { %20583 = vmatmul.mubr.f32.vlgmr.msra.gmra.mxu0 %v20582_v60  ;;  %20641 = vmatpush1.msra.mxu1 %v20640_v32  ;;  %v21625_v38 = vsub.f32 %v31778_v49, %v31792_v1 }
 0x7a6   :  { %20724 = vmatpush1.msra.mxu0 %v20637_v26  ;;  %20805 = vmatprep.subr.mxu1 %v31645_v20  ;;  %v21151_v9 = vsub.f32 %v20501_v4, %v31725_v30  ;;  %v31822_v26 = vand.u32 4294901760, %v21636_v42 }
 0x7a7   :  { %20892 = vmatprep.subr.mxu0 %v20632_v40  ;;  %20471 = vmatprep.mubr.f32.mxu1 %v34009_v16  ;;  %v31812_v54 = vand.u32 4294901760, %v21625_v38  ;;  %v31819_v40 = vand.u32 4294901760, %v31269_v43 }
 0x7a8   :  { %20588 = vmatprep.mubr.f32.mxu0 %v34009_v16  ;;  %20473 = vmatmul.mubr.f32.gmra.mxu1 %v31558_v6  ;;  %v21147_v6 = vsub.f32 %v21145_v53, %v21146_v3  ;;  %v21152_v34 = vand.u32 4294901760, %v21151_v9 }
 0x7a9   :  { %20594 = vmatmul.mubr.f32.gmra.mxu0 %v20593_v24  ;;  %20674 = vmatprep.mubr.f32.mxu1 %v34009_v16 }
 0x7aa   :  { %20757 = vmatprep.mubr.f32.mxu0 %v34009_v16  ;;  %v21148_v5 = vand.u32 4294901760, %v21147_v6  ;;  %v21153_v29 = vsub.f32 %v21151_v9, %v21152_v34 }
 0x7ac   :  { %20676 = vmatmul.mubr.f32.vlgmr.msra.gmra.mxu1 %v31662_v59  ;;  %v21154_v15 = vand.u32 4294901760, %v21153_v29 }
 0x7ad   :  { %20760 = vmatmul.mubr.f32.vlgmr.msra.gmra.mxu0 %v31672_v2  ;;  %20807 = vmatpush1.msra.mxu1 %v31666_v23 }
 0x7ae   :  { %20896 = vmatpush1.msra.mxu0 %v20638_v28  ;;  %20975 = vmatprep.subr.mxu1 %v31645_v20  ;;  %v21682_v20 = vand.u32 4294901760, %v21681_v35 }
 0x7af   :  { %21056 = vmatprep.subr.mxu0 %v31714_v39  ;;  %20681 = vmatprep.mubr.f32.mxu1 %v34009_v16 }
 0x7b0   :  { %20765 = vmatprep.mubr.f32.mxu0 %v34009_v16  ;;  %20683 = vmatmul.mubr.f32.gmra.mxu1 %v31674_v25  ;;  %v21683_v18 = vsub.f32 %v21681_v35, %v21682_v20 }
 0x7b1   :  { %20768 = vmatmul.mubr.f32.gmra.mxu0 %v31688_v8  ;;  %20840 = vmatprep.mubr.f32.mxu1 %v34009_v16 }
 0x7b2   :  { %20929 = vmatprep.mubr.f32.mxu0 %v34009_v16 }
 0x7b4   :  { %20844 = vmatmul.mubr.f32.vlgmr.msra.gmra.mxu1 %v31685_v46 }
 0x7b5   :  { %20931 = vmatmul.mubr.f32.vlgmr.msra.gmra.mxu0 %v31662_v59  ;;  %20977 = vmatpush1.msra.mxu1 %v31666_v23  ;;  %v21684_v23 = vand.u32 4294901760, %v21683_v18 }
 0x7b6   :  { %21058 = vmatpush1.msra.mxu0 %v31725_v30  ;;  %21149 = vmatprep.subr.mxu1 %v21148_v5 }
 0x7b7   :  { %21235 = vmatprep.subr.mxu0 %v21145_v53  ;;  %20849 = vmatprep.mubr.f32.mxu1 %v34009_v16 }
 0x7b8   :  { %20936 = vmatprep.mubr.f32.mxu0 %v34009_v16  ;;  %20853 = vmatmul.mubr.f32.gmra.mxu1 %v31699_v31 }
 0x7b9   :  { %20938 = vmatmul.mubr.f32.gmra.mxu0 %v31674_v25  ;;  %21010 = vmatprep.mubr.f32.mxu1 %v34009_v16 }
 0x7ba   :  { %21091 = vmatprep.mubr.f32.mxu0 %v34009_v16 }
 0x7bc   :  { %21012 = vmatmul.mubr.f32.vlgmr.msra.gmra.mxu1 %v31662_v59 }
 0x7bd   :  { %21097 = vmatmul.mubr.f32.vlgmr.msra.gmra.mxu0 %v20582_v60  ;;  %21155 = vmatpush1.msra.mxu1 %v21154_v15 }
 0x7be   :  { %21238 = vmatpush1.msra.mxu0 %v21151_v9  ;;  %21319 = vmatprep.subr.mxu1 %v31714_v39 }
 0x7bf   :  { %21406 = vmatprep.subr.mxu0 %v21146_v3  ;;  %21017 = vmatprep.mubr.f32.mxu1 %v34009_v16  ;;  %v22196_v3 = vand.u32 4294901760, %v31847_v48 }
 0x7c0   :  { %21102 = vmatprep.mubr.f32.mxu0 %v34009_v16  ;;  %21019 = vmatmul.mubr.f32.gmra.mxu1 %v31674_v25 }
 0x7c1   :  { %21108 = vmatmul.mubr.f32.gmra.mxu0 %v20593_v24  ;;  %21188 = vmatprep.mubr.f32.mxu1 %v34009_v16  ;;  %v22594_v24 = vpop.permute.xlu0 %22593 }
 0x7c2   :  { %21271 = vmatprep.mubr.f32.mxu0 %v34009_v16 }
 0x7c4   :  { %21190 = vmatmul.mubr.f32.vlgmr.msra.gmra.mxu1 %v31662_v59 }
 0x7c5   :  { %21274 = vmatmul.mubr.f32.vlgmr.msra.gmra.mxu0 %v31672_v2  ;;  %21321 = vmatpush1.msra.mxu1 %v31725_v30 }
 0x7c6   :  { %21410 = vmatpush1.msra.mxu0 %v21152_v34  ;;  %21489 = vmatprep.subr.mxu1 %v31714_v39  ;;  %v22600_v34 = vsel %vm4847_vm3, %v22594_v24, %v31854_v57 }
 0x7c7   :  { %21586 = vmatprep.subr.mxu0 %v31754_v50  ;;  %21195 = vmatprep.mubr.f32.mxu1 %v34009_v16 }
 0x7c8   :  { %21279 = vmatprep.mubr.f32.mxu0 %v34009_v16  ;;  %21197 = vmatmul.mubr.f32.gmra.mxu1 %v31674_v25 }
 0x7c9   :  { %21282 = vmatmul.mubr.f32.gmra.mxu0 %v31688_v8  ;;  %21354 = vmatprep.mubr.f32.mxu1 %v34009_v16 }
 0x7ca   :  { %21443 = vmatprep.mubr.f32.mxu0 %v34009_v16 }
 0x7cc   :  { %21358 = vmatmul.mubr.f32.vlgmr.msra.gmra.mxu1 %v31685_v46 }
 0x7cd   :  { %21445 = vmatmul.mubr.f32.vlgmr.msra.gmra.mxu0 %v31662_v59  ;;  %21491 = vmatpush1.msra.mxu1 %v31725_v30 }
 0x7ce   :  { %21588 = vmatpush1.msra.mxu0 %v31772_v21  ;;  %21679 = vmatprep.subr.mxu1 %v21678_v14 }
 0x7cf   :  { %21765 = vmatprep.subr.mxu0 %v21675_v56  ;;  %21363 = vmatprep.mubr.f32.mxu1 %v34009_v16  ;;  %v22197_v56 = vsub.f32 %v31847_v48, %v22196_v3 }
 0x7d0   :  { %21450 = vmatprep.mubr.f32.mxu0 %v34009_v16  ;;  %21367 = vmatmul.mubr.f32.gmra.mxu1 %v31699_v31 }
 0x7d1   :  { %21452 = vmatmul.mubr.f32.gmra.mxu0 %v31674_v25  ;;  %21524 = vmatprep.mubr.f32.mxu1 %v34009_v16 }
 0x7d2   :  { %21621 = vmatprep.mubr.f32.mxu0 %v34009_v16 }
 0x7d4   :  { %v17438_v58 = vpop.f32.mrf.mxu0  ;;  %21526 = vmatmul.mubr.f32.vlgmr.msra.gmra.mxu1 %v31662_v59  ;;  %v31830_v59 = vsub.f32 %v31269_v43, %v31819_v40 }
 0x7d5   :  { %21627 = vmatmul.mubr.f32.vlgmr.msra.gmra.mxu0 %v31812_v54  ;;  %21685 = vmatpush1.msra.mxu1 %v21684_v23  ;;  %v22198_v23 = vand.u32 4294901760, %v22197_v56 }
 0x7d6   :  { %v17440_v2 = vpop.f32.mrf.mxu0  ;;  %21768 = vmatpush1.msra.mxu0 %v21681_v35  ;;  %21849 = vmatprep.subr.mxu1 %v31754_v50  ;;  %v31875_v35 = vpop.permute.xlu0 %22591 }
 0x7d7   :  { %21936 = vmatprep.subr.mxu0 %v21676_v52  ;;  %21531 = vmatprep.mubr.f32.mxu1 %v34009_v16  ;;  %v22604_v52 = vmul.f32 %v34023_v55, %v22600_v34 }
 0x7d8   :  { %v17449_v19 = vpop.f32.mrf.mxu0  ;;  %21632 = vmatprep.mubr.f32.mxu0 %v34009_v16  ;;  %21533 = vmatmul.mubr.f32.gmra.mxu1 %v31674_v25  ;;  %v22190_v25 = vand.u32 4294901760, %v31830_v59 }
 0x7d9   :  { %21638 = vmatmul.mubr.f32.gmra.mxu0 %v31822_v26  ;;  %21718 = vmatprep.mubr.f32.mxu1 %v34009_v16 }
 0x7da   :  { %v17451_v46 = vpop.f32.mrf.mxu0  ;;  %21801 = vmatprep.mubr.f32.mxu0 %v34009_v16  ;;  %v22191_v60 = vsub.f32 %v31830_v59, %v22190_v25 }
 0x7dc   :  { %v17615_v8 = vpop.f32.mrf.mxu0  ;;  %v17531_v28 = vpop.f32.mrf.mxu1  ;;  %21720 = vmatmul.mubr.f32.vlgmr.msra.gmra.mxu1 %v31767_v7  ;;  %v22192_v6 = vand.u32 4294901760, %v22191_v60 }
 0x7dd   :  { %v17532_v63 = vadd.f32 %v17531_v28, %v17438_v58  ;;  %21804 = vmatmul.mubr.f32.vlgmr.msra.gmra.mxu0 %v31778_v49  ;;  %21851 = vmatpush1.msra.mxu1 %v31772_v21 }
 0x7de   :  { %v17617_v33 = vpop.f32.mrf.mxu0  ;;  %21940 = vmatpush1.msra.mxu0 %v21682_v20  ;;  %22019 = vmatprep.subr.mxu1 %v31754_v50  ;;  %v17533_v62 = vpop.f32.mrf.mxu1 }
 0x7df   :  { %v17616_v31 = vadd.f32 %v17615_v8, %v17532_v63  ;;  %22100 = vmatprep.subr.mxu0 %v31819_v40  ;;  %v17534_v51 = vadd.f32 %v17533_v62, %v17440_v2  ;;  %21725 = vmatprep.mubr.f32.mxu1 %v34009_v16  ;;  %v22607_v2 = vld [vmem:[%s33640_s1 + $0xe0] sm:$0xff] }
 0x7e0   :  { %21809 = vmatprep.mubr.f32.mxu0 %v34009_v16  ;;  %v17538_v47 = vpop.f32.mrf.mxu1  ;;  %21727 = vmatmul.mubr.f32.gmra.mxu1 %v31780_v22 }
 0x7e1   :  { %v17618_v32 = vadd.f32 %v17617_v33, %v17534_v51  ;;  %v17539_v45 = vadd.f32 %v17538_v47, %v17449_v19  ;;  %v17623_v39 = vpop.f32.mrf.mxu0  ;;  %21812 = vmatmul.mubr.f32.gmra.mxu0 %v31795_v10  ;;  %21884 = vmatprep.mubr.f32.mxu1 %v34009_v16  ;;  %v31883_v19 = vand.u32 4294901760, %v22604_v52  ;;  %v34024_v51 = vld [vmem:[#allocation17_spill] sm:$0xff] }
 0x7e2   :  { %v17540_v37 = vpop.f32.mrf.mxu1  ;;  %21973 = vmatprep.mubr.f32.mxu0 %v34009_v16 }
 0x7e3   :  { %v17624_v4 = vadd.f32 %v17623_v39, %v17539_v45  ;;  %v17541_v53 = vadd.f32 %v17540_v37, %v17451_v46  ;;  %v17625_v30 = vpop.f32.mrf.mxu0  ;;  %v22601_v46 = vsel %vm4847_vm3, %v31875_v35, %v22594_v24  ;;  %v31905_v45 = vsub.f32 %v22604_v52, %v31883_v19 }
 0x7e4   :  { %v17699_v9 = vpop.f32.mrf.mxu1  ;;  %21888 = vmatmul.mubr.f32.vlgmr.msra.gmra.mxu1 %v31792_v1  ;;  %v22603_v47 = vmul.f32 %v34024_v51, %v22601_v46  ;;  %v34025_v51 = vld [vmem:[#allocation19_spill] sm:$0xff] }
 0x7e5   :  { %v17626_v5 = vadd.f32 %v17625_v30, %v17541_v53  ;;  %v17700_v29 = vadd.f32 %v17699_v9, %v17616_v31  ;;  %v17786_v15 = vpop.f32.mrf.mxu0  ;;  %21975 = vmatmul.mubr.f32.vlgmr.msra.gmra.mxu0 %v31767_v7  ;;  %22021 = vmatpush1.msra.mxu1 %v31772_v21  ;;  %v22610_v31 = vsel %vm120_vm0, %v22607_v2, 0  ;;  %v22736_v34 = vand.u32 4294901760, %v31905_v45 }
 0x7e6   :  { %22102 = vmatpush1.msra.mxu0 %v31836_v0  ;;  %22193 = vmatprep.subr.mxu1 %v22192_v6  ;;  %v17701_v12 = vpop.f32.mrf.mxu1  ;;  %v31917_v53 = vand.u32 4294901760, %v22603_v47 }
 0x7e7   :  { %v17787_v50 = vadd.f32 %v17786_v15, %v17700_v29  ;;  %22279 = vmatprep.subr.mxu0 %v31830_v59  ;;  %v17702_v11 = vadd.f32 %v17701_v12, %v17618_v32  ;;  %v17788_v41 = vpop.f32.mrf.mxu0  ;;  %21893 = vmatprep.mubr.f32.mxu1 %v34009_v16 }
 0x7e8   :  { %21980 = vmatprep.mubr.f32.mxu0 %v34009_v16  ;;  %v17708_v21 = vpop.f32.mrf.mxu1  ;;  %21897 = vmatmul.mubr.f32.gmra.mxu1 %v31804_v17 }
 0x7e9   :  { %v17789_v44 = vadd.f32 %v17788_v41, %v17702_v11  ;;  %v17709_v20 = vadd.f32 %v17708_v21, %v17624_v4  ;;  %v17793_v14 = vpop.f32.mrf.mxu0  ;;  %21982 = vmatmul.mubr.f32.gmra.mxu0 %v31780_v22  ;;  %22054 = vmatprep.mubr.f32.mxu1 %v34009_v16 }
 0x7ea   :  { %v17710_v38 = vpop.f32.mrf.mxu1  ;;  %22135 = vmatprep.mubr.f32.mxu0 %v34009_v16 }
 0x7eb   :  { %v17794_v18 = vadd.f32 %v17793_v14, %v17709_v20  ;;  %v17711_v42 = vadd.f32 %v17710_v38, %v17626_v5  ;;  %v17795_v58 = vpop.f32.mrf.mxu0 }
 0x7ec   :  { %v17867_v8 = vpop.f32.mrf.mxu1  ;;  %22056 = vmatmul.mubr.f32.vlgmr.msra.gmra.mxu1 %v31767_v7 }
 0x7ed   :  { %v17796_v28 = vadd.f32 %v17795_v58, %v17711_v42  ;;  %v31889_v63 = vadd.f32 %v17867_v8, %v17787_v50  ;;  %v17952_v33 = vpop.f32.mrf.mxu0  ;;  %22141 = vmatmul.mubr.f32.vlgmr.msra.gmra.mxu0 %v31812_v54  ;;  %22199 = vmatpush1.msra.mxu1 %v22198_v23  ;;  %v22608_v54 = vld [vmem:[%s33640_s1 + $0xe8] sm:$0xff]  ;;  %v31934_v50 = vsub.f32 %v22603_v47, %v31917_v53 }
 0x7ee   :  { %22282 = vmatpush1.msra.mxu0 %v31847_v48  ;;  %22363 = vmatprep.subr.mxu1 %v31819_v40  ;;  %v17869_v62 = vpop.f32.mrf.mxu1  ;;  %v22613_v4 = vsel %vm120_vm0, %v22608_v54, 0  ;;  %v22598_v48 = vpop.permute.xlu1 %22597 }
 0x7ef   :  { %22450 = vmatprep.subr.mxu0 %v22190_v25  ;;  %v31898_v60 = vadd.f32 %v17869_v62, %v17789_v44  ;;  %v17954_v32 = vpop.f32.mrf.mxu0  ;;  %22061 = vmatprep.mubr.f32.mxu1 %v34009_v16  ;;  %v31913_v25 = vand.u32 4294901760, %v22610_v31  ;;  %v31928_v15 = vand.u32 4294901760, %v22613_v4  ;;  %v22742_v14 = vand.u32 4294901760, %v31934_v50 }
 0x7f0   :  { %22146 = vmatprep.mubr.f32.mxu0 %v34009_v16  ;;  %v17874_v39 = vpop.f32.mrf.mxu1  ;;  %22063 = vmatmul.mubr.f32.gmra.mxu1 %v31780_v22 }
 0x7f1   :  { %v31909_v24 = vadd.f32 %v17874_v39, %v17794_v18  ;;  %v17963_v59 = vpop.f32.mrf.mxu0  ;;  %22152 = vmatmul.mubr.f32.gmra.mxu0 %v31822_v26  ;;  %22232 = vmatprep.mubr.f32.mxu1 %v34009_v16  ;;  %v31926_v29 = vsub.f32 %v22610_v31, %v31913_v25  ;;  %v31949_v44 = vsub.f32 %v22613_v4, %v31928_v15 }
 0x7f2   :  { %v17876_v37 = vpop.f32.mrf.mxu1  ;;  %22315 = vmatprep.mubr.f32.mxu0 %v34009_v16 }
 0x7f3   :  { %v31919_v30 = vadd.f32 %v17876_v37, %v17796_v28  ;;  %v17965_v9 = vpop.f32.mrf.mxu0  ;;  %v31946_v21 = vand.u32 4294901760, %v31926_v29 }
 0x7f4   :  { %v18045_v6 = vpop.f32.mrf.mxu1  ;;  %22234 = vmatmul.mubr.f32.vlgmr.msra.gmra.mxu1 %v31767_v7 }
 0x7f5   :  { %v18046_v26 = vadd.f32 %v18045_v6, %v17952_v33  ;;  %v18129_v5 = vpop.f32.mrf.mxu0  ;;  %22318 = vmatmul.mubr.f32.vlgmr.msra.gmra.mxu0 %v31778_v49  ;;  %22365 = vmatpush1.msra.mxu1 %v31836_v0  ;;  %v22685_v28 = vsub.f32 %v31926_v29, %v31946_v21  ;;  %v31962_v33 = vand.u32 4294901760, %v31949_v44 }
 0x7f6   :  { %22454 = vmatpush1.msra.mxu0 %v22196_v3  ;;  %22533 = vmatprep.subr.mxu1 %v31819_v40  ;;  %v18047_v12 = vpop.f32.mrf.mxu1  ;;  %v22737_v40 = vsub.f32 %v31905_v45, %v22736_v34 }
 0x7f7   :  { %v18130_v11 = vadd.f32 %v18129_v5, %v18046_v26  ;;  %22646 = vmatprep.subr.mxu0 %v31883_v19  ;;  %v18048_v49 = vadd.f32 %v18047_v12, %v17954_v32  ;;  %v18131_v41 = vpop.f32.mrf.mxu0  ;;  %22239 = vmatprep.mubr.f32.mxu1 %v34009_v16  ;;  %v31975_v37 = vand.u32 4294901760, %v22685_v28  ;;  %v22696_v4 = vsub.f32 %v31949_v44, %v31962_v33 }
 0x7f8   :  { %22323 = vmatprep.mubr.f32.mxu0 %v34009_v16  ;;  %v18052_v56 = vpop.f32.mrf.mxu1  ;;  %22241 = vmatmul.mubr.f32.gmra.mxu1 %v31780_v22  ;;  %v22738_v23 = vand.u32 4294901760, %v22737_v40 }
 0x7f9   :  { %v18132_v3 = vadd.f32 %v18131_v41, %v18048_v49  ;;  %v18053_v55 = vadd.f32 %v18052_v56, %v17963_v59  ;;  %v18137_v52 = vpop.f32.mrf.mxu0  ;;  %22326 = vmatmul.mubr.f32.gmra.mxu0 %v31795_v10  ;;  %22398 = vmatprep.mubr.f32.mxu1 %v34009_v16  ;;  %v22602_v10 = vsel %vm4847_vm3, %v22598_v48, %v31875_v35 }
 0x7fa   :  { %v18054_v20 = vpop.f32.mrf.mxu1  ;;  %22487 = vmatprep.mubr.f32.mxu0 %v34009_v16  ;;  %v22606_v47 = vmul.f32 %v34025_v51, %v22602_v10 }
 0x7fb   :  { %v18138_v38 = vadd.f32 %v18137_v52, %v18053_v55  ;;  %v18055_v18 = vadd.f32 %v18054_v20, %v17965_v9  ;;  %v18139_v42 = vpop.f32.mrf.mxu0 }
 0x7fc   :  { %v18213_v58 = vpop.f32.mrf.mxu1  ;;  %22402 = vmatmul.mubr.f32.vlgmr.msra.gmra.mxu1 %v31792_v1 }
 0x7fd   :  { %v18140_v2 = vadd.f32 %v18139_v42, %v18055_v18  ;;  %v18214_v46 = vadd.f32 %v18213_v58, %v18130_v11  ;;  %v18300_v8 = vpop.f32.mrf.mxu0  ;;  %22489 = vmatmul.mubr.f32.vlgmr.msra.gmra.mxu0 %v31767_v7  ;;  %22535 = vmatpush1.msra.mxu1 %v31836_v0  ;;  %v22743_v0 = vsub.f32 %v31934_v50, %v22742_v14  ;;  %v31983_v11 = vand.u32 4294901760, %v22606_v47 }
 0x7fe   :  { %22648 = vmatpush1.msra.mxu0 %v31917_v53  ;;  %22739 = vmatprep.subr.mxu1 %v22738_v23  ;;  %v18215_v35 = vpop.f32.mrf.mxu1 }
 0x7ff   :  { %v18301_v62 = vadd.f32 %v18300_v8, %v18214_v46  ;;  %22825 = vmatprep.subr.mxu0 %v31905_v45  ;;  %v18216_v1 = vadd.f32 %v18215_v35, %v18132_v3  ;;  %v18302_v31 = vpop.f32.mrf.mxu0  ;;  %22407 = vmatprep.mubr.f32.mxu1 %v34009_v16  ;;  %v22744_v12 = vand.u32 4294901760, %v22743_v0  ;;  %v31989_v3 = vand.u32 4294901760, %v22696_v4 }
 0x800   :  { %22494 = vmatprep.mubr.f32.mxu0 %v34009_v16  ;;  %v18222_v32 = vpop.f32.mrf.mxu1  ;;  %22411 = vmatmul.mubr.f32.gmra.mxu1 %v31804_v17  ;;  %v22599_v17 = vsel %vm4847_vm3, %v31854_v57, %v22598_v48  ;;  %v34026_v48 = vld [vmem:[#allocation20_spill] sm:$0xff] }
 0x801   :  { %v18303_v54 = vadd.f32 %v18302_v31, %v18216_v1  ;;  %v18223_v39 = vadd.f32 %v18222_v32, %v18138_v38  ;;  %v18307_v59 = vpop.f32.mrf.mxu0  ;;  %22496 = vmatmul.mubr.f32.gmra.mxu0 %v31780_v22  ;;  %22568 = vmatprep.mubr.f32.mxu1 %v34009_v16  ;;  %v22605_v52 = vmul.f32 %v34026_v48, %v22599_v17  ;;  %v34027_v48 = vld [vmem:[#allocation40_spill] sm:$0xff] }
 0x802   :  { %v18224_v9 = vpop.f32.mrf.mxu1  ;;  %22681 = vmatprep.mubr.f32.mxu0 %v34009_v16  ;;  %v32001_v38 = vsub.f32 %v22606_v47, %v31983_v11  ;;  %v23654_v47 = vpop.permute.xlu0 %23653 }
 0x803   :  { %v18308_v6 = vadd.f32 %v18307_v59, %v18223_v39  ;;  %v18225_v26 = vadd.f32 %v18224_v9, %v18140_v2  ;;  %v18309_v5 = vpop.f32.mrf.mxu0  ;;  %v32012_v58 = vand.u32 4294901760, %v22605_v52 }
 0x804   :  { %v18381_v49 = vpop.f32.mrf.mxu1  ;;  %22570 = vmatmul.mubr.f32.vlgmr.msra.gmra.mxu1 %v31767_v7  ;;  %v23250_v46 = vand.u32 4294901760, %v32001_v38 }
 0x805   :  { %v18310_v41 = vadd.f32 %v18309_v5, %v18225_v26  ;;  %v31986_v56 = vadd.f32 %v18381_v49, %v18301_v62  ;;  %v18472_v40 = vpop.f32.mrf.mxu0  ;;  %22687 = vmatmul.mubr.f32.vlgmr.msra.gmra.mxu0 %v31975_v37  ;;  %22745 = vmatpush1.msra.mxu1 %v22744_v12  ;;  %v32025_v35 = vsub.f32 %v22605_v52, %v32012_v58 }
 0x806   :  { %v18473_v55 = vadd.f32 %v18472_v40, %v31889_v63  ;;  %22828 = vmatpush1.msra.mxu0 %v31934_v50  ;;  %22909 = vmatprep.subr.mxu1 %v31883_v19  ;;  %v18383_v57 = vpop.f32.mrf.mxu1  ;;  %v32034_v50 = vpop.permute.xlu1 %23655 }
 0x807   :  { %22996 = vmatprep.subr.mxu0 %v22736_v34  ;;  %v31997_v7 = vadd.f32 %v18383_v57, %v18303_v54  ;;  %v18474_v20 = vpop.f32.mrf.mxu0  ;;  %22575 = vmatprep.mubr.f32.mxu1 %v34009_v16  ;;  %v23256_v54 = vand.u32 4294901760, %v32025_v35  ;;  %v23660_v26 = vsel %vm5802_vm6, %v23654_v47, %v32034_v50 }
 0x808   :  { %v18475_v63 = vadd.f32 %v18474_v20, %v31898_v60  ;;  %22692 = vmatprep.mubr.f32.mxu0 %v34009_v16  ;;  %v18388_v18 = vpop.f32.mrf.mxu1  ;;  %22577 = vmatmul.mubr.f32.gmra.mxu1 %v31780_v22  ;;  %v23664_v52 = vmul.f32 %v23660_v26, %v34027_v48  ;;  %v32055_v20 = vpop.permute.xlu0 %23651 }
 0x809   :  { %v32006_v42 = vadd.f32 %v18388_v18, %v18308_v6  ;;  %v18483_v10 = vpop.f32.mrf.mxu0  ;;  %22698 = vmatmul.mubr.f32.gmra.mxu0 %v31989_v3  ;;  %22778 = vmatprep.mubr.f32.mxu1 %v34009_v16  ;;  %v23257_v57 = vsub.f32 %v32025_v35, %v23256_v54 }
 0x80a   :  { %v18484_v45 = vadd.f32 %v18483_v10, %v31909_v24  ;;  %v18390_v34 = vpop.f32.mrf.mxu1  ;;  %22861 = vmatprep.mubr.f32.mxu0 %v34009_v16 }
 0x80b   :  { %v32014_v60 = vadd.f32 %v18390_v34, %v18310_v41  ;;  %v18485_v23 = vpop.f32.mrf.mxu0 }
 0x80c   :  { %v18486_v2 = vadd.f32 %v18485_v23, %v31919_v30  ;;  %v18565_v22 = vpop.f32.mrf.mxu1  ;;  %22780 = vmatmul.mubr.f32.vlgmr.msra.gmra.mxu1 %v31913_v25 }
 0x80d   :  { %v18566_v8 = vadd.f32 %v18565_v22, %v18473_v55  ;;  %v18649_v28 = vpop.f32.mrf.mxu0  ;;  %22864 = vmatmul.mubr.f32.vlgmr.msra.gmra.mxu0 %v31926_v29  ;;  %22911 = vmatpush1.msra.mxu1 %v31917_v53  ;;  %v23258_v22 = vand.u32 4294901760, %v23257_v57 }
 0x80e   :  { %23000 = vmatpush1.msra.mxu0 %v22742_v14  ;;  %23079 = vmatprep.subr.mxu1 %v31883_v19  ;;  %v18567_v24 = vpop.f32.mrf.mxu1  ;;  %v23251_v19 = vsub.f32 %v32001_v38, %v23250_v46 }
 0x80f   :  { %v18650_v30 = vadd.f32 %v18649_v28, %v18566_v8  ;;  %23160 = vmatprep.subr.mxu0 %v31983_v11  ;;  %v18568_v62 = vadd.f32 %v18567_v24, %v18475_v63  ;;  %v18651_v1 = vpop.f32.mrf.mxu0  ;;  %22785 = vmatprep.mubr.f32.mxu1 %v34009_v16  ;;  %v23667_v8 = vld [vmem:[%s33640_s1 + $0xf0] sm:$0xff]  ;;  %v32063_v28 = vand.u32 4294901760, %v23664_v52  ;;  %v23661_v24 = vsel %vm5802_vm6, %v32055_v20, %v23654_v47 }
 0x810   :  { %22869 = vmatprep.mubr.f32.mxu0 %v34009_v16  ;;  %v18572_v31 = vpop.f32.mrf.mxu1  ;;  %22787 = vmatmul.mubr.f32.gmra.mxu1 %v31928_v15  ;;  %v23252_v6 = vand.u32 4294901760, %v23251_v19 }
 0x811   :  { %v18652_v14 = vadd.f32 %v18651_v1, %v18568_v62  ;;  %v18573_v0 = vadd.f32 %v18572_v31, %v18484_v45  ;;  %v18657_v51 = vpop.f32.mrf.mxu0  ;;  %22872 = vmatmul.mubr.f32.gmra.mxu0 %v31949_v44  ;;  %22944 = vmatprep.mubr.f32.mxu1 %v34009_v16 }
 0x812   :  { %v18574_v32 = vpop.f32.mrf.mxu1  ;;  %23033 = vmatprep.mubr.f32.mxu0 %v34009_v16 }
 0x813   :  { %v18658_v39 = vadd.f32 %v18657_v51, %v18573_v0  ;;  %v18575_v59 = vadd.f32 %v18574_v32, %v18486_v2  ;;  %v18659_v4 = vpop.f32.mrf.mxu0  ;;  %v23670_v0 = vsel %vm120_vm0, %v23667_v8, 0  ;;  %v34028_v51 = vld [vmem:[#allocation42_spill] sm:$0xff] }
 0x814   :  { %v18733_v9 = vpop.f32.mrf.mxu1  ;;  %22948 = vmatmul.mubr.f32.vlgmr.msra.gmra.mxu1 %v31946_v21  ;;  %v23663_v47 = vmul.f32 %v23661_v24, %v34028_v51 }
 0x815   :  { %v18660_v5 = vadd.f32 %v18659_v4, %v18575_v59  ;;  %v18734_v12 = vadd.f32 %v18733_v9, %v18650_v30  ;;  %v18820_v17 = vpop.f32.mrf.mxu0  ;;  %23035 = vmatmul.mubr.f32.vlgmr.msra.gmra.mxu0 %v31913_v25  ;;  %23081 = vmatpush1.msra.mxu1 %v31917_v53  ;;  %v32095_v9 = vand.u32 4294901760, %v23670_v0 }
 0x816   :  { %23162 = vmatpush1.msra.mxu0 %v32012_v58  ;;  %23253 = vmatprep.subr.mxu1 %v23252_v6  ;;  %v18735_v49 = vpop.f32.mrf.mxu1 }
 0x817   :  { %v18821_v41 = vadd.f32 %v18820_v17, %v18734_v12  ;;  %23339 = vmatprep.subr.mxu0 %v32001_v38  ;;  %v18736_v40 = vadd.f32 %v18735_v49, %v18652_v14  ;;  %v18822_v55 = vpop.f32.mrf.mxu0  ;;  %22953 = vmatprep.mubr.f32.mxu1 %v34009_v16 }
 0x818   :  { %23040 = vmatprep.mubr.f32.mxu0 %v34009_v16  ;;  %v18742_v53 = vpop.f32.mrf.mxu1  ;;  %22957 = vmatmul.mubr.f32.gmra.mxu1 %v31962_v33 }
 0x819   :  { %v18823_v63 = vadd.f32 %v18822_v55, %v18736_v40  ;;  %v18743_v18 = vadd.f32 %v18742_v53, %v18658_v39  ;;  %v18827_v10 = vpop.f32.mrf.mxu0  ;;  %23042 = vmatmul.mubr.f32.gmra.mxu0 %v31928_v15  ;;  %23114 = vmatprep.mubr.f32.mxu1 %v34009_v16  ;;  %v32110_v55 = vsub.f32 %v23670_v0, %v32095_v9 }
 0x81a   :  { %v18744_v45 = vpop.f32.mrf.mxu1  ;;  %23195 = vmatprep.mubr.f32.mxu0 %v34009_v16 }
 0x81b   :  { %v18828_v34 = vadd.f32 %v18827_v10, %v18743_v18  ;;  %v18745_v23 = vadd.f32 %v18744_v45, %v18660_v5  ;;  %v18829_v2 = vpop.f32.mrf.mxu0  ;;  %v32100_v5 = vand.u32 4294901760, %v23663_v47  ;;  %v32130_v45 = vand.u32 4294901760, %v32110_v55 }
 0x81c   :  { %v18901_v30 = vpop.f32.mrf.mxu1  ;;  %23116 = vmatmul.mubr.f32.vlgmr.msra.gmra.mxu1 %v31913_v25 }
 0x81d   :  { %v18830_v62 = vadd.f32 %v18829_v2, %v18745_v23  ;;  %v32069_v1 = vadd.f32 %v18901_v30, %v18821_v41  ;;  %v18986_v31 = vpop.f32.mrf.mxu0  ;;  %23201 = vmatmul.mubr.f32.vlgmr.msra.gmra.mxu0 %v31975_v37  ;;  %23259 = vmatpush1.msra.mxu1 %v23258_v22  ;;  %v23668_v37 = vld [vmem:[%s33640_s1 + $0xf8] sm:$0xff]  ;;  %v32118_v48 = vsub.f32 %v23663_v47, %v32100_v5 }
 0x81e   :  { %v18987_v19 = vadd.f32 %v18986_v31, %v31986_v56  ;;  %23342 = vmatpush1.msra.mxu0 %v32025_v35  ;;  %23423 = vmatprep.subr.mxu1 %v31983_v11  ;;  %v18903_v14 = vpop.f32.mrf.mxu1  ;;  %v32086_v56 = vsub.f32 %v23664_v52, %v32063_v28  ;;  %v23658_v35 = vpop.permute.xlu1 %23657  ;;  %v23745_v0 = vsub.f32 %v32110_v55, %v32130_v45 }
 0x81f   :  { %23510 = vmatprep.subr.mxu0 %v23250_v46  ;;  %v32079_v32 = vadd.f32 %v18903_v14, %v18823_v63  ;;  %v18988_v39 = vpop.f32.mrf.mxu0  ;;  %23121 = vmatprep.mubr.f32.mxu1 %v34009_v16  ;;  %v23802_v2 = vand.u32 4294901760, %v32118_v48 }
 0x820   :  { %v18989_v59 = vadd.f32 %v18988_v39, %v31997_v7  ;;  %23206 = vmatprep.mubr.f32.mxu0 %v34009_v16  ;;  %v18908_v4 = vpop.f32.mrf.mxu1  ;;  %23123 = vmatmul.mubr.f32.gmra.mxu1 %v31928_v15  ;;  %v23673_v7 = vsel %vm120_vm0, %v23668_v37, 0  ;;  %v34029_v37 = vld [vmem:[#allocation45_spill] sm:$0xff] }
 0x821   :  { %v32091_v38 = vadd.f32 %v18908_v4, %v18828_v34  ;;  %v18997_v46 = vpop.f32.mrf.mxu0  ;;  %23212 = vmatmul.mubr.f32.gmra.mxu0 %v31989_v3  ;;  %23292 = vmatprep.mubr.f32.mxu1 %v34009_v16  ;;  %v23796_v3 = vand.u32 4294901760, %v32086_v56  ;;  %v32112_v57 = vand.u32 4294901760, %v23673_v7 }
 0x822   :  { %v18998_v6 = vadd.f32 %v18997_v46, %v32006_v42  ;;  %v18910_v26 = vpop.f32.mrf.mxu1  ;;  %23375 = vmatprep.mubr.f32.mxu0 %v34009_v16 }
 0x823   :  { %v32102_v12 = vadd.f32 %v18910_v26, %v18830_v62  ;;  %v18999_v17 = vpop.f32.mrf.mxu0  ;;  %v32133_v34 = vsub.f32 %v23673_v7, %v32112_v57  ;;  %v32159_v7 = vand.u32 4294901760, %v23745_v0 }
 0x824   :  { %v19000_v49 = vadd.f32 %v18999_v17, %v32014_v60  ;;  %v19079_v41 = vpop.f32.mrf.mxu1  ;;  %23294 = vmatmul.mubr.f32.vlgmr.msra.gmra.mxu1 %v31913_v25 }
 0x825   :  { %v19080_v40 = vadd.f32 %v19079_v41, %v18987_v19  ;;  %23378 = vmatmul.mubr.f32.vlgmr.msra.gmra.mxu0 %v31926_v29  ;;  %23425 = vmatpush1.msra.mxu1 %v32012_v58  ;;  %v19163_v42 = vpop.f32.mrf.mxu0  ;;  %v32146_v51 = vand.u32 4294901760, %v32133_v34 }
 0x826   :  { %23514 = vmatpush1.msra.mxu0 %v23256_v54  ;;  %23593 = vmatprep.subr.mxu1 %v31983_v11  ;;  %v19081_v60 = vpop.f32.mrf.mxu1  ;;  %v23797_v11 = vsub.f32 %v32086_v56, %v23796_v3 }
 0x827   :  { %23706 = vmatprep.subr.mxu0 %v32063_v28  ;;  %v19082_v29 = vadd.f32 %v19081_v60, %v18989_v59  ;;  %v19164_v52 = vadd.f32 %v19163_v42, %v19080_v40  ;;  %23299 = vmatprep.mubr.f32.mxu1 %v34009_v16  ;;  %v19165_v53 = vpop.f32.mrf.mxu0  ;;  %v23756_v17 = vsub.f32 %v32133_v34, %v32146_v51 }
 0x828   :  { %23383 = vmatprep.mubr.f32.mxu0 %v34009_v16  ;;  %v19086_v63 = vpop.f32.mrf.mxu1  ;;  %23301 = vmatmul.mubr.f32.gmra.mxu1 %v31928_v15  ;;  %v23798_v62 = vand.u32 4294901760, %v23797_v11 }
 0x829   :  { %v19087_v54 = vadd.f32 %v19086_v63, %v18998_v6  ;;  %v19166_v18 = vadd.f32 %v19165_v53, %v19082_v29  ;;  %23386 = vmatmul.mubr.f32.gmra.mxu0 %v31949_v44  ;;  %v19171_v10 = vpop.f32.mrf.mxu0  ;;  %23458 = vmatprep.mubr.f32.mxu1 %v34009_v16  ;;  %v23662_v44 = vsel %vm5802_vm6, %v23658_v35, %v32055_v20 }
 0x82a   :  { %v19088_v23 = vpop.f32.mrf.mxu1  ;;  %23547 = vmatprep.mubr.f32.mxu0 %v34009_v16  ;;  %v23666_v59 = vmul.f32 %v23662_v44, %v34029_v37 }
 0x82b   :  { %v19089_v22 = vadd.f32 %v19088_v23, %v19000_v49  ;;  %v19172_v8 = vadd.f32 %v19171_v10, %v19087_v54  ;;  %v19173_v24 = vpop.f32.mrf.mxu0  ;;  %v32173_v54 = vand.u32 4294901760, %v23756_v17 }
 0x82c   :  { %v19247_v30 = vpop.f32.mrf.mxu1  ;;  %23462 = vmatmul.mubr.f32.vlgmr.msra.gmra.mxu1 %v31946_v21  ;;  %v32167_v29 = vand.u32 4294901760, %v23666_v59 }
 0x82d   :  { %v19174_v31 = vadd.f32 %v19173_v24, %v19089_v22  ;;  %v19248_v19 = vadd.f32 %v19247_v30, %v19164_v52  ;;  %23549 = vmatmul.mubr.f32.vlgmr.msra.gmra.mxu0 %v31913_v25  ;;  %23595 = vmatpush1.msra.mxu1 %v32012_v58  ;;  %v19334_v14 = vpop.f32.mrf.mxu0  ;;  %v23803_v58 = vsub.f32 %v32118_v48, %v23802_v2 }
 0x82e   :  { %23708 = vmatpush1.msra.mxu0 %v32100_v5  ;;  %23799 = vmatprep.subr.mxu1 %v23798_v62  ;;  %v19249_v20 = vpop.f32.mrf.mxu1  ;;  %v32184_v23 = vsub.f32 %v23666_v59, %v32167_v29  ;;  %v24714_v59 = vpop.permute.xlu0 %24713 }
 0x82f   :  { %23885 = vmatprep.subr.mxu0 %v32086_v56  ;;  %v19250_v21 = vadd.f32 %v19249_v20, %v19166_v18  ;;  %v19335_v47 = vadd.f32 %v19334_v14, %v19248_v19  ;;  %23467 = vmatprep.mubr.f32.mxu1 %v34009_v16  ;;  %v19336_v39 = vpop.f32.mrf.mxu0  ;;  %v23804_v60 = vand.u32 4294901760, %v23803_v58 }
 0x830   :  { %23554 = vmatprep.mubr.f32.mxu0 %v34009_v16  ;;  %v19256_v4 = vpop.f32.mrf.mxu1  ;;  %23471 = vmatmul.mubr.f32.gmra.mxu1 %v31962_v33  ;;  %v23659_v33 = vsel %vm5802_vm6, %v32034_v50, %v23658_v35  ;;  %v34030_v50 = vld [vmem:[#allocation46_spill] sm:$0xff] }
 0x831   :  { %v19257_v46 = vadd.f32 %v19256_v4, %v19172_v8  ;;  %v19337_v6 = vadd.f32 %v19336_v39, %v19250_v21  ;;  %23556 = vmatmul.mubr.f32.gmra.mxu0 %v31928_v15  ;;  %v19341_v26 = vpop.f32.mrf.mxu0  ;;  %23628 = vmatprep.mubr.f32.mxu1 %v34009_v16  ;;  %v23665_v35 = vmul.f32 %v23659_v33, %v34030_v50 }
 0x832   :  { %v19258_v49 = vpop.f32.mrf.mxu1  ;;  %23741 = vmatprep.mubr.f32.mxu0 %v34009_v16 }
 0x833   :  { %v19259_v41 = vadd.f32 %v19258_v49, %v19174_v31  ;;  %v19342_v40 = vadd.f32 %v19341_v26, %v19257_v46  ;;  %v19343_v42 = vpop.f32.mrf.mxu0 }
 0x834   :  { %v19415_v52 = vpop.f32.mrf.mxu1  ;;  %23630 = vmatmul.mubr.f32.vlgmr.msra.gmra.mxu1 %v31913_v25 }
 0x835   :  { %v19344_v53 = vadd.f32 %v19343_v42, %v19259_v41  ;;  %v32170_v63 = vadd.f32 %v19415_v52, %v19335_v47  ;;  %23747 = vmatmul.mubr.f32.vlgmr.msra.gmra.mxu0 %v32159_v7  ;;  %23805 = vmatpush1.msra.mxu1 %v23804_v60  ;;  %v19524_v11 = vpop.f32.mrf.mxu0 }
 0x836   :  { %23888 = vmatpush1.msra.mxu0 %v32118_v48  ;;  %23969 = vmatprep.subr.mxu1 %v32063_v28  ;;  %v19417_v18 = vpop.f32.mrf.mxu1  ;;  %v32214_v48 = vpop.permute.xlu1 %24715 }
 0x837   :  { %24056 = vmatprep.subr.mxu0 %v23796_v3  ;;  %v32180_v25 = vadd.f32 %v19417_v18, %v19337_v6  ;;  %23635 = vmatprep.mubr.f32.mxu1 %v34009_v16  ;;  %v19526_v10 = vpop.f32.mrf.mxu0  ;;  %v32193_v3 = vand.u32 4294901760, %v23665_v35 }
 0x838   :  { %23752 = vmatprep.mubr.f32.mxu0 %v34009_v16  ;;  %v19422_v22 = vpop.f32.mrf.mxu1  ;;  %23637 = vmatmul.mubr.f32.gmra.mxu1 %v31928_v15  ;;  %v24310_v15 = vand.u32 4294901760, %v32184_v23 }
 0x839   :  { %v32188_v8 = vadd.f32 %v19422_v22, %v19342_v40  ;;  %23758 = vmatmul.mubr.f32.gmra.mxu0 %v32173_v54  ;;  %v19535_v24 = vpop.f32.mrf.mxu0  ;;  %23838 = vmatprep.mubr.f32.mxu1 %v34009_v16  ;;  %v32205_v0 = vsub.f32 %v23665_v35, %v32193_v3  ;;  %v24720_v40 = vsel %vm6761_vm10, %v24714_v59, %v32214_v48  ;;  %v34031_v35 = vld [vmem:[#allocation39_spill] sm:$0xff]  ;;  %v32235_v22 = vpop.permute.xlu0 %24711 }
 0x83a   :  { %v19424_v56 = vpop.f32.mrf.mxu1  ;;  %23921 = vmatprep.mubr.f32.mxu0 %v34009_v16 }
 0x83b   :  { %v32195_v44 = vadd.f32 %v19424_v56, %v19344_v53  ;;  %v19537_v30 = vpop.f32.mrf.mxu0  ;;  %v24316_v46 = vand.u32 4294901760, %v32205_v0 }
 0x83c   :  { %v19617_v62 = vpop.f32.mrf.mxu1  ;;  %23840 = vmatmul.mubr.f32.vlgmr.msra.gmra.mxu1 %v32095_v9 }
 0x83d   :  { %v19618_v31 = vadd.f32 %v19617_v62, %v19524_v11  ;;  %23924 = vmatmul.mubr.f32.vlgmr.msra.gmra.mxu0 %v32110_v55  ;;  %23971 = vmatpush1.msra.mxu1 %v32100_v5  ;;  %v19701_v19 = vpop.f32.mrf.mxu0  ;;  %v24317_v50 = vsub.f32 %v32205_v0, %v24316_v46 }
 0x83e   :  { %24060 = vmatpush1.msra.mxu0 %v23802_v2  ;;  %24139 = vmatprep.subr.mxu1 %v32063_v28  ;;  %v19619_v14 = vpop.f32.mrf.mxu1  ;;  %v24311_v28 = vsub.f32 %v32184_v23, %v24310_v15 }
 0x83f   :  { %24220 = vmatprep.subr.mxu0 %v32167_v29  ;;  %v19620_v20 = vadd.f32 %v19619_v14, %v19526_v10  ;;  %v19702_v21 = vadd.f32 %v19701_v19, %v19618_v31  ;;  %23845 = vmatprep.mubr.f32.mxu1 %v34009_v16  ;;  %v19703_v47 = vpop.f32.mrf.mxu0  ;;  %v24724_v10 = vmul.f32 %v34031_v35, %v24720_v40 }
 0x840   :  { %23929 = vmatprep.mubr.f32.mxu0 %v34009_v16  ;;  %v19624_v39 = vpop.f32.mrf.mxu1  ;;  %23847 = vmatmul.mubr.f32.gmra.mxu1 %v32112_v57  ;;  %v24312_v41 = vand.u32 4294901760, %v24311_v28 }
 0x841   :  { %v19625_v2 = vadd.f32 %v19624_v39, %v19535_v24  ;;  %v19704_v58 = vadd.f32 %v19703_v47, %v19620_v20  ;;  %23932 = vmatmul.mubr.f32.gmra.mxu0 %v32133_v34  ;;  %v19709_v37 = vpop.f32.mrf.mxu0  ;;  %24004 = vmatprep.mubr.f32.mxu1 %v34009_v16  ;;  %v24318_v20 = vand.u32 4294901760, %v24317_v50  ;;  %v32243_v47 = vand.u32 4294901760, %v24724_v10 }
 0x842   :  { %v19626_v4 = vpop.f32.mrf.mxu1  ;;  %24093 = vmatprep.mubr.f32.mxu0 %v34009_v16  ;;  %v24721_v39 = vsel %vm6761_vm10, %v32235_v22, %v24714_v59 }
 0x843   :  { %v19627_v6 = vadd.f32 %v19626_v4, %v19537_v30  ;;  %v19710_v26 = vadd.f32 %v19709_v37, %v19625_v2  ;;  %v19711_v17 = vpop.f32.mrf.mxu0  ;;  %v32264_v40 = vsub.f32 %v24724_v10, %v32243_v47 }
 0x844   :  { %v19785_v49 = vpop.f32.mrf.mxu1  ;;  %24008 = vmatmul.mubr.f32.vlgmr.msra.gmra.mxu1 %v32130_v45 }
 0x845   :  { %v19712_v42 = vadd.f32 %v19711_v17, %v19627_v6  ;;  %v19786_v60 = vadd.f32 %v19785_v49, %v19702_v21  ;;  %24095 = vmatmul.mubr.f32.vlgmr.msra.gmra.mxu0 %v32095_v9  ;;  %24141 = vmatpush1.msra.mxu1 %v32100_v5  ;;  %v19872_v33 = vpop.f32.mrf.mxu0  ;;  %v24727_v21 = vld [vmem:[%s33640_s1 + $0x100] sm:$0xff] }
 0x846   :  { %24222 = vmatpush1.msra.mxu0 %v32193_v3  ;;  %24313 = vmatprep.subr.mxu1 %v24312_v41  ;;  %v19787_v52 = vpop.f32.mrf.mxu1  ;;  %v24730_v6 = vsel %vm120_vm0, %v24727_v21, 0  ;;  %v24728_v41 = vld [vmem:[%s33640_s1 + $0x108] sm:$0xff] }
 0x847   :  { %24399 = vmatprep.subr.mxu0 %v32184_v23  ;;  %v19788_v53 = vadd.f32 %v19787_v52, %v19704_v58  ;;  %v19873_v11 = vadd.f32 %v19872_v33, %v19786_v60  ;;  %24013 = vmatprep.mubr.f32.mxu1 %v34009_v16  ;;  %v19874_v18 = vpop.f32.mrf.mxu0  ;;  %v32273_v60 = vand.u32 4294901760, %v24730_v6  ;;  %v24733_v52 = vsel %vm120_vm0, %v24728_v41, 0 }
 0x848   :  { %24100 = vmatprep.mubr.f32.mxu0 %v34009_v16  ;;  %v19794_v5 = vpop.f32.mrf.mxu1  ;;  %24017 = vmatmul.mubr.f32.gmra.mxu1 %v32146_v51 }
 0x849   :  { %v19795_v24 = vadd.f32 %v19794_v5, %v19710_v26  ;;  %v19875_v56 = vadd.f32 %v19874_v18, %v19788_v53  ;;  %24102 = vmatmul.mubr.f32.gmra.mxu0 %v32112_v57  ;;  %v19879_v30 = vpop.f32.mrf.mxu0  ;;  %24174 = vmatprep.mubr.f32.mxu1 %v34009_v16  ;;  %v34032_v26 = vld [vmem:[#allocation41_spill] sm:$0xff] }
 0x84a   :  { %v19796_v62 = vpop.f32.mrf.mxu1  ;;  %24255 = vmatprep.mubr.f32.mxu0 %v34009_v16  ;;  %v24723_v17 = vmul.f32 %v34032_v26, %v24721_v39 }
 0x84b   :  { %v19797_v31 = vadd.f32 %v19796_v62, %v19712_v42  ;;  %v19880_v19 = vadd.f32 %v19879_v30, %v19795_v24  ;;  %v19881_v14 = vpop.f32.mrf.mxu0  ;;  %v32290_v24 = vsub.f32 %v24730_v6, %v32273_v60 }
 0x84c   :  { %v19953_v28 = vpop.f32.mrf.mxu1  ;;  %24176 = vmatmul.mubr.f32.vlgmr.msra.gmra.mxu1 %v32095_v9  ;;  %v32277_v53 = vand.u32 4294901760, %v24723_v17 }
 0x84d   :  { %v19882_v2 = vadd.f32 %v19881_v14, %v19797_v31  ;;  %v19954_v58 = vadd.f32 %v19953_v28, %v19873_v11  ;;  %24261 = vmatmul.mubr.f32.vlgmr.msra.gmra.mxu0 %v32159_v7  ;;  %24319 = vmatpush1.msra.mxu1 %v24318_v20  ;;  %v20038_v37 = vpop.f32.mrf.mxu0  ;;  %v32310_v20 = vand.u32 4294901760, %v32290_v24 }
 0x84e   :  { %24402 = vmatpush1.msra.mxu0 %v32205_v0  ;;  %24483 = vmatprep.subr.mxu1 %v32167_v29  ;;  %v19955_v4 = vpop.f32.mrf.mxu1  ;;  %v24718_v0 = vpop.permute.xlu1 %24717 }
 0x84f   :  { %v32255_v59 = vadd.f32 %v19954_v58, %v32069_v1  ;;  %24570 = vmatprep.subr.mxu0 %v24310_v15  ;;  %v19956_v49 = vadd.f32 %v19955_v4, %v19875_v56  ;;  %24181 = vmatprep.mubr.f32.mxu1 %v34009_v16  ;;  %v20040_v7 = vpop.f32.mrf.mxu0 }
 0x850   :  { %24266 = vmatprep.mubr.f32.mxu0 %v34009_v16  ;;  %v19960_v42 = vpop.f32.mrf.mxu1  ;;  %24183 = vmatmul.mubr.f32.gmra.mxu1 %v32112_v57 }
 0x851   :  { %v32269_v1 = vadd.f32 %v19956_v49, %v32079_v32  ;;  %v19961_v23 = vadd.f32 %v19960_v42, %v19880_v19  ;;  %24272 = vmatmul.mubr.f32.gmra.mxu0 %v32173_v54  ;;  %v20049_v15 = vpop.f32.mrf.mxu0  ;;  %24352 = vmatprep.mubr.f32.mxu1 %v34009_v16  ;;  %v24856_v54 = vand.u32 4294901760, %v32264_v40 }
 0x852   :  { %v19962_v33 = vpop.f32.mrf.mxu1  ;;  %24435 = vmatprep.mubr.f32.mxu0 %v34009_v16 }
 0x853   :  { %v32280_v11 = vadd.f32 %v19961_v23, %v32091_v38  ;;  %v19963_v32 = vadd.f32 %v19962_v33, %v19882_v2  ;;  %v20051_v18 = vpop.f32.mrf.mxu0  ;;  %v32292_v38 = vand.u32 4294901760, %v24733_v52 }
 0x854   :  { %v20131_v50 = vpop.f32.mrf.mxu1  ;;  %24354 = vmatmul.mubr.f32.vlgmr.msra.gmra.mxu1 %v32095_v9 }
 0x855   :  { %v32285_v35 = vadd.f32 %v19963_v32, %v32102_v12  ;;  %v20132_v10 = vadd.f32 %v20131_v50, %v20038_v37  ;;  %24438 = vmatmul.mubr.f32.vlgmr.msra.gmra.mxu0 %v32110_v55  ;;  %24485 = vmatpush1.msra.mxu1 %v32193_v3  ;;  %v20215_v5 = vpop.f32.mrf.mxu0  ;;  %v32298_v12 = vsub.f32 %v24723_v17, %v32277_v53 }
 0x856   :  { %24574 = vmatpush1.msra.mxu0 %v24316_v46  ;;  %24653 = vmatprep.subr.mxu1 %v32167_v29  ;;  %v20133_v56 = vpop.f32.mrf.mxu1  ;;  %v24857_v29 = vsub.f32 %v32264_v40, %v24856_v54  ;;  %v32313_v21 = vsub.f32 %v24733_v52, %v32292_v38 }
 0x857   :  { %24766 = vmatprep.subr.mxu0 %v32243_v47  ;;  %v20134_v55 = vadd.f32 %v20133_v56, %v20040_v7  ;;  %v20216_v30 = vadd.f32 %v20215_v5, %v20132_v10  ;;  %24359 = vmatprep.mubr.f32.mxu1 %v34009_v16  ;;  %v20217_v62 = vpop.f32.mrf.mxu0  ;;  %v24862_v28 = vand.u32 4294901760, %v32298_v12  ;;  %v24805_v7 = vsub.f32 %v32290_v24, %v32310_v20 }
 0x858   :  { %24443 = vmatprep.mubr.f32.mxu0 %v34009_v16  ;;  %v20138_v31 = vpop.f32.mrf.mxu1  ;;  %24361 = vmatmul.mubr.f32.gmra.mxu1 %v32112_v57  ;;  %v24858_v6 = vand.u32 4294901760, %v24857_v29  ;;  %v32326_v41 = vand.u32 4294901760, %v32313_v21 }
 0x859   :  { %v20139_v46 = vadd.f32 %v20138_v31, %v20049_v15  ;;  %v20218_v19 = vadd.f32 %v20217_v62, %v20134_v55  ;;  %24446 = vmatmul.mubr.f32.gmra.mxu0 %v32133_v34  ;;  %v20223_v14 = vpop.f32.mrf.mxu0  ;;  %24518 = vmatprep.mubr.f32.mxu1 %v34009_v16  ;;  %v24722_v34 = vsel %vm6761_vm10, %v24718_v0, %v32235_v22  ;;  %v34033_v15 = vld [vmem:[#allocation43_spill] sm:$0xff]  ;;  %v32339_v10 = vand.u32 4294901760, %v24805_v7 }
 0x85a   :  { %v20140_v39 = vpop.f32.mrf.mxu1  ;;  %24607 = vmatprep.mubr.f32.mxu0 %v34009_v16  ;;  %v24726_v33 = vmul.f32 %v34033_v15, %v24722_v34  ;;  %v24816_v5 = vsub.f32 %v32313_v21, %v32326_v41 }
 0x85b   :  { %v20141_v2 = vadd.f32 %v20140_v39, %v20051_v18  ;;  %v20224_v58 = vadd.f32 %v20223_v14, %v20139_v46  ;;  %v20225_v37 = vpop.f32.mrf.mxu0 }
 0x85c   :  { %v20299_v4 = vpop.f32.mrf.mxu1  ;;  %24522 = vmatmul.mubr.f32.vlgmr.msra.gmra.mxu1 %v32130_v45  ;;  %v32347_v29 = vand.u32 4294901760, %v24726_v33 }
 0x85d   :  { %v20226_v26 = vadd.f32 %v20225_v37, %v20141_v2  ;;  %v20300_v17 = vadd.f32 %v20299_v4, %v20216_v30  ;;  %24609 = vmatmul.mubr.f32.vlgmr.msra.gmra.mxu0 %v32095_v9  ;;  %24655 = vmatpush1.msra.mxu1 %v32193_v3  ;;  %v20386_v49 = vpop.f32.mrf.mxu0  ;;  %v24863_v3 = vsub.f32 %v32298_v12, %v24862_v28  ;;  %v32351_v2 = vand.u32 4294901760, %v24816_v5  ;;  %v34034_v37 = vld [vmem:[#allocation44_spill] sm:$0xff] }
 0x85e   :  { %24768 = vmatpush1.msra.mxu0 %v32277_v53  ;;  %24859 = vmatprep.subr.mxu1 %v24858_v6  ;;  %v20301_v22 = vpop.f32.mrf.mxu1  ;;  %v32363_v4 = vsub.f32 %v24726_v33, %v32347_v29 }
 0x85f   :  { %24945 = vmatprep.subr.mxu0 %v32264_v40  ;;  %v20302_v45 = vadd.f32 %v20301_v22, %v20218_v19  ;;  %v20387_v42 = vadd.f32 %v20386_v49, %v20300_v17  ;;  %24527 = vmatprep.mubr.f32.mxu1 %v34009_v16  ;;  %v20388_v23 = vpop.f32.mrf.mxu0  ;;  %v24864_v31 = vand.u32 4294901760, %v24863_v3 }
 0x860   :  { %24614 = vmatprep.mubr.f32.mxu0 %v34009_v16  ;;  %v20308_v52 = vpop.f32.mrf.mxu1  ;;  %24531 = vmatmul.mubr.f32.gmra.mxu1 %v32146_v51  ;;  %v24719_v51 = vsel %vm6761_vm10, %v32214_v48, %v24718_v0 }
 0x861   :  { %v20309_v32 = vadd.f32 %v20308_v52, %v20224_v58  ;;  %v20389_v18 = vadd.f32 %v20388_v23, %v20302_v45  ;;  %24616 = vmatmul.mubr.f32.gmra.mxu0 %v32112_v57  ;;  %v20393_v50 = vpop.f32.mrf.mxu0  ;;  %24688 = vmatprep.mubr.f32.mxu1 %v34009_v16  ;;  %v24725_v48 = vmul.f32 %v34034_v37, %v24719_v51 }
 0x862   :  { %v20310_v56 = vpop.f32.mrf.mxu1  ;;  %24801 = vmatprep.mubr.f32.mxu0 %v34009_v16 }
 0x863   :  { %v20311_v55 = vadd.f32 %v20310_v56, %v20226_v26  ;;  %v20394_v30 = vadd.f32 %v20393_v50, %v20309_v32  ;;  %v20395_v62 = vpop.f32.mrf.mxu0  ;;  %v32373_v17 = vand.u32 4294901760, %v24725_v48  ;;  %v25774_v50 = vpop.permute.xlu0 %25773 }
 0x864   :  { %v20467_v46 = vpop.f32.mrf.mxu1  ;;  %24690 = vmatmul.mubr.f32.vlgmr.msra.gmra.mxu1 %v32095_v9 }
 0x865   :  { %v20396_v19 = vadd.f32 %v20395_v62, %v20311_v55  ;;  %v20468_v14 = vadd.f32 %v20467_v46, %v20387_v42  ;;  %24807 = vmatmul.mubr.f32.vlgmr.msra.gmra.mxu0 %v32339_v10  ;;  %24865 = vmatpush1.msra.mxu1 %v24864_v31  ;;  %v20584_v39 = vpop.f32.mrf.mxu0  ;;  %v32389_v3 = vsub.f32 %v24725_v48, %v32373_v17 }
 0x866   :  { %24948 = vmatpush1.msra.mxu0 %v32298_v12  ;;  %25029 = vmatprep.subr.mxu1 %v32243_v47  ;;  %v20469_v58 = vpop.f32.mrf.mxu1  ;;  %v32398_v12 = vpop.permute.xlu1 %25775 }
 0x867   :  { %v32357_v0 = vadd.f32 %v20468_v14, %v32170_v63  ;;  %25116 = vmatprep.subr.mxu0 %v24856_v54  ;;  %v20470_v9 = vadd.f32 %v20469_v58, %v20389_v18  ;;  %24695 = vmatprep.mubr.f32.mxu1 %v34009_v16  ;;  %v20586_v34 = vpop.f32.mrf.mxu0  ;;  %v25376_v56 = vand.u32 4294901760, %v32389_v3  ;;  %v25780_v46 = vsel %vm7716_vm11, %v25774_v50, %v32398_v12 }
 0x868   :  { %24812 = vmatprep.mubr.f32.mxu0 %v34009_v16  ;;  %v20474_v6 = vpop.f32.mrf.mxu1  ;;  %24697 = vmatmul.mubr.f32.gmra.mxu1 %v32112_v57 }
 0x869   :  { %v32368_v26 = vadd.f32 %v20470_v9, %v32180_v25  ;;  %v20475_v63 = vadd.f32 %v20474_v6, %v20394_v30  ;;  %24818 = vmatmul.mubr.f32.gmra.mxu0 %v32351_v2  ;;  %v20595_v40 = vpop.f32.mrf.mxu0  ;;  %24898 = vmatprep.mubr.f32.mxu1 %v34009_v16  ;;  %v25370_v25 = vand.u32 4294901760, %v32363_v4  ;;  %v34035_v6 = vld [vmem:[#allocation47_spill] sm:$0xff] }
 0x86a   :  { %v20476_v54 = vpop.f32.mrf.mxu1  ;;  %24981 = vmatprep.mubr.f32.mxu0 %v34009_v16 }
 0x86b   :  { %v32376_v49 = vadd.f32 %v20475_v63, %v32188_v8  ;;  %v20477_v7 = vadd.f32 %v20476_v54, %v20396_v19  ;;  %v20597_v22 = vpop.f32.mrf.mxu0  ;;  %v25784_v63 = vmul.f32 %v25780_v46, %v34035_v6 }
 0x86c   :  { %v20677_v57 = vpop.f32.mrf.mxu1  ;;  %24900 = vmatmul.mubr.f32.vlgmr.msra.gmra.mxu1 %v32273_v60 }
 0x86d   :  { %v32381_v45 = vadd.f32 %v20477_v7, %v32195_v44  ;;  %v20678_v42 = vadd.f32 %v20677_v57, %v20584_v39  ;;  %24984 = vmatmul.mubr.f32.vlgmr.msra.gmra.mxu0 %v32290_v24  ;;  %25031 = vmatpush1.msra.mxu1 %v32277_v53  ;;  %v20761_v23 = vpop.f32.mrf.mxu0 }
 0x86e   :  { %25120 = vmatpush1.msra.mxu0 %v24862_v28  ;;  %25199 = vmatprep.subr.mxu1 %v32243_v47  ;;  %v20679_v8 = vpop.f32.mrf.mxu1  ;;  %v25371_v47 = vsub.f32 %v32363_v4, %v25370_v25 }
 0x86f   :  { %25280 = vmatprep.subr.mxu0 %v32347_v29  ;;  %v20680_v15 = vadd.f32 %v20679_v8, %v20586_v34  ;;  %v20762_v44 = vadd.f32 %v20761_v23, %v20678_v42  ;;  %24905 = vmatprep.mubr.f32.mxu1 %v34009_v16  ;;  %v20763_v33 = vpop.f32.mrf.mxu0  ;;  %v25377_v34 = vsub.f32 %v32389_v3, %v25376_v56 }
 0x870   :  { %24989 = vmatprep.mubr.f32.mxu0 %v34009_v16  ;;  %v20684_v52 = vpop.f32.mrf.mxu1  ;;  %24907 = vmatmul.mubr.f32.gmra.mxu1 %v32292_v38  ;;  %v25372_v51 = vand.u32 4294901760, %v25371_v47 }
 0x871   :  { %v20685_v28 = vadd.f32 %v20684_v52, %v20595_v40  ;;  %v20764_v32 = vadd.f32 %v20763_v33, %v20680_v15  ;;  %24992 = vmatmul.mubr.f32.gmra.mxu0 %v32313_v21  ;;  %v20769_v18 = vpop.f32.mrf.mxu0  ;;  %25064 = vmatprep.mubr.f32.mxu1 %v34009_v16  ;;  %v32419_v40 = vpop.permute.xlu0 %25771  ;;  %v25378_v15 = vand.u32 4294901760, %v25377_v34  ;;  %v32427_v33 = vand.u32 4294901760, %v25784_v63 }
 0x872   :  { %v20686_v5 = vpop.f32.mrf.mxu1  ;;  %25153 = vmatprep.mubr.f32.mxu0 %v34009_v16  ;;  %v25781_v52 = vsel %vm7716_vm11, %v32419_v40, %v25774_v50 }
 0x873   :  { %v20687_v55 = vadd.f32 %v20686_v5, %v20597_v22  ;;  %v20770_v30 = vadd.f32 %v20769_v18, %v20685_v28  ;;  %v20771_v62 = vpop.f32.mrf.mxu0  ;;  %v32448_v46 = vsub.f32 %v25784_v63, %v32427_v33 }
 0x874   :  { %v20845_v31 = vpop.f32.mrf.mxu1  ;;  %25068 = vmatmul.mubr.f32.vlgmr.msra.gmra.mxu1 %v32310_v20 }
 0x875   :  { %v20772_v19 = vadd.f32 %v20771_v62, %v20687_v55  ;;  %v20846_v14 = vadd.f32 %v20845_v31, %v20762_v44  ;;  %25155 = vmatmul.mubr.f32.vlgmr.msra.gmra.mxu0 %v32273_v60  ;;  %25201 = vmatpush1.msra.mxu1 %v32277_v53  ;;  %v20932_v39 = vpop.f32.mrf.mxu0  ;;  %v25787_v44 = vld [vmem:[%s33640_s1 + $0x110] sm:$0xff] }
 0x876   :  { %25282 = vmatpush1.msra.mxu0 %v32373_v17  ;;  %25373 = vmatprep.subr.mxu1 %v25372_v51  ;;  %v20847_v58 = vpop.f32.mrf.mxu1  ;;  %v25790_v55 = vsel %vm120_vm0, %v25787_v44, 0  ;;  %v25788_v51 = vld [vmem:[%s33640_s1 + $0x118] sm:$0xff] }
 0x877   :  { %25459 = vmatprep.subr.mxu0 %v32363_v4  ;;  %v20848_v37 = vadd.f32 %v20847_v58, %v20764_v32  ;;  %v20933_v48 = vadd.f32 %v20932_v39, %v20846_v14  ;;  %25073 = vmatprep.mubr.f32.mxu1 %v34009_v16  ;;  %v20934_v9 = vpop.f32.mrf.mxu0  ;;  %v32457_v14 = vand.u32 4294901760, %v25790_v55  ;;  %v25793_v58 = vsel %vm120_vm0, %v25788_v51, 0 }
 0x878   :  { %25160 = vmatprep.mubr.f32.mxu0 %v34009_v16  ;;  %v20854_v53 = vpop.f32.mrf.mxu1  ;;  %25077 = vmatmul.mubr.f32.gmra.mxu1 %v32326_v41 }
 0x879   :  { %v20855_v54 = vadd.f32 %v20854_v53, %v20770_v30  ;;  %v20935_v7 = vadd.f32 %v20934_v9, %v20848_v37  ;;  %25162 = vmatmul.mubr.f32.gmra.mxu0 %v32292_v38  ;;  %v20939_v22 = vpop.f32.mrf.mxu0  ;;  %25234 = vmatprep.mubr.f32.mxu1 %v34009_v16  ;;  %v34036_v30 = vld [vmem:[#allocation48_spill] sm:$0xff] }
 0x87a   :  { %v20856_v57 = vpop.f32.mrf.mxu1  ;;  %25315 = vmatprep.mubr.f32.mxu0 %v34009_v16  ;;  %v25783_v62 = vmul.f32 %v25781_v52, %v34036_v30 }
 0x87b   :  { %v20857_v42 = vadd.f32 %v20856_v57, %v20772_v19  ;;  %v20940_v23 = vadd.f32 %v20939_v22, %v20855_v54  ;;  %v20941_v8 = vpop.f32.mrf.mxu0  ;;  %v32474_v54 = vsub.f32 %v25790_v55, %v32457_v14 }
 0x87c   :  { %v21013_v47 = vpop.f32.mrf.mxu1  ;;  %25236 = vmatmul.mubr.f32.vlgmr.msra.gmra.mxu1 %v32273_v60  ;;  %v32461_v37 = vand.u32 4294901760, %v25783_v62 }
 0x87d   :  { %v20942_v28 = vadd.f32 %v20941_v8, %v20857_v42  ;;  %v21014_v32 = vadd.f32 %v21013_v47, %v20933_v48  ;;  %25321 = vmatmul.mubr.f32.vlgmr.msra.gmra.mxu0 %v32339_v10  ;;  %25379 = vmatpush1.msra.mxu1 %v25378_v15  ;;  %v21098_v18 = vpop.f32.mrf.mxu0  ;;  %v32494_v15 = vand.u32 4294901760, %v32474_v54 }
 0x87e   :  { %25462 = vmatpush1.msra.mxu0 %v32389_v3  ;;  %25543 = vmatprep.subr.mxu1 %v32347_v29  ;;  %v21015_v5 = vpop.f32.mrf.mxu1  ;;  %v25778_v3 = vpop.permute.xlu1 %25777 }
 0x87f   :  { %v32439_v50 = vadd.f32 %v21014_v32, %v32255_v59  ;;  %25630 = vmatprep.subr.mxu0 %v25370_v25  ;;  %v21016_v31 = vadd.f32 %v21015_v5, %v20935_v7  ;;  %25241 = vmatprep.mubr.f32.mxu1 %v34009_v16  ;;  %v21100_v10 = vpop.f32.mrf.mxu0 }
 0x880   :  { %25326 = vmatprep.mubr.f32.mxu0 %v34009_v16  ;;  %v21020_v19 = vpop.f32.mrf.mxu1  ;;  %25243 = vmatmul.mubr.f32.gmra.mxu1 %v32292_v38 }
 0x881   :  { %v32453_v59 = vadd.f32 %v21016_v31, %v32269_v1  ;;  %v21021_v4 = vadd.f32 %v21020_v19, %v20940_v23  ;;  %25332 = vmatmul.mubr.f32.gmra.mxu0 %v32351_v2  ;;  %v21109_v25 = vpop.f32.mrf.mxu0  ;;  %25412 = vmatprep.mubr.f32.mxu1 %v34009_v16  ;;  %v25916_v2 = vand.u32 4294901760, %v32448_v46 }
 0x882   :  { %v21022_v39 = vpop.f32.mrf.mxu1  ;;  %25495 = vmatprep.mubr.f32.mxu0 %v34009_v16 }
 0x883   :  { %v32464_v48 = vadd.f32 %v21021_v4, %v32280_v11  ;;  %v21023_v1 = vadd.f32 %v21022_v39, %v20942_v28  ;;  %v21111_v9 = vpop.f32.mrf.mxu0  ;;  %v32476_v11 = vand.u32 4294901760, %v25793_v58 }
 0x884   :  { %v21191_v34 = vpop.f32.mrf.mxu1  ;;  %25414 = vmatmul.mubr.f32.vlgmr.msra.gmra.mxu1 %v32273_v60 }
 0x885   :  { %v32469_v6 = vadd.f32 %v21023_v1, %v32285_v35  ;;  %v21192_v63 = vadd.f32 %v21191_v34, %v21098_v18  ;;  %25498 = vmatmul.mubr.f32.vlgmr.msra.gmra.mxu0 %v32290_v24  ;;  %25545 = vmatpush1.msra.mxu1 %v32373_v17  ;;  %v21275_v53 = vpop.f32.mrf.mxu0  ;;  %v32482_v35 = vsub.f32 %v25783_v62, %v32461_v37 }
 0x886   :  { %25634 = vmatpush1.msra.mxu0 %v25376_v56  ;;  %25713 = vmatprep.subr.mxu1 %v32347_v29  ;;  %v21193_v7 = vpop.f32.mrf.mxu1  ;;  %v25917_v29 = vsub.f32 %v32448_v46, %v25916_v2  ;;  %v32497_v44 = vsub.f32 %v25793_v58, %v32476_v11 }
 0x887   :  { %25826 = vmatprep.subr.mxu0 %v32427_v33  ;;  %v21194_v24 = vadd.f32 %v21193_v7, %v21100_v10  ;;  %v21276_v22 = vadd.f32 %v21275_v53, %v21192_v63  ;;  %25419 = vmatprep.mubr.f32.mxu1 %v34009_v16  ;;  %v21277_v57 = vpop.f32.mrf.mxu0  ;;  %v25922_v47 = vand.u32 4294901760, %v32482_v35  ;;  %v25865_v10 = vsub.f32 %v32474_v54, %v32494_v15 }
 0x888   :  { %25503 = vmatprep.mubr.f32.mxu0 %v34009_v16  ;;  %v21198_v42 = vpop.f32.mrf.mxu1  ;;  %25421 = vmatmul.mubr.f32.gmra.mxu1 %v32292_v38  ;;  %v25918_v55 = vand.u32 4294901760, %v25917_v29  ;;  %v32510_v51 = vand.u32 4294901760, %v32497_v44 }
 0x889   :  { %v21199_v56 = vadd.f32 %v21198_v42, %v21109_v25  ;;  %v21278_v23 = vadd.f32 %v21277_v57, %v21194_v24  ;;  %25506 = vmatmul.mubr.f32.gmra.mxu0 %v32313_v21  ;;  %v21283_v8 = vpop.f32.mrf.mxu0  ;;  %25578 = vmatprep.mubr.f32.mxu1 %v34009_v16  ;;  %v25782_v21 = vsel %vm7716_vm11, %v25778_v3, %v32419_v40  ;;  %v34037_v25 = vld [vmem:[#allocation49_spill] sm:$0xff]  ;;  %v32523_v63 = vand.u32 4294901760, %v25865_v10 }
 0x88a   :  { %v21200_v52 = vpop.f32.mrf.mxu1  ;;  %25667 = vmatprep.mubr.f32.mxu0 %v34009_v16  ;;  %v25786_v39 = vmul.f32 %v25782_v21, %v34037_v25  ;;  %v25876_v53 = vsub.f32 %v32497_v44, %v32510_v51 }
 0x88b   :  { %v21201_v28 = vadd.f32 %v21200_v52, %v21111_v9  ;;  %v21284_v32 = vadd.f32 %v21283_v8, %v21199_v56  ;;  %v21285_v18 = vpop.f32.mrf.mxu0 }
 0x88c   :  { %v21359_v5 = vpop.f32.mrf.mxu1  ;;  %25582 = vmatmul.mubr.f32.vlgmr.msra.gmra.mxu1 %v32310_v20  ;;  %v32531_v29 = vand.u32 4294901760, %v25786_v39 }
 0x88d   :  { %v21286_v30 = vadd.f32 %v21285_v18, %v21201_v28  ;;  %v21360_v62 = vadd.f32 %v21359_v5, %v21276_v22  ;;  %25669 = vmatmul.mubr.f32.vlgmr.msra.gmra.mxu0 %v32273_v60  ;;  %25715 = vmatpush1.msra.mxu1 %v32373_v17  ;;  %v21446_v31 = vpop.f32.mrf.mxu0  ;;  %v25923_v17 = vsub.f32 %v32482_v35, %v25922_v47  ;;  %v32535_v28 = vand.u32 4294901760, %v25876_v53 }
 0x88e   :  { %25828 = vmatpush1.msra.mxu0 %v32461_v37  ;;  %25919 = vmatprep.subr.mxu1 %v25918_v55  ;;  %v21361_v40 = vpop.f32.mrf.mxu1  ;;  %v32547_v21 = vsub.f32 %v25786_v39, %v32531_v29 }
 0x88f   :  { %26005 = vmatprep.subr.mxu0 %v32448_v46  ;;  %v21362_v20 = vadd.f32 %v21361_v40, %v21278_v23  ;;  %v21447_v19 = vadd.f32 %v21446_v31, %v21360_v62  ;;  %25587 = vmatprep.mubr.f32.mxu1 %v34009_v16  ;;  %v21448_v4 = vpop.f32.mrf.mxu0  ;;  %v25924_v42 = vand.u32 4294901760, %v25923_v17 }
 0x890   :  { %25674 = vmatprep.mubr.f32.mxu0 %v34009_v16  ;;  %v21368_v58 = vpop.f32.mrf.mxu1  ;;  %25591 = vmatmul.mubr.f32.gmra.mxu1 %v32326_v41  ;;  %v25779_v41 = vsel %vm7716_vm11, %v32398_v12, %v25778_v3 }
 0x891   :  { %v21369_v1 = vadd.f32 %v21368_v58, %v21284_v32  ;;  %v21449_v9 = vadd.f32 %v21448_v4, %v21362_v20  ;;  %25676 = vmatmul.mubr.f32.gmra.mxu0 %v32292_v38  ;;  %v21453_v34 = vpop.f32.mrf.mxu0  ;;  %25748 = vmatprep.mubr.f32.mxu1 %v34009_v16  ;;  %v25785_v12 = vmul.f32 %v25779_v41, %v34038_v61 }
 0x892   :  { %v21370_v7 = vpop.f32.mrf.mxu1  ;;  %25861 = vmatprep.mubr.f32.mxu0 %v34009_v16 }
 0x893   :  { %v21371_v24 = vadd.f32 %v21370_v7, %v21286_v30  ;;  %v21454_v22 = vadd.f32 %v21453_v34, %v21369_v1  ;;  %v21455_v57 = vpop.f32.mrf.mxu0  ;;  %v32557_v30 = vand.u32 4294901760, %v25785_v12 }
 0x894   :  { %v21527_v56 = vpop.f32.mrf.mxu1  ;;  %25750 = vmatmul.mubr.f32.vlgmr.msra.gmra.mxu1 %v32273_v60 }
 0x895   :  { %v21456_v23 = vadd.f32 %v21455_v57, %v21371_v24  ;;  %v21528_v8 = vadd.f32 %v21527_v56, %v21447_v19  ;;  %25867 = vmatmul.mubr.f32.vlgmr.msra.gmra.mxu0 %v32523_v63  ;;  %25925 = vmatpush1.msra.mxu1 %v25924_v42  ;;  %v21628_v52 = vpop.f32.mrf.mxu0  ;;  %v32573_v4 = vsub.f32 %v25785_v12, %v32557_v30 }
 0x896   :  { %26008 = vmatpush1.msra.mxu0 %v32482_v35  ;;  %26089 = vmatprep.subr.mxu1 %v32427_v33  ;;  %v21529_v32 = vpop.f32.mrf.mxu1 }
 0x897   :  { %v32541_v3 = vadd.f32 %v21528_v8, %v32357_v0  ;;  %26176 = vmatprep.subr.mxu0 %v25916_v2  ;;  %v21530_v60 = vadd.f32 %v21529_v32, %v21449_v9  ;;  %25755 = vmatprep.mubr.f32.mxu1 %v34009_v16  ;;  %v21630_v18 = vpop.f32.mrf.mxu0  ;;  %v26436_v9 = vand.u32 4294901760, %v32573_v4 }
 0x898   :  { %25872 = vmatprep.mubr.f32.mxu0 %v34009_v16  ;;  %v21534_v5 = vpop.f32.mrf.mxu1  ;;  %25757 = vmatmul.mubr.f32.gmra.mxu1 %v32292_v38 }
 0x899   :  { %v32552_v55 = vadd.f32 %v21530_v60, %v32368_v26  ;;  %v21535_v0 = vadd.f32 %v21534_v5, %v21454_v22  ;;  %25878 = vmatmul.mubr.f32.gmra.mxu0 %v32535_v28  ;;  %v21639_v46 = vpop.f32.mrf.mxu0  ;;  %25958 = vmatprep.mubr.f32.mxu1 %v34009_v16  ;;  %v26430_v26 = vand.u32 4294901760, %v32547_v21  ;;  %v26437_v32 = vsub.f32 %v32573_v4, %v26436_v9 }
 0x89a   :  { %v21536_v2 = vpop.f32.mrf.mxu1  ;;  %26041 = vmatprep.mubr.f32.mxu0 %v34009_v16 }
 0x89b   :  { %v32560_v62 = vadd.f32 %v21535_v0, %v32376_v49  ;;  %v21537_v31 = vadd.f32 %v21536_v2, %v21456_v23  ;;  %v21641_v10 = vpop.f32.mrf.mxu0  ;;  %v26438_v2 = vand.u32 4294901760, %v26437_v32 }
 0x89c   :  { %v21721_v38 = vpop.f32.mrf.mxu1  ;;  %25960 = vmatmul.mubr.f32.vlgmr.msra.gmra.mxu1 %v32457_v14 }
 0x89d   :  { %v32565_v40 = vadd.f32 %v21537_v31, %v32381_v45  ;;  %v21722_v20 = vadd.f32 %v21721_v38, %v21628_v52  ;;  %26044 = vmatmul.mubr.f32.vlgmr.msra.gmra.mxu0 %v32474_v54  ;;  %26091 = vmatpush1.msra.mxu1 %v32461_v37  ;;  %v21805_v19 = vpop.f32.mrf.mxu0 }
 0x89e   :  { %26180 = vmatpush1.msra.mxu0 %v25922_v47  ;;  %26259 = vmatprep.subr.mxu1 %v32427_v33  ;;  %v21723_v49 = vpop.f32.mrf.mxu1  ;;  %v26431_v33 = vsub.f32 %v32547_v21, %v26430_v26 }
 0x89f   :  { %26340 = vmatprep.subr.mxu0 %v32531_v29  ;;  %v21724_v17 = vadd.f32 %v21723_v49, %v21630_v18  ;;  %v21806_v45 = vadd.f32 %v21805_v19, %v21722_v20  ;;  %25965 = vmatprep.mubr.f32.mxu1 %v34009_v16  ;;  %v21807_v25 = vpop.f32.mrf.mxu0 }
 0x8a0   :  { %26049 = vmatprep.mubr.f32.mxu0 %v34009_v16  ;;  %v21728_v39 = vpop.f32.mrf.mxu1  ;;  %25967 = vmatmul.mubr.f32.gmra.mxu1 %v32476_v11  ;;  %v26432_v22 = vand.u32 4294901760, %v26431_v33 }
 0x8a1   :  { %v21729_v35 = vadd.f32 %v21728_v39, %v21639_v46  ;;  %v21808_v47 = vadd.f32 %v21807_v25, %v21724_v17  ;;  %26052 = vmatmul.mubr.f32.gmra.mxu0 %v32497_v44  ;;  %v21813_v58 = vpop.f32.mrf.mxu0  ;;  %26124 = vmatprep.mubr.f32.mxu1 %v34009_v16 }
 0x8a2   :  { %v21730_v1 = vpop.f32.mrf.mxu1  ;;  %26213 = vmatprep.mubr.f32.mxu0 %v34009_v16 }
 0x8a3   :  { %v21731_v34 = vadd.f32 %v21730_v1, %v21641_v10  ;;  %v21814_v53 = vadd.f32 %v21813_v58, %v21729_v35  ;;  %v21815_v7 = vpop.f32.mrf.mxu0 }
 0x8a4   :  { %v21889_v24 = vpop.f32.mrf.mxu1  ;;  %26128 = vmatmul.mubr.f32.vlgmr.msra.gmra.mxu1 %v32494_v15 }
 0x8a5   :  { %v21816_v57 = vadd.f32 %v21815_v7, %v21731_v34  ;;  %v21890_v42 = vadd.f32 %v21889_v24, %v21806_v45  ;;  %26215 = vmatmul.mubr.f32.vlgmr.msra.gmra.mxu0 %v32457_v14  ;;  %26261 = vmatpush1.msra.mxu1 %v32461_v37  ;;  %v21976_v41 = vpop.f32.mrf.mxu0 }
 0x8a6   :  { %26342 = vmatpush1.msra.mxu0 %v32557_v30  ;;  %26433 = vmatprep.subr.mxu1 %v26432_v22  ;;  %v21891_v56 = vpop.f32.mrf.mxu1 }
 0x8a7   :  { %26519 = vmatprep.subr.mxu0 %v32547_v21  ;;  %v21892_v23 = vadd.f32 %v21891_v56, %v21808_v47  ;;  %v21977_v8 = vadd.f32 %v21976_v41, %v21890_v42  ;;  %26133 = vmatprep.mubr.f32.mxu1 %v34009_v16  ;;  %v21978_v52 = vpop.f32.mrf.mxu0  ;;  %v27097_v21 = vld [vmem:[%s33640_s1 + $0x120] sm:$0xff]  ;;  %v34039_v56 = vld [vmem:[#allocation23_spill] sm:$0xff] }
 0x8a8   :  { %26220 = vmatprep.mubr.f32.mxu0 %v34009_v16  ;;  %v21898_v61 = vpop.f32.mrf.mxu1  ;;  %26137 = vmatmul.mubr.f32.gmra.mxu1 %v32510_v51  ;;  %v27102_v33 = vsel %vm120_vm0, %v27097_v21, 0 }
 0x8a9   :  { %v21899_v37 = vadd.f32 %v21898_v61, %v21814_v53  ;;  %v21979_v12 = vadd.f32 %v21978_v52, %v21892_v23  ;;  %26222 = vmatmul.mubr.f32.gmra.mxu0 %v32476_v11  ;;  %v21983_v60 = vpop.f32.mrf.mxu0  ;;  %26294 = vmatprep.mubr.f32.mxu1 %v34009_v16  ;;  %v32625_v58 = vand.u32 4294901760, %v27102_v33 }
 0x8aa   :  { %v21900_v18 = vpop.f32.mrf.mxu1  ;;  %26375 = vmatprep.mubr.f32.mxu0 %v34009_v16 }
 0x8ab   :  { %v21901_v5 = vadd.f32 %v21900_v18, %v21816_v57  ;;  %v21984_v0 = vadd.f32 %v21983_v60, %v21899_v37  ;;  %v21985_v46 = vpop.f32.mrf.mxu0  ;;  %v32634_v7 = vsub.f32 %v27102_v33, %v32625_v58 }
 0x8ac   :  { %v22057_v31 = vpop.f32.mrf.mxu1  ;;  %26296 = vmatmul.mubr.f32.vlgmr.msra.gmra.mxu1 %v32457_v14 }
 0x8ad   :  { %v21986_v10 = vadd.f32 %v21985_v46, %v21901_v5  ;;  %v22058_v38 = vadd.f32 %v22057_v31, %v21977_v8  ;;  %26381 = vmatmul.mubr.f32.vlgmr.msra.gmra.mxu0 %v32523_v63  ;;  %26439 = vmatpush1.msra.mxu1 %v26438_v2  ;;  %v22142_v20 = vpop.f32.mrf.mxu0  ;;  %v27099_v8 = vld [vmem:[%s33640_s1 + $0x130] sm:$0xff] }
 0x8ae   :  { %26522 = vmatpush1.msra.mxu0 %v32573_v4  ;;  %26603 = vmatprep.subr.mxu1 %v32531_v29  ;;  %v22059_v19 = vpop.f32.mrf.mxu1  ;;  %v32650_v4 = vand.u32 4294901760, %v32634_v7  ;;  %v27108_v61 = vsel %vm120_vm0, %v27099_v8, 0 }
 0x8af   :  { %v32605_v49 = vadd.f32 %v22058_v38, %v32439_v50  ;;  %26690 = vmatprep.subr.mxu0 %v26430_v26  ;;  %v22060_v17 = vadd.f32 %v22059_v19, %v21979_v12  ;;  %26301 = vmatprep.mubr.f32.mxu1 %v34009_v16  ;;  %v22144_v45 = vpop.f32.mrf.mxu0  ;;  %v32662_v18 = vand.u32 4294901760, %v27108_v61 }
 0x8b0   :  { %26386 = vmatprep.mubr.f32.mxu0 %v34009_v16  ;;  %v22064_v63 = vpop.f32.mrf.mxu1  ;;  %26303 = vmatmul.mubr.f32.gmra.mxu1 %v32476_v11  ;;  %v27183_v5 = vsub.f32 %v32634_v7, %v32650_v4 }
 0x8b1   :  { %v32613_v25 = vadd.f32 %v22060_v17, %v32453_v59  ;;  %v22065_v39 = vadd.f32 %v22064_v63, %v21984_v0  ;;  %26392 = vmatmul.mubr.f32.gmra.mxu0 %v32535_v28  ;;  %v22153_v50 = vpop.f32.mrf.mxu0  ;;  %26472 = vmatprep.mubr.f32.mxu1 %v34009_v16  ;;  %v34041_v63 = vld [vmem:[#allocation31_spill] sm:$0xff] }
 0x8b2   :  { %v22066_v26 = vpop.f32.mrf.mxu1  ;;  %26555 = vmatprep.mubr.f32.mxu0 %v34009_v16 }
 0x8b3   :  { %v32623_v35 = vadd.f32 %v22065_v39, %v32464_v48  ;;  %v22067_v59 = vadd.f32 %v22066_v26, %v21986_v10  ;;  %v22155_v47 = vpop.f32.mrf.mxu0  ;;  %v27098_v48 = vld [vmem:[%s33640_s1 + $0x128] sm:$0xff]  ;;  %v32673_v10 = vsub.f32 %v27108_v61, %v32662_v18  ;;  %v34042_v26 = vld [vmem:[#allocation25_spill] sm:$0xff] }
 0x8b4   :  { %v22235_v28 = vpop.f32.mrf.mxu1  ;;  %26474 = vmatmul.mubr.f32.vlgmr.msra.gmra.mxu1 %v32457_v14  ;;  %v27105_v24 = vsel %vm120_vm0, %v27098_v48, 0 }
 0x8b5   :  { %v32629_v1 = vadd.f32 %v22067_v59, %v32469_v6  ;;  %v22236_v34 = vadd.f32 %v22235_v28, %v22142_v20  ;;  %26558 = vmatmul.mubr.f32.vlgmr.msra.gmra.mxu0 %v32474_v54  ;;  %26605 = vmatpush1.msra.mxu1 %v32557_v30  ;;  %v22319_v53 = vpop.f32.mrf.mxu0  ;;  %v32645_v42 = vand.u32 4294901760, %v27105_v24  ;;  %v32691_v28 = vand.u32 4294901760, %v27183_v5 }
 0x8b6   :  { %26694 = vmatpush1.msra.mxu0 %v26436_v9  ;;  %26773 = vmatprep.subr.mxu1 %v32531_v29  ;;  %v22237_v6 = vpop.f32.mrf.mxu1 }
 0x8b7   :  { %v22238_v22 = vadd.f32 %v22237_v6, %v22144_v45  ;;  %v22320_v54 = vadd.f32 %v22319_v53, %v22236_v34  ;;  %26479 = vmatprep.mubr.f32.mxu1 %v34009_v16  ;;  %v22321_v57 = vpop.f32.mrf.mxu0  ;;  %26563 = vmatprep.mubr.f32.mxu0 %v34009_v16  ;;  %v32659_v32 = vsub.f32 %v27105_v24, %v32645_v42  ;;  %v34040_v45 = vld [vmem:[#allocation24_spill] sm:$0xff]  ;;  %v32694_v34 = vand.u32 4294901760, %v32673_v10 }
 0x8b8   :  { %v22242_v41 = vpop.f32.mrf.mxu1  ;;  %26481 = vmatmul.mubr.f32.gmra.mxu1 %v32476_v11  ;;  %27144 = vmatprep.subr.mxu0 %v34039_v56 }
 0x8b9   :  { %v22243_v29 = vadd.f32 %v22242_v41, %v22153_v50  ;;  %v22322_v9 = vadd.f32 %v22321_v57, %v22238_v22  ;;  %v22327_v23 = vpop.f32.mrf.mxu0  ;;  %26566 = vmatmul.mubr.f32.gmra.mxu0 %v32497_v44  ;;  %26638 = vmatprep.mubr.f32.mxu1 %v34009_v16  ;;  %v32668_v0 = vand.u32 4294901760, %v32659_v32 }
 0x8ba   :  { %v22244_v52 = vpop.f32.mrf.mxu1  ;;  %26727 = vmatprep.mubr.f32.mxu0 %v34009_v16 }
 0x8bb   :  { %v22245_v37 = vadd.f32 %v22244_v52, %v22155_v47  ;;  %v22328_v12 = vadd.f32 %v22327_v23, %v22243_v29  ;;  %v22329_v60 = vpop.f32.mrf.mxu0  ;;  %v27194_v21 = vsub.f32 %v32659_v32, %v32668_v0  ;;  %v34043_v52 = vld [vmem:[#allocation33_spill] sm:$0xff] }
 0x8bc   :  { %v22403_v44 = vpop.f32.mrf.mxu1  ;;  %26642 = vmatmul.mubr.f32.vlgmr.msra.gmra.mxu1 %v32494_v15  ;;  %v27100_v15 = vld [vmem:[%s33640_s1 + $0x138] sm:$0xff] }
 0x8bd   :  { %v22330_v46 = vadd.f32 %v22329_v60, %v22245_v37  ;;  %v22404_v2 = vadd.f32 %v22403_v44, %v22320_v54  ;;  %26775 = vmatpush1.msra.mxu1 %v32557_v30  ;;  %v22490_v31 = vpop.f32.mrf.mxu0  ;;  %26729 = vmatmul.mubr.f32.vlgmr.msra.gmra.mxu0 %v32457_v14  ;;  %v27111_v20 = vsel %vm120_vm0, %v27100_v15, 0  ;;  %v32701_v54 = vand.u32 4294901760, %v27194_v21  ;;  %v34045_v44 = vld [vmem:[#allocation27_spill] sm:$0xff] }
 0x8be   :  { %v22405_v38 = vpop.f32.mrf.mxu1  ;;  %26647 = vmatprep.mubr.f32.mxu1 %v34009_v16  ;;  %26734 = vmatprep.mubr.f32.mxu0 %v34009_v16  ;;  %v32683_v39 = vand.u32 4294901760, %v27111_v20 }
 0x8bf   :  { %v22406_v19 = vadd.f32 %v22405_v38, %v22322_v9  ;;  %v22491_v17 = vadd.f32 %v22490_v31, %v22404_v2  ;;  %v22492_v30 = vpop.f32.mrf.mxu0  ;;  %27146 = vmatpush1.msra.mxu0 %v34040_v45  ;;  %27259 = vmatprep.subr.mxu1 %v34041_v63  ;;  %v27205_v9 = vsub.f32 %v32673_v10, %v32694_v34 }
 0x8c0   :  { %v22412_v50 = vpop.f32.mrf.mxu1  ;;  %26651 = vmatmul.mubr.f32.gmra.mxu1 %v32510_v51  ;;  %27359 = vmatprep.subr.mxu0 %v34042_v26  ;;  %v32698_v51 = vsub.f32 %v27111_v20, %v32683_v39 }
 0x8c1   :  { %v22413_v33 = vadd.f32 %v22412_v50, %v22328_v12  ;;  %v22493_v59 = vadd.f32 %v22492_v30, %v22406_v19  ;;  %v22497_v47 = vpop.f32.mrf.mxu0  ;;  %26736 = vmatmul.mubr.f32.gmra.mxu0 %v32476_v11  ;;  %26808 = vmatprep.mubr.f32.mxu1 %v34009_v16  ;;  %v34044_v12 = vld [vmem:[#allocation26_spill] sm:$0xff] }
 0x8c2   :  { %v22414_v53 = vpop.f32.mrf.mxu1  ;;  %27179 = vmatprep.mubr.f32.mxu0 %v34009_v16  ;;  %v32708_v23 = vand.u32 4294901760, %v32698_v51 }
 0x8c3   :  { %v22415_v48 = vadd.f32 %v22414_v53, %v22330_v46  ;;  %v22498_v6 = vadd.f32 %v22497_v47, %v22413_v33  ;;  %v22499_v24 = vpop.f32.mrf.mxu0 }
 0x8c4   :  { %v22571_v22 = vpop.f32.mrf.mxu1  ;;  %26810 = vmatmul.mubr.f32.vlgmr.msra.gmra.mxu1 %v32457_v14  ;;  %v27216_v31 = vsub.f32 %v32698_v51, %v32708_v23 }
 0x8c5   :  { %v22500_v57 = vadd.f32 %v22499_v24, %v22415_v48  ;;  %v22572_v41 = vadd.f32 %v22571_v22, %v22491_v17  ;;  %v22688_v29 = vpop.f32.mrf.mxu0  ;;  %26815 = vmatprep.mubr.f32.mxu1 %v34009_v16  ;;  %27185 = vmatmul.mubr.f32.vlgmr.msra.gmra.mxu0 %v32691_v28 }
 0x8c6   :  { %v22573_v8 = vpop.f32.mrf.mxu1  ;;  %27265 = vmatpush1.msra.mxu1 %v34043_v52  ;;  %27190 = vmatprep.mubr.f32.mxu0 %v34009_v16  ;;  %v32738_v63 = vand.u32 4294901760, %v27216_v31 }
 0x8c7   :  { %v32713_v14 = vadd.f32 %v22572_v41, %v32541_v3  ;;  %v22574_v61 = vadd.f32 %v22573_v8, %v22493_v59  ;;  %v22690_v37 = vpop.f32.mrf.mxu0  ;;  %27362 = vmatpush1.msra.mxu0 %v34044_v12  ;;  %27459 = vmatprep.subr.mxu1 %v34039_v56  ;;  %v32724_v3 = vand.u32 4294901760, %v27205_v9  ;;  %v34046_v9 = vld [vmem:[#allocation28_spill] sm:$0xff] }
 0x8c8   :  { %v22578_v60 = vpop.f32.mrf.mxu1  ;;  %26817 = vmatmul.mubr.f32.gmra.mxu1 %v32476_v11  ;;  %27564 = vmatprep.subr.mxu0 %v34045_v44 }
 0x8c9   :  { %v32720_v5 = vadd.f32 %v22574_v61, %v32552_v55  ;;  %v22579_v46 = vadd.f32 %v22578_v60, %v22498_v6  ;;  %v22699_v2 = vpop.f32.mrf.mxu0  ;;  %27298 = vmatprep.mubr.f32.mxu1 %v34009_v16  ;;  %27196 = vmatmul.mubr.f32.gmra.mxu0 %v32701_v54 }
 0x8ca   :  { %v22580_v15 = vpop.f32.mrf.mxu1  ;;  %27201 = vmatprep.mubr.f32.mxu0 %v34009_v16 }
 0x8cb   :  { %v32730_v11 = vadd.f32 %v22579_v46, %v32560_v62  ;;  %v22581_v38 = vadd.f32 %v22580_v15, %v22500_v57  ;;  %v22701_v55 = vpop.f32.mrf.mxu0 }
 0x8cc   :  { %v22781_v20 = vpop.f32.mrf.mxu1  ;;  %27300 = vmatmul.mubr.f32.vlgmr.msra.gmra.mxu1 %v32625_v58 }
 0x8cd   :  { %v32734_v19 = vadd.f32 %v22581_v38, %v32565_v40  ;;  %v22782_v17 = vadd.f32 %v22781_v20, %v22688_v29  ;;  %v22865_v30 = vpop.f32.mrf.mxu0  ;;  %27305 = vmatprep.mubr.f32.mxu1 %v34009_v16  ;;  %27207 = vmatmul.mubr.f32.gmra.mxu0 %v32724_v3 }
 0x8ce   :  { %v22783_v50 = vpop.f32.mrf.mxu1  ;;  %27212 = vmatprep.mubr.f32.mxu0 %v34009_v16  ;;  %27461 = vmatpush1.msra.mxu1 %v34040_v45 }
 0x8cf   :  { %v22784_v62 = vadd.f32 %v22783_v50, %v22690_v37  ;;  %v22866_v21 = vadd.f32 %v22865_v30, %v22782_v17  ;;  %v22867_v26 = vpop.f32.mrf.mxu0  ;;  %27661 = vmatprep.subr.mxu1 %v34039_v56  ;;  %v34047_v37 = vld [vmem:[#allocation29_spill] sm:$0xff] }
 0x8d0   :  { %v22788_v40 = vpop.f32.mrf.mxu1  ;;  %27307 = vmatmul.mubr.f32.gmra.mxu1 %v32645_v42 }
 0x8d1   :  { %v22789_v33 = vadd.f32 %v22788_v40, %v22699_v2  ;;  %v22868_v59 = vadd.f32 %v22867_v26, %v22784_v62  ;;  %v22873_v47 = vpop.f32.mrf.mxu0  ;;  %27312 = vmatprep.mubr.f32.mxu1 %v34009_v16  ;;  %27218 = vmatmul.mubr.f32.gmra.mxu0 %v32738_v63  ;;  %v34048_v40 = vld [vmem:[#allocation37_spill] sm:$0xff] }
 0x8d2   :  { %v22790_v53 = vpop.f32.mrf.mxu1  ;;  %27395 = vmatprep.mubr.f32.mxu0 %v34009_v16 }
 0x8d3   :  { %v22791_v48 = vadd.f32 %v22790_v53, %v22701_v55  ;;  %v22874_v6 = vadd.f32 %v22873_v47, %v22789_v33  ;;  %v22875_v24 = vpop.f32.mrf.mxu0 }
 0x8d4   :  { %v22949_v22 = vpop.f32.mrf.mxu1  ;;  %27314 = vmatmul.mubr.f32.gmra.mxu1 %v32662_v18 }
 0x8d5   :  { %v22876_v56 = vadd.f32 %v22875_v24, %v22791_v48  ;;  %v22950_v57 = vadd.f32 %v22949_v22, %v22866_v21  ;;  %v23036_v41 = vpop.f32.mrf.mxu0  ;;  %27319 = vmatprep.mubr.f32.mxu1 %v34009_v16  ;;  %27398 = vmatmul.mubr.f32.vlgmr.msra.gmra.mxu0 %v32634_v7 }
 0x8d6   :  { %v22951_v29 = vpop.f32.mrf.mxu1  ;;  %27403 = vmatprep.mubr.f32.mxu0 %v34009_v16  ;;  %27568 = vmatpush1.msra.mxu0 %v34046_v9 }
 0x8d7   :  { %v22952_v8 = vadd.f32 %v22951_v29, %v22868_v59  ;;  %v23037_v52 = vadd.f32 %v23036_v41, %v22950_v57  ;;  %v23038_v61 = vpop.f32.mrf.mxu0  ;;  %27756 = vmatprep.subr.mxu0 %v34047_v37  ;;  %v34049_v41 = vld [vmem:[#allocation30_spill] sm:$0xff] }
 0x8d8   :  { %v22958_v12 = vpop.f32.mrf.mxu1  ;;  %27321 = vmatmul.mubr.f32.gmra.mxu1 %v32683_v39 }
 0x8d9   :  { %v22959_v60 = vadd.f32 %v22958_v12, %v22874_v6  ;;  %v23039_v44 = vadd.f32 %v23038_v61, %v22952_v8  ;;  %v23043_v46 = vpop.f32.mrf.mxu0  ;;  %27494 = vmatprep.mubr.f32.mxu1 %v34009_v16  ;;  %27406 = vmatmul.mubr.f32.gmra.mxu0 %v32659_v32  ;;  %v34050_v8 = vld [vmem:[#allocation32_spill] sm:$0xff] }
 0x8da   :  { %v22960_v2 = vpop.f32.mrf.mxu1  ;;  %27411 = vmatprep.mubr.f32.mxu0 %v34009_v16 }
 0x8db   :  { %v22961_v31 = vadd.f32 %v22960_v2, %v22876_v56  ;;  %v23044_v15 = vadd.f32 %v23043_v46, %v22959_v60  ;;  %v23045_v38 = vpop.f32.mrf.mxu0 }
 0x8dc   :  { %v23117_v55 = vpop.f32.mrf.mxu1  ;;  %27498 = vmatmul.mubr.f32.vlgmr.msra.gmra.mxu1 %v32650_v4 }
 0x8dd   :  { %v23046_v20 = vadd.f32 %v23045_v38, %v22961_v31  ;;  %v23118_v17 = vadd.f32 %v23117_v55, %v23037_v52  ;;  %v23202_v30 = vpop.f32.mrf.mxu0  ;;  %27503 = vmatprep.mubr.f32.mxu1 %v34009_v16  ;;  %27414 = vmatmul.mubr.f32.gmra.mxu0 %v32673_v10 }
 0x8de   :  { %v23119_v50 = vpop.f32.mrf.mxu1  ;;  %27419 = vmatprep.mubr.f32.mxu0 %v34009_v16  ;;  %27663 = vmatpush1.msra.mxu1 %v34040_v45 }
 0x8df   :  { %v32763_v62 = vadd.f32 %v23118_v17, %v32605_v49  ;;  %v23120_v21 = vadd.f32 %v23119_v50, %v23039_v44  ;;  %v23204_v26 = vpop.f32.mrf.mxu0  ;;  %27871 = vmatprep.subr.mxu1 %v34048_v40  ;;  %v34051_v17 = vld [vmem:[#allocation38_spill] sm:$0xff] }
 0x8e0   :  { %v23124_v33 = vpop.f32.mrf.mxu1  ;;  %27507 = vmatmul.mubr.f32.gmra.mxu1 %v32668_v0 }
 0x8e1   :  { %v32768_v59 = vadd.f32 %v23120_v21, %v32613_v25  ;;  %v23125_v47 = vadd.f32 %v23124_v33, %v23044_v15  ;;  %v23213_v53 = vpop.f32.mrf.mxu0  ;;  %27512 = vmatprep.mubr.f32.mxu1 %v34009_v16  ;;  %27422 = vmatmul.mubr.f32.gmra.mxu0 %v32698_v51 }
 0x8e2   :  { %v23126_v45 = vpop.f32.mrf.mxu1  ;;  %27601 = vmatprep.mubr.f32.mxu0 %v34009_v16 }
 0x8e3   :  { %v32774_v49 = vadd.f32 %v23125_v47, %v32623_v35  ;;  %v23127_v48 = vadd.f32 %v23126_v45, %v23046_v20  ;;  %v23215_v6 = vpop.f32.mrf.mxu0 }
 0x8e4   :  { %v23295_v24 = vpop.f32.mrf.mxu1  ;;  %27516 = vmatmul.mubr.f32.gmra.mxu1 %v32694_v34 }
 0x8e5   :  { %v32778_v25 = vadd.f32 %v23127_v48, %v32629_v1  ;;  %v23296_v22 = vadd.f32 %v23295_v24, %v23202_v30  ;;  %v23379_v56 = vpop.f32.mrf.mxu0  ;;  %27521 = vmatprep.mubr.f32.mxu1 %v34009_v16  ;;  %27603 = vmatmul.mubr.f32.vlgmr.msra.gmra.mxu0 %v32625_v58 }
 0x8e6   :  { %v23297_v57 = vpop.f32.mrf.mxu1  ;;  %27608 = vmatprep.mubr.f32.mxu0 %v34009_v16  ;;  %27758 = vmatpush1.msra.mxu0 %v34049_v41 }
 0x8e7   :  { %v23298_v35 = vadd.f32 %v23297_v57, %v23204_v26  ;;  %v23380_v29 = vadd.f32 %v23379_v56, %v23296_v22  ;;  %v23381_v9 = vpop.f32.mrf.mxu0  ;;  %27971 = vmatprep.subr.mxu0 %v34050_v8 }
 0x8e8   :  { %v23302_v52 = vpop.f32.mrf.mxu1  ;;  %27525 = vmatmul.mubr.f32.gmra.mxu1 %v32708_v23 }
 0x8e9   :  { %v23303_v1 = vadd.f32 %v23302_v52, %v23213_v53  ;;  %v23382_v61 = vadd.f32 %v23381_v9, %v23298_v35  ;;  %v23387_v12 = vpop.f32.mrf.mxu0  ;;  %27696 = vmatprep.mubr.f32.mxu1 %v34009_v16  ;;  %27610 = vmatmul.mubr.f32.gmra.mxu0 %v32645_v42 }
 0x8ea   :  { %v23304_v60 = vpop.f32.mrf.mxu1  ;;  %27615 = vmatprep.mubr.f32.mxu0 %v34009_v16 }
 0x8eb   :  { %v23305_v44 = vadd.f32 %v23304_v60, %v23215_v6  ;;  %v23388_v46 = vadd.f32 %v23387_v12, %v23303_v1  ;;  %v23389_v2 = vpop.f32.mrf.mxu0  ;;  %v34053_v1 = vld [vmem:[#allocation35_spill] sm:$0xff] }
 0x8ec   :  { %v23463_v31 = vpop.f32.mrf.mxu1  ;;  %27698 = vmatmul.mubr.f32.vlgmr.msra.gmra.mxu1 %v32625_v58 }
 0x8ed   :  { %v23390_v15 = vadd.f32 %v23389_v2, %v23305_v44  ;;  %v23464_v38 = vadd.f32 %v23463_v31, %v23380_v29  ;;  %v23550_v55 = vpop.f32.mrf.mxu0  ;;  %27703 = vmatprep.mubr.f32.mxu1 %v34009_v16  ;;  %27617 = vmatmul.mubr.f32.gmra.mxu0 %v32662_v18  ;;  %v34052_v29 = vld [vmem:[#allocation34_spill] sm:$0xff] }
 0x8ee   :  { %v23465_v20 = vpop.f32.mrf.mxu1  ;;  %27622 = vmatprep.mubr.f32.mxu0 %v34009_v16  ;;  %27877 = vmatpush1.msra.mxu1 %v34051_v17 }
 0x8ef   :  { %v23466_v30 = vadd.f32 %v23465_v20, %v23382_v61  ;;  %v23551_v50 = vadd.f32 %v23550_v55, %v23464_v38  ;;  %v23552_v21 = vpop.f32.mrf.mxu0  ;;  %28071 = vmatprep.subr.mxu1 %v34047_v37 }
 0x8f0   :  { %v23472_v26 = vpop.f32.mrf.mxu1  ;;  %27705 = vmatmul.mubr.f32.gmra.mxu1 %v32645_v42 }
 0x8f1   :  { %v23473_v40 = vadd.f32 %v23472_v26, %v23388_v46  ;;  %v23553_v33 = vadd.f32 %v23552_v21, %v23466_v30  ;;  %v23557_v47 = vpop.f32.mrf.mxu0  ;;  %27710 = vmatprep.mubr.f32.mxu1 %v34009_v16  ;;  %27624 = vmatmul.mubr.f32.gmra.mxu0 %v32683_v39 }
 0x8f2   :  { %v23474_v53 = vpop.f32.mrf.mxu1  ;;  %27791 = vmatprep.mubr.f32.mxu0 %v34009_v16 }
 0x8f3   :  { %v23475_v45 = vadd.f32 %v23474_v53, %v23390_v15  ;;  %v23558_v48 = vadd.f32 %v23557_v47, %v23473_v40  ;;  %v23559_v6 = vpop.f32.mrf.mxu0 }
 0x8f4   :  { %v23631_v24 = vpop.f32.mrf.mxu1  ;;  %27712 = vmatmul.mubr.f32.gmra.mxu1 %v32662_v18 }
 0x8f5   :  { %v23560_v22 = vadd.f32 %v23559_v6, %v23475_v45  ;;  %v23632_v56 = vadd.f32 %v23631_v24, %v23551_v50  ;;  %v23748_v57 = vpop.f32.mrf.mxu0  ;;  %27717 = vmatprep.mubr.f32.mxu1 %v34009_v16  ;;  %27797 = vmatmul.mubr.f32.vlgmr.msra.gmra.mxu0 %v32691_v28 }
 0x8f6   :  { %v23633_v35 = vpop.f32.mrf.mxu1  ;;  %27802 = vmatprep.mubr.f32.mxu0 %v34009_v16  ;;  %27974 = vmatpush1.msra.mxu0 %v34052_v29 }
 0x8f7   :  { %v32805_v9 = vadd.f32 %v23632_v56, %v32713_v14  ;;  %v23634_v8 = vadd.f32 %v23633_v35, %v23553_v33  ;;  %v23750_v52 = vpop.f32.mrf.mxu0  ;;  %28176 = vmatprep.subr.mxu0 %v34053_v1 }
 0x8f8   :  { %v23638_v61 = vpop.f32.mrf.mxu1  ;;  %27719 = vmatmul.mubr.f32.gmra.mxu1 %v32683_v39 }
 0x8f9   :  { %v32810_v12 = vadd.f32 %v23634_v8, %v32720_v5  ;;  %v23639_v60 = vadd.f32 %v23638_v61, %v23558_v48  ;;  %v23759_v28 = vpop.f32.mrf.mxu0  ;;  %27910 = vmatprep.mubr.f32.mxu1 %v34009_v16  ;;  %27808 = vmatmul.mubr.f32.gmra.mxu0 %v32701_v54 }
 0x8fa   :  { %v23640_v44 = vpop.f32.mrf.mxu1  ;;  %27813 = vmatprep.mubr.f32.mxu0 %v34009_v16 }
 0x8fb   :  { %v32816_v14 = vadd.f32 %v23639_v60, %v32730_v11  ;;  %v23641_v46 = vadd.f32 %v23640_v44, %v23560_v22  ;;  %v23761_v2 = vpop.f32.mrf.mxu0 }
 0x8fc   :  { %v23841_v31 = vpop.f32.mrf.mxu1  ;;  %27912 = vmatmul.mubr.f32.vlgmr.msra.gmra.mxu1 %v32625_v58 }
 0x8fd   :  { %v32820_v5 = vadd.f32 %v23641_v46, %v32734_v19  ;;  %v23842_v15 = vadd.f32 %v23841_v31, %v23748_v57  ;;  %v23925_v38 = vpop.f32.mrf.mxu0  ;;  %27917 = vmatprep.mubr.f32.mxu1 %v34009_v16  ;;  %27819 = vmatmul.mubr.f32.gmra.mxu0 %v32724_v3 }
 0x8fe   :  { %v23843_v54 = vpop.f32.mrf.mxu1  ;;  %27824 = vmatprep.mubr.f32.mxu0 %v34009_v16  ;;  %28073 = vmatpush1.msra.mxu1 %v34049_v41 }
 0x8ff   :  { %v23844_v11 = vadd.f32 %v23843_v54, %v23750_v52  ;;  %v23926_v55 = vadd.f32 %v23925_v38, %v23842_v15  ;;  %v23927_v20 = vpop.f32.mrf.mxu0  ;;  %28273 = vmatprep.subr.mxu1 %v34047_v37 }
 0x900   :  { %v23848_v17 = vpop.f32.mrf.mxu1  ;;  %27919 = vmatmul.mubr.f32.gmra.mxu1 %v32645_v42 }
 0x901   :  { %v23849_v19 = vadd.f32 %v23848_v17, %v23759_v28  ;;  %v23928_v30 = vadd.f32 %v23927_v20, %v23844_v11  ;;  %v23933_v50 = vpop.f32.mrf.mxu0  ;;  %27924 = vmatprep.mubr.f32.mxu1 %v34009_v16  ;;  %27830 = vmatmul.mubr.f32.gmra.mxu0 %v32738_v63  ;;  %v34054_v63 = vld [vmem:[#allocation36_spill] sm:$0xff] }
 0x902   :  { %v23850_v3 = vpop.f32.mrf.mxu1  ;;  %28007 = vmatprep.mubr.f32.mxu0 %v34009_v16 }
 0x903   :  { %v23851_v21 = vadd.f32 %v23850_v3, %v23761_v2  ;;  %v23934_v26 = vadd.f32 %v23933_v50, %v23849_v19  ;;  %v23935_v40 = vpop.f32.mrf.mxu0 }
 0x904   :  { %v24009_v33 = vpop.f32.mrf.mxu1  ;;  %27926 = vmatmul.mubr.f32.gmra.mxu1 %v32662_v18 }
 0x905   :  { %v23936_v37 = vadd.f32 %v23935_v40, %v23851_v21  ;;  %v24010_v47 = vadd.f32 %v24009_v33, %v23926_v55  ;;  %v24096_v53 = vpop.f32.mrf.mxu0  ;;  %27931 = vmatprep.mubr.f32.mxu1 %v34009_v16  ;;  %28010 = vmatmul.mubr.f32.vlgmr.msra.gmra.mxu0 %v32634_v7 }
 0x906   :  { %v24011_v45 = vpop.f32.mrf.mxu1  ;;  %28015 = vmatprep.mubr.f32.mxu0 %v34009_v16  ;;  %28180 = vmatpush1.msra.mxu0 %v34054_v63 }
 0x907   :  { %v24012_v48 = vadd.f32 %v24011_v45, %v23928_v30  ;;  %v24097_v6 = vadd.f32 %v24096_v53, %v24010_v47  ;;  %v24098_v24 = vpop.f32.mrf.mxu0 }
 0x908   :  { %v24018_v22 = vpop.f32.mrf.mxu1  ;;  %27933 = vmatmul.mubr.f32.gmra.mxu1 %v32683_v39 }
 0x909   :  { %v24019_v56 = vadd.f32 %v24018_v22, %v23934_v26  ;;  %v24099_v57 = vadd.f32 %v24098_v24, %v24012_v48  ;;  %v24103_v35 = vpop.f32.mrf.mxu0  ;;  %28106 = vmatprep.mubr.f32.mxu1 %v34009_v16  ;;  %28018 = vmatmul.mubr.f32.gmra.mxu0 %v32659_v32 }
 0x90a   :  { %v24020_v29 = vpop.f32.mrf.mxu1  ;;  %28023 = vmatprep.mubr.f32.mxu0 %v34009_v16 }
 0x90b   :  { %v24021_v7 = vadd.f32 %v24020_v29, %v23936_v37  ;;  %v24104_v8 = vadd.f32 %v24103_v35, %v24019_v56  ;;  %v24105_v52 = vpop.f32.mrf.mxu0 }
 0x90c   :  { %v24177_v1 = vpop.f32.mrf.mxu1  ;;  %28110 = vmatmul.mubr.f32.vlgmr.msra.gmra.mxu1 %v32650_v4 }
 0x90d   :  { %v24106_v61 = vadd.f32 %v24105_v52, %v24021_v7  ;;  %v24178_v60 = vadd.f32 %v24177_v1, %v24097_v6  ;;  %v24262_v28 = vpop.f32.mrf.mxu0  ;;  %28115 = vmatprep.mubr.f32.mxu1 %v34009_v16  ;;  %28026 = vmatmul.mubr.f32.gmra.mxu0 %v32673_v10 }
 0x90e   :  { %v24179_v44 = vpop.f32.mrf.mxu1  ;;  %28031 = vmatprep.mubr.f32.mxu0 %v34009_v16  ;;  %28275 = vmatpush1.msra.mxu1 %v34049_v41 }
 0x90f   :  { %v32846_v32 = vadd.f32 %v24178_v60, %v32763_v62  ;;  %v24180_v46 = vadd.f32 %v24179_v44, %v24099_v57  ;;  %v24264_v2 = vpop.f32.mrf.mxu0 }
 0x910   :  { %v24184_v31 = vpop.f32.mrf.mxu1  ;;  %28119 = vmatmul.mubr.f32.gmra.mxu1 %v32668_v0 }
 0x911   :  { %v32850_v4 = vadd.f32 %v24180_v46, %v32768_v59  ;;  %v24185_v15 = vadd.f32 %v24184_v31, %v24104_v8  ;;  %v24273_v38 = vpop.f32.mrf.mxu0  ;;  %28124 = vmatprep.mubr.f32.mxu1 %v34009_v16  ;;  %28034 = vmatmul.mubr.f32.gmra.mxu0 %v32698_v51 }
 0x912   :  { %v24186_v10 = vpop.f32.mrf.mxu1  ;;  %28213 = vmatprep.mubr.f32.mxu0 %v34009_v16 }
 0x913   :  { %v32856_v62 = vadd.f32 %v24185_v15, %v32774_v49  ;;  %v24187_v41 = vadd.f32 %v24186_v10, %v24106_v61  ;;  %v24275_v54 = vpop.f32.mrf.mxu0 }
 0x914   :  { %v24355_v11 = vpop.f32.mrf.mxu1  ;;  %28128 = vmatmul.mubr.f32.gmra.mxu1 %v32694_v34 }
 0x915   :  { %v32860_v0 = vadd.f32 %v24187_v41, %v32778_v25  ;;  %v24356_v59 = vadd.f32 %v24355_v11, %v24262_v28  ;;  %v24439_v55 = vpop.f32.mrf.mxu0  ;;  %28133 = vmatprep.mubr.f32.mxu1 %v34009_v16  ;;  %28215 = vmatmul.mubr.f32.vlgmr.msra.gmra.mxu0 %v32625_v58 }
 0x916   :  { %v24357_v51 = vpop.f32.mrf.mxu1  ;;  %28220 = vmatprep.mubr.f32.mxu0 %v34009_v16 }
 0x917   :  { %v24358_v20 = vadd.f32 %v24357_v51, %v24264_v2  ;;  %v24440_v49 = vadd.f32 %v24439_v55, %v24356_v59  ;;  %v24441_v17 = vpop.f32.mrf.mxu0 }
 0x918   :  { %v24362_v19 = vpop.f32.mrf.mxu1  ;;  %28137 = vmatmul.mubr.f32.gmra.mxu1 %v32708_v23 }
 0x919   :  { %v24363_v30 = vadd.f32 %v24362_v19, %v24273_v38  ;;  %v24442_v34 = vadd.f32 %v24441_v17, %v24358_v20  ;;  %v24447_v50 = vpop.f32.mrf.mxu0  ;;  %28308 = vmatprep.mubr.f32.mxu1 %v34009_v16  ;;  %28222 = vmatmul.mubr.f32.gmra.mxu0 %v32645_v42 }
 0x91a   :  { %v24364_v25 = vpop.f32.mrf.mxu1  ;;  %28227 = vmatprep.mubr.f32.mxu0 %v34009_v16 }
 0x91b   :  { %v24365_v3 = vadd.f32 %v24364_v25, %v24275_v54  ;;  %v24448_v21 = vadd.f32 %v24447_v50, %v24363_v30  ;;  %v24449_v26 = vpop.f32.mrf.mxu0 }
 0x91c   :  { %v24523_v40 = vpop.f32.mrf.mxu1  ;;  %28310 = vmatmul.mubr.f32.vlgmr.msra.gmra.mxu1 %v32625_v58 }
 0x91d   :  { %v24450_v33 = vadd.f32 %v24449_v26, %v24365_v3  ;;  %v24524_v37 = vadd.f32 %v24523_v40, %v24440_v49  ;;  %v24610_v47 = vpop.f32.mrf.mxu0  ;;  %28315 = vmatprep.mubr.f32.mxu1 %v34009_v16  ;;  %28229 = vmatmul.mubr.f32.gmra.mxu0 %v32662_v18 }
 0x91e   :  { %v24525_v23 = vpop.f32.mrf.mxu1  ;;  %28234 = vmatprep.mubr.f32.mxu0 %v34009_v16 }
 0x91f   :  { %v24526_v53 = vadd.f32 %v24525_v23, %v24442_v34  ;;  %v24611_v45 = vadd.f32 %v24610_v47, %v24524_v37  ;;  %v24612_v63 = vpop.f32.mrf.mxu0 }
 0x920   :  { %v24532_v48 = vpop.f32.mrf.mxu1  ;;  %28317 = vmatmul.mubr.f32.gmra.mxu1 %v32645_v42 }
 0x921   :  { %v24533_v6 = vadd.f32 %v24532_v48, %v24448_v21  ;;  %v24613_v24 = vadd.f32 %v24612_v63, %v24526_v53  ;;  %v24617_v22 = vpop.f32.mrf.mxu0  ;;  %28322 = vmatprep.mubr.f32.mxu1 %v34009_v16  ;;  %28236 = vmatmul.mubr.f32.gmra.mxu0 %v32683_v39 }
 0x922   :  { %v24534_v58 = vpop.f32.mrf.mxu1 }
 0x923   :  { %v24535_v56 = vadd.f32 %v24534_v58, %v24450_v33  ;;  %v24618_v57 = vadd.f32 %v24617_v22, %v24533_v6  ;;  %v24619_v35 = vpop.f32.mrf.mxu0 }
 0x924   :  { %v24691_v29 = vpop.f32.mrf.mxu1  ;;  %28324 = vmatmul.mubr.f32.gmra.mxu1 %v32662_v18 }
 0x925   :  { %v24620_v7 = vadd.f32 %v24619_v35, %v24535_v56  ;;  %v24692_v8 = vadd.f32 %v24691_v29, %v24611_v45  ;;  %v24808_v52 = vpop.f32.mrf.mxu0  ;;  %28329 = vmatprep.mubr.f32.mxu1 %v34009_v16 }
 0x926   :  { %v24693_v42 = vpop.f32.mrf.mxu1 }
 0x927   :  { %v32879_v1 = vadd.f32 %v24692_v8, %v32805_v9  ;;  %v24694_v61 = vadd.f32 %v24693_v42, %v24613_v24  ;;  %v24810_v60 = vpop.f32.mrf.mxu0 }
 0x928   :  { %v24698_v28 = vpop.f32.mrf.mxu1  ;;  %28331 = vmatmul.mubr.f32.gmra.mxu1 %v32683_v39 }
 0x929   :  { %34055 = vst [vmem:[#allocation80_spill] sm:$0xff] %v32879_v1  ;;  %v32883_v44 = vadd.f32 %v24694_v61, %v32810_v12  ;;  %v24699_v46 = vadd.f32 %v24698_v28, %v24618_v57  ;;  %v24819_v2 = vpop.f32.mrf.mxu0 }
 0x92a   :  { %v24700_v18 = vpop.f32.mrf.mxu1 }
 0x92b   :  { %34056 = vst [vmem:[#allocation52_spill] sm:$0xff] %v32883_v44  ;;  %v32886_v31 = vadd.f32 %v24699_v46, %v32816_v14  ;;  %v24701_v15 = vadd.f32 %v24700_v18, %v24620_v7  ;;  %v24821_v16 = vpop.f32.mrf.mxu0 }
 0x92c   :  { %v24901_v38 = vpop.f32.mrf.mxu1 }
 0x92d   :  { %34057 = vst [vmem:[#allocation74_spill] sm:$0xff] %v32886_v31  ;;  %v32889_v9 = vadd.f32 %v24701_v15, %v32820_v5  ;;  %v24902_v10 = vadd.f32 %v24901_v38, %v24808_v52  ;;  %v24985_v41 = vpop.f32.mrf.mxu0 }
 0x92e   :  { %v24903_v54 = vpop.f32.mrf.mxu1 }
 0x92f   :  { %34058 = vst [vmem:[#allocation56_spill] sm:$0xff] %v32889_v9  ;;  %v24904_v11 = vadd.f32 %v24903_v54, %v24810_v60  ;;  %v24986_v39 = vadd.f32 %v24985_v41, %v24902_v10  ;;  %v24987_v59 = vpop.f32.mrf.mxu0 }
 0x930   :  { %v24908_v12 = vpop.f32.mrf.mxu1 }
 0x931   :  { %v24909_v55 = vadd.f32 %v24908_v12, %v24819_v2  ;;  %v24988_v51 = vadd.f32 %v24987_v59, %v24904_v11  ;;  %v24993_v20 = vpop.f32.mrf.mxu0 }
 0x932   :  { %v24910_v49 = vpop.f32.mrf.mxu1 }
 0x933   :  { %v24911_v17 = vadd.f32 %v24910_v49, %v24821_v16  ;;  %v24994_v14 = vadd.f32 %v24993_v20, %v24909_v55  ;;  %v24995_v19 = vpop.f32.mrf.mxu0 }
 0x934   :  { %v25069_v30 = vpop.f32.mrf.mxu1 }
 0x935   :  { %v24996_v34 = vadd.f32 %v24995_v19, %v24911_v17  ;;  %v25070_v50 = vadd.f32 %v25069_v30, %v24986_v39  ;;  %v25156_v25 = vpop.f32.mrf.mxu0 }
 0x936   :  { %v25071_v5 = vpop.f32.mrf.mxu1 }
 0x937   :  { %v25072_v3 = vadd.f32 %v25071_v5, %v24988_v51  ;;  %v25157_v21 = vadd.f32 %v25156_v25, %v25070_v50  ;;  %v25158_v26 = vpop.f32.mrf.mxu0 }
 0x938   :  { %v25078_v40 = vpop.f32.mrf.mxu1 }
 0x939   :  { %v25079_v33 = vadd.f32 %v25078_v40, %v24994_v14  ;;  %v25159_v37 = vadd.f32 %v25158_v26, %v25072_v3  ;;  %v25163_v47 = vpop.f32.mrf.mxu0 }
 0x93a   :  { %v25080_v23 = vpop.f32.mrf.mxu1 }
 0x93b   :  { %v25081_v53 = vadd.f32 %v25080_v23, %v24996_v34  ;;  %v25164_v45 = vadd.f32 %v25163_v47, %v25079_v33  ;;  %v25165_v63 = vpop.f32.mrf.mxu0 }
 0x93c   :  { %v25237_v48 = vpop.f32.mrf.mxu1 }
 0x93d   :  { %v25166_v6 = vadd.f32 %v25165_v63, %v25081_v53  ;;  %v25238_v24 = vadd.f32 %v25237_v48, %v25157_v21  ;;  %v32891_v22 = vpop.f32.mrf.mxu0 }
 0x93e   :  { %v25239_v58 = vpop.f32.mrf.mxu1 }
 0x93f   :  { %v32894_v56 = vadd.f32 %v25238_v24, %v32846_v32  ;;  %v25240_v57 = vadd.f32 %v25239_v58, %v25159_v37  ;;  %v32896_v35 = vpop.f32.mrf.mxu0 }
 0x940   :  { %v25244_v29 = vpop.f32.mrf.mxu1 }
 0x941   :  { %34059 = vst [vmem:[#allocation55_spill] sm:$0xff] %v32894_v56  ;;  %v32899_v7 = vadd.f32 %v25240_v57, %v32850_v4  ;;  %v25245_v8 = vadd.f32 %v25244_v29, %v25164_v45  ;;  %v32901_v52 = vpop.f32.mrf.mxu0 }
 0x942   :  { %v25246_v42 = vpop.f32.mrf.mxu1 }
 0x943   :  { %v32904_v61 = vadd.f32 %v25245_v8, %v32856_v62  ;;  %v25247_v60 = vadd.f32 %v25246_v42, %v25166_v6  ;;  %v32906_v28 = vpop.f32.mrf.mxu0 }
 0x944   :  { %v25415_v46 = vpop.f32.mrf.mxu1 }
 0x945   :  { %34060 = vst [vmem:[#allocation82_spill] sm:$0xff] %v32904_v61  ;;  %v32909_v32 = vadd.f32 %v25247_v60, %v32860_v0  ;;  %v32911_v2 = vpop.f32.mrf.mxu0  ;;  %v25416_v9 = vadd.f32 %v25415_v46, %v32891_v22 }
 0x946   :  { %v25417_v18 = vpop.f32.mrf.mxu1 }
 0x947   :  { %34061 = vst [vmem:[#allocation79_spill] sm:$0xff] %v32909_v32  ;;  %v32913_v15 = vpop.f32.mrf.mxu0  ;;  %v25418_v61 = vadd.f32 %v25417_v18, %v32896_v35 }
 0x948   :  { %v25422_v4 = vpop.f32.mrf.mxu1 }
 0x949   :  { %v32915_v16 = vpop.f32.mrf.mxu0  ;;  %v25423_v32 = vadd.f32 %v25422_v4, %v32901_v52  ;;  %v25502_v22 = vadd.f32 %v32913_v15, %v25418_v61 }
 0x94a   :  { %v25424_v38 = vpop.f32.mrf.mxu1 }
 0x94b   :  { %v32917_v10 = vpop.f32.mrf.mxu0 }
 0x94c   :  { %v32919_v62 = vpop.f32.mrf.mxu1 }
 0x94d   :  { %v32921_v41 = vpop.f32.mrf.mxu0 }
 0x94e   :  { %v32923_v54 = vpop.f32.mrf.mxu1 }
 0x94f   :  { %v32925_v11 = vpop.f32.mrf.mxu0 }
 0x950   :  { %v32927_v0 = vpop.f32.mrf.mxu1 }
 0x951   :  { %v32929_v39 = vpop.f32.mrf.mxu0 }
 0x952   :  { %v32931_v59 = vpop.f32.mrf.mxu1 }
 0x953   :  { %v32933_v12 = vpop.f32.mrf.mxu0 }
 0x954   :  { %34062 = vst [vmem:[#allocation71_spill] sm:$0xff] %v32933_v12  ;;  %v32935_v55 = vpop.f32.mrf.mxu1 }
 0x955   :  { %v25868_v51 = vpop.f32.mrf.mxu0 }
 0x956   :  { %v32937_v20 = vpop.f32.mrf.mxu1 }
 0x957   :  { %v25870_v49 = vpop.f32.mrf.mxu0 }
 0x958   :  { %v32939_v17 = vpop.f32.mrf.mxu1 }
 0x959   :  { %34063 = vst [vmem:[#allocation70_spill] sm:$0xff] %v32939_v17  ;;  %v25879_v14 = vpop.f32.mrf.mxu0 }
 0x95a   :  { %v32941_v19 = vpop.f32.mrf.mxu1 }
 0x95b   :  { %34064 = vst [vmem:[#allocation60_spill] sm:$0xff] %v32941_v19  ;;  %v25881_v30 = vpop.f32.mrf.mxu0 }
 0x95c   :  { %v25961_v34 = vpop.f32.mrf.mxu1 }
 0x95d   :  { %v26045_v50 = vpop.f32.mrf.mxu0  ;;  %v25962_v13 = vadd.f32 %v25961_v34, %v25868_v51  ;;  %v25425_v51 = vadd.f32 %v25424_v38, %v32906_v28 }
 0x95e   :  { %v25963_v25 = vpop.f32.mrf.mxu1 }
 0x95f   :  { %v26047_v5 = vpop.f32.mrf.mxu0  ;;  %v25964_v42 = vadd.f32 %v25963_v25, %v25870_v49  ;;  %v26046_v17 = vadd.f32 %v26045_v50, %v25962_v13  ;;  %v25500_v25 = vadd.f32 %v32911_v2, %v25416_v9 }
 0x960   :  { %v25968_v3 = vpop.f32.mrf.mxu1 }
 0x961   :  { %v26053_v21 = vpop.f32.mrf.mxu0  ;;  %v25969_v19 = vadd.f32 %v25968_v3, %v25879_v14  ;;  %v26048_v44 = vadd.f32 %v26047_v5, %v25964_v42  ;;  %v25508_v5 = vadd.f32 %v32915_v16, %v25423_v32  ;;  %v25584_v52 = vadd.f32 %v32919_v62, %v25500_v25  ;;  %v34074_v42 = vld [vmem:[#allocation80_spill] sm:$0xff] }
 0x962   :  { %v25970_v26 = vpop.f32.mrf.mxu1 }
 0x963   :  { %v26055_v40 = vpop.f32.mrf.mxu0  ;;  %v25971_v36 = vadd.f32 %v25970_v26, %v25881_v30  ;;  %v26054_v46 = vadd.f32 %v26053_v21, %v25969_v19  ;;  %v25593_v28 = vadd.f32 %v32927_v0, %v25508_v5 }
 0x964   :  { %v26129_v33 = vpop.f32.mrf.mxu1 }
 0x965   :  { %v26216_v37 = vpop.f32.mrf.mxu0  ;;  %v26056_v12 = vadd.f32 %v26055_v40, %v25971_v36  ;;  %v26130_v35 = vadd.f32 %v26129_v33, %v26046_v17  ;;  %v25678_v40 = vadd.f32 %v32929_v39, %v25593_v28  ;;  %v34069_v39 = vld [vmem:[#allocation70_spill] sm:$0xff] }
 0x966   :  { %v26131_v47 = vpop.f32.mrf.mxu1 }
 0x967   :  { %v26218_v23 = vpop.f32.mrf.mxu0 }
 0x968   :  { %v26138_v53 = vpop.f32.mrf.mxu1 }
 0x969   :  { %v26223_v45 = vpop.f32.mrf.mxu0  ;;  %v26139_v4 = vadd.f32 %v26138_v53, %v26054_v46 }
 0x96a   :  { %v26140_v63 = vpop.f32.mrf.mxu1 }
 0x96b   :  { %v26225_v48 = vpop.f32.mrf.mxu0  ;;  %v26141_v18 = vadd.f32 %v26140_v63, %v26056_v12  ;;  %v26217_v12 = vadd.f32 %v26216_v37, %v26130_v35 }
 0x96c   :  { %v26297_v6 = vpop.f32.mrf.mxu1 }
 0x96d   :  { %v26382_v24 = vpop.f32.mrf.mxu0  ;;  %v26226_v17 = vadd.f32 %v26225_v48, %v26141_v18  ;;  %v26298_v26 = vadd.f32 %v26297_v6, %v26217_v12  ;;  %v34077_v18 = vld [vmem:[#allocation82_spill] sm:$0xff] }
 0x96e   :  { %v26299_v58 = vpop.f32.mrf.mxu1 }
 0x96f   :  { %v26384_v57 = vpop.f32.mrf.mxu0 }
 0x970   :  { %v32943_v29 = vpop.f32.mrf.mxu1 }
 0x971   :  { %34065 = vst [vmem:[#allocation77_spill] sm:$0xff] %v32943_v29  ;;  %v26393_v8 = vpop.f32.mrf.mxu0  ;;  %v26132_v29 = vadd.f32 %v26131_v47, %v26048_v44  ;;  %v25586_v44 = vadd.f32 %v32923_v54, %v25502_v22  ;;  %v34076_v22 = vld [vmem:[#allocation60_spill] sm:$0xff] }
 0x972   :  { %v26306_v60 = vpop.f32.mrf.mxu1 }
 0x973   :  { %v26395_v43 = vpop.f32.mrf.mxu0  ;;  %v26219_v9 = vadd.f32 %v26218_v23, %v26132_v29  ;;  %v25673_v21 = vadd.f32 %v32925_v11, %v25586_v44  ;;  %v26307_v0 = vadd.f32 %v26306_v60, %v26226_v17  ;;  %v34072_v29 = vld [vmem:[#allocation79_spill] sm:$0xff] }
 0x974   :  { %v26475_v27 = vpop.f32.mrf.mxu1 }
 0x975   :  { %v26559_v31 = vpop.f32.mrf.mxu0  ;;  %v26476_v30 = vadd.f32 %v26475_v27, %v26382_v24  ;;  %v25510_v27 = vadd.f32 %v32917_v10, %v25425_v51  ;;  %v26300_v19 = vadd.f32 %v26299_v58, %v26219_v9  ;;  %v26224_v10 = vadd.f32 %v26223_v45, %v26139_v4  ;;  %v34068_v45 = vld [vmem:[#allocation71_spill] sm:$0xff]  ;;  %v34080_v9 = vld [vmem:[#allocation74_spill] sm:$0xff] }
 0x976   :  { %v26477_v1 = vpop.f32.mrf.mxu1  ;;  %v25759_v58 = vadd.f32 %v34069_v39, %v25678_v40 }
 0x977   :  { %v26561_v56 = vpop.f32.mrf.mxu0  ;;  %v26478_v13 = vadd.f32 %v26477_v1, %v26384_v57  ;;  %v26560_v61 = vadd.f32 %v26559_v31, %v26476_v30  ;;  %v25671_v1 = vadd.f32 %v32921_v41, %v25584_v52  ;;  %v25595_v62 = vadd.f32 %v32931_v59, %v25510_v27  ;;  %v34075_v30 = vld [vmem:[#allocation52_spill] sm:$0xff] }
 0x978   :  { %v26482_v49 = vpop.f32.mrf.mxu1  ;;  %v25754_v41 = vadd.f32 %v32937_v20, %v25673_v21  ;;  %v32963_v59 = vadd.f32 %v26300_v19, %v32899_v7 }
 0x979   :  { %v26567_v34 = vpop.f32.mrf.mxu0  ;;  %v26483_v15 = vadd.f32 %v26482_v49, %v26393_v8  ;;  %v26562_v54 = vadd.f32 %v26561_v56, %v26478_v13  ;;  %v25752_v33 = vadd.f32 %v32935_v55, %v25671_v1  ;;  %v34067_v56 = vld [vmem:[#allocation77_spill] sm:$0xff]  ;;  %v25680_v63 = vadd.f32 %v34068_v45, %v25595_v62  ;;  %v34070_v55 = vld [vmem:[#allocation55_spill] sm:$0xff] }
 0x97a   :  { %v26484_v14 = vpop.f32.mrf.mxu1  ;;  %34066 = vst [vmem:[#allocation66_spill] sm:$0xff] %v32963_v59  ;;  %v26305_v23 = vadd.f32 %v34067_v56, %v26224_v10  ;;  %v32969_v57 = vadd.f32 %v26298_v26, %v34070_v55  ;;  %v32972_v8 = vadd.f32 %v26307_v0, %v34072_v29  ;;  %v26848_v35 = vmul.f32 %v32963_v59, %v32963_v59 }
 0x97b   :  { %v26569_v36 = vpop.f32.mrf.mxu0  ;;  %v26485_v32 = vadd.f32 %v26484_v14, %v26395_v43  ;;  %v26568_v37 = vadd.f32 %v26567_v34, %v26483_v15  ;;  %v25765_v60 = vadd.f32 %v25752_v33, %v34074_v42  ;;  %v25766_v34 = vadd.f32 %v25754_v41, %v34075_v30 }
 0x97c   :  { %v26643_v2 = vpop.f32.mrf.mxu1  ;;  %34071 = vst [vmem:[#allocation87_spill] sm:$0xff] %v32969_v57  ;;  %34073 = vst [vmem:[#allocation76_spill] sm:$0xff] %v32972_v8  ;;  %v25761_v46 = vadd.f32 %v34076_v22, %v25680_v63  ;;  %v32980_v14 = vadd.f32 %v26305_v23, %v34077_v18  ;;  %v26835_v52 = vadd.f32 %v32963_v59, %v32969_v57 }
 0x97d   :  { %v26730_v38 = vpop.f32.mrf.mxu0  ;;  %v26644_v50 = vadd.f32 %v26643_v2, %v26560_v61  ;;  %v26570_v53 = vadd.f32 %v26569_v36, %v26485_v32  ;;  %v25769_v2 = vadd.f32 %v25759_v58, %v34080_v9  ;;  %v26847_v27 = vmul.f32 %v32969_v57, %v32969_v57 }
 0x97e   :  { %v26645_v16 = vpop.f32.mrf.mxu1  ;;  %34078 = vst [vmem:[#allocation61_spill] sm:$0xff] %v32980_v14  ;;  %v26852_v28 = vmul.f32 %v32972_v8, %v32972_v8  ;;  %v26851_v62 = vmul.f32 %v32980_v14, %v32980_v14 }
 0x97f   :  { %v26732_v3 = vpop.f32.mrf.mxu0  ;;  %v26646_v43 = vadd.f32 %v26645_v16, %v26562_v54  ;;  %v26731_v48 = vadd.f32 %v26730_v38, %v26644_v50  ;;  %v34082_v16 = vld [vmem:[#allocation56_spill] sm:$0xff]  ;;  %v26840_v54 = vadd.f32 %v32972_v8, %v32980_v14 }
 0x980   :  { %v26652_v31 = vpop.f32.mrf.mxu1  ;;  %v25770_v1 = vadd.f32 %v25761_v46, %v34082_v16  ;;  %v26860_v33 = vadd.f32 %v26852_v28, %v26851_v62 }
 0x981   :  { %v26737_v47 = vpop.f32.mrf.mxu0  ;;  %v26653_v6 = vadd.f32 %v26652_v31, %v26568_v37  ;;  %v26733_v49 = vadd.f32 %v26732_v3, %v26646_v43  ;;  %v26855_v3 = vadd.f32 %v26848_v35, %v26847_v27 }
 0x982   :  { %v26654_v11 = vpop.f32.mrf.mxu1 }
 0x983   :  { %v26739_v24 = vpop.f32.mrf.mxu0  ;;  %v26655_v20 = vadd.f32 %v26654_v11, %v26570_v53  ;;  %v26738_v13 = vadd.f32 %v26737_v47, %v26653_v6 }
 0x984   :  { %v26811_v7 = vpop.f32.mrf.mxu1 }
 0x985   :  { %v26812_v25 = vadd.f32 %v26811_v7, %v26731_v48  ;;  %v27186_v51 = vpop.f32.mrf.mxu0  ;;  %v26740_v61 = vadd.f32 %v26739_v24, %v26655_v20 }
 0x986   :  { %v26813_v5 = vpop.f32.mrf.mxu1 }
 0x987   :  { %v32984_v36 = vadd.f32 %v26812_v25, %v25765_v60  ;;  %v26814_v44 = vadd.f32 %v26813_v5, %v26733_v49  ;;  %v27188_v4 = vpop.f32.mrf.mxu0 }
 0x988   :  { %v26818_v15 = vpop.f32.mrf.mxu1 }
 0x989   :  { %34079 = vst [vmem:[#allocation85_spill] sm:$0xff] %v32984_v36  ;;  %v26849_v38 = vmul.f32 %v32984_v36, %v32984_v36  ;;  %v32993_v12 = vadd.f32 %v26814_v44, %v25766_v34  ;;  %v26819_v17 = vadd.f32 %v26818_v15, %v26738_v13  ;;  %v26836_v19 = vadd.f32 %v26835_v52, %v32984_v36  ;;  %v27197_v32 = vpop.f32.mrf.mxu0 }
 0x98a   :  { %v26820_v50 = vpop.f32.mrf.mxu1 }
 0x98b   :  { %34081 = vst [vmem:[#allocation78_spill] sm:$0xff] %v32993_v12  ;;  %v33001_v21 = vadd.f32 %v26819_v17, %v25769_v2  ;;  %v26821_v10 = vadd.f32 %v26820_v50, %v26740_v61  ;;  %v26837_v26 = vadd.f32 %v26836_v19, %v32993_v12  ;;  %v26850_v0 = vmul.f32 %v32993_v12, %v32993_v12  ;;  %v27199_v31 = vpop.f32.mrf.mxu0 }
 0x98c   :  { %v26856_v40 = vadd.f32 %v26855_v3, %v26849_v38  ;;  %v27301_v37 = vpop.f32.mrf.mxu1 }
 0x98d   :  { %34083 = vst [vmem:[#allocation81_spill] sm:$0xff] %v33001_v21  ;;  %v26853_v43 = vmul.f32 %v33001_v21, %v33001_v21  ;;  %v33008_v47 = vadd.f32 %v26821_v10, %v25770_v1  ;;  %26838 = vadd.xlane.f32.xlu0 %v26837_v26  ;;  %v26841_v41 = vadd.f32 %v26840_v54, %v33001_v21  ;;  %v27208_v23 = vpop.f32.mrf.mxu0 }
 0x98e   :  { %v27302_v56 = vadd.f32 %v27301_v37, %v27186_v51  ;;  %v26857_v53 = vadd.f32 %v26856_v40, %v26850_v0  ;;  %v27303_v11 = vpop.f32.mrf.mxu1 }
 0x98f   :  { %34084 = vst [vmem:[#allocation68_spill] sm:$0xff] %v33008_v47  ;;  %v26842_v45 = vadd.f32 %v26841_v41, %v33008_v47  ;;  %v26854_v63 = vmul.f32 %v33008_v47, %v33008_v47  ;;  %v26861_v48 = vadd.f32 %v26860_v33, %v26853_v43  ;;  %v27304_v6 = vadd.f32 %v27303_v11, %v27188_v4  ;;  %v27210_v24 = vpop.f32.mrf.mxu0 }
 0x990   :  { %v27308_v39 = vpop.f32.mrf.mxu1 }
 0x991   :  { %26858 = vadd.xlane.f32.xlu0 %v26857_v53  ;;  %26843 = vadd.xlane.f32.xlu1 %v26842_v45  ;;  %v33014_v58 = vadd.f32 %v27308_v39, %v27197_v32  ;;  %v27219_v55 = vpop.f32.mrf.mxu0  ;;  %v26862_v20 = vadd.f32 %v26861_v48, %v26854_v63 }
 0x992   :  { %v27310_v29 = vpop.f32.mrf.mxu1 }
 0x993   :  { %v33016_v7 = vadd.f32 %v27310_v29, %v27199_v31  ;;  %v27221_v42 = vpop.f32.mrf.mxu0 }
 0x994   :  { %v27315_v60 = vpop.f32.mrf.mxu1 }
 0x995   :  { %26863 = vadd.xlane.f32.xlu0 %v26862_v20  ;;  %v27316_v49 = vadd.f32 %v27315_v60, %v27208_v23  ;;  %v27399_v25 = vpop.f32.mrf.mxu0 }
 0x996   :  { %v27317_v51 = vpop.f32.mrf.mxu1  ;;  %v27400_v30 = vadd.f32 %v27399_v25, %v27302_v56 }
 0x997   :  { %v27318_v34 = vadd.f32 %v27317_v51, %v27210_v24  ;;  %v27401_v22 = vpop.f32.mrf.mxu0 }
 0x998   :  { %v27322_v46 = vpop.f32.mrf.mxu1  ;;  %v27402_v35 = vadd.f32 %v27401_v22, %v27304_v6 }
 0x999   :  { %v33018_v18 = vadd.f32 %v27322_v46, %v27219_v55  ;;  %v33020_v5 = vpop.f32.mrf.mxu0 }
 0x99a   :  { %v27324_v52 = vpop.f32.mrf.mxu1 }
 0x99b   :  { %v33022_v13 = vadd.f32 %v27324_v52, %v27221_v42  ;;  %v33024_v44 = vpop.f32.mrf.mxu0 }
 0x99c   :  { %v27499_v4 = vpop.f32.mrf.mxu1 }
 0x99d   :  { %v33026_v9 = vadd.f32 %v27499_v4, %v27400_v30  ;;  %v27415_v2 = vpop.f32.mrf.mxu0 }
 0x99e   :  { %v27501_v27 = vpop.f32.mrf.mxu1  ;;  %v27416_v28 = vadd.f32 %v27415_v2, %v27316_v49 }
 0x99f   :  { %v33028_v61 = vadd.f32 %v27501_v27, %v27402_v35  ;;  %v27417_v15 = vpop.f32.mrf.mxu0 }
 0x9a0   :  { %v33030_v38 = vpop.f32.mrf.mxu1  ;;  %v27418_v17 = vadd.f32 %v27417_v15, %v27318_v34 }
 0x9a1   :  { %v33038_v54 = vpop.f32.mrf.mxu0 }
 0x9a2   :  { %v33032_v19 = vpop.f32.mrf.mxu1 }
 0x9a3   :  { %v33040_v50 = vpop.f32.mrf.mxu0 }
 0x9a4   :  { %v27517_v32 = vpop.f32.mrf.mxu1 }
 0x9a5   :  { %v33034_v16 = vadd.f32 %v27517_v32, %v27416_v28  ;;  %v33046_v26 = vpop.f32.mrf.mxu0 }
 0x9a6   :  { %v27519_v1 = vpop.f32.mrf.mxu1 }
 0x9a7   :  { %34085 = vst [vmem:[#allocation84_spill] sm:$0xff] %v33034_v16  ;;  %v33036_v62 = vadd.f32 %v27519_v1, %v27418_v17  ;;  %v33048_v0 = vpop.f32.mrf.mxu0 }
 0x9a8   :  { %v33042_v3 = vpop.f32.mrf.mxu1 }
 0x9a9   :  { %34086 = vst [vmem:[#allocation86_spill] sm:$0xff] %v33036_v62  ;;  %v33052_v40 = vpop.f32.mrf.mxu0 }
 0x9aa   :  { %v33044_v10 = vpop.f32.mrf.mxu1 }
 0x9ab   :  { %v33056_v37 = vpop.f32.mrf.mxu0 }
 0x9ac   :  { %v33050_v31 = vpop.f32.mrf.mxu1 }
 0x9ad   :  { %34087 = vst [vmem:[#allocation72_spill] sm:$0xff] %v33050_v31  ;;  %v33060_v41 = vpop.f32.mrf.mxu0 }
 0x9ae   :  { %v33054_v33 = vpop.f32.mrf.mxu1  ;;  %34089 = vst [vmem:[#allocation67_spill] sm:$0xff] %v33060_v41 }
 0x9af   :  { %34088 = vst [vmem:[#allocation57_spill] sm:$0xff] %v33054_v33  ;;  %v33064_v23 = vpop.f32.mrf.mxu0 }
 0x9b0   :  { %v33058_v43 = vpop.f32.mrf.mxu1  ;;  %34090 = vst [vmem:[#allocation92_spill] sm:$0xff] %v33064_v23 }
 0x9b1   :  { %v33068_v11 = vpop.f32.mrf.mxu0 }
 0x9b2   :  { %v33062_v56 = vpop.f32.mrf.mxu1 }
 0x9b3   :  { %v33072_v63 = vpop.f32.mrf.mxu0 }
 0x9b4   :  { %v33066_v53 = vpop.f32.mrf.mxu1 }
 0x9b5   :  { %34091 = vst [vmem:[#allocation89_spill] sm:$0xff] %v33066_v53  ;;  %v33078_v24 = vpop.f32.mrf.mxu0 }
 0x9b6   :  { %v33070_v45 = vpop.f32.mrf.mxu1 }
 0x9b7   :  { %34092 = vst [vmem:[#allocation88_spill] sm:$0xff] %v33070_v45  ;;  %v33080_v39 = vpop.f32.mrf.mxu0 }
 0x9b8   :  { %v33074_v48 = vpop.f32.mrf.mxu1 }
 0x9b9   :  { %v33084_v29 = vpop.f32.mrf.mxu0 }
 0x9ba   :  { %v33076_v6 = vpop.f32.mrf.mxu1 }
 0x9bb   :  { %v33088_v42 = vpop.f32.mrf.mxu0 }
 0x9bc   :  { %v33082_v55 = vpop.f32.mrf.mxu1 }
 0x9bd   :  { %v33092_v49 = vpop.f32.mrf.mxu0 }
 0x9be   :  { %v33086_v20 = vpop.f32.mrf.mxu1 }
 0x9bf   :  { %v33096_v51 = vpop.f32.mrf.mxu0 }
 0x9c0   :  { %v33090_v60 = vpop.f32.mrf.mxu1 }
 0x9c1   :  { %v33100_v34 = vpop.f32.mrf.mxu0 }
 0x9c2   :  { %v33094_v25 = vpop.f32.mrf.mxu1 }
 0x9c3   :  { %v33104_v46 = vpop.f32.mrf.mxu0 }
 0x9c4   :  { %v33098_v30 = vpop.f32.mrf.mxu1 }
 0x9c5   :  { %v33110_v4 = vpop.f32.mrf.mxu0 }
 0x9c6   :  { %v33102_v22 = vpop.f32.mrf.mxu1 }
 0x9c7   :  { %v33112_v2 = vpop.f32.mrf.mxu0 }
 0x9c8   :  { %v33106_v35 = vpop.f32.mrf.mxu1  ;;  %34093 = vst [vmem:[#allocation73_spill] sm:$0xff] %v33112_v2 }
 0x9c9   :  { %v28019_v17 = vpop.f32.mrf.mxu0 }
 0x9ca   :  { %v33108_v52 = vpop.f32.mrf.mxu1 }
 0x9cb   :  { %v28021_v36 = vpop.f32.mrf.mxu0 }
 0x9cc   :  { %v33114_v27 = vpop.f32.mrf.mxu1 }
 0x9cd   :  { %34094 = vst [vmem:[#allocation90_spill] sm:$0xff] %v33114_v27  ;;  %v33118_v41 = vpop.f32.mrf.mxu0 }
 0x9ce   :  { %v33116_v32 = vpop.f32.mrf.mxu1  ;;  %34096 = vst [vmem:[#allocation91_spill] sm:$0xff] %v33118_v41 }
 0x9cf   :  { %34095 = vst [vmem:[#allocation63_spill] sm:$0xff] %v33116_v32  ;;  %v33120_v32 = vpop.f32.mrf.mxu0 }
 0x9d0   :  { %v28120_v59 = vpop.f32.mrf.mxu1  ;;  %34097 = vst [vmem:[#allocation75_spill] sm:$0xff] %v33120_v32 }
 0xa16   :  { %v26839_v28 = vpop.xlane.xlu0 %26838 }
 0xa17   :  { %v26845_v15 = vmul.f32 0.001953125, %v26839_v28  ;;  %v28122_v28 = vpop.f32.mrf.mxu1 }
 0xa19   :  { %v26867_v21 = vmul.f32 %v26845_v15, %v26845_v15  ;;  %v33122_v33 = vpop.f32.mrf.mxu1 }
 0xa1a   :  { %v26859_v1 = vpop.xlane.xlu0 %26858  ;;  %v26844_v47 = vpop.xlane.xlu1 %26843  ;;  %34098 = vst [vmem:[#allocation58_spill] sm:$0xff] %v33122_v33 }
 0xa1b   :  { %v26865_v8 = vmul.f32 0.001953125, %v26859_v1  ;;  %v26846_v14 = vmul.f32 0.001953125, %v26844_v47  ;;  %v28035_v1 = vpop.f32.mrf.mxu0  ;;  %v33124_v47 = vpop.f32.mrf.mxu1 }
 0xa1c   :  { %34099 = vst [vmem:[#allocation93_spill] sm:$0xff] %v33124_v47 }
 0xa1d   :  { %v26869_v12 = vsub.f32 %v26865_v8, %v26867_v21  ;;  %v26868_v53 = vmul.f32 %v26846_v14, %v26846_v14  ;;  %v26831_v8 = vld [vmem:[%s33640_s1 + $0x150] sm:$0xff] }
 0xa1e   :  { %v26864_v57 = vpop.xlane.xlu0 %26863 }
 0xa1f   :  { %v26871_v45 = vadd.f32 1e-05, %v26869_v12  ;;  %v26866_v23 = vmul.f32 0.001953125, %v26864_v57  ;;  %v28037_v12 = vpop.f32.mrf.mxu0  ;;  %v28138_v57 = vpop.f32.mrf.mxu1 }
 0xa21   :  { %28765 = vrsqrt.f32 %v26871_v45  ;;  %v26870_v62 = vsub.f32 %v26866_v23, %v26868_v53  ;;  %v28140_v45 = vpop.f32.mrf.mxu1  ;;  %v33135_v47 = vpop.f32.mrf.mxu0 }
 0xa23   :  { %v26872_v16 = vadd.f32 1e-05, %v26870_v62  ;;  %v26833_v62 = vld [vmem:[%s33640_s1 + $0x170] sm:$0xff]  ;;  %v33140_v41 = vpop.f32.mrf.mxu0  ;;  %v33142_v27 = vpop.f32.mrf.mxu1 }
 0xa25   :  { %28767 = vrsqrt.f32 %v26872_v16  ;;  %v26832_v16 = vld [vmem:[%s33640_s1 + $0x158] sm:$0xff] }
 0xa2e   :  { %v28766_v21 = vpop.eup %28765 }
 0xa2f   :  { %v26875_v23 = vmul.f32 %v28766_v21, %v26831_v8  ;;  %v26834_v8 = vld [vmem:[%s33640_s1 + $0x178] sm:$0xff] }
 0xa31   :  { %26883 = vperm.xlu1 %28760, %v26875_v23   ;;  %v26877_v53 = vmul.f32 %v26875_v23, %v26845_v15  ;;  %v28223_v15 = vpop.f32.mrf.mxu0  ;;  %v33144_v23 = vpop.f32.mrf.mxu1 }
 0xa32   :  { %v28768_v33 = vpop.eup %28767 }
 0xa33   :  { %v26879_v32 = vsub.f32 %v26833_v62, %v26877_v53  ;;  %v26876_v31 = vmul.f32 %v28768_v33, %v26832_v16  ;;  %v27408_v62 = vadd.f32 %v33020_v5, %v33014_v58  ;;  %v27410_v33 = vadd.f32 %v33024_v44, %v33016_v7  ;;  %v28225_v16 = vpop.f32.mrf.mxu0 }
 0xa34   :  { %v27923_v58 = vadd.f32 %v33094_v25, %v33088_v42  ;;  %v27935_v7 = vadd.f32 %v33106_v35, %v33100_v34 }
 0xa35   :  { %26901 = vperm.xlu1 %28760, %v26879_v32   ;;  %26888 = vperm.xlu0 %28759, %v26876_v31   ;;  %v26878_v21 = vmul.f32 %v26876_v31, %v26846_v14  ;;  %v27921_v32 = vadd.f32 %v33090_v60, %v33084_v29  ;;  %v28318_v14 = vpop.f32.mrf.mxu1  ;;  %v27424_v31 = vadd.f32 %v33038_v54, %v33018_v18  ;;  %v33162_v44 = vpop.f32.mrf.mxu0 }
 0xa36   :  { %v27509_v53 = vadd.f32 %v33030_v38, %v27408_v62  ;;  %v28022_v54 = vadd.f32 %v28021_v36, %v27923_v58  ;;  %v28036_v42 = vadd.f32 %v28035_v1, %v27935_v7 }
 0xa37   :  { %v26880_v2 = vsub.f32 %v26834_v8, %v26878_v21  ;;  %v27511_v8 = vadd.f32 %v33032_v19, %v27410_v33  ;;  %v28020_v5 = vadd.f32 %v28019_v17, %v27921_v32  ;;  %v28320_v29 = vpop.f32.mrf.mxu1  ;;  %v27527_v60 = vadd.f32 %v33042_v3, %v27424_v31  ;;  %v33170_v25 = vpop.f32.mrf.mxu0  ;;  %v34101_v21 = vld [vmem:[#allocation53_spill] sm:$0xff] }
 0xa38   :  { %v27937_v19 = vadd.f32 %v33108_v52, %v33104_v46  ;;  %v28123_v36 = vadd.f32 %v28122_v28, %v28022_v54  ;;  %v28139_v46 = vadd.f32 %v28138_v57, %v28036_v42  ;;  %v27607_v33 = vadd.f32 %v33048_v0, %v33028_v61  ;;  %v34111_v54 = vld [vmem:[#allocation67_spill] sm:$0xff]  ;;  %v34113_v42 = vld [vmem:[#allocation92_spill] sm:$0xff] }
 0xa39   :  { %26906 = vperm.xlu1 %28760, %v26880_v2   ;;  %v27426_v2 = vadd.f32 %v33040_v50, %v33022_v13  ;;  %v27612_v13 = vadd.f32 %v33052_v40, %v27509_v53  ;;  %v27614_v38 = vadd.f32 %v33056_v37, %v27511_v8  ;;  %v28121_v50 = vadd.f32 %v28120_v59, %v28020_v5  ;;  %v33172_v34 = vpop.f32.mrf.mxu1  ;;  %v28237_v17 = vpop.f32.mrf.mxu0  ;;  %v34106_v53 = vld [vmem:[#allocation90_spill] sm:$0xff]  ;;  %v34108_v5 = vld [vmem:[#allocation72_spill] sm:$0xff] }
 0xa3a   :  { %v27626_v35 = vadd.f32 %v33068_v11, %v27527_v60  ;;  %v27914_v37 = vadd.f32 %v33082_v55, %v33078_v24  ;;  %v28038_v59 = vadd.f32 %v28037_v12, %v27937_v19  ;;  %v27916_v24 = vadd.f32 %v33086_v20, %v33080_v39  ;;  %v34102_v20 = vld [vmem:[#allocation54_spill] sm:$0xff]  ;;  %v34110_v19 = vld [vmem:[#allocation84_spill] sm:$0xff] }
 0xa3b   :  { %v27529_v18 = vadd.f32 %v33044_v10, %v27426_v2  ;;  %v33177_v10 = vadd.f32 %v33058_v43, %v27612_v13  ;;  %v33180_v40 = vadd.f32 %v33062_v56, %v27614_v38  ;;  %v28224_v52 = vadd.f32 %v28223_v15, %v28121_v50  ;;  %v33184_v1 = vpop.f32.mrf.mxu1  ;;  %v34100_v43 = vld [vmem:[#allocation59_spill] sm:$0xff]  ;;  %v28239_v32 = vpop.f32.mrf.mxu0  ;;  %v34112_v50 = vld [vmem:[#allocation86_spill] sm:$0xff] }
 0xa3c   :  { %v33187_v11 = vadd.f32 %v33074_v48, %v27626_v35  ;;  %v26933_v56 = vadd.f32 %v34101_v21, %v34100_v43  ;;  %v27928_v55 = vadd.f32 %v33098_v30, %v33092_v49  ;;  %v28012_v28 = vadd.f32 %v33110_v4, %v27914_v37  ;;  %v34103_v30 = vld [vmem:[#allocation64_spill] sm:$0xff]  ;;  %v34104_v4 = vld [vmem:[#allocation69_spill] sm:$0xff] }
 0xa3d   :  { %v27628_v3 = vadd.f32 %v33072_v63, %v27529_v18  ;;  %v28350_v62 = vadd.f32 %v33180_v40, %v33177_v10  ;;  %v28141_v12 = vadd.f32 %v28140_v45, %v28038_v59  ;;  %v28226_v48 = vadd.f32 %v28225_v16, %v28123_v36  ;;  %v28332_v31 = vpop.f32.mrf.mxu1  ;;  %v34109_v18 = vld [vmem:[#allocation57_spill] sm:$0xff]  ;;  %v34115_v36 = vld [vmem:[#allocation63_spill] sm:$0xff] }
 0xa3e   :  { %v33201_v57 = vadd.f32 %v28318_v14, %v28224_v52  ;;  %v27605_v15 = vadd.f32 %v33046_v26, %v33026_v9  ;;  %v26934_v49 = vadd.f32 %v26933_v56, %v34102_v20  ;;  %v26938_v45 = vadd.f32 %v34104_v4, %v34103_v30  ;;  %v34105_v14 = vld [vmem:[#allocation73_spill] sm:$0xff]  ;;  %v34107_v26 = vld [vmem:[#allocation91_spill] sm:$0xff] }
 0xa3f   :  { %v33190_v63 = vadd.f32 %v33076_v6, %v27628_v3  ;;  %v28238_v6 = vadd.f32 %v28237_v17, %v28139_v46  ;;  %v27930_v16 = vadd.f32 %v33102_v22, %v33096_v51  ;;  %v28014_v2 = vadd.f32 %v34105_v14, %v27916_v24  ;;  %v28334_v51 = vpop.f32.mrf.mxu1  ;;  %v34114_v3 = vld [vmem:[#allocation51_spill] sm:$0xff]  ;;  %v34117_v17 = vld [vmem:[#allocation58_spill] sm:$0xff] }
 0xa40   :  { %v28112_v9 = vadd.f32 %v34106_v53, %v28012_v28  ;;  %v28028_v8 = vadd.f32 %v34107_v26, %v27928_v55  ;;  %v28351_v61 = vadd.f32 %v28350_v62, %v33201_v57  ;;  %v33218_v0 = vadd.f32 %v28320_v29, %v28226_v48  ;;  %v34116_v46 = vld [vmem:[#allocation75_spill] sm:$0xff]  ;;  %v34118_v48 = vld [vmem:[#allocation62_spill] sm:$0xff] }
 0xa41   :  { %v28360_v39 = vadd.f32 %v33190_v63, %v33187_v11  ;;  %v28240_v58 = vadd.f32 %v28239_v32, %v28141_v12  ;;  %v33220_v7 = vadd.f32 %v28332_v31, %v28238_v6  ;;  %v33223_v60 = vadd.f32 %v34108_v5, %v27605_v15 }
 0xa42   :  { %v33226_v13 = vadd.f32 %v34109_v18, %v27607_v33  ;;  %v26961_v22 = vmul.f32 %v34103_v30, %v34103_v30  ;;  %v26962_v38 = vmul.f32 %v34104_v4, %v34104_v4  ;;  %v27619_v29 = vadd.f32 %v34111_v54, %v34110_v19 }
 0xa43   :  { %v27621_v35 = vadd.f32 %v34113_v42, %v34112_v50  ;;  %v26935_v37 = vadd.f32 %v26934_v49, %v34114_v3  ;;  %v28114_v59 = vadd.f32 %v34115_v36, %v28014_v2  ;;  %v28030_v52 = vadd.f32 %v34116_v46, %v27930_v16  ;;  %v34121_v16 = vld [vmem:[#allocation93_spill] sm:$0xff] }
 0xa44   :  { %v28130_v56 = vadd.f32 %v34117_v17, %v28028_v8  ;;  %v28217_v62 = vadd.f32 %v33135_v47, %v28112_v9  ;;  %v28361_v24 = vadd.f32 %v28360_v39, %v33220_v7  ;;  %v33242_v55 = vadd.f32 %v28334_v51, %v28240_v58  ;;  %v34119_v47 = vld [vmem:[#allocation89_spill] sm:$0xff]  ;;  %v34120_v39 = vld [vmem:[#allocation88_spill] sm:$0xff] }
 0xa45   :  { %v28352_v28 = vadd.f32 %v28351_v61, %v33218_v0  ;;  %v28345_v12 = vadd.f32 %v33226_v13, %v33223_v60  ;;  %v26939_v6 = vadd.f32 %v26938_v45, %v34118_v48  ;;  %v26978_v15 = vadd.f32 %v26962_v38, %v26961_v22  ;;  %v34122_v8 = vld [vmem:[#allocation65_spill] sm:$0xff] }
 0xa46   :  { %v28373_v33 = vmul.f32 %v33177_v10, %v33177_v10  ;;  %v28374_v32 = vmul.f32 %v33180_v40, %v33180_v40  ;;  %v33253_v31 = vadd.f32 %v34119_v47, %v27619_v29  ;;  %v33256_v49 = vadd.f32 %v34120_v39, %v27621_v35  ;;  %v34123_v47 = vld [vmem:[#allocation87_spill] sm:$0xff] }
 0xa47   :  { %v28132_v14 = vadd.f32 %v34121_v16, %v28030_v52  ;;  %v28219_v2 = vadd.f32 %v33140_v41, %v28114_v59  ;;  %v33261_v53 = vadd.f32 %v33142_v27, %v28217_v62  ;;  %v28231_v45 = vadd.f32 %v33162_v44, %v28130_v56  ;;  %v34124_v16 = vld [vmem:[#allocation66_spill] sm:$0xff] }
 0xa48   :  { %v28362_v9 = vadd.f32 %v28361_v24, %v33242_v55  ;;  %v26963_v26 = vmul.f32 %v34118_v48, %v34118_v48  ;;  %v26940_v61 = vadd.f32 %v26939_v6, %v34122_v8  ;;  %v26957_v58 = vmul.f32 %v34100_v43, %v34100_v43 }
 0xa49   :  { %v26958_v5 = vmul.f32 %v34101_v21, %v34101_v21  ;;  %v28390_v41 = vadd.f32 %v28374_v32, %v28373_v33  ;;  %v28355_v27 = vadd.f32 %v33256_v49, %v33253_v31  ;;  %v28375_v44 = vmul.f32 %v33201_v57, %v33201_v57 }
 0xa4a   :  { %v26979_v18 = vadd.f32 %v26978_v15, %v26963_v26  ;;  %v28346_v51 = vadd.f32 %v28345_v12, %v33261_v53  ;;  %v33278_v22 = vadd.f32 %v33144_v23, %v28219_v2  ;;  %v28233_v38 = vadd.f32 %v33170_v25, %v28132_v14  ;;  %v34125_v2 = vld [vmem:[#allocation85_spill] sm:$0xff] }
 0xa4b   :  { %v33282_v19 = vadd.f32 %v33172_v34, %v28231_v45  ;;  %v26964_v54 = vmul.f32 %v34122_v8, %v34122_v8  ;;  %v26973_v29 = vadd.f32 %v26958_v5, %v26957_v58  ;;  %v28369_v50 = vmul.f32 %v33223_v60, %v33223_v60 }
 0xa4c   :  { %v28376_v42 = vmul.f32 %v33218_v0, %v33218_v0  ;;  %v28391_v23 = vadd.f32 %v28390_v41, %v28375_v44  ;;  %v28370_v25 = vmul.f32 %v33226_v13, %v33226_v13  ;;  %v28347_v36 = vadd.f32 %v28346_v51, %v33278_v22 }
 0xa4d   :  { %v26980_v35 = vadd.f32 %v26979_v18, %v26964_v54  ;;  %v28356_v34 = vadd.f32 %v28355_v27, %v33282_v19  ;;  %v26959_v59 = vmul.f32 %v34102_v20, %v34102_v20  ;;  %v28371_v17 = vmul.f32 %v33261_v53, %v33261_v53  ;;  %v34127_v18 = vld [vmem:[#allocation61_spill] sm:$0xff] }
 0xa4e   :  { %v28392_v46 = vadd.f32 %v28391_v23, %v28376_v42  ;;  %v28385_v52 = vadd.f32 %v28370_v25, %v28369_v50  ;;  %v28372_v24 = vmul.f32 %v33278_v22, %v33278_v22  ;;  %v28377_v33 = vmul.f32 %v33253_v31, %v33253_v31 }
 0xa4f   :  { %v26974_v62 = vadd.f32 %v26973_v29, %v26959_v59  ;;  %v28378_v32 = vmul.f32 %v33256_v49, %v33256_v49  ;;  %v34129_v29 = vld [vmem:[#allocation81_spill] sm:$0xff] }
 0xa50   :  { %v28386_v12 = vadd.f32 %v28385_v52, %v28371_v17 }
 0xa51   :  { %v28395_v42 = vadd.f32 %v28378_v32, %v28377_v33 }
 0xa52   :  { %v28387_v6 = vadd.f32 %v28386_v12, %v28372_v24 }
 0xa54   :  { %26936 = vadd.xlane.f32.xlu0 %v26935_v37  ;;  %v33294_v37 = vadd.f32 %v33184_v1, %v28233_v38  ;;  %v26960_v1 = vmul.f32 %v34114_v3, %v34114_v3  ;;  %v34128_v38 = vld [vmem:[#allocation76_spill] sm:$0xff] }
 0xa56   :  { %v28357_v56 = vadd.f32 %v28356_v34, %v33294_v37 }
 0xa58   :  { %28353 = vadd.xlane.f32.xlu0 %v28352_v28  ;;  %v26975_v28 = vadd.f32 %v26974_v62, %v26960_v1 }
 0xa5c   :  { %28363 = vadd.xlane.f32.xlu0 %v28362_v9  ;;  %v34126_v9 = vld [vmem:[#allocation78_spill] sm:$0xff] }
 0xa5d   :  { %26941 = vadd.xlane.f32.xlu1 %v26940_v61 }
 0xa60   :  { %26981 = vadd.xlane.f32.xlu0 %v26980_v35 }
 0xa61   :  { %28348 = vadd.xlane.f32.xlu1 %v28347_v36  ;;  %v34130_v36 = vld [vmem:[#allocation68_spill] sm:$0xff] }
 0xa64   :  { %28393 = vadd.xlane.f32.xlu0 %v28392_v46 }
 0xa65   :  { %28358 = vadd.xlane.f32.xlu1 %v28357_v56 }
 0xa69   :  { %26976 = vadd.xlane.f32.xlu1 %v26975_v28  ;;  %v28379_v28 = vmul.f32 %v33282_v19, %v33282_v19 }
 0xa6d   :  { %28388 = vadd.xlane.f32.xlu1 %v28387_v6 }
 0xaac   :  { %v26884_v15 = vpop.permute.xlu1 %26883 }
 0xaad   :  { %v26891_v39 = vmul.f32 %v26884_v15, %v34123_v47  ;;  %v26892_v14 = vmul.f32 %v26884_v15, %v34124_v16  ;;  %v26893_v45 = vmul.f32 %v26884_v15, %v34125_v2  ;;  %v26894_v26 = vmul.f32 %v26884_v15, %v34126_v9 }
 0xaae   :  { %v28381_v16 = vmul.f32 %v33187_v11, %v33187_v11  ;;  %v28382_v9 = vmul.f32 %v33190_v63, %v33190_v63 }
 0xab0   :  { %v26889_v61 = vpop.permute.xlu0 %26888  ;;  %v26902_v58 = vpop.permute.xlu1 %26901 }
 0xab1   :  { %v26909_v5 = vadd.f32 %v26902_v58, %v26891_v39  ;;  %v26910_v41 = vadd.f32 %v26902_v58, %v26892_v14  ;;  %v26911_v27 = vadd.f32 %v26902_v58, %v26893_v45  ;;  %v26912_v44 = vadd.f32 %v26902_v58, %v26894_v26 }
 0xab2   :  { %v26895_v51 = vmul.f32 %v26889_v61, %v34127_v18  ;;  %v26896_v54 = vmul.f32 %v26889_v61, %v34128_v38  ;;  %v26897_v50 = vmul.f32 %v26889_v61, %v34129_v29  ;;  %v26898_v59 = vmul.f32 %v26889_v61, %v34130_v36 }
 0xab3   :  { %v33317_v35 = vmax.f32 %v26909_v5, 0.0  ;;  %v33319_v23 = vmax.f32 %v26910_v41, 0.0  ;;  %v33321_v25 = vmax.f32 %v26911_v27, 0.0  ;;  %v33324_v56 = vmax.f32 %v26912_v44, 0.0 }
 0xab4   :  { %v26907_v34 = vpop.permute.xlu1 %26906  ;;  %v28380_v44 = vmul.f32 %v33294_v37, %v33294_v37  ;;  %v28400_v29 = vadd.f32 %v28382_v9, %v28381_v16 }
 0xab5   :  { %v26913_v46 = vadd.f32 %v26907_v34, %v26895_v51  ;;  %v26914_v52 = vadd.f32 %v26907_v34, %v26896_v54  ;;  %v26915_v17 = vadd.f32 %v26907_v34, %v26897_v50  ;;  %v26943_v62 = vadd.f32 %v33319_v23, %v33317_v35 }
 0xab6   :  { %v26965_v1 = vmul.f32 %v33317_v35, %v33317_v35  ;;  %v26966_v24 = vmul.f32 %v33319_v23, %v33319_v23  ;;  %v26916_v12 = vadd.f32 %v26907_v34, %v26898_v59  ;;  %v26967_v47 = vmul.f32 %v33321_v25, %v33321_v25 }
 0xab7   :  { %v33334_v6 = vmax.f32 %v26913_v46, 0.0  ;;  %v33336_v15 = vmax.f32 %v26914_v52, 0.0  ;;  %v33338_v33 = vmax.f32 %v26915_v17, 0.0  ;;  %v26944_v32 = vadd.f32 %v26943_v62, %v33321_v25 }
 0xab8   :  { %v26983_v39 = vadd.f32 %v26966_v24, %v26965_v1  ;;  %v26968_v61 = vmul.f32 %v33324_v56, %v33324_v56  ;;  %v33356_v5 = vmax.f32 %v26916_v12, 0.0  ;;  %v28396_v51 = vadd.f32 %v28395_v42, %v28379_v28 }
 0xab9   :  { %v26948_v14 = vadd.f32 %v33336_v15, %v33334_v6  ;;  %v26969_v2 = vmul.f32 %v33334_v6, %v33334_v6  ;;  %v26970_v45 = vmul.f32 %v33336_v15, %v33336_v15  ;;  %v26945_v26 = vadd.f32 %v26944_v32, %v33324_v56 }
 0xaba   :  { %v26984_v58 = vadd.f32 %v26983_v39, %v26967_v47  ;;  %v26971_v38 = vmul.f32 %v33338_v33, %v33338_v33  ;;  %v28383_v50 = vmul.f32 %v33220_v7, %v33220_v7  ;;  %v28397_v36 = vadd.f32 %v28396_v51, %v28380_v44 }
 0xabb   :  { %v26949_v41 = vadd.f32 %v26948_v14, %v33338_v33  ;;  %v26988_v27 = vadd.f32 %v26970_v45, %v26969_v2  ;;  %26946 = vadd.xlane.f32.xlu0 %v26945_v26  ;;  %v26972_v59 = vmul.f32 %v33356_v5, %v33356_v5  ;;  %v28384_v46 = vmul.f32 %v33242_v55, %v33242_v55 }
 0xabc   :  { %v26985_v18 = vadd.f32 %v26984_v58, %v26968_v61  ;;  %v28401_v52 = vadd.f32 %v28400_v29, %v28383_v50 }
 0xabd   :  { %v26950_v54 = vadd.f32 %v26949_v41, %v33356_v5  ;;  %v26989_v34 = vadd.f32 %v26988_v27, %v26971_v38 }
 0xabe   :  { %26986 = vadd.xlane.f32.xlu1 %v26985_v18  ;;  %v28402_v17 = vadd.f32 %v28401_v52, %v28384_v46  ;;  %v26926_v52 = vld [vmem:[%s33640_s1 + $0x1c8] sm:$0xff] }
 0xabf   :  { %26951 = vadd.xlane.f32.xlu0 %v26950_v54  ;;  %v26990_v42 = vadd.f32 %v26989_v34, %v26972_v59 }
 0xac2   :  { %28398 = vadd.xlane.f32.xlu1 %v28397_v36 }
 0xac3   :  { %26991 = vadd.xlane.f32.xlu0 %v26990_v42 }
 0xac7   :  { %28403 = vadd.xlane.f32.xlu0 %v28402_v17 }
 0xadd   :  { %v26937_v62 = vpop.xlane.xlu0 %26936 }
 0xade   :  { %v26953_v41 = vmul.f32 0.001953125, %v26937_v62 }
 0xae0   :  { %v26997_v51 = vmul.f32 %v26953_v41, %v26953_v41 }
 0xae1   :  { %v28354_v1 = vpop.xlane.xlu0 %28353 }
 0xae2   :  { %v28366_v39 = vmul.f32 0.001953125, %v28354_v1  ;;  %v28338_v1 = vld [vmem:[%s33640_s1 + $0x188] sm:$0xff] }
 0xae4   :  { %v28410_v9 = vmul.f32 %v28366_v39, %v28366_v39 }
 0xae5   :  { %v33370_v24 = vpop.xlane.xlu0 %28363 }
 0xae6   :  { %v26942_v28 = vpop.xlane.xlu1 %26941 }
 0xae7   :  { %v26954_v12 = vmul.f32 0.001953125, %v26942_v28 }
 0xae9   :  { %v26998_v32 = vmul.f32 %v26954_v12, %v26954_v12  ;;  %v26982_v47 = vpop.xlane.xlu0 %26981 }
 0xaea   :  { %v26994_v16 = vmul.f32 0.001953125, %v26982_v47  ;;  %v28349_v14 = vpop.xlane.xlu1 %28348 }
 0xaeb   :  { %v28365_v38 = vmul.f32 0.001953125, %v28349_v14 }
 0xaec   :  { %v27002_v2 = vsub.f32 %v26994_v16, %v26998_v32  ;;  %v26925_v16 = vld [vmem:[%s33640_s1 + $0x1c0] sm:$0xff] }
 0xaed   :  { %v28394_v45 = vpop.xlane.xlu0 %28393  ;;  %v28409_v34 = vmul.f32 %v28365_v38, %v28365_v38 }
 0xaee   :  { %v27006_v26 = vadd.f32 1e-05, %v27002_v2  ;;  %v28406_v61 = vmul.f32 0.001953125, %v28394_v45  ;;  %v28359_v58 = vpop.xlane.xlu1 %28358 }
 0xaf0   :  { %28769 = vrsqrt.f32 %v27006_v26  ;;  %v28414_v27 = vsub.f32 %v28406_v61, %v28410_v9  ;;  %v28337_v9 = vld [vmem:[%s33640_s1 + $0x180] sm:$0xff] }
 0xaf2   :  { %v28418_v44 = vadd.f32 1e-05, %v28414_v27  ;;  %v26977_v18 = vpop.xlane.xlu1 %26976 }
 0xaf3   :  { %v26993_v54 = vmul.f32 0.001953125, %v26977_v18 }
 0xaf4   :  { %28771 = vrsqrt.f32 %v28418_v44 }
 0xaf5   :  { %v27001_v29 = vsub.f32 %v26993_v54, %v26997_v51  ;;  %v28367_v54 = vmul.f32 0.001953125, %v28359_v58 }
 0xaf6   :  { %v28389_v50 = vpop.xlane.xlu1 %28388 }
 0xaf7   :  { %v27005_v36 = vadd.f32 1e-05, %v27001_v29  ;;  %v28405_v59 = vmul.f32 0.001953125, %v28389_v50 }
 0xaf9   :  { %28773 = vrsqrt.f32 %v27005_v36  ;;  %v28413_v46 = vsub.f32 %v28405_v59, %v28409_v34  ;;  %v28411_v36 = vmul.f32 %v28367_v54, %v28367_v54 }
 0xafb   :  { %v28417_v42 = vadd.f32 1e-05, %v28413_v46 }
 0xafd   :  { %v28770_v17 = vpop.eup %28769  ;;  %28775 = vrsqrt.f32 %v28417_v42 }
 0xafe   :  { %v27014_v62 = vmul.f32 %v28770_v17, %v26926_v52  ;;  %v28368_v52 = vmul.f32 0.001953125, %v33370_v24 }
 0xb00   :  { %27032 = vperm.xlu0 %28759, %v27014_v62   ;;  %v33378_v28 = vmul.f32 %v27014_v62, %v26954_v12 }
 0xb01   :  { %v28772_v32 = vpop.eup %28771 }
 0xb02   :  { %v28426_v47 = vmul.f32 %v28772_v32, %v28338_v1  ;;  %v28412_v32 = vmul.f32 %v28368_v52, %v28368_v52 }
 0xb04   :  { %v33383_v14 = vmul.f32 %v28426_v47, %v28366_v39 }
 0xb06   :  { %v28774_v2 = vpop.eup %28773 }
 0xb07   :  { %v27013_v45 = vmul.f32 %v28774_v2, %v26925_v16 }
 0xb09   :  { %27027 = vperm.xlu1 %28760, %v27013_v45   ;;  %v27017_v26 = vmul.f32 %v27013_v45, %v26953_v41 }
 0xb0a   :  { %v28776_v61 = vpop.eup %28775 }
 0xb0b   :  { %v28425_v27 = vmul.f32 %v28776_v61, %v28337_v9  ;;  %v28339_v61 = vld [vmem:[%s33640_s1 + $0x190] sm:$0xff] }
 0xb0d   :  { %28444 = vperm.xlu1 %28760, %v28426_v47   ;;  %28439 = vperm.xlu0 %28759, %v28425_v27   ;;  %v28429_v12 = vmul.f32 %v28425_v27, %v28365_v38 }
 0xb44   :  { %v26947_v44 = vpop.xlane.xlu0 %26946 }
 0xb45   :  { %v26955_v18 = vmul.f32 0.001953125, %v26947_v44 }
 0xb47   :  { %v26987_v51 = vpop.xlane.xlu1 %26986  ;;  %v26999_v29 = vmul.f32 %v26955_v18, %v26955_v18 }
 0xb48   :  { %v26995_v39 = vmul.f32 0.001953125, %v26987_v51  ;;  %v26952_v50 = vpop.xlane.xlu0 %26951 }
 0xb49   :  { %v26956_v47 = vmul.f32 0.001953125, %v26952_v50  ;;  %v28340_v50 = vld [vmem:[%s33640_s1 + $0x198] sm:$0xff] }
 0xb4a   :  { %v27003_v59 = vsub.f32 %v26995_v39, %v26999_v29  ;;  %v26929_v29 = vld [vmem:[%s33640_s1 + $0x1e0] sm:$0xff]  ;;  %v26927_v39 = vld [vmem:[%s33640_s1 + $0x1d0] sm:$0xff] }
 0xb4b   :  { %v28399_v34 = vpop.xlane.xlu1 %28398  ;;  %v27000_v45 = vmul.f32 %v26956_v47, %v26956_v47 }
 0xb4c   :  { %v28407_v46 = vmul.f32 0.001953125, %v28399_v34  ;;  %v26992_v42 = vpop.xlane.xlu0 %26991  ;;  %v27007_v17 = vadd.f32 1e-05, %v27003_v59  ;;  %v27021_v34 = vsub.f32 %v26929_v29, %v27017_v26 }
 0xb4d   :  { %v26996_v16 = vmul.f32 0.001953125, %v26992_v42 }
 0xb4e   :  { %v28415_v41 = vsub.f32 %v28407_v46, %v28411_v36  ;;  %v28341_v46 = vld [vmem:[%s33640_s1 + $0x1a0] sm:$0xff] }
 0xb4f   :  { %v27004_v9 = vsub.f32 %v26996_v16, %v27000_v45  ;;  %v28343_v16 = vld [vmem:[%s33640_s1 + $0x1b0] sm:$0xff] }
 0xb50   :  { %v28419_v62 = vadd.f32 1e-05, %v28415_v41  ;;  %v28404_v1 = vpop.xlane.xlu0 %28403  ;;  %v26930_v41 = vld [vmem:[%s33640_s1 + $0x1e8] sm:$0xff] }
 0xb51   :  { %v28408_v38 = vmul.f32 0.001953125, %v28404_v1  ;;  %v27008_v24 = vadd.f32 1e-05, %v27004_v9  ;;  %v26931_v1 = vld [vmem:[%s33640_s1 + $0x1f0] sm:$0xff]  ;;  %v27022_v26 = vsub.f32 %v26930_v41, %v33378_v28 }
 0xb52   :  { %28777 = vrsqrt.f32 %v28419_v62 }
 0xb53   :  { %28779 = vrsqrt.f32 %v27007_v17  ;;  %v28416_v58 = vsub.f32 %v28408_v38, %v28412_v32  ;;  %v28433_v17 = vsub.f32 %v28341_v46, %v28429_v12  ;;  %v28342_v32 = vld [vmem:[%s33640_s1 + $0x1a8] sm:$0xff] }
 0xb54   :  { %v28434_v12 = vsub.f32 %v28342_v32, %v33383_v14  ;;  %v28344_v14 = vld [vmem:[%s33640_s1 + $0x1b8] sm:$0xff] }
 0xb55   :  { %v28420_v2 = vadd.f32 1e-05, %v28416_v58 }
 0xb57   :  { %28781 = vrsqrt.f32 %v28420_v2  ;;  %v26928_v2 = vld [vmem:[%s33640_s1 + $0x1d8] sm:$0xff] }
 0xb58   :  { %28783 = vrsqrt.f32 %v27008_v24 }
 0xb5f   :  { %v28778_v27 = vpop.eup %28777 }
 0xb60   :  { %v28427_v44 = vmul.f32 %v28778_v27, %v28339_v61  ;;  %v28780_v51 = vpop.eup %28779 }
 0xb61   :  { %v27015_v36 = vmul.f32 %v28780_v51, %v26927_v39 }
 0xb62   :  { %28449 = vperm.xlu0 %28759, %v28427_v44   ;;  %v28431_v58 = vmul.f32 %v28427_v44, %v28367_v54  ;;  %v26932_v54 = vld [vmem:[%s33640_s1 + $0x1f8] sm:$0xff] }
 0xb63   :  { %v27019_v62 = vmul.f32 %v27015_v36, %v26955_v18 }
 0xb64   :  { %v28782_v59 = vpop.eup %28781  ;;  %v28435_v28 = vsub.f32 %v28343_v16, %v28431_v58 }
 0xb65   :  { %v28428_v42 = vmul.f32 %v28782_v59, %v28340_v50  ;;  %v27023_v38 = vsub.f32 %v26931_v1, %v27019_v62  ;;  %v28784_v18 = vpop.eup %28783 }
 0xb66   :  { %27063 = vperm.xlu0 %28759, %v27021_v34   ;;  %v27016_v45 = vmul.f32 %v28784_v18, %v26928_v2 }
 0xb67   :  { %28454 = vperm.xlu1 %28760, %v28428_v42   ;;  %v28432_v24 = vmul.f32 %v28428_v42, %v28368_v52 }
 0xb68   :  { %v27020_v9 = vmul.f32 %v27016_v45, %v26956_v47 }
 0xb69   :  { %v28436_v27 = vsub.f32 %v28344_v14, %v28432_v24 }
 0xb6a   :  { %28475 = vperm.xlu0 %28759, %v28433_v17   ;;  %v27024_v61 = vsub.f32 %v26932_v54, %v27020_v9 }
 0xb6b   :  { %27068 = vperm.xlu1 %28760, %v27022_v26  }
 0xb6e   :  { %27073 = vperm.xlu0 %28759, %v27023_v38  }
 0xb6f   :  { %28480 = vperm.xlu1 %28760, %v28434_v12  }
 0xb72   :  { %28485 = vperm.xlu0 %28759, %v28435_v28  }
 0xb73   :  { %27037 = vperm.xlu1 %28760, %v27015_v36  }
 0xb77   :  { %27042 = vperm.xlu1 %28760, %v27016_v45  }
 0xb7b   :  { %27078 = vperm.xlu1 %28760, %v27024_v61   ;;  %v27033_v44 = vpop.permute.xlu0 %27032 }
 0xb7c   :  { %v27049_v47 = vmul.f32 %v27033_v44, %v34103_v30  ;;  %v27050_v36 = vmul.f32 %v27033_v44, %v34104_v4  ;;  %v27051_v59 = vmul.f32 %v27033_v44, %v34118_v48  ;;  %v27052_v52 = vmul.f32 %v27033_v44, %v34122_v8 }
 0xb7f   :  { %28490 = vperm.xlu1 %28760, %v28436_v27  }
 0xb84   :  { %v27028_v51 = vpop.permute.xlu1 %27027 }
 0xb85   :  { %v27045_v46 = vmul.f32 %v27028_v51, %v34100_v43  ;;  %v27046_v42 = vmul.f32 %v27028_v51, %v34101_v21  ;;  %v27047_v41 = vmul.f32 %v27028_v51, %v34102_v20  ;;  %v27048_v17 = vmul.f32 %v27028_v51, %v34114_v3 }
 0xb88   :  { %v28440_v29 = vpop.permute.xlu0 %28439  ;;  %v28445_v50 = vpop.permute.xlu1 %28444 }
 0xb89   :  { %v28457_v62 = vmul.f32 %v28440_v29, %v33223_v60  ;;  %v28458_v30 = vmul.f32 %v28440_v29, %v33226_v13  ;;  %v28459_v26 = vmul.f32 %v28440_v29, %v33261_v53  ;;  %v28460_v4 = vmul.f32 %v28440_v29, %v33278_v22 }
 0xb8a   :  { %v28461_v48 = vmul.f32 %v28445_v50, %v33177_v10  ;;  %v28462_v8 = vmul.f32 %v28445_v50, %v33180_v40  ;;  %v28463_v60 = vmul.f32 %v28445_v50, %v33201_v57  ;;  %v28464_v13 = vmul.f32 %v28445_v50, %v33218_v0 }
 0xbdd   :  { %v28450_v39 = vpop.permute.xlu0 %28449 }
 0xbde   :  { %v28465_v53 = vmul.f32 %v28450_v39, %v33253_v31  ;;  %v28466_v10 = vmul.f32 %v28450_v39, %v33256_v49  ;;  %v28467_v28 = vmul.f32 %v28450_v39, %v33282_v19  ;;  %v28468_v45 = vmul.f32 %v28450_v39, %v33294_v37 }
 0xbe1   :  { %v27064_v34 = vpop.permute.xlu0 %27063 }
 0xbe2   :  { %v28455_v1 = vpop.permute.xlu1 %28454  ;;  %v27081_v43 = vadd.f32 %v27064_v34, %v27045_v46  ;;  %v27082_v32 = vadd.f32 %v27064_v34, %v27046_v42  ;;  %v27083_v21 = vadd.f32 %v27064_v34, %v27047_v41  ;;  %v27084_v12 = vadd.f32 %v27064_v34, %v27048_v17 }
 0xbe3   :  { %v33448_v9 = vmul.f32 %v28455_v1, %v33187_v11  ;;  %v33451_v0 = vmul.f32 %v28455_v1, %v33190_v63  ;;  %v33454_v31 = vmul.f32 %v28455_v1, %v33220_v7  ;;  %v33461_v24 = vmul.f32 %v28455_v1, %v33242_v55 }
 0xbe5   :  { %v28476_v38 = vpop.permute.xlu0 %28475 }
 0xbe6   :  { %v28493_v20 = vadd.f32 %v28476_v38, %v28457_v62  ;;  %v28494_v58 = vadd.f32 %v28476_v38, %v28458_v30  ;;  %v28495_v3 = vadd.f32 %v28476_v38, %v28459_v26  ;;  %v28496_v16 = vadd.f32 %v28476_v38, %v28460_v4  ;;  %v27069_v22 = vpop.permute.xlu1 %27068 }
 0xbe7   :  { %v27085_v37 = vadd.f32 %v27069_v22, %v27049_v47  ;;  %v27086_v11 = vadd.f32 %v27069_v22, %v27050_v36  ;;  %v27087_v7 = vadd.f32 %v27069_v22, %v27051_v59  ;;  %v27088_v39 = vadd.f32 %v27069_v22, %v27052_v52 }
 0xbe8   :  { %v28509_v18 = vadd.f32 %v28493_v20, %v27081_v43  ;;  %v28510_v40 = vadd.f32 %v28494_v58, %v27082_v32  ;;  %v28511_v2 = vadd.f32 %v28495_v3, %v27083_v21  ;;  %v28512_v54 = vadd.f32 %v28496_v16, %v27084_v12 }
 0xbe9   :  { %v27074_v57 = vpop.permute.xlu0 %27073 }
 0xbea   :  { %v33456_v61 = vmax.f32 %v28509_v18, 0.0  ;;  %v33458_v49 = vmax.f32 %v28510_v40, 0.0  ;;  %v33463_v19 = vmax.f32 %v28511_v2, 0.0  ;;  %v28481_v14 = vpop.permute.xlu1 %28480  ;;  %v33465_v29 = vmax.f32 %v28512_v54, 0.0 }
 0xbeb   :  { %v28497_v27 = vadd.f32 %v28481_v14, %v28461_v48  ;;  %v28498_v44 = vadd.f32 %v28481_v14, %v28462_v8  ;;  %v28499_v51 = vadd.f32 %v28481_v14, %v28463_v60  ;;  %v28500_v63 = vadd.f32 %v28481_v14, %v28464_v13 }
 0xbec   :  { %v28549_v34 = vadd.f32 %v33458_v49, %v33456_v61  ;;  %v28573_v42 = vmul.f32 %v33456_v61, %v33456_v61  ;;  %v28574_v47 = vmul.f32 %v33458_v49, %v33458_v49  ;;  %v28575_v59 = vmul.f32 %v33463_v19, %v33463_v19 }
 0xbed   :  { %v28486_v50 = vpop.permute.xlu0 %28485  ;;  %v28513_v46 = vadd.f32 %v28497_v27, %v27085_v37  ;;  %v28514_v55 = vadd.f32 %v28498_v44, %v27086_v11  ;;  %v28515_v36 = vadd.f32 %v28499_v51, %v27087_v7  ;;  %v28516_v41 = vadd.f32 %v28500_v63, %v27088_v39 }
 0xbee   :  { %v28501_v17 = vadd.f32 %v28486_v50, %v28465_v53  ;;  %v27038_v62 = vpop.permute.xlu1 %27037  ;;  %v28502_v30 = vadd.f32 %v28486_v50, %v28466_v10  ;;  %v28503_v26 = vadd.f32 %v28486_v50, %v28467_v28  ;;  %v28550_v32 = vadd.f32 %v28549_v34, %v33463_v19 }
 0xbef   :  { %v33475_v52 = vmax.f32 %v28513_v46, 0.0  ;;  %v33477_v1 = vmax.f32 %v28514_v55, 0.0  ;;  %v27053_v4 = vmul.f32 %v27038_v62, %v33317_v35  ;;  %v27054_v48 = vmul.f32 %v27038_v62, %v33319_v23 }
 0xbf0   :  { %v27055_v8 = vmul.f32 %v27038_v62, %v33321_v25  ;;  %v27056_v43 = vmul.f32 %v27038_v62, %v33324_v56  ;;  %v33490_v58 = vmax.f32 %v28515_v36, 0.0  ;;  %v33492_v25 = vmax.f32 %v28516_v41, 0.0 }
 0xbf1   :  { %v28554_v21 = vadd.f32 %v33477_v1, %v33475_v52  ;;  %v28577_v38 = vmul.f32 %v33475_v52, %v33475_v52  ;;  %v28578_v20 = vmul.f32 %v33477_v1, %v33477_v1  ;;  %v27089_v35 = vadd.f32 %v27074_v57, %v27053_v4 }
 0xbf2   :  { %v27090_v3 = vadd.f32 %v27074_v57, %v27054_v48  ;;  %v27091_v23 = vadd.f32 %v27074_v57, %v27055_v8  ;;  %v27043_v16 = vpop.permute.xlu1 %27042  ;;  %v28504_v56 = vadd.f32 %v28486_v50, %v28468_v45  ;;  %v27092_v60 = vadd.f32 %v27074_v57, %v27056_v43 }
 0xbf3   :  { %v28551_v13 = vadd.f32 %v28550_v32, %v33465_v29  ;;  %v28517_v53 = vadd.f32 %v28501_v17, %v27089_v35  ;;  %v27057_v10 = vmul.f32 %v27043_v16, %v33334_v6  ;;  %v27058_v18 = vmul.f32 %v27043_v16, %v33336_v15 }
 0xbf4   :  { %v28518_v12 = vadd.f32 %v28502_v30, %v27090_v3  ;;  %v28519_v22 = vadd.f32 %v28503_v26, %v27091_v23  ;;  %v27059_v40 = vmul.f32 %v27043_v16, %v33338_v33  ;;  %v28555_v2 = vadd.f32 %v28554_v21, %v33490_v58 }
 0xbf5   :  { %28552 = vadd.xlane.f32.xlu0 %v28551_v13  ;;  %v28594_v28 = vadd.f32 %v28578_v20, %v28577_v38  ;;  %v33499_v54 = vmax.f32 %v28517_v53, 0.0  ;;  %v27060_v45 = vmul.f32 %v27043_v16, %v33356_v5  ;;  %v28579_v11 = vmul.f32 %v33490_v58, %v33490_v58 }
 0xbf6   :  { %v33501_v37 = vmax.f32 %v28518_v12, 0.0  ;;  %v27079_v57 = vpop.permute.xlu1 %27078  ;;  %v33506_v14 = vmax.f32 %v28519_v22, 0.0  ;;  %v28580_v15 = vmul.f32 %v33492_v25, %v33492_v25  ;;  %v28576_v33 = vmul.f32 %v33465_v29, %v33465_v29 }
 0xbf7   :  { %v27093_v6 = vadd.f32 %v27079_v57, %v27057_v10  ;;  %v28556_v27 = vadd.f32 %v28555_v2, %v33492_v25  ;;  %v28595_v44 = vadd.f32 %v28594_v28, %v28579_v11  ;;  %v28589_v51 = vadd.f32 %v28574_v47, %v28573_v42 }
 0xbf8   :  { %v28520_v63 = vadd.f32 %v28504_v56, %v27092_v60  ;;  %v27094_v7 = vadd.f32 %v27079_v57, %v27058_v18  ;;  %v28559_v5 = vadd.f32 %v33501_v37, %v33499_v54  ;;  %v28581_v39 = vmul.f32 %v33499_v54, %v33499_v54 }
 0xbf9   :  { %v28582_v50 = vmul.f32 %v33501_v37, %v33501_v37  ;;  %v27095_v34 = vadd.f32 %v27079_v57, %v27059_v40  ;;  %28557 = vadd.xlane.f32.xlu1 %v28556_v27  ;;  %v28596_v46 = vadd.f32 %v28595_v44, %v28580_v15  ;;  %v28590_v36 = vadd.f32 %v28589_v51, %v28575_v59 }
 0xbfa   :  { %v28491_v55 = vpop.permute.xlu1 %28490  ;;  %v33519_v41 = vmax.f32 %v28520_v63, 0.0  ;;  %v28560_v26 = vadd.f32 %v28559_v5, %v33506_v14  ;;  %v28583_v4 = vmul.f32 %v33506_v14, %v33506_v14  ;;  %v27096_v8 = vadd.f32 %v27079_v57, %v27060_v45 }
 0xbfb   :  { %v28505_v42 = vadd.f32 %v28491_v55, %v33448_v9  ;;  %v28506_v47 = vadd.f32 %v28491_v55, %v33451_v0  ;;  %v28507_v17 = vadd.f32 %v28491_v55, %v33454_v31  ;;  %v28508_v62 = vadd.f32 %v28491_v55, %v33461_v24  ;;  %28597 = vadd.xlane.f32.xlu0 %v28596_v46 }
 0xbfc   :  { %v28591_v30 = vadd.f32 %v28590_v36, %v28576_v33  ;;  %v28599_v48 = vadd.f32 %v28582_v50, %v28581_v39  ;;  %v28561_v9 = vadd.f32 %v28560_v26, %v33519_v41  ;;  %v28584_v0 = vmul.f32 %v33519_v41, %v33519_v41 }
 0xbfd   :  { %v28521_v59 = vadd.f32 %v28505_v42, %v27093_v6  ;;  %v28522_v43 = vadd.f32 %v28506_v47, %v27094_v7  ;;  %v28523_v32 = vadd.f32 %v28507_v17, %v27095_v34  ;;  %v28524_v24 = vadd.f32 %v28508_v62, %v27096_v8 }
 0xbfe   :  { %28592 = vadd.xlane.f32.xlu1 %v28591_v30  ;;  %v28600_v31 = vadd.f32 %v28599_v48, %v28583_v4  ;;  %v28542_v4 = vld [vmem:[%s33640_s1 + $0x208] sm:$0xff] }
 0xbff   :  { %v33531_v21 = vmax.f32 %v28521_v59, 0.0  ;;  %v33533_v38 = vmax.f32 %v28522_v43, 0.0  ;;  %v33535_v20 = vmax.f32 %v28523_v32, 0.0  ;;  %28562 = vadd.xlane.f32.xlu0 %v28561_v9  ;;  %v33543_v56 = vmax.f32 %v28524_v24, 0.0  ;;  %v28541_v59 = vld [vmem:[%s33640_s1 + $0x200] sm:$0xff] }
 0xc00   :  { %v28601_v35 = vadd.f32 %v28600_v31, %v28584_v0  ;;  %v28546_v31 = vld [vmem:[%s33640_s1 + $0x228] sm:$0xff]  ;;  %v28545_v24 = vld [vmem:[%s33640_s1 + $0x220] sm:$0xff] }
 0xc01   :  { %v28564_v3 = vadd.f32 %v33533_v38, %v33531_v21  ;;  %v28585_v23 = vmul.f32 %v33531_v21, %v33531_v21  ;;  %v28586_v16 = vmul.f32 %v33533_v38, %v33533_v38  ;;  %v28587_v13 = vmul.f32 %v33535_v20, %v33535_v20 }
 0xc02   :  { %28602 = vadd.xlane.f32.xlu1 %v28601_v35  ;;  %v28588_v10 = vmul.f32 %v33543_v56, %v33543_v56  ;;  %v28543_v35 = vld [vmem:[%s33640_s1 + $0x210] sm:$0xff] }
 0xc03   :  { %v28565_v60 = vadd.f32 %v28564_v3, %v33535_v20  ;;  %v28604_v53 = vadd.f32 %v28586_v16, %v28585_v23 }
 0xc05   :  { %v28566_v12 = vadd.f32 %v28565_v60, %v33543_v56  ;;  %v28605_v22 = vadd.f32 %v28604_v53, %v28587_v13  ;;  %v28547_v53 = vld [vmem:[%s33640_s1 + $0x230] sm:$0xff] }
 0xc07   :  { %28567 = vadd.xlane.f32.xlu0 %v28566_v12  ;;  %v28606_v18 = vadd.f32 %v28605_v22, %v28588_v10  ;;  %v28544_v10 = vld [vmem:[%s33640_s1 + $0x218] sm:$0xff] }
 0xc0b   :  { %28607 = vadd.xlane.f32.xlu0 %v28606_v18 }
 0xc7e   :  { %v28553_v40 = vpop.xlane.xlu0 %28552 }
 0xc7f   :  { %v28569_v28 = vmul.f32 0.001953125, %v28553_v40 }
 0xc81   :  { %v28613_v33 = vmul.f32 %v28569_v28, %v28569_v28 }
 0xc82   :  { %v28558_v2 = vpop.xlane.xlu1 %28557 }
 0xc83   :  { %v28570_v45 = vmul.f32 0.001953125, %v28558_v2  ;;  %v28548_v2 = vld [vmem:[%s33640_s1 + $0x238] sm:$0xff] }
 0xc84   :  { %v28598_v57 = vpop.xlane.xlu0 %28597 }
 0xc85   :  { %v28614_v11 = vmul.f32 %v28570_v45, %v28570_v45  ;;  %v28610_v6 = vmul.f32 0.001953125, %v28598_v57 }
 0xc87   :  { %v28593_v15 = vpop.xlane.xlu1 %28592  ;;  %v28618_v27 = vsub.f32 %v28610_v6, %v28614_v11 }
 0xc88   :  { %v28609_v44 = vmul.f32 0.001953125, %v28593_v15  ;;  %v28563_v51 = vpop.xlane.xlu0 %28562 }
 0xc89   :  { %v28622_v63 = vadd.f32 1e-05, %v28618_v27  ;;  %v28571_v5 = vmul.f32 0.001953125, %v28563_v51 }
 0xc8a   :  { %v28617_v7 = vsub.f32 %v28609_v44, %v28613_v33 }
 0xc8b   :  { %v28603_v39 = vpop.xlane.xlu1 %28602  ;;  %28785 = vrsqrt.f32 %v28622_v63  ;;  %v28615_v34 = vmul.f32 %v28571_v5, %v28571_v5 }
 0xc8c   :  { %v28621_v50 = vadd.f32 1e-05, %v28617_v7  ;;  %v28611_v46 = vmul.f32 0.001953125, %v28603_v39 }
 0xc8e   :  { %28787 = vrsqrt.f32 %v28621_v50  ;;  %v28619_v55 = vsub.f32 %v28611_v46, %v28615_v34 }
 0xc90   :  { %v28623_v36 = vadd.f32 1e-05, %v28619_v55  ;;  %v28568_v42 = vpop.xlane.xlu0 %28567 }
 0xc91   :  { %v28572_v47 = vmul.f32 0.001953125, %v28568_v42 }
 0xc92   :  { %28789 = vrsqrt.f32 %v28623_v36 }
 0xc93   :  { %v28616_v62 = vmul.f32 %v28572_v47, %v28572_v47 }
 0xc94   :  { %v28608_v17 = vpop.xlane.xlu0 %28607 }
 0xc95   :  { %v28612_v30 = vmul.f32 0.001953125, %v28608_v17 }
 0xc97   :  { %v28620_v26 = vsub.f32 %v28612_v30, %v28616_v62 }
 0xc98   :  { %v28786_v48 = vpop.eup %28785 }
 0xc99   :  { %v28624_v8 = vadd.f32 1e-05, %v28620_v26  ;;  %v28630_v43 = vmul.f32 %v28786_v48, %v28542_v4 }
 0xc9b   :  { %v28788_v32 = vpop.eup %28787  ;;  %28791 = vrsqrt.f32 %v28624_v8  ;;  %28648 = vperm.xlu0 %28759, %v28630_v43   ;;  %v28634_v0 = vmul.f32 %v28630_v43, %v28570_v45 }
 0xc9c   :  { %v28629_v9 = vmul.f32 %v28788_v32, %v28541_v59 }
 0xc9d   :  { %v28638_v16 = vsub.f32 %v28546_v31, %v28634_v0 }
 0xc9e   :  { %28643 = vperm.xlu1 %28760, %v28629_v9   ;;  %v28633_v3 = vmul.f32 %v28629_v9, %v28569_v28 }
 0xc9f   :  { %v28790_v23 = vpop.eup %28789 }
 0xca0   :  { %v28637_v60 = vsub.f32 %v28545_v24, %v28633_v3  ;;  %v28631_v13 = vmul.f32 %v28790_v23, %v28543_v35 }
 0xca2   :  { %28684 = vperm.xlu1 %28760, %v28638_v16   ;;  %28679 = vperm.xlu0 %28759, %v28637_v60   ;;  %v28635_v12 = vmul.f32 %v28631_v13, %v28571_v5 }
 0xca4   :  { %v28639_v22 = vsub.f32 %v28547_v53, %v28635_v12 }
 0xca6   :  { %28653 = vperm.xlu1 %28760, %v28631_v13   ;;  %28689 = vperm.xlu0 %28759, %v28639_v22  }
 0xca8   :  { %v28792_v18 = vpop.eup %28791 }
 0xca9   :  { %v28632_v40 = vmul.f32 %v28792_v18, %v28544_v10 }
 0xcab   :  { %28658 = vperm.xlu1 %28760, %v28632_v40   ;;  %v28636_v28 = vmul.f32 %v28632_v40, %v28572_v47 }
 0xcad   :  { %v28640_v45 = vsub.f32 %v28548_v2, %v28636_v28 }
 0xcaf   :  { %28694 = vperm.xlu1 %28760, %v28640_v45  }
 0xd16   :  { %v28649_v57 = vpop.permute.xlu0 %28648 }
 0xd17   :  { %v28665_v44 = vmul.f32 %v28649_v57, %v33475_v52  ;;  %v28666_v51 = vmul.f32 %v28649_v57, %v33477_v1  ;;  %v28667_v63 = vmul.f32 %v28649_v57, %v33490_v58  ;;  %v28668_v7 = vmul.f32 %v28649_v57, %v33492_v25 }
 0xd19   :  { %v28644_v11 = vpop.permute.xlu1 %28643 }
 0xd1a   :  { %v28661_v6 = vmul.f32 %v28644_v11, %v33456_v61  ;;  %v28662_v15 = vmul.f32 %v28644_v11, %v33458_v49  ;;  %v28663_v33 = vmul.f32 %v28644_v11, %v33463_v19  ;;  %v28664_v27 = vmul.f32 %v28644_v11, %v33465_v29 }
 0xd1d   :  { %v28680_v5 = vpop.permute.xlu0 %28679  ;;  %v28685_v39 = vpop.permute.xlu1 %28684 }
 0xd1e   :  { %v28697_v50 = vadd.f32 %v28680_v5, %v28661_v6  ;;  %v28698_v34 = vadd.f32 %v28680_v5, %v28662_v15  ;;  %v28699_v46 = vadd.f32 %v28680_v5, %v28663_v33  ;;  %v28700_v61 = vadd.f32 %v28680_v5, %v28664_v27 }
 0xd1f   :  { %v28701_v55 = vadd.f32 %v28685_v39, %v28665_v44  ;;  %v28702_v49 = vadd.f32 %v28685_v39, %v28666_v51  ;;  %v28703_v36 = vadd.f32 %v28685_v39, %v28667_v63  ;;  %v28704_v19 = vadd.f32 %v28685_v39, %v28668_v7 }
 0xd20   :  { %28713 = vst [vmem:[%s33641_s2] sm:$0xff] %v28697_v50  ;;  %28714 = vst [vmem:[%s33641_s2 + $0x8] sm:$0xff] %v28698_v34 }
 0xd21   :  { %28715 = vst [vmem:[%s33641_s2 + $0x10] sm:$0xff] %v28699_v46  ;;  %28716 = vst [vmem:[%s33641_s2 + $0x18] sm:$0xff] %v28700_v61  ;;  %v28654_v29 = vpop.permute.xlu1 %28653  ;;  %v28690_v42 = vpop.permute.xlu0 %28689 }
 0xd22   :  { %28717 = vst [vmem:[%s33641_s2 + $0x20] sm:$0xff] %v28701_v55  ;;  %28718 = vst [vmem:[%s33641_s2 + $0x28] sm:$0xff] %v28702_v49  ;;  %v28669_v52 = vmul.f32 %v28654_v29, %v33499_v54  ;;  %v28670_v1 = vmul.f32 %v28654_v29, %v33501_v37  ;;  %v28671_v58 = vmul.f32 %v28654_v29, %v33506_v14 }
 0xd23   :  { %28719 = vst [vmem:[%s33641_s2 + $0x30] sm:$0xff] %v28703_v36  ;;  %28720 = vst [vmem:[%s33641_s2 + $0x38] sm:$0xff] %v28704_v19  ;;  %v28672_v25 = vmul.f32 %v28654_v29, %v33519_v41 }
 0xd24   :  { %v28705_v47 = vadd.f32 %v28690_v42, %v28669_v52  ;;  %v28706_v17 = vadd.f32 %v28690_v42, %v28670_v1  ;;  %v28707_v62 = vadd.f32 %v28690_v42, %v28671_v58 }
 0xd25   :  { %v28708_v30 = vadd.f32 %v28690_v42, %v28672_v25 }
 0xd26   :  { %28721 = vst [vmem:[%s33641_s2 + $0x40] sm:$0xff] %v28705_v47  ;;  %28722 = vst [vmem:[%s33641_s2 + $0x48] sm:$0xff] %v28706_v17  ;;  %v28659_v54 = vpop.permute.xlu1 %28658 }
 0xd27   :  { %28723 = vst [vmem:[%s33641_s2 + $0x50] sm:$0xff] %v28707_v62  ;;  %28724 = vst [vmem:[%s33641_s2 + $0x58] sm:$0xff] %v28708_v30  ;;  %v28673_v37 = vmul.f32 %v28659_v54, %v33531_v21  ;;  %v28674_v14 = vmul.f32 %v28659_v54, %v33533_v38  ;;  %v28675_v41 = vmul.f32 %v28659_v54, %v33535_v20 }
 0xd28   :  { %v28676_v26 = vmul.f32 %v28659_v54, %v33543_v56 }
 0xd2a   :  { %v28695_v4 = vpop.permute.xlu1 %28694 }
 0xd2b   :  { %v28709_v48 = vadd.f32 %v28695_v4, %v28673_v37  ;;  %v28710_v8 = vadd.f32 %v28695_v4, %v28674_v14  ;;  %v28711_v59 = vadd.f32 %v28695_v4, %v28675_v41  ;;  %v28712_v43 = vadd.f32 %v28695_v4, %v28676_v26 }
 0xd2d   :  { %28725 = vst [vmem:[%s33641_s2 + $0x60] sm:$0xff] %v28709_v48  ;;  %28726 = vst [vmem:[%s33641_s2 + $0x68] sm:$0xff] %v28710_v8 }
 0xd2e   :  { %28727 = vst [vmem:[%s33641_s2 + $0x70] sm:$0xff] %v28711_v59  ;;  %28728 = vst [vmem:[%s33641_s2 + $0x78] sm:$0xff] %v28712_v43 }

</bundles_post_ra>
